<compile_context>
chip_gen: v7x
topology: tpu7x:2x2x1
jax: 0.10.0
libtpu: 0.0.40
codegen_flags: <defaults>
</compile_context>

<pallas_src>
import jax
import jax.numpy as jnp
from jax import lax
from jax.experimental import pallas as pl
from jax.experimental.pallas import tpu as pltpu

# Static geometry (MNIST-like 28x28, single input channel).
H = W = 28
C1, C2 = 16, 32          # conv1 / conv2 output channels
K = 5                    # kernel size (stride 1, padding 2)
P1H = 14                 # after pool1
P2H = 7                  # after pool2
EMB = C2 * P2H * P2H     # 1568


# --------------------------------------------------------------------------------------
# Kernel
# --------------------------------------------------------------------------------------
def _make_kernel(tb):
    m1 = tb * 9          # conv1/pool1 rows per block (pitch 9 per image: 1 pad + 7 + 1 pad)
    m2 = tb * 9 - 2      # conv2/pool2 rows per block (pitch 9, rows b*9+m2, m2<7 valid)

    def kernel(x_ref, wb1_ref, wb2_ref, b1_ref, b2_ref, mask_ref, out_ref):
        b1row = b1_ref[...]          # [1, 256]   bias for conv1, lane = X1*16 + c
        b2row = b2_ref[...]          # [1, 512]   bias for conv2, lane = dx2*256 + n2*32 + d
        mask = mask_ref[...]         # [m1, 1]    1 on data rows, 0 on the pitch-9 pad rows

        # ---------------- conv1 + bias + ReLU + 2x2 max-pool (y-parity split) -----------
        # x_ref[0, q, b*9 + t, :] = xpad_b[4*(t-1) + q, :]  (t=0 and the 8 tail rows are 0)
        # Row j = b*9 + 1 + m of the accumulators holds conv1_b[4m + 2ey + dy, ...] with
        # lane layout fx*256 + X1*16 + c  (x = 2*X1 + fx).
        p1 = []
        for ey in range(2):                      # pooled-row parity (py = 2m + ey)
            ph = []
            for dy in range(2):                  # pool-1 y phase
                acc = None
                for ky in range(K):
                    a = 2 * ey + dy + ky         # padded-image row offset 4m + a
                    q, w = a % 4, a // 4
                    lhs = x_ref[0, q, w:w + m1, :]                       # [m1, 32]
                    d = jnp.dot(lhs, wb1_ref[ky],
                                preferred_element_type=jnp.float32)      # [m1, 512]
                    acc = d if acc is None else acc + d
                ph.append(acc)
            m = jnp.maximum(ph[0], ph[1])                # pool over dy
            m = jnp.maximum(m[:, 0:256], m[:, 256:512])  # pool over dx (fx lane halves)
            # bias + ReLU, then zero the pitch-9 padding rows (conv2 reads them as ring)
            p1.append(jnp.maximum(m + b1row, 0.0) * mask)                # [m1, 256]

        # ---------------- conv2 + bias + ReLU + 2x2 max-pool ----------------------------
        # ACC row J = b*9 + m2 (m2 < 7 valid); lane = dx2*256 + n2*32 + d.
        best = None
        for dy2 in range(2):                     # pool-2 y phase
            acc = None
            for ky in range(K):
                a = dy2 + ky
                ey, v0 = a % 2, a // 2           # parity slab / contiguous row offset
                d = jnp.dot(p1[ey][v0:v0 + m2, :], wb2_ref[ky],
                            preferred_element_type=jnp.float32)          # [m2, 512]
                acc = d if acc is None else acc + d
            r = jnp.maximum(acc + b2row, 0.0)                # bias + ReLU
            r = jnp.maximum(r[:, 0:256], r[:, 256:512])      # pool over dx2
            best = r if best is None else jnp.maximum(best, r)   # pool over dy2

        # ---------------- write out: lane-dense [7, 7*32] rows per image ----------------
        for bl in range(tb):
            out_ref[0, bl, :, :] = best[bl * 9: bl * 9 + 7, 0:224]

    return kernel


# --------------------------------------------------------------------------------------
# Host-side packing (pure layout / weight reshaping, done once per call)
# --------------------------------------------------------------------------------------
def _prep_input(image, tb):
    """[B,1,28,28] -> [nb, 4, tb*9 + 8, 32]: zero-padded image, rows split by y mod 4,
    per-image pitch 9 (one leading zero row), batch padded to a multiple of tb."""
    B = image.shape[0]
    x = image[:, 0].astype(jnp.float32)
    xpad = jnp.pad(x, ((0, 0), (2, 2), (2, 2)))                    # [B, 32, 32]
    xq = xpad.reshape(B, 8, 4, 32).transpose(0, 2, 1, 3)           # [B, 4, 8, 32], row 4s+q
    xq = jnp.pad(xq, ((0, 0), (0, 0), (1, 0), (0, 0)))             # [B, 4, 9, 32], t = s+1
    bp = ((B + tb - 1) // tb) * tb
    xq = jnp.pad(xq, ((0, bp - B), (0, 0), (0, 0), (0, 0)))
    nb = bp // tb
    xq = xq.reshape(nb, tb, 4, 9, 32).transpose(0, 2, 1, 3, 4).reshape(nb, 4, tb * 9, 32)
    xq = jnp.pad(xq, ((0, 0), (0, 0), (0, 8), (0, 0)))             # zero tail rows per block
    return xq, nb, bp


def _pack_wb1(w1):
    """Banded conv1 weights: WB1[ky, jcol, fx*256 + X1*16 + c] = w1[c,0,ky,kx],
    kx = jcol - (2*X1 + fx), zero outside the band / for X1 >= 14."""
    w1k = jnp.transpose(w1[:, 0], (1, 2, 0)).astype(jnp.float32)   # [ky, kx, c]
    fx = jnp.arange(2)[:, None, None]
    x1 = jnp.arange(16)[None, :, None]
    jc = jnp.arange(32)[None, None, :]
    kx = jc - (2 * x1 + fx)                                        # [2, 16, 32]
    valid = (kx >= 0) & (kx <= 4) & (x1 < P1H)
    w = w1k[:, jnp.clip(kx, 0, 4), :]                              # [5, 2, 16, 32, 16]
    w = jnp.where(valid[None, :, :, :, None], w, 0.0)
    return jnp.transpose(w, (0, 3, 1, 2, 4)).reshape(K, 32, 512)   # [5, 32, 512]


def _pack_wb2(w2):
    """Banded conv2 weights: WB2[ky, X1*16 + c, dx2*256 + n2*32 + d] = w2[d,c,ky,kx],
    kx = X1 - (2*n2 + dx2) + 2, zero outside the band / padding lanes."""
    w2k = jnp.transpose(w2, (2, 3, 1, 0)).astype(jnp.float32)      # [ky, kx, c, d]
    dx2 = jnp.arange(2)[:, None, None]
    n2 = jnp.arange(8)[None, :, None]
    x1 = jnp.arange(16)[None, None, :]
    kx = x1 - (2 * n2 + dx2) + 2                                   # [2, 8, 16]
    valid = (kx >= 0) & (kx <= 4) & (x1 < P1H) & (n2 < P2H)
    w = w2k[:, jnp.clip(kx, 0, 4), :, :]                           # [5, 2, 8, 16, 16, 32]
    w = jnp.where(valid[None, :, :, :, None, None], w, 0.0)
    return jnp.transpose(w, (0, 3, 4, 1, 2, 5)).reshape(K, 256, 512)


def _pack_biases(b1, b2):
    lane_ok = (jnp.arange(16) < P1H).astype(jnp.float32)[:, None]
    b1big = (jnp.broadcast_to(b1[None, :], (16, C1)) * lane_ok).reshape(1, 256)
    n_ok = (jnp.arange(8) < P2H).astype(jnp.float32)[None, :, None]
    b2big = (jnp.broadcast_to(b2[None, None, :], (2, 8, C2)) * n_ok).reshape(1, 512)
    return b1big.astype(jnp.float32), b2big.astype(jnp.float32)


# --------------------------------------------------------------------------------------
# Forward wrapper
# --------------------------------------------------------------------------------------
def image_embed_forward(image, params, tb=4):
    """image: [B, 1, 28, 28] (NCHW).  Returns [B, 32*7*7] (PyTorch channel-major flatten).
    `tb` = images per grid step (tune 8-32 for large batches; demo uses 4 -> 2 grid steps)."""
    w1, b1, w2, b2 = params
    B = image.shape[0]
    assert image.shape[1:] == (1, H, W)

    x4, nb, bp = _prep_input(image, tb)
    wb1, wb2 = _pack_wb1(w1), _pack_wb2(w2)
    b1big, b2big = _pack_biases(b1, b2)
    maskrow = jnp.tile(jnp.array([0, 1, 1, 1, 1, 1, 1, 1, 0], jnp.float32), tb).reshape(tb * 9, 1)

    out = pl.pallas_call(
        _make_kernel(tb),
        out_shape=jax.ShapeDtypeStruct((nb, tb, P2H, P2H * C2), jnp.float32),
        grid=(nb,),
        in_specs=[
            pl.BlockSpec((1, 4, tb * 9 + 8, 32), lambda i: (i, 0, 0, 0)),  # padded images
            pl.BlockSpec((K, 32, 512), lambda i: (0, 0, 0)),               # resident conv1 bands
            pl.BlockSpec((K, 256, 512), lambda i: (0, 0, 0)),              # resident conv2 bands
            pl.BlockSpec((1, 256), lambda i: (0, 0)),                      # conv1 bias row
            pl.BlockSpec((1, 512), lambda i: (0, 0)),                      # conv2 bias row
            pl.BlockSpec((tb * 9, 1), lambda i: (0, 0)),                   # pad-row mask
        ],
        out_specs=pl.BlockSpec((1, tb, P2H, P2H * C2), lambda i: (i, 0, 0, 0)),
        compiler_params=pltpu.CompilerParams(
            dimension_semantics=("parallel",),
            vmem_limit_bytes=32 * 1024 * 1024,
        ),
    )(x4, wb1, wb2, b1big, b2big, maskrow)

    # Layout-only epilogue: [nb,tb,7,7*32] -> channel-major flatten [B, 1568].
    out = out.reshape(bp, P2H, P2H, C2)[:B]
    return jnp.transpose(out, (0, 3, 1, 2)).reshape(B, EMB)


# --------------------------------------------------------------------------------------
# Parameter init (PyTorch nn.Conv2d default) and pure-JAX reference
# --------------------------------------------------------------------------------------
def init_params(key):
    k1, k2 = jax.random.split(key)

    def conv_init(kk, out_c, in_c, ks):
        fan_in = in_c * ks * ks
        bound = 1.0 / jnp.sqrt(jnp.float32(fan_in))
        kw, kb = jax.random.split(kk)
        w = jax.random.uniform(kw, (out_c, in_c, ks, ks), jnp.float32, -bound, bound)
        b = jax.random.uniform(kb, (out_c,), jnp.float32, -bound, bound)
        return w, b

    w1, b1 = conv_init(k1, C1, 1, K)
    w2, b2 = conv_init(k2, C2, C1, K)
    return (w1, b1, w2, b2)


def reference_forward(image, params):
    w1, b1, w2, b2 = params
    dn = ("NCHW", "OIHW", "NCHW")
    x = image.astype(jnp.float32)
    c1 = lax.conv_general_dilated(x, w1, (1, 1), ((2, 2), (2, 2)),
                                  dimension_numbers=dn, precision=lax.Precision.HIGHEST)
    r1 = jnp.maximum(c1 + b1[None, :, None, None], 0.0)
    p1 = r1.reshape(-1, C1, P1H, 2, P1H, 2).max(axis=(3, 5))
    c2 = lax.conv_general_dilated(p1, w2, (1, 1), ((2, 2), (2, 2)),
                                  dimension_numbers=dn, precision=lax.Precision.HIGHEST)
    r2 = jnp.maximum(c2 + b2[None, :, None, None], 0.0)
    p2 = r2.reshape(-1, C2, P2H, 2, P2H, 2).max(axis=(3, 5))
    return p2.reshape(p2.shape[0], -1)


if __name__ == "__main__":
    key = jax.random.PRNGKey(0)
    k_img, k_par = jax.random.split(key)

    B = 8                                            # small batch; tb=4 -> 2 grid steps
    image = jax.random.normal(k_img, (B, 1, H, W), dtype=jnp.float32)
    params = init_params(k_par)

    fwd = jax.jit(lambda im, p: image_embed_forward(im, p, tb=4))
    emb = fwd(image, params)
    jax.block_until_ready(emb)

    ref = reference_forward(image, params)
    assert emb.shape == (B, EMB)
    err = float(jnp.max(jnp.abs(emb - ref)))
    assert jnp.allclose(emb, ref, atol=2e-3, rtol=2e-3), err

    print("KERNEL_OK")
</pallas_src>

<mosaic_0001>
module attributes {stable_mosaic.version = 11 : i64} {
  func.func @kernel(%arg0: i32, %arg1: memref<1x4x44x32xf32, #tpu.memory_space<vmem>>, %arg2: memref<5x32x512xf32, #tpu.memory_space<vmem>>, %arg3: memref<5x256x512xf32, #tpu.memory_space<vmem>>, %arg4: memref<1x256xf32, #tpu.memory_space<vmem>>, %arg5: memref<1x512xf32, #tpu.memory_space<vmem>>, %arg6: memref<36x1xf32, #tpu.memory_space<vmem>>, %arg7: memref<1x4x7x224xf32, #tpu.memory_space<vmem>>) attributes {dimension_semantics = [#tpu.dimension_semantics<parallel>], iteration_bounds = array<i64: 2>, scalar_prefetch = 0 : i64, scratch_operands = 0 : i64, tpu.core_type = #tpu.core_type<tc>, window_params = [{transform_indices = @transform_0, window_bounds = array<i64: 1, 4, 44, 32>}, {pipeline_mode = #tpu.pipeline_mode<synchronous>, transform_indices = @transform_1, window_bounds = array<i64: 5, 32, 512>}, {pipeline_mode = #tpu.pipeline_mode<synchronous>, transform_indices = @transform_2, window_bounds = array<i64: 5, 256, 512>}, {pipeline_mode = #tpu.pipeline_mode<synchronous>, transform_indices = @transform_3, window_bounds = array<i64: 1, 256>}, {pipeline_mode = #tpu.pipeline_mode<synchronous>, transform_indices = @transform_4, window_bounds = array<i64: 1, 512>}, {pipeline_mode = #tpu.pipeline_mode<synchronous>, transform_indices = @transform_5, window_bounds = array<i64: 36, 1>}, {transform_indices = @transform_6, window_bounds = array<i64: 1, 4, 7, 224>}]} {
    %c0 = arith.constant 0 : index
    %c0_0 = arith.constant 0 : index
    %0 = vector.load %arg4[%c0, %c0_0] : memref<1x256xf32, #tpu.memory_space<vmem>>, vector<1x256xf32>
    %c0_1 = arith.constant 0 : index
    %c0_2 = arith.constant 0 : index
    %1 = vector.load %arg5[%c0_1, %c0_2] : memref<1x512xf32, #tpu.memory_space<vmem>>, vector<1x512xf32>
    %c0_3 = arith.constant 0 : index
    %c0_4 = arith.constant 0 : index
    %2 = vector.load %arg6[%c0_3, %c0_4] : memref<36x1xf32, #tpu.memory_space<vmem>>, vector<36x1xf32>
    %c0_5 = arith.constant 0 : index
    %c0_6 = arith.constant 0 : index
    %c0_7 = arith.constant 0 : index
    %c0_8 = arith.constant 0 : index
    %3 = vector.load %arg1[%c0_5, %c0_6, %c0_7, %c0_8] : memref<1x4x44x32xf32, #tpu.memory_space<vmem>>, vector<1x1x36x32xf32>
    %4 = vector.shape_cast %3 : vector<1x1x36x32xf32> to vector<36x32xf32>
    %c0_9 = arith.constant 0 : index
    %c0_10 = arith.constant 0 : index
    %c0_11 = arith.constant 0 : index
    %5 = vector.load %arg2[%c0_9, %c0_10, %c0_11] : memref<5x32x512xf32, #tpu.memory_space<vmem>>, vector<1x32x512xf32>
    %6 = vector.shape_cast %5 : vector<1x32x512xf32> to vector<32x512xf32>
    %cst = arith.constant dense<0.000000e+00> : vector<36x512xf32>
    %7 = tpu.matmul %4, %6, %cst {dimension_numbers = #tpu.dot_dimension_numbers<[1], [0], [0], [1], [0, 0, 1, 1], [], []>} : vector<36x32xf32>, vector<32x512xf32>, vector<36x512xf32> -> vector<36x512xf32>
    %c0_12 = arith.constant 0 : index
    %c1 = arith.constant 1 : index
    %c0_13 = arith.constant 0 : index
    %c0_14 = arith.constant 0 : index
    %8 = vector.load %arg1[%c0_12, %c1, %c0_13, %c0_14] : memref<1x4x44x32xf32, #tpu.memory_space<vmem>>, vector<1x1x36x32xf32>
    %9 = vector.shape_cast %8 : vector<1x1x36x32xf32> to vector<36x32xf32>
    %c1_15 = arith.constant 1 : index
    %c0_16 = arith.constant 0 : index
    %c0_17 = arith.constant 0 : index
    %10 = vector.load %arg2[%c1_15, %c0_16, %c0_17] : memref<5x32x512xf32, #tpu.memory_space<vmem>>, vector<1x32x512xf32>
    %11 = vector.shape_cast %10 : vector<1x32x512xf32> to vector<32x512xf32>
    %cst_18 = arith.constant dense<0.000000e+00> : vector<36x512xf32>
    %12 = tpu.matmul %9, %11, %cst_18 {dimension_numbers = #tpu.dot_dimension_numbers<[1], [0], [0], [1], [0, 0, 1, 1], [], []>} : vector<36x32xf32>, vector<32x512xf32>, vector<36x512xf32> -> vector<36x512xf32>
    %13 = arith.addf %7, %12 : vector<36x512xf32>
    %c0_19 = arith.constant 0 : index
    %c2 = arith.constant 2 : index
    %c0_20 = arith.constant 0 : index
    %c0_21 = arith.constant 0 : index
    %14 = vector.load %arg1[%c0_19, %c2, %c0_20, %c0_21] : memref<1x4x44x32xf32, #tpu.memory_space<vmem>>, vector<1x1x36x32xf32>
    %15 = vector.shape_cast %14 : vector<1x1x36x32xf32> to vector<36x32xf32>
    %c2_22 = arith.constant 2 : index
    %c0_23 = arith.constant 0 : index
    %c0_24 = arith.constant 0 : index
    %16 = vector.load %arg2[%c2_22, %c0_23, %c0_24] : memref<5x32x512xf32, #tpu.memory_space<vmem>>, vector<1x32x512xf32>
    %17 = vector.shape_cast %16 : vector<1x32x512xf32> to vector<32x512xf32>
    %cst_25 = arith.constant dense<0.000000e+00> : vector<36x512xf32>
    %18 = tpu.matmul %15, %17, %cst_25 {dimension_numbers = #tpu.dot_dimension_numbers<[1], [0], [0], [1], [0, 0, 1, 1], [], []>} : vector<36x32xf32>, vector<32x512xf32>, vector<36x512xf32> -> vector<36x512xf32>
    %19 = arith.addf %13, %18 : vector<36x512xf32>
    %c0_26 = arith.constant 0 : index
    %c3 = arith.constant 3 : index
    %c0_27 = arith.constant 0 : index
    %c0_28 = arith.constant 0 : index
    %20 = vector.load %arg1[%c0_26, %c3, %c0_27, %c0_28] : memref<1x4x44x32xf32, #tpu.memory_space<vmem>>, vector<1x1x36x32xf32>
    %21 = vector.shape_cast %20 : vector<1x1x36x32xf32> to vector<36x32xf32>
    %c3_29 = arith.constant 3 : index
    %c0_30 = arith.constant 0 : index
    %c0_31 = arith.constant 0 : index
    %22 = vector.load %arg2[%c3_29, %c0_30, %c0_31] : memref<5x32x512xf32, #tpu.memory_space<vmem>>, vector<1x32x512xf32>
    %23 = vector.shape_cast %22 : vector<1x32x512xf32> to vector<32x512xf32>
    %cst_32 = arith.constant dense<0.000000e+00> : vector<36x512xf32>
    %24 = tpu.matmul %21, %23, %cst_32 {dimension_numbers = #tpu.dot_dimension_numbers<[1], [0], [0], [1], [0, 0, 1, 1], [], []>} : vector<36x32xf32>, vector<32x512xf32>, vector<36x512xf32> -> vector<36x512xf32>
    %25 = arith.addf %19, %24 : vector<36x512xf32>
    %c0_33 = arith.constant 0 : index
    %c0_34 = arith.constant 0 : index
    %c1_35 = arith.constant 1 : index
    %c0_36 = arith.constant 0 : index
    %26 = vector.load %arg1[%c0_33, %c0_34, %c1_35, %c0_36] : memref<1x4x44x32xf32, #tpu.memory_space<vmem>>, vector<1x1x36x32xf32>
    %27 = vector.shape_cast %26 : vector<1x1x36x32xf32> to vector<36x32xf32>
    %c4 = arith.constant 4 : index
    %c0_37 = arith.constant 0 : index
    %c0_38 = arith.constant 0 : index
    %28 = vector.load %arg2[%c4, %c0_37, %c0_38] : memref<5x32x512xf32, #tpu.memory_space<vmem>>, vector<1x32x512xf32>
    %29 = vector.shape_cast %28 : vector<1x32x512xf32> to vector<32x512xf32>
    %cst_39 = arith.constant dense<0.000000e+00> : vector<36x512xf32>
    %30 = tpu.matmul %27, %29, %cst_39 {dimension_numbers = #tpu.dot_dimension_numbers<[1], [0], [0], [1], [0, 0, 1, 1], [], []>} : vector<36x32xf32>, vector<32x512xf32>, vector<36x512xf32> -> vector<36x512xf32>
    %31 = arith.addf %25, %30 : vector<36x512xf32>
    %c0_40 = arith.constant 0 : index
    %c1_41 = arith.constant 1 : index
    %c0_42 = arith.constant 0 : index
    %c0_43 = arith.constant 0 : index
    %32 = vector.load %arg1[%c0_40, %c1_41, %c0_42, %c0_43] : memref<1x4x44x32xf32, #tpu.memory_space<vmem>>, vector<1x1x36x32xf32>
    %33 = vector.shape_cast %32 : vector<1x1x36x32xf32> to vector<36x32xf32>
    %c0_44 = arith.constant 0 : index
    %c0_45 = arith.constant 0 : index
    %c0_46 = arith.constant 0 : index
    %34 = vector.load %arg2[%c0_44, %c0_45, %c0_46] : memref<5x32x512xf32, #tpu.memory_space<vmem>>, vector<1x32x512xf32>
    %35 = vector.shape_cast %34 : vector<1x32x512xf32> to vector<32x512xf32>
    %cst_47 = arith.constant dense<0.000000e+00> : vector<36x512xf32>
    %36 = tpu.matmul %33, %35, %cst_47 {dimension_numbers = #tpu.dot_dimension_numbers<[1], [0], [0], [1], [0, 0, 1, 1], [], []>} : vector<36x32xf32>, vector<32x512xf32>, vector<36x512xf32> -> vector<36x512xf32>
    %c0_48 = arith.constant 0 : index
    %c2_49 = arith.constant 2 : index
    %c0_50 = arith.constant 0 : index
    %c0_51 = arith.constant 0 : index
    %37 = vector.load %arg1[%c0_48, %c2_49, %c0_50, %c0_51] : memref<1x4x44x32xf32, #tpu.memory_space<vmem>>, vector<1x1x36x32xf32>
    %38 = vector.shape_cast %37 : vector<1x1x36x32xf32> to vector<36x32xf32>
    %c1_52 = arith.constant 1 : index
    %c0_53 = arith.constant 0 : index
    %c0_54 = arith.constant 0 : index
    %39 = vector.load %arg2[%c1_52, %c0_53, %c0_54] : memref<5x32x512xf32, #tpu.memory_space<vmem>>, vector<1x32x512xf32>
    %40 = vector.shape_cast %39 : vector<1x32x512xf32> to vector<32x512xf32>
    %cst_55 = arith.constant dense<0.000000e+00> : vector<36x512xf32>
    %41 = tpu.matmul %38, %40, %cst_55 {dimension_numbers = #tpu.dot_dimension_numbers<[1], [0], [0], [1], [0, 0, 1, 1], [], []>} : vector<36x32xf32>, vector<32x512xf32>, vector<36x512xf32> -> vector<36x512xf32>
    %42 = arith.addf %36, %41 : vector<36x512xf32>
    %c0_56 = arith.constant 0 : index
    %c3_57 = arith.constant 3 : index
    %c0_58 = arith.constant 0 : index
    %c0_59 = arith.constant 0 : index
    %43 = vector.load %arg1[%c0_56, %c3_57, %c0_58, %c0_59] : memref<1x4x44x32xf32, #tpu.memory_space<vmem>>, vector<1x1x36x32xf32>
    %44 = vector.shape_cast %43 : vector<1x1x36x32xf32> to vector<36x32xf32>
    %c2_60 = arith.constant 2 : index
    %c0_61 = arith.constant 0 : index
    %c0_62 = arith.constant 0 : index
    %45 = vector.load %arg2[%c2_60, %c0_61, %c0_62] : memref<5x32x512xf32, #tpu.memory_space<vmem>>, vector<1x32x512xf32>
    %46 = vector.shape_cast %45 : vector<1x32x512xf32> to vector<32x512xf32>
    %cst_63 = arith.constant dense<0.000000e+00> : vector<36x512xf32>
    %47 = tpu.matmul %44, %46, %cst_63 {dimension_numbers = #tpu.dot_dimension_numbers<[1], [0], [0], [1], [0, 0, 1, 1], [], []>} : vector<36x32xf32>, vector<32x512xf32>, vector<36x512xf32> -> vector<36x512xf32>
    %48 = arith.addf %42, %47 : vector<36x512xf32>
    %c0_64 = arith.constant 0 : index
    %c0_65 = arith.constant 0 : index
    %c1_66 = arith.constant 1 : index
    %c0_67 = arith.constant 0 : index
    %49 = vector.load %arg1[%c0_64, %c0_65, %c1_66, %c0_67] : memref<1x4x44x32xf32, #tpu.memory_space<vmem>>, vector<1x1x36x32xf32>
    %50 = vector.shape_cast %49 : vector<1x1x36x32xf32> to vector<36x32xf32>
    %c3_68 = arith.constant 3 : index
    %c0_69 = arith.constant 0 : index
    %c0_70 = arith.constant 0 : index
    %51 = vector.load %arg2[%c3_68, %c0_69, %c0_70] : memref<5x32x512xf32, #tpu.memory_space<vmem>>, vector<1x32x512xf32>
    %52 = vector.shape_cast %51 : vector<1x32x512xf32> to vector<32x512xf32>
    %cst_71 = arith.constant dense<0.000000e+00> : vector<36x512xf32>
    %53 = tpu.matmul %50, %52, %cst_71 {dimension_numbers = #tpu.dot_dimension_numbers<[1], [0], [0], [1], [0, 0, 1, 1], [], []>} : vector<36x32xf32>, vector<32x512xf32>, vector<36x512xf32> -> vector<36x512xf32>
    %54 = arith.addf %48, %53 : vector<36x512xf32>
    %c0_72 = arith.constant 0 : index
    %c1_73 = arith.constant 1 : index
    %c1_74 = arith.constant 1 : index
    %c0_75 = arith.constant 0 : index
    %55 = vector.load %arg1[%c0_72, %c1_73, %c1_74, %c0_75] : memref<1x4x44x32xf32, #tpu.memory_space<vmem>>, vector<1x1x36x32xf32>
    %56 = vector.shape_cast %55 : vector<1x1x36x32xf32> to vector<36x32xf32>
    %c4_76 = arith.constant 4 : index
    %c0_77 = arith.constant 0 : index
    %c0_78 = arith.constant 0 : index
    %57 = vector.load %arg2[%c4_76, %c0_77, %c0_78] : memref<5x32x512xf32, #tpu.memory_space<vmem>>, vector<1x32x512xf32>
    %58 = vector.shape_cast %57 : vector<1x32x512xf32> to vector<32x512xf32>
    %cst_79 = arith.constant dense<0.000000e+00> : vector<36x512xf32>
    %59 = tpu.matmul %56, %58, %cst_79 {dimension_numbers = #tpu.dot_dimension_numbers<[1], [0], [0], [1], [0, 0, 1, 1], [], []>} : vector<36x32xf32>, vector<32x512xf32>, vector<36x512xf32> -> vector<36x512xf32>
    %60 = arith.addf %54, %59 : vector<36x512xf32>
    %61 = arith.maximumf %31, %60 : vector<36x512xf32>
    %62 = vector.extract_strided_slice %61 {offsets = [0, 0], sizes = [36, 256], strides = [1, 1]} : vector<36x512xf32> to vector<36x256xf32>
    %63 = vector.extract_strided_slice %61 {offsets = [0, 256], sizes = [36, 256], strides = [1, 1]} : vector<36x512xf32> to vector<36x256xf32>
    %64 = arith.maximumf %62, %63 : vector<36x256xf32>
    %65 = vector.broadcast %0 : vector<1x256xf32> to vector<36x256xf32>
    %66 = arith.addf %64, %65 : vector<36x256xf32>
    %cst_80 = arith.constant 0.000000e+00 : f32
    %67 = vector.broadcast %cst_80 : f32 to vector<36x256xf32>
    %68 = arith.maximumf %66, %67 : vector<36x256xf32>
    %69 = vector.broadcast %2 : vector<36x1xf32> to vector<36x256xf32>
    %70 = arith.mulf %68, %69 : vector<36x256xf32>
    %c0_81 = arith.constant 0 : index
    %c2_82 = arith.constant 2 : index
    %c0_83 = arith.constant 0 : index
    %c0_84 = arith.constant 0 : index
    %71 = vector.load %arg1[%c0_81, %c2_82, %c0_83, %c0_84] : memref<1x4x44x32xf32, #tpu.memory_space<vmem>>, vector<1x1x36x32xf32>
    %72 = vector.shape_cast %71 : vector<1x1x36x32xf32> to vector<36x32xf32>
    %c0_85 = arith.constant 0 : index
    %c0_86 = arith.constant 0 : index
    %c0_87 = arith.constant 0 : index
    %73 = vector.load %arg2[%c0_85, %c0_86, %c0_87] : memref<5x32x512xf32, #tpu.memory_space<vmem>>, vector<1x32x512xf32>
    %74 = vector.shape_cast %73 : vector<1x32x512xf32> to vector<32x512xf32>
    %cst_88 = arith.constant dense<0.000000e+00> : vector<36x512xf32>
    %75 = tpu.matmul %72, %74, %cst_88 {dimension_numbers = #tpu.dot_dimension_numbers<[1], [0], [0], [1], [0, 0, 1, 1], [], []>} : vector<36x32xf32>, vector<32x512xf32>, vector<36x512xf32> -> vector<36x512xf32>
    %c0_89 = arith.constant 0 : index
    %c3_90 = arith.constant 3 : index
    %c0_91 = arith.constant 0 : index
    %c0_92 = arith.constant 0 : index
    %76 = vector.load %arg1[%c0_89, %c3_90, %c0_91, %c0_92] : memref<1x4x44x32xf32, #tpu.memory_space<vmem>>, vector<1x1x36x32xf32>
    %77 = vector.shape_cast %76 : vector<1x1x36x32xf32> to vector<36x32xf32>
    %c1_93 = arith.constant 1 : index
    %c0_94 = arith.constant 0 : index
    %c0_95 = arith.constant 0 : index
    %78 = vector.load %arg2[%c1_93, %c0_94, %c0_95] : memref<5x32x512xf32, #tpu.memory_space<vmem>>, vector<1x32x512xf32>
    %79 = vector.shape_cast %78 : vector<1x32x512xf32> to vector<32x512xf32>
    %cst_96 = arith.constant dense<0.000000e+00> : vector<36x512xf32>
    %80 = tpu.matmul %77, %79, %cst_96 {dimension_numbers = #tpu.dot_dimension_numbers<[1], [0], [0], [1], [0, 0, 1, 1], [], []>} : vector<36x32xf32>, vector<32x512xf32>, vector<36x512xf32> -> vector<36x512xf32>
    %81 = arith.addf %75, %80 : vector<36x512xf32>
    %c0_97 = arith.constant 0 : index
    %c0_98 = arith.constant 0 : index
    %c1_99 = arith.constant 1 : index
    %c0_100 = arith.constant 0 : index
    %82 = vector.load %arg1[%c0_97, %c0_98, %c1_99, %c0_100] : memref<1x4x44x32xf32, #tpu.memory_space<vmem>>, vector<1x1x36x32xf32>
    %83 = vector.shape_cast %82 : vector<1x1x36x32xf32> to vector<36x32xf32>
    %c2_101 = arith.constant 2 : index
    %c0_102 = arith.constant 0 : index
    %c0_103 = arith.constant 0 : index
    %84 = vector.load %arg2[%c2_101, %c0_102, %c0_103] : memref<5x32x512xf32, #tpu.memory_space<vmem>>, vector<1x32x512xf32>
    %85 = vector.shape_cast %84 : vector<1x32x512xf32> to vector<32x512xf32>
    %cst_104 = arith.constant dense<0.000000e+00> : vector<36x512xf32>
    %86 = tpu.matmul %83, %85, %cst_104 {dimension_numbers = #tpu.dot_dimension_numbers<[1], [0], [0], [1], [0, 0, 1, 1], [], []>} : vector<36x32xf32>, vector<32x512xf32>, vector<36x512xf32> -> vector<36x512xf32>
    %87 = arith.addf %81, %86 : vector<36x512xf32>
    %c0_105 = arith.constant 0 : index
    %c1_106 = arith.constant 1 : index
    %c1_107 = arith.constant 1 : index
    %c0_108 = arith.constant 0 : index
    %88 = vector.load %arg1[%c0_105, %c1_106, %c1_107, %c0_108] : memref<1x4x44x32xf32, #tpu.memory_space<vmem>>, vector<1x1x36x32xf32>
    %89 = vector.shape_cast %88 : vector<1x1x36x32xf32> to vector<36x32xf32>
    %c3_109 = arith.constant 3 : index
    %c0_110 = arith.constant 0 : index
    %c0_111 = arith.constant 0 : index
    %90 = vector.load %arg2[%c3_109, %c0_110, %c0_111] : memref<5x32x512xf32, #tpu.memory_space<vmem>>, vector<1x32x512xf32>
    %91 = vector.shape_cast %90 : vector<1x32x512xf32> to vector<32x512xf32>
    %cst_112 = arith.constant dense<0.000000e+00> : vector<36x512xf32>
    %92 = tpu.matmul %89, %91, %cst_112 {dimension_numbers = #tpu.dot_dimension_numbers<[1], [0], [0], [1], [0, 0, 1, 1], [], []>} : vector<36x32xf32>, vector<32x512xf32>, vector<36x512xf32> -> vector<36x512xf32>
    %93 = arith.addf %87, %92 : vector<36x512xf32>
    %c0_113 = arith.constant 0 : index
    %c2_114 = arith.constant 2 : index
    %c1_115 = arith.constant 1 : index
    %c0_116 = arith.constant 0 : index
    %94 = vector.load %arg1[%c0_113, %c2_114, %c1_115, %c0_116] : memref<1x4x44x32xf32, #tpu.memory_space<vmem>>, vector<1x1x36x32xf32>
    %95 = vector.shape_cast %94 : vector<1x1x36x32xf32> to vector<36x32xf32>
    %c4_117 = arith.constant 4 : index
    %c0_118 = arith.constant 0 : index
    %c0_119 = arith.constant 0 : index
    %96 = vector.load %arg2[%c4_117, %c0_118, %c0_119] : memref<5x32x512xf32, #tpu.memory_space<vmem>>, vector<1x32x512xf32>
    %97 = vector.shape_cast %96 : vector<1x32x512xf32> to vector<32x512xf32>
    %cst_120 = arith.constant dense<0.000000e+00> : vector<36x512xf32>
    %98 = tpu.matmul %95, %97, %cst_120 {dimension_numbers = #tpu.dot_dimension_numbers<[1], [0], [0], [1], [0, 0, 1, 1], [], []>} : vector<36x32xf32>, vector<32x512xf32>, vector<36x512xf32> -> vector<36x512xf32>
    %99 = arith.addf %93, %98 : vector<36x512xf32>
    %c0_121 = arith.constant 0 : index
    %c3_122 = arith.constant 3 : index
    %c0_123 = arith.constant 0 : index
    %c0_124 = arith.constant 0 : index
    %100 = vector.load %arg1[%c0_121, %c3_122, %c0_123, %c0_124] : memref<1x4x44x32xf32, #tpu.memory_space<vmem>>, vector<1x1x36x32xf32>
    %101 = vector.shape_cast %100 : vector<1x1x36x32xf32> to vector<36x32xf32>
    %c0_125 = arith.constant 0 : index
    %c0_126 = arith.constant 0 : index
    %c0_127 = arith.constant 0 : index
    %102 = vector.load %arg2[%c0_125, %c0_126, %c0_127] : memref<5x32x512xf32, #tpu.memory_space<vmem>>, vector<1x32x512xf32>
    %103 = vector.shape_cast %102 : vector<1x32x512xf32> to vector<32x512xf32>
    %cst_128 = arith.constant dense<0.000000e+00> : vector<36x512xf32>
    %104 = tpu.matmul %101, %103, %cst_128 {dimension_numbers = #tpu.dot_dimension_numbers<[1], [0], [0], [1], [0, 0, 1, 1], [], []>} : vector<36x32xf32>, vector<32x512xf32>, vector<36x512xf32> -> vector<36x512xf32>
    %c0_129 = arith.constant 0 : index
    %c0_130 = arith.constant 0 : index
    %c1_131 = arith.constant 1 : index
    %c0_132 = arith.constant 0 : index
    %105 = vector.load %arg1[%c0_129, %c0_130, %c1_131, %c0_132] : memref<1x4x44x32xf32, #tpu.memory_space<vmem>>, vector<1x1x36x32xf32>
    %106 = vector.shape_cast %105 : vector<1x1x36x32xf32> to vector<36x32xf32>
    %c1_133 = arith.constant 1 : index
    %c0_134 = arith.constant 0 : index
    %c0_135 = arith.constant 0 : index
    %107 = vector.load %arg2[%c1_133, %c0_134, %c0_135] : memref<5x32x512xf32, #tpu.memory_space<vmem>>, vector<1x32x512xf32>
    %108 = vector.shape_cast %107 : vector<1x32x512xf32> to vector<32x512xf32>
    %cst_136 = arith.constant dense<0.000000e+00> : vector<36x512xf32>
    %109 = tpu.matmul %106, %108, %cst_136 {dimension_numbers = #tpu.dot_dimension_numbers<[1], [0], [0], [1], [0, 0, 1, 1], [], []>} : vector<36x32xf32>, vector<32x512xf32>, vector<36x512xf32> -> vector<36x512xf32>
    %110 = arith.addf %104, %109 : vector<36x512xf32>
    %c0_137 = arith.constant 0 : index
    %c1_138 = arith.constant 1 : index
    %c1_139 = arith.constant 1 : index
    %c0_140 = arith.constant 0 : index
    %111 = vector.load %arg1[%c0_137, %c1_138, %c1_139, %c0_140] : memref<1x4x44x32xf32, #tpu.memory_space<vmem>>, vector<1x1x36x32xf32>
    %112 = vector.shape_cast %111 : vector<1x1x36x32xf32> to vector<36x32xf32>
    %c2_141 = arith.constant 2 : index
    %c0_142 = arith.constant 0 : index
    %c0_143 = arith.constant 0 : index
    %113 = vector.load %arg2[%c2_141, %c0_142, %c0_143] : memref<5x32x512xf32, #tpu.memory_space<vmem>>, vector<1x32x512xf32>
    %114 = vector.shape_cast %113 : vector<1x32x512xf32> to vector<32x512xf32>
    %cst_144 = arith.constant dense<0.000000e+00> : vector<36x512xf32>
    %115 = tpu.matmul %112, %114, %cst_144 {dimension_numbers = #tpu.dot_dimension_numbers<[1], [0], [0], [1], [0, 0, 1, 1], [], []>} : vector<36x32xf32>, vector<32x512xf32>, vector<36x512xf32> -> vector<36x512xf32>
    %116 = arith.addf %110, %115 : vector<36x512xf32>
    %c0_145 = arith.constant 0 : index
    %c2_146 = arith.constant 2 : index
    %c1_147 = arith.constant 1 : index
    %c0_148 = arith.constant 0 : index
    %117 = vector.load %arg1[%c0_145, %c2_146, %c1_147, %c0_148] : memref<1x4x44x32xf32, #tpu.memory_space<vmem>>, vector<1x1x36x32xf32>
    %118 = vector.shape_cast %117 : vector<1x1x36x32xf32> to vector<36x32xf32>
    %c3_149 = arith.constant 3 : index
    %c0_150 = arith.constant 0 : index
    %c0_151 = arith.constant 0 : index
    %119 = vector.load %arg2[%c3_149, %c0_150, %c0_151] : memref<5x32x512xf32, #tpu.memory_space<vmem>>, vector<1x32x512xf32>
    %120 = vector.shape_cast %119 : vector<1x32x512xf32> to vector<32x512xf32>
    %cst_152 = arith.constant dense<0.000000e+00> : vector<36x512xf32>
    %121 = tpu.matmul %118, %120, %cst_152 {dimension_numbers = #tpu.dot_dimension_numbers<[1], [0], [0], [1], [0, 0, 1, 1], [], []>} : vector<36x32xf32>, vector<32x512xf32>, vector<36x512xf32> -> vector<36x512xf32>
    %122 = arith.addf %116, %121 : vector<36x512xf32>
    %c0_153 = arith.constant 0 : index
    %c3_154 = arith.constant 3 : index
    %c1_155 = arith.constant 1 : index
    %c0_156 = arith.constant 0 : index
    %123 = vector.load %arg1[%c0_153, %c3_154, %c1_155, %c0_156] : memref<1x4x44x32xf32, #tpu.memory_space<vmem>>, vector<1x1x36x32xf32>
    %124 = vector.shape_cast %123 : vector<1x1x36x32xf32> to vector<36x32xf32>
    %c4_157 = arith.constant 4 : index
    %c0_158 = arith.constant 0 : index
    %c0_159 = arith.constant 0 : index
    %125 = vector.load %arg2[%c4_157, %c0_158, %c0_159] : memref<5x32x512xf32, #tpu.memory_space<vmem>>, vector<1x32x512xf32>
    %126 = vector.shape_cast %125 : vector<1x32x512xf32> to vector<32x512xf32>
    %cst_160 = arith.constant dense<0.000000e+00> : vector<36x512xf32>
    %127 = tpu.matmul %124, %126, %cst_160 {dimension_numbers = #tpu.dot_dimension_numbers<[1], [0], [0], [1], [0, 0, 1, 1], [], []>} : vector<36x32xf32>, vector<32x512xf32>, vector<36x512xf32> -> vector<36x512xf32>
    %128 = arith.addf %122, %127 : vector<36x512xf32>
    %129 = arith.maximumf %99, %128 : vector<36x512xf32>
    %130 = vector.extract_strided_slice %129 {offsets = [0, 0], sizes = [36, 256], strides = [1, 1]} : vector<36x512xf32> to vector<36x256xf32>
    %131 = vector.extract_strided_slice %129 {offsets = [0, 256], sizes = [36, 256], strides = [1, 1]} : vector<36x512xf32> to vector<36x256xf32>
    %132 = arith.maximumf %130, %131 : vector<36x256xf32>
    %133 = vector.broadcast %0 : vector<1x256xf32> to vector<36x256xf32>
    %134 = arith.addf %132, %133 : vector<36x256xf32>
    %cst_161 = arith.constant 0.000000e+00 : f32
    %135 = vector.broadcast %cst_161 : f32 to vector<36x256xf32>
    %136 = arith.maximumf %134, %135 : vector<36x256xf32>
    %137 = vector.broadcast %2 : vector<36x1xf32> to vector<36x256xf32>
    %138 = arith.mulf %136, %137 : vector<36x256xf32>
    %139 = vector.extract_strided_slice %70 {offsets = [0, 0], sizes = [34, 256], strides = [1, 1]} : vector<36x256xf32> to vector<34x256xf32>
    %c0_162 = arith.constant 0 : index
    %c0_163 = arith.constant 0 : index
    %c0_164 = arith.constant 0 : index
    %140 = vector.load %arg3[%c0_162, %c0_163, %c0_164] : memref<5x256x512xf32, #tpu.memory_space<vmem>>, vector<1x256x512xf32>
    %141 = vector.shape_cast %140 : vector<1x256x512xf32> to vector<256x512xf32>
    %cst_165 = arith.constant dense<0.000000e+00> : vector<34x512xf32>
    %142 = tpu.matmul %139, %141, %cst_165 {dimension_numbers = #tpu.dot_dimension_numbers<[1], [0], [0], [1], [0, 0, 1, 1], [], []>} : vector<34x256xf32>, vector<256x512xf32>, vector<34x512xf32> -> vector<34x512xf32>
    %143 = vector.extract_strided_slice %138 {offsets = [0, 0], sizes = [34, 256], strides = [1, 1]} : vector<36x256xf32> to vector<34x256xf32>
    %c1_166 = arith.constant 1 : index
    %c0_167 = arith.constant 0 : index
    %c0_168 = arith.constant 0 : index
    %144 = vector.load %arg3[%c1_166, %c0_167, %c0_168] : memref<5x256x512xf32, #tpu.memory_space<vmem>>, vector<1x256x512xf32>
    %145 = vector.shape_cast %144 : vector<1x256x512xf32> to vector<256x512xf32>
    %cst_169 = arith.constant dense<0.000000e+00> : vector<34x512xf32>
    %146 = tpu.matmul %143, %145, %cst_169 {dimension_numbers = #tpu.dot_dimension_numbers<[1], [0], [0], [1], [0, 0, 1, 1], [], []>} : vector<34x256xf32>, vector<256x512xf32>, vector<34x512xf32> -> vector<34x512xf32>
    %147 = arith.addf %142, %146 : vector<34x512xf32>
    %148 = vector.extract_strided_slice %70 {offsets = [1, 0], sizes = [34, 256], strides = [1, 1]} : vector<36x256xf32> to vector<34x256xf32>
    %c2_170 = arith.constant 2 : index
    %c0_171 = arith.constant 0 : index
    %c0_172 = arith.constant 0 : index
    %149 = vector.load %arg3[%c2_170, %c0_171, %c0_172] : memref<5x256x512xf32, #tpu.memory_space<vmem>>, vector<1x256x512xf32>
    %150 = vector.shape_cast %149 : vector<1x256x512xf32> to vector<256x512xf32>
    %cst_173 = arith.constant dense<0.000000e+00> : vector<34x512xf32>
    %151 = tpu.matmul %148, %150, %cst_173 {dimension_numbers = #tpu.dot_dimension_numbers<[1], [0], [0], [1], [0, 0, 1, 1], [], []>} : vector<34x256xf32>, vector<256x512xf32>, vector<34x512xf32> -> vector<34x512xf32>
    %152 = arith.addf %147, %151 : vector<34x512xf32>
    %153 = vector.extract_strided_slice %138 {offsets = [1, 0], sizes = [34, 256], strides = [1, 1]} : vector<36x256xf32> to vector<34x256xf32>
    %c3_174 = arith.constant 3 : index
    %c0_175 = arith.constant 0 : index
    %c0_176 = arith.constant 0 : index
    %154 = vector.load %arg3[%c3_174, %c0_175, %c0_176] : memref<5x256x512xf32, #tpu.memory_space<vmem>>, vector<1x256x512xf32>
    %155 = vector.shape_cast %154 : vector<1x256x512xf32> to vector<256x512xf32>
    %cst_177 = arith.constant dense<0.000000e+00> : vector<34x512xf32>
    %156 = tpu.matmul %153, %155, %cst_177 {dimension_numbers = #tpu.dot_dimension_numbers<[1], [0], [0], [1], [0, 0, 1, 1], [], []>} : vector<34x256xf32>, vector<256x512xf32>, vector<34x512xf32> -> vector<34x512xf32>
    %157 = arith.addf %152, %156 : vector<34x512xf32>
    %158 = vector.extract_strided_slice %70 {offsets = [2, 0], sizes = [34, 256], strides = [1, 1]} : vector<36x256xf32> to vector<34x256xf32>
    %c4_178 = arith.constant 4 : index
    %c0_179 = arith.constant 0 : index
    %c0_180 = arith.constant 0 : index
    %159 = vector.load %arg3[%c4_178, %c0_179, %c0_180] : memref<5x256x512xf32, #tpu.memory_space<vmem>>, vector<1x256x512xf32>
    %160 = vector.shape_cast %159 : vector<1x256x512xf32> to vector<256x512xf32>
    %cst_181 = arith.constant dense<0.000000e+00> : vector<34x512xf32>
    %161 = tpu.matmul %158, %160, %cst_181 {dimension_numbers = #tpu.dot_dimension_numbers<[1], [0], [0], [1], [0, 0, 1, 1], [], []>} : vector<34x256xf32>, vector<256x512xf32>, vector<34x512xf32> -> vector<34x512xf32>
    %162 = arith.addf %157, %161 : vector<34x512xf32>
    %163 = vector.broadcast %1 : vector<1x512xf32> to vector<34x512xf32>
    %164 = arith.addf %162, %163 : vector<34x512xf32>
    %cst_182 = arith.constant 0.000000e+00 : f32
    %165 = vector.broadcast %cst_182 : f32 to vector<34x512xf32>
    %166 = arith.maximumf %164, %165 : vector<34x512xf32>
    %167 = vector.extract_strided_slice %166 {offsets = [0, 0], sizes = [34, 256], strides = [1, 1]} : vector<34x512xf32> to vector<34x256xf32>
    %168 = vector.extract_strided_slice %166 {offsets = [0, 256], sizes = [34, 256], strides = [1, 1]} : vector<34x512xf32> to vector<34x256xf32>
    %169 = arith.maximumf %167, %168 : vector<34x256xf32>
    %170 = vector.extract_strided_slice %138 {offsets = [0, 0], sizes = [34, 256], strides = [1, 1]} : vector<36x256xf32> to vector<34x256xf32>
    %c0_183 = arith.constant 0 : index
    %c0_184 = arith.constant 0 : index
    %c0_185 = arith.constant 0 : index
    %171 = vector.load %arg3[%c0_183, %c0_184, %c0_185] : memref<5x256x512xf32, #tpu.memory_space<vmem>>, vector<1x256x512xf32>
    %172 = vector.shape_cast %171 : vector<1x256x512xf32> to vector<256x512xf32>
    %cst_186 = arith.constant dense<0.000000e+00> : vector<34x512xf32>
    %173 = tpu.matmul %170, %172, %cst_186 {dimension_numbers = #tpu.dot_dimension_numbers<[1], [0], [0], [1], [0, 0, 1, 1], [], []>} : vector<34x256xf32>, vector<256x512xf32>, vector<34x512xf32> -> vector<34x512xf32>
    %174 = vector.extract_strided_slice %70 {offsets = [1, 0], sizes = [34, 256], strides = [1, 1]} : vector<36x256xf32> to vector<34x256xf32>
    %c1_187 = arith.constant 1 : index
    %c0_188 = arith.constant 0 : index
    %c0_189 = arith.constant 0 : index
    %175 = vector.load %arg3[%c1_187, %c0_188, %c0_189] : memref<5x256x512xf32, #tpu.memory_space<vmem>>, vector<1x256x512xf32>
    %176 = vector.shape_cast %175 : vector<1x256x512xf32> to vector<256x512xf32>
    %cst_190 = arith.constant dense<0.000000e+00> : vector<34x512xf32>
    %177 = tpu.matmul %174, %176, %cst_190 {dimension_numbers = #tpu.dot_dimension_numbers<[1], [0], [0], [1], [0, 0, 1, 1], [], []>} : vector<34x256xf32>, vector<256x512xf32>, vector<34x512xf32> -> vector<34x512xf32>
    %178 = arith.addf %173, %177 : vector<34x512xf32>
    %179 = vector.extract_strided_slice %138 {offsets = [1, 0], sizes = [34, 256], strides = [1, 1]} : vector<36x256xf32> to vector<34x256xf32>
    %c2_191 = arith.constant 2 : index
    %c0_192 = arith.constant 0 : index
    %c0_193 = arith.constant 0 : index
    %180 = vector.load %arg3[%c2_191, %c0_192, %c0_193] : memref<5x256x512xf32, #tpu.memory_space<vmem>>, vector<1x256x512xf32>
    %181 = vector.shape_cast %180 : vector<1x256x512xf32> to vector<256x512xf32>
    %cst_194 = arith.constant dense<0.000000e+00> : vector<34x512xf32>
    %182 = tpu.matmul %179, %181, %cst_194 {dimension_numbers = #tpu.dot_dimension_numbers<[1], [0], [0], [1], [0, 0, 1, 1], [], []>} : vector<34x256xf32>, vector<256x512xf32>, vector<34x512xf32> -> vector<34x512xf32>
    %183 = arith.addf %178, %182 : vector<34x512xf32>
    %184 = vector.extract_strided_slice %70 {offsets = [2, 0], sizes = [34, 256], strides = [1, 1]} : vector<36x256xf32> to vector<34x256xf32>
    %c3_195 = arith.constant 3 : index
    %c0_196 = arith.constant 0 : index
    %c0_197 = arith.constant 0 : index
    %185 = vector.load %arg3[%c3_195, %c0_196, %c0_197] : memref<5x256x512xf32, #tpu.memory_space<vmem>>, vector<1x256x512xf32>
    %186 = vector.shape_cast %185 : vector<1x256x512xf32> to vector<256x512xf32>
    %cst_198 = arith.constant dense<0.000000e+00> : vector<34x512xf32>
    %187 = tpu.matmul %184, %186, %cst_198 {dimension_numbers = #tpu.dot_dimension_numbers<[1], [0], [0], [1], [0, 0, 1, 1], [], []>} : vector<34x256xf32>, vector<256x512xf32>, vector<34x512xf32> -> vector<34x512xf32>
    %188 = arith.addf %183, %187 : vector<34x512xf32>
    %189 = vector.extract_strided_slice %138 {offsets = [2, 0], sizes = [34, 256], strides = [1, 1]} : vector<36x256xf32> to vector<34x256xf32>
    %c4_199 = arith.constant 4 : index
    %c0_200 = arith.constant 0 : index
    %c0_201 = arith.constant 0 : index
    %190 = vector.load %arg3[%c4_199, %c0_200, %c0_201] : memref<5x256x512xf32, #tpu.memory_space<vmem>>, vector<1x256x512xf32>
    %191 = vector.shape_cast %190 : vector<1x256x512xf32> to vector<256x512xf32>
    %cst_202 = arith.constant dense<0.000000e+00> : vector<34x512xf32>
    %192 = tpu.matmul %189, %191, %cst_202 {dimension_numbers = #tpu.dot_dimension_numbers<[1], [0], [0], [1], [0, 0, 1, 1], [], []>} : vector<34x256xf32>, vector<256x512xf32>, vector<34x512xf32> -> vector<34x512xf32>
    %193 = arith.addf %188, %192 : vector<34x512xf32>
    %194 = vector.broadcast %1 : vector<1x512xf32> to vector<34x512xf32>
    %195 = arith.addf %193, %194 : vector<34x512xf32>
    %cst_203 = arith.constant 0.000000e+00 : f32
    %196 = vector.broadcast %cst_203 : f32 to vector<34x512xf32>
    %197 = arith.maximumf %195, %196 : vector<34x512xf32>
    %198 = vector.extract_strided_slice %197 {offsets = [0, 0], sizes = [34, 256], strides = [1, 1]} : vector<34x512xf32> to vector<34x256xf32>
    %199 = vector.extract_strided_slice %197 {offsets = [0, 256], sizes = [34, 256], strides = [1, 1]} : vector<34x512xf32> to vector<34x256xf32>
    %200 = arith.maximumf %198, %199 : vector<34x256xf32>
    %201 = arith.maximumf %169, %200 : vector<34x256xf32>
    %202 = vector.extract_strided_slice %201 {offsets = [0, 0], sizes = [7, 224], strides = [1, 1]} : vector<34x256xf32> to vector<7x224xf32>
    %c0_204 = arith.constant 0 : index
    %c0_205 = arith.constant 0 : index
    %c0_206 = arith.constant 0 : index
    %c0_207 = arith.constant 0 : index
    %203 = vector.load %arg7[%c0_204, %c0_205, %c0_206, %c0_207] : memref<1x4x7x224xf32, #tpu.memory_space<vmem>>, vector<1x1x7x224xf32>
    %204 = vector.shape_cast %203 : vector<1x1x7x224xf32> to vector<7x224xf32>
    %205 = vector.shape_cast %202 : vector<7x224xf32> to vector<1x1x7x224xf32>
    tpu.vector_store %arg7[%c0_204, %c0_205, %c0_206, %c0_207], %205 {strides = array<i32>} : memref<1x4x7x224xf32, #tpu.memory_space<vmem>>, vector<1x1x7x224xf32>,
    %206 = vector.extract_strided_slice %201 {offsets = [9, 0], sizes = [7, 224], strides = [1, 1]} : vector<34x256xf32> to vector<7x224xf32>
    %c0_208 = arith.constant 0 : index
    %c1_209 = arith.constant 1 : index
    %c0_210 = arith.constant 0 : index
    %c0_211 = arith.constant 0 : index
    %207 = vector.load %arg7[%c0_208, %c1_209, %c0_210, %c0_211] : memref<1x4x7x224xf32, #tpu.memory_space<vmem>>, vector<1x1x7x224xf32>
    %208 = vector.shape_cast %207 : vector<1x1x7x224xf32> to vector<7x224xf32>
    %209 = vector.shape_cast %206 : vector<7x224xf32> to vector<1x1x7x224xf32>
    tpu.vector_store %arg7[%c0_208, %c1_209, %c0_210, %c0_211], %209 {strides = array<i32>} : memref<1x4x7x224xf32, #tpu.memory_space<vmem>>, vector<1x1x7x224xf32>,
    %210 = vector.extract_strided_slice %201 {offsets = [18, 0], sizes = [7, 224], strides = [1, 1]} : vector<34x256xf32> to vector<7x224xf32>
    %c0_212 = arith.constant 0 : index
    %c2_213 = arith.constant 2 : index
    %c0_214 = arith.constant 0 : index
    %c0_215 = arith.constant 0 : index
    %211 = vector.load %arg7[%c0_212, %c2_213, %c0_214, %c0_215] : memref<1x4x7x224xf32, #tpu.memory_space<vmem>>, vector<1x1x7x224xf32>
    %212 = vector.shape_cast %211 : vector<1x1x7x224xf32> to vector<7x224xf32>
    %213 = vector.shape_cast %210 : vector<7x224xf32> to vector<1x1x7x224xf32>
    tpu.vector_store %arg7[%c0_212, %c2_213, %c0_214, %c0_215], %213 {strides = array<i32>} : memref<1x4x7x224xf32, #tpu.memory_space<vmem>>, vector<1x1x7x224xf32>,
    %214 = vector.extract_strided_slice %201 {offsets = [27, 0], sizes = [7, 224], strides = [1, 1]} : vector<34x256xf32> to vector<7x224xf32>
    %c0_216 = arith.constant 0 : index
    %c3_217 = arith.constant 3 : index
    %c0_218 = arith.constant 0 : index
    %c0_219 = arith.constant 0 : index
    %215 = vector.load %arg7[%c0_216, %c3_217, %c0_218, %c0_219] : memref<1x4x7x224xf32, #tpu.memory_space<vmem>>, vector<1x1x7x224xf32>
    %216 = vector.shape_cast %215 : vector<1x1x7x224xf32> to vector<7x224xf32>
    %217 = vector.shape_cast %214 : vector<7x224xf32> to vector<1x1x7x224xf32>
    tpu.vector_store %arg7[%c0_216, %c3_217, %c0_218, %c0_219], %217 {strides = array<i32>} : memref<1x4x7x224xf32, #tpu.memory_space<vmem>>, vector<1x1x7x224xf32>,
    return
  }
  func.func @transform_0(%arg0: i32) -> (i32, i32, i32, i32) {
    %c0_i32 = arith.constant 0 : i32
    %c0_i32_0 = arith.constant 0 : i32
    %c0_i32_1 = arith.constant 0 : i32
    %c0_i32_2 = arith.constant 0 : i32
    return %arg0, %c0_i32, %c0_i32_0, %c0_i32_1 : i32, i32, i32, i32
  }
  func.func @transform_1(%arg0: i32) -> (i32, i32, i32) {
    %c0_i32 = arith.constant 0 : i32
    %c0_i32_0 = arith.constant 0 : i32
    %c0_i32_1 = arith.constant 0 : i32
    %c0_i32_2 = arith.constant 0 : i32
    return %c0_i32, %c0_i32_0, %c0_i32_1 : i32, i32, i32
  }
  func.func @transform_2(%arg0: i32) -> (i32, i32, i32) {
    %c0_i32 = arith.constant 0 : i32
    %c0_i32_0 = arith.constant 0 : i32
    %c0_i32_1 = arith.constant 0 : i32
    %c0_i32_2 = arith.constant 0 : i32
    return %c0_i32, %c0_i32_0, %c0_i32_1 : i32, i32, i32
  }
  func.func @transform_3(%arg0: i32) -> (i32, i32) {
    %c0_i32 = arith.constant 0 : i32
    %c0_i32_0 = arith.constant 0 : i32
    %c0_i32_1 = arith.constant 0 : i32
    return %c0_i32, %c0_i32_0 : i32, i32
  }
  func.func @transform_4(%arg0: i32) -> (i32, i32) {
    %c0_i32 = arith.constant 0 : i32
    %c0_i32_0 = arith.constant 0 : i32
    %c0_i32_1 = arith.constant 0 : i32
    return %c0_i32, %c0_i32_0 : i32, i32
  }
  func.func @transform_5(%arg0: i32) -> (i32, i32) {
    %c0_i32 = arith.constant 0 : i32
    %c0_i32_0 = arith.constant 0 : i32
    %c0_i32_1 = arith.constant 0 : i32
    return %c0_i32, %c0_i32_0 : i32, i32
  }
  func.func @transform_6(%arg0: i32) -> (i32, i32, i32, i32) {
    %c0_i32 = arith.constant 0 : i32
    %c0_i32_0 = arith.constant 0 : i32
    %c0_i32_1 = arith.constant 0 : i32
    %c0_i32_2 = arith.constant 0 : i32
    return %arg0, %c0_i32, %c0_i32_0, %c0_i32_1 : i32, i32, i32, i32
  }
}

</mosaic_0001>

<bundles_post_ra>
// kernel: tile.6
= control target key start
LH: loop header
LB: loop body
LE: loop exit
PB: predicated region body
PF: predicated region fallthrough
CT: control target
= control target key end

     0   :  { %s22_s0 = inlined_call_operand.vmem [shape: f32[9], index: 0, kind: input, shape index: {}]   ;;  %s23_s1 = inlined_call_operand.vmem [shape: f32[4,9], index: 1, kind: output, shape index: {}]  }
   0x1   :  { %v4_v0 = vld [vmem:[%s22_s0] ss:$0 sm:$0xff] }
   0x2   :  { %5 = vst [vmem:[%s23_s1] sm:$0xf] %v4_v0 }

// kernel: tile.0
= control target key start
LH: loop header
LB: loop body
LE: loop exit
PB: predicated region body
PF: predicated region fallthrough
CT: control target
= control target key end

     0   :  { %s86_s8 = smov 127   ;;  %vm7_vm0 = vcmask 7168   ;;  %s87_s11 = smov 124   ;;  %s158_s0 = inlined_call_operand.vmem [shape: f32[4,9], index: 0, kind: input, shape index: {}]   ;;  %s159_s1 = inlined_call_operand.vmem [shape: f32[36,1], index: 1, kind: output, shape index: {}]  }
   0x1   :  { %v4_v0 = vld [vmem:[%s158_s0] sm:$0xf]  ;;  %s85_s0 = smov 125   ;;  %s88_s12 = smov 126  }
   0x2   :  { %5 = vst [vmem:[#allocation0] sm:$0xf] %v4_v0  ;;  %s89_s13 = smov 122   ;;  %s90_s14 = smov 123  }
   0x3   :  { %s91_s15 = smov 120   ;;  %s92_s16 = smov 121  }
   0x9   :  { %v21_v1 = vld [vmem:[#allocation0] sm:$0xf]  }
   0xa   :  { %v9_v2 = vld [vmem:[#allocation0] sm:$0xf]   ;;  %22 = vrot.lane.b32.xlu1 %v21_v1, %s85_s0 }
   0xb   :  { %10 = vrot.lane.b32.xlu0 %v9_v2, %s86_s8  ;;  %v27_v3 = vld [vmem:[#allocation0] sm:$0xf]  }
   0xc   :  { %v15_v4 = vld [vmem:[#allocation0] sm:$0xf]  }
   0xd   :  { %v6_v5 = vld [vmem:[#allocation0] sm:$0xf]  }
   0xe   :  { %8 = vst.msk [vmem:[%s159_s1] ss:$9 sm:$0xf] %vm7_vm0, %v6_v5   ;;  %28 = vrot.lane.b32.xlu1 %v27_v3, %s87_s11  ;;  %v41_v6 = vld.sshfl [vmem:[#allocation0] sm:$0xff pattern:$0x22222103]  }
   0xf   :  { %16 = vrot.lane.b32.xlu0 %v15_v4, %s88_s12 }
  0x12   :  { %42 = vrot.lane.b32.xlu1 %v41_v6, %s89_s13 }
  0x13   :  { %34 = vrot.lane.b32.xlu0 %v41_v6, %s90_s14 }
  0x16   :  { %58 = vrot.lane.b32.xlu1 %v41_v6, %s91_s15 }
  0x17   :  { %50 = vrot.lane.b32.xlu0 %v41_v6, %s92_s16 }
  0x7c   :  { %v23_v7 = vpop.permute.xlu1 %22  }
  0x7d   :  { %v11_v8 = vpop.permute.xlu0 %10   ;;  %67 = vst.msk [vmem:[%s159_s1 + $0x3] ss:$9 sm:$0xf] %vm7_vm0, %v23_v7  }
  0x7e   :  { %65 = vst.msk [vmem:[%s159_s1 + $0x1] ss:$9 sm:$0xf] %vm7_vm0, %v11_v8  }
  0x80   :  { %v29_v9 = vpop.permute.xlu1 %28  }
  0x81   :  { %v17_v10 = vpop.permute.xlu0 %16   ;;  %68 = vst.msk [vmem:[%s159_s1 + $0x4] ss:$9 sm:$0xf] %vm7_vm0, %v29_v9  }
  0x82   :  { %66 = vst.msk [vmem:[%s159_s1 + $0x2] ss:$9 sm:$0xf] %vm7_vm0, %v17_v10  }
  0x84   :  { %v43_v11 = vpop.permute.xlu1 %42  }
  0x85   :  { %v35_v12 = vpop.permute.xlu0 %34   ;;  %71 = vst.msk [vmem:[%s159_s1 + $0x21] ss:$-27 sm:$0x3] %vm7_vm0, %v43_v11   ;;  %72 = vst.msk [vmem:[%s159_s1 - $0x3] ss:$9 sm:$0xc] %vm7_vm0, %v43_v11  }
  0x86   :  { %69 = vst.msk [vmem:[%s159_s1 + $0x20] ss:$-27 sm:$0x3] %vm7_vm0, %v35_v12   ;;  %70 = vst.msk [vmem:[%s159_s1 - $0x4] ss:$9 sm:$0xc] %vm7_vm0, %v35_v12  }
  0x88   :  { %v59_v13 = vpop.permute.xlu1 %58  }
  0x89   :  { %v51_v14 = vpop.permute.xlu0 %50   ;;  %75 = vst.msk [vmem:[%s159_s1 + $0x23] ss:$-27 sm:$0x3] %vm7_vm0, %v59_v13   ;;  %76 = vst.msk [vmem:[%s159_s1 - $0x1] ss:$9 sm:$0xc] %vm7_vm0, %v59_v13  }
  0x8a   :  { %73 = vst.msk [vmem:[%s159_s1 + $0x22] ss:$-27 sm:$0x3] %vm7_vm0, %v51_v14   ;;  %74 = vst.msk [vmem:[%s159_s1 - $0x2] ss:$9 sm:$0xc] %vm7_vm0, %v51_v14  }

// kernel: _lambda_.1
= control target key start
LH: loop header
LB: loop body
LE: loop exit
PB: predicated region body
PF: predicated region fallthrough
CT: control target
= control target key end

     0   :  { %s10689_s21 = smov 0   ;;  %s15755_s0 = inlined_call_operand.vmem [shape: f32[2,4,44,32], index: 0, kind: input, shape index: {}]   ;;  %s15756_s1 = inlined_call_operand.vmem [shape: f32[5,32,512], index: 1, kind: input, shape index: {}]   ;;  %s15757_s2 = inlined_call_operand.vmem [shape: f32[5,256,512], index: 2, kind: input, shape index: {}]   ;;  %s15758_s3 = inlined_call_operand.vmem [shape: f32[1,256], index: 3, kind: input, shape index: {}]   ;;  %s15759_s4 = inlined_call_operand.vmem [shape: f32[1,512], index: 4, kind: input, shape index: {}]   ;;  %s15760_s5 = inlined_call_operand.vmem [shape: f32[36,1], index: 5, kind: input, shape index: {}]   ;;  %s15761_s6 = inlined_call_operand.vmem [shape: f32[2,4,7,224], index: 6, kind: output, shape index: {}]  }
   0x1 LB: > { %s7728_s22 = sadd.s32 4294967295, %s10650_s21   ;;  %p7732_p0 = scmp.ge.s32.totalorder %s10650_s21, 1  ;;  %s10650_s21 = sphi %s10689_s21, %s16_s21  }
   0x2   : > { %p212_p1 = scmp.lt.s32.totalorder %s10650_s21, 3 }
   0x4   : > { %p213_p2 = pnand %p7732_p0, %p212_p1 }
   0x6   : > { %216 = sbr.rel (%p213_p2) target bundleno = 1457 (0x5b1), region = 44 }
   0xd   : > { %v7742_v0 = vld [vmem:[%s15756_s1 + $0x88] sm:$0xff]  ;;  %v7744_v2 = vld [vmem:[%s15756_s1 + $0x98] sm:$0xff]  ;;  %p242_p3 = scmp.lt.s32.totalorder %s7728_s22, 1  ;;  %v7741_v5 = vld [vmem:[%s15756_s1 + $0x80] sm:$0xff]  ;;  %v10652_v7 = vmov 0.0   ;;  %vm303_vm0 = vcmask 261120  }
   0xe   : > { %v7746_v1 = vld [vmem:[%s15756_s1 + $0xa8] sm:$0xff]  ;;  %v7748_v4 = vld [vmem:[%s15756_s1 + $0xb8] sm:$0xff]  ;;  %v7745_v6 = vld [vmem:[%s15756_s1 + $0xa0] sm:$0xff]  ;;  %383 = vmatprep.mubr.f32.mxu0 %v10652_v7  ;;  %478 = vmatprep.mubr.f32.mxu1 %v10652_v7  ;;  %vm5479_vm1 = vcmask 1046528   ;;  %vm6224_vm2 = vcmask 1045504   ;;  %vm7633_vm3 = vcmask 784384  }
   0xf   : > { %v10706_v3 = vpack.c.bf16 %v7746_v1, %v7742_v0  ;;  %v10719_v8 = vpack.c.bf16 %v7748_v4, %v7744_v2  ;;  %v10721_v9 = vpack.c.bf16 %v7745_v6, %v7741_v5  ;;  %v7743_v10 = vld [vmem:[%s15756_s1 + $0x90] sm:$0xff]  ;;  %v7750_v12 = vld [vmem:[%s15756_s1 + $0xc8] sm:$0xff]  ;;  %s16703_s22 = smov (!%p242_p3, %s7728_s22), 1  ;;  %v7752_v15 = vld [vmem:[%s15756_s1 + $0xd8] sm:$0xff]  ;;  %vm7661_vm4 = vcmask 1044480  }
  0x10   : > { %v7747_v11 = vld [vmem:[%s15756_s1 + $0xb0] sm:$0xff]  ;;  %v7754_v14 = vld [vmem:[%s15756_s1 + $0xe8] sm:$0xff]  ;;  %v7756_v16 = vld [vmem:[%s15756_s1 + $0xf8] sm:$0xff]  ;;  %s10631_s7 = smul.u32 192, %s16703_s22  ;;  %s8550_s13 = sshll.u32 %s16703_s22, 6 }
  0x11   : > { %8552 = vmatprep.subr.bf16.mxu0 %v10706_v3  ;;  %v10735_v13 = vpack.c.bf16 %v7747_v11, %v7743_v10  ;;  %8560 = vmatprep.subr.bf16.mxu1 %v10719_v8  ;;  %v10748_v17 = vpack.c.bf16 %v7754_v14, %v7750_v12  ;;  %v10750_v18 = vpack.c.bf16 %v7756_v16, %v7752_v15  ;;  %v7749_v19 = vld [vmem:[%s15756_s1 + $0xc0] sm:$0xff]  ;;  %v7751_v21 = vld [vmem:[%s15756_s1 + $0xd0] sm:$0xff]  ;;  %v265_v24 = vld [vmem:[%s15756_s1 + $0x8] sm:$0xff]  ;;  %s15712_s17 = scalar_lea.vmem %s15761_s6, %s8550_s13 }
  0x12   : > { %8554 = vmatpush1.bf16.msra.mxu0 %v10721_v9  ;;  %v7753_v20 = vld [vmem:[%s15756_s1 + $0xe0] sm:$0xff]  ;;  %v7755_v23 = vld [vmem:[%s15756_s1 + $0xf0] sm:$0xff]  ;;  %v269_v25 = vld [vmem:[%s15756_s1 + $0x28] sm:$0xff]  ;;  %s10781_s16 = scalar_lea.vmem %s15755_s0, %s10631_s7 }
  0x13   : > { %8562 = vmatpush1.bf16.msra.mxu1 %v10735_v13  ;;  %v10763_v22 = vpack.c.bf16 %v7753_v20, %v7749_v19  ;;  %8556 = vmatprep.subr.bf16.mxu0 %v10748_v17  ;;  %v10776_v26 = vpack.c.bf16 %v7755_v23, %v7751_v21  ;;  %v10783_v27 = vpack.c.bf16 %v269_v25, %v265_v24  ;;  %v267_v28 = vld [vmem:[%s15756_s1 + $0x18] sm:$0xff]  ;;  %v264_v30 = vld [vmem:[%s15756_s1] sm:$0xff]  ;;  %v266_v33 = vld [vmem:[%s15756_s1 + $0x10] sm:$0xff] }
  0x14   : > { %8564 = vmatprep.subr.bf16.mxu1 %v10750_v18  ;;  %v271_v29 = vld [vmem:[%s15756_s1 + $0x38] sm:$0xff]  ;;  %v268_v32 = vld [vmem:[%s15756_s1 + $0x20] sm:$0xff]  ;;  %v10804_v34 = vld [vmem:[%s10781_s16 + $0x30] sm:$0xff] }
  0x15   : > { %v10794_v31 = vpack.c.bf16 %v271_v29, %v267_v28  ;;  %v10806_v35 = vpack.c.bf16 %v268_v32, %v264_v30  ;;  %v270_v36 = vld [vmem:[%s15756_s1 + $0x30] sm:$0xff]  ;;  %v273_v38 = vld [vmem:[%s15756_s1 + $0x48] sm:$0xff]  ;;  %v275_v40 = vld [vmem:[%s15756_s1 + $0x58] sm:$0xff] }
  0x16   : > { %8558 = vmatpush1.bf16.msra.mxu0 %v10763_v22  ;;  %v10813_v37 = vpack.c.bf16 %v270_v36, %v266_v33  ;;  %v277_v39 = vld [vmem:[%s15756_s1 + $0x68] sm:$0xff]  ;;  %v279_v42 = vld [vmem:[%s15756_s1 + $0x78] sm:$0xff]  ;;  %v272_v43 = vld [vmem:[%s15756_s1 + $0x40] sm:$0xff] }
  0x17   : > { %8566 = vmatpush1.bf16.msra.mxu1 %v10776_v26  ;;  %8568 = vmatprep.subr.bf16.mxu0 %v10783_v27  ;;  %v10825_v41 = vpack.c.bf16 %v277_v39, %v273_v38  ;;  %v276_v44 = vld [vmem:[%s15756_s1 + $0x60] sm:$0xff]  ;;  %v10838_v45 = vpack.c.bf16 %v279_v42, %v275_v40  ;;  %v274_v46 = vld [vmem:[%s15756_s1 + $0x50] sm:$0xff]  ;;  %v10850_v48 = vld [vmem:[%s10781_s16 + $0x38] sm:$0xff] }
  0x18   : > { %8576 = vmatprep.subr.bf16.mxu1 %v10794_v31  ;;  %v278_v47 = vld [vmem:[%s15756_s1 + $0x70] sm:$0xff]  ;;  %v7783_v49 = vld [vmem:[%s15756_s1 + $0x108] sm:$0xff]  ;;  %v10857_v50 = vpack.c.bf16 %v276_v44, %v272_v43  ;;  %v7785_v52 = vld [vmem:[%s15756_s1 + $0x118] sm:$0xff] }
  0x19   : > { %7757 = vmatmul.mubr.msk.f32.vlgmr.msra.gmra.mrb[0].mxu0 %vm303_vm0, %v10804_v34  ;;  %v7787_v51 = vld [vmem:[%s15756_s1 + $0x128] sm:$0xff]  ;;  %v7789_v53 = vld [vmem:[%s15756_s1 + $0x138] sm:$0xff]  ;;  %v10870_v54 = vpack.c.bf16 %v278_v47, %v274_v46  ;;  %v10883_v57 = vld [vmem:[%s10781_s16 + $0x40] sm:$0xff] }
  0x1a   : > { %7762 = vmatmul.mubr.msk.f32.vlgmr.msra.gmra.mrb[0].mxu1 %vm303_vm0, %v10804_v34  ;;  %8570 = vmatpush1.bf16.msra.mxu0 %v10806_v35  ;;  %v10872_v55 = vpack.c.bf16 %v7787_v51, %v7783_v49  ;;  %v10877_v56 = vpack.c.bf16 %v7789_v53, %v7785_v52  ;;  %v10896_v58 = vld [vmem:[%s10781_s16 + $0x48] sm:$0xff]  ;;  %v10905_v59 = vld [vmem:[%s10781_s16 + $0x50] sm:$0xf]  ;;  %v7782_v60 = vld [vmem:[%s15756_s1 + $0x100] sm:$0xff] }
  0x1b   : > { %8578 = vmatpush1.bf16.msra.mxu1 %v10813_v37  ;;  %389 = vmatprep.mubr.f32.mxu0 %v10652_v7  ;;  %v7786_v61 = vld [vmem:[%s15756_s1 + $0x120] sm:$0xff]  ;;  %v7784_v62 = vld [vmem:[%s15756_s1 + $0x110] sm:$0xff]  ;;  %v7791_v0 = vld [vmem:[%s15756_s1 + $0x148] sm:$0xff] }
  0x1c   : > { %484 = vmatprep.mubr.f32.mxu1 %v10652_v7  ;;  %8572 = vmatprep.subr.bf16.mxu0 %v10825_v41  ;;  %v7788_v63 = vld [vmem:[%s15756_s1 + $0x130] sm:$0xff]  ;;  %v7795_v1 = vld [vmem:[%s15756_s1 + $0x168] sm:$0xff]  ;;  %v259_v2 = vld [vmem:[%s10781_s16] sm:$0xff]  ;;  %v10932_v4 = vpack.c.bf16 %v7786_v61, %v7782_v60 }
  0x1d   : > { %7758 = vmatmul.mubr.msk.f32.gmra.mrb[2].mxu0 %vm303_vm0, %v10850_v48  ;;  %8580 = vmatprep.subr.bf16.mxu1 %v10838_v45  ;;  %v7793_v5 = vld [vmem:[%s15756_s1 + $0x158] sm:$0xff]  ;;  %v10941_v10 = vpack.c.bf16 %v7788_v63, %v7784_v62  ;;  %v10943_v11 = vpack.c.bf16 %v7795_v1, %v7791_v0  ;;  %v7790_v12 = vld [vmem:[%s15756_s1 + $0x140] sm:$0xff]  ;;  %v7792_v15 = vld [vmem:[%s15756_s1 + $0x150] sm:$0xff] }
  0x1e   : > { %7763 = vmatmul.mubr.msk.f32.gmra.mrb[2].mxu1 %vm303_vm0, %v10850_v48  ;;  %395 = vmatprep.mubr.f32.mxu0 %v10652_v7  ;;  %v7797_v6 = vld [vmem:[%s15756_s1 + $0x178] sm:$0xff]  ;;  %v7794_v14 = vld [vmem:[%s15756_s1 + $0x160] sm:$0xff]  ;;  %v7796_v19 = vld [vmem:[%s15756_s1 + $0x170] sm:$0xff] }
  0x1f   : > { %490 = vmatprep.mubr.f32.mxu1 %v10652_v7  ;;  %8574 = vmatpush1.bf16.msra.mxu0 %v10857_v50  ;;  %v10955_v16 = vpack.c.bf16 %v7797_v6, %v7793_v5  ;;  %v7814_v20 = vld [vmem:[%s15756_s1 + $0x188] sm:$0xff]  ;;  %v7816_v24 = vld [vmem:[%s15756_s1 + $0x198] sm:$0xff]  ;;  %v10977_v28 = vpack.c.bf16 %v7794_v14, %v7790_v12  ;;  %v10981_v29 = vpack.c.bf16 %v7796_v19, %v7792_v15  ;;  %v261_v33 = vld [vmem:[%s10781_s16 + $0x10] sm:$0xff] }
  0x20   : > { %8582 = vmatpush1.bf16.msra.mxu1 %v10870_v54  ;;  %8584 = vmatprep.subr.bf16.mxu0 %v10872_v55  ;;  %v7818_v21 = vld [vmem:[%s15756_s1 + $0x1a8] sm:$0xff]  ;;  %v7820_v25 = vld [vmem:[%s15756_s1 + $0x1b8] sm:$0xff]  ;;  %v263_v38 = vld [vmem:[%s10781_s16 + $0x20] sm:$0xf] }
  0x21   : > { %7759 = vmatmul.mubr.msk.f32.gmra.mrb[4].mxu0 %vm303_vm0, %v10883_v57  ;;  %8592 = vmatprep.subr.bf16.mxu1 %v10877_v56  ;;  %v260_v23 = vld [vmem:[%s10781_s16 + $0x8] sm:$0xff]  ;;  %v10983_v30 = vpack.c.bf16 %v7818_v21, %v7814_v20  ;;  %v10987_v32 = vpack.c.bf16 %v7820_v25, %v7816_v24  ;;  %v262_v36 = vld [vmem:[%s10781_s16 + $0x18] sm:$0xff]  ;;  %v7813_v39 = vld [vmem:[%s15756_s1 + $0x180] sm:$0xff] }
  0x22   : > { %7764 = vmatmul.mubr.msk.f32.gmra.mrb[4].mxu1 %vm303_vm0, %v10883_v57  ;;  %401 = vmatprep.mubr.f32.mxu0 %v10652_v7  ;;  %v7817_v40 = vld [vmem:[%s15756_s1 + $0x1a0] sm:$0xff]  ;;  %v7815_v42 = vld [vmem:[%s15756_s1 + $0x190] sm:$0xff]  ;;  %v7822_v44 = vld [vmem:[%s15756_s1 + $0x1c8] sm:$0xff] }
  0x23   : > { %496 = vmatprep.mubr.f32.mxu1 %v10652_v7  ;;  %v7819_v43 = vld [vmem:[%s15756_s1 + $0x1b0] sm:$0xff]  ;;  %v7826_v46 = vld [vmem:[%s15756_s1 + $0x1e8] sm:$0xff]  ;;  %v11029_v47 = vld [vmem:[%s10781_s16 + $0x60] sm:$0xff]  ;;  %v11031_v49 = vpack.c.bf16 %v7817_v40, %v7813_v39 }
  0x24   : > { %v7824_v51 = vld [vmem:[%s15756_s1 + $0x1d8] sm:$0xff]  ;;  %v11040_v53 = vpack.c.bf16 %v7819_v43, %v7815_v42  ;;  %v11042_v60 = vpack.c.bf16 %v7826_v46, %v7822_v44  ;;  %v7821_v61 = vld [vmem:[%s15756_s1 + $0x1c0] sm:$0xff]  ;;  %v7823_v63 = vld [vmem:[%s15756_s1 + $0x1d0] sm:$0xff] }
  0x25   : > { %7760 = vmatmul.mubr.msk.f32.gmra.mrb[6].mxu0 %vm303_vm0, %v10896_v58  ;;  %v7828_v52 = vld [vmem:[%s15756_s1 + $0x1f8] sm:$0xff]  ;;  %v7825_v62 = vld [vmem:[%s15756_s1 + $0x1e0] sm:$0xff]  ;;  %v7827_v1 = vld [vmem:[%s15756_s1 + $0x1f0] sm:$0xff] }
  0x26   : > { %7765 = vmatmul.mubr.msk.f32.gmra.mrb[6].mxu1 %vm303_vm0, %v10896_v58  ;;  %407 = vmatprep.mubr.f32.mxu0 %v10652_v7  ;;  %v11055_v0 = vpack.c.bf16 %v7828_v52, %v7824_v51  ;;  %v7844_v5 = vld [vmem:[%s15756_s1 + $0x228] sm:$0xff]  ;;  %v7842_v12 = vld [vmem:[%s15756_s1 + $0x218] sm:$0xff]  ;;  %v11080_v15 = vpack.c.bf16 %v7825_v62, %v7821_v61  ;;  %v11084_v19 = vpack.c.bf16 %v7827_v1, %v7823_v63  ;;  %v11119_v25 = vld [vmem:[%s10781_s16 + $0x80] sm:$0xf] }
  0x27   : > { %502 = vmatprep.mubr.f32.mxu1 %v10652_v7  ;;  %v11070_v6 = vld [vmem:[%s10781_s16 + $0x68] sm:$0xff]  ;;  %v7846_v14 = vld [vmem:[%s15756_s1 + $0x238] sm:$0xff]  ;;  %v7845_v39 = vld [vmem:[%s15756_s1 + $0x230] sm:$0xff] }
  0x28   : > { %v11091_v21 = vpack.c.bf16 %v7846_v14, %v7842_v12  ;;  %v11110_v24 = vld [vmem:[%s10781_s16 + $0x78] sm:$0xff]  ;;  %v7848_v40 = vld [vmem:[%s15756_s1 + $0x248] sm:$0xff]  ;;  %v11146_v43 = vld [vmem:[%s10781_s16 + $0x90] sm:$0xff] }
  0x29   : > { %7761 = vmatmul.mubr.msk.f32.gmra.mrb[8].mxu0 %vm303_vm0, %v10905_v59  ;;  %v7852_v42 = vld [vmem:[%s15756_s1 + $0x268] sm:$0xff]  ;;  %v7850_v46 = vld [vmem:[%s15756_s1 + $0x258] sm:$0xff]  ;;  %v7847_v62 = vld [vmem:[%s15756_s1 + $0x240] sm:$0xff] }
  0x2a   : > { %7766 = vmatmul.mubr.msk.f32.gmra.mrb[8].mxu1 %vm303_vm0, %v10905_v59  ;;  %588 = vmatprep.mubr.f32.mxu0 %v10652_v7  ;;  %v7854_v51 = vld [vmem:[%s15756_s1 + $0x278] sm:$0xff]  ;;  %v11159_v61 = vpack.c.bf16 %v7852_v42, %v7848_v40  ;;  %v7851_v63 = vld [vmem:[%s15756_s1 + $0x260] sm:$0xff]  ;;  %v11238_v42 = vld [vmem:[%s10781_s16 + $0x9] sm:$0xff] }
  0x2b   : > { %683 = vmatprep.mubr.f32.mxu1 %v10652_v7  ;;  %v11169_v1 = vpack.c.bf16 %v7854_v51, %v7850_v46  ;;  %v11181_v12 = vld [vmem:[%s10781_s16 + $0x98] sm:$0xff]  ;;  %v11185_v14 = vpack.c.bf16 %v7851_v63, %v7847_v62  ;;  %v11229_v40 = vld [vmem:[%s10781_s16 + $0x1] sm:$0xff] }
  0x2c   : > { %v11251_v46 = vld [vmem:[%s10781_s16 + $0x11] sm:$0xff]  ;;  %v11264_v51 = vld [vmem:[%s10781_s16 + $0x19] sm:$0xff]  ;;  %v11273_v62 = vld [vmem:[%s10781_s16 + $0x21] sm:$0xf] }
  0x2d   : > { %7767 = vmatmul.mubr.msk.f32.vlgmr.msra.gmra.mrb[0].mxu0 %vm303_vm0, %v259_v2  ;;  %v258_v63 = vld [vmem:[%s15760_s5 + $0x20] sm:$0xf] }
  0x2e   : > { %7772 = vmatmul.mubr.msk.f32.vlgmr.msra.gmra.mrb[0].mxu1 %vm303_vm0, %v259_v2  ;;  %8586 = vmatpush1.bf16.msra.mxu0 %v10932_v4  ;;  %v7840_v2 = vld [vmem:[%s15756_s1 + $0x208] sm:$0xff] }
  0x2f   : > { %8594 = vmatpush1.bf16.msra.mxu1 %v10941_v10  ;;  %594 = vmatprep.mubr.f32.mxu0 %v10652_v7  ;;  %v11086_v20 = vpack.c.bf16 %v7844_v5, %v7840_v2  ;;  %v7849_v2 = vld [vmem:[%s15756_s1 + $0x250] sm:$0xff] }
  0x30   : > { %689 = vmatprep.mubr.f32.mxu1 %v10652_v7  ;;  %8588 = vmatprep.subr.bf16.mxu0 %v10943_v11  ;;  %v7853_v5 = vld [vmem:[%s15756_s1 + $0x270] sm:$0xff] }
  0x31   : > { %7768 = vmatmul.mubr.msk.f32.gmra.mrb[2].mxu0 %vm303_vm0, %v260_v23  ;;  %8596 = vmatprep.subr.bf16.mxu1 %v10955_v16 }
  0x32   : > { %7773 = vmatmul.mubr.msk.f32.gmra.mrb[2].mxu1 %vm303_vm0, %v260_v23  ;;  %600 = vmatprep.mubr.f32.mxu0 %v10652_v7  ;;  %v11097_v23 = vld [vmem:[%s10781_s16 + $0x70] sm:$0xff] }
  0x33   : > { %695 = vmatprep.mubr.f32.mxu1 %v10652_v7  ;;  %8590 = vmatpush1.bf16.msra.mxu0 %v10977_v28 }
  0x34   : > { %8598 = vmatpush1.bf16.msra.mxu1 %v10981_v29  ;;  %8600 = vmatprep.subr.bf16.mxu0 %v10983_v30 }
  0x35   : > { %7769 = vmatmul.mubr.msk.f32.gmra.mrb[4].mxu0 %vm303_vm0, %v261_v33  ;;  %8608 = vmatprep.subr.bf16.mxu1 %v10987_v32 }
  0x36   : > { %7774 = vmatmul.mubr.msk.f32.gmra.mrb[4].mxu1 %vm303_vm0, %v261_v33  ;;  %606 = vmatprep.mubr.f32.mxu0 %v10652_v7  ;;  %v7839_v33 = vld [vmem:[%s15756_s1 + $0x200] sm:$0xff] }
  0x37   : > { %701 = vmatprep.mubr.f32.mxu1 %v10652_v7 }
  0x39   : > { %7770 = vmatmul.mubr.msk.f32.gmra.mrb[6].mxu0 %vm303_vm0, %v262_v36 }
  0x3a   : > { %7775 = vmatmul.mubr.msk.f32.gmra.mrb[6].mxu1 %vm303_vm0, %v262_v36  ;;  %612 = vmatprep.mubr.f32.mxu0 %v10652_v7  ;;  %v7843_v36 = vld [vmem:[%s15756_s1 + $0x220] sm:$0xff] }
  0x3b   : > { %707 = vmatprep.mubr.f32.mxu1 %v10652_v7  ;;  %v11148_v44 = vpack.c.bf16 %v7843_v36, %v7839_v33  ;;  %v11189_v33 = vpack.c.bf16 %v7853_v5, %v7849_v2  ;;  %v11198_v36 = vld [vmem:[%s10781_s16 + $0xa0] sm:$0xff]  ;;  %v11449_v2 = vld [vmem:[%s10781_s16 + $0x31] sm:$0xff] }
  0x3c   : > { %v11458_v5 = vld [vmem:[%s10781_s16 + $0x39] sm:$0xff] }
  0x3d   : > { %7771 = vmatmul.mubr.msk.f32.gmra.mrb[8].mxu0 %vm303_vm0, %v263_v38 }
  0x3e   : > { %7776 = vmatmul.mubr.msk.f32.gmra.mrb[8].mxu1 %vm303_vm0, %v263_v38  ;;  %816 = vmatprep.mubr.f32.mxu0 %v10652_v7  ;;  %v7841_v38 = vld [vmem:[%s15756_s1 + $0x210] sm:$0xff] }
  0x3f   : > { %911 = vmatprep.mubr.f32.mxu1 %v10652_v7  ;;  %v11157_v52 = vpack.c.bf16 %v7845_v39, %v7841_v38  ;;  %v11211_v38 = vld [vmem:[%s10781_s16 + $0xa8] sm:$0xff]  ;;  %v11220_v39 = vld [vmem:[%s10781_s16 + $0xb0] sm:$0xf] }
  0x41   : > { %7798 = vmatmul.mubr.msk.f32.vlgmr.msra.gmra.mrb[0].mxu0 %vm303_vm0, %v11029_v47 }
  0x42   : > { %7803 = vmatmul.mubr.msk.f32.vlgmr.msra.gmra.mrb[0].mxu1 %vm303_vm0, %v11029_v47  ;;  %8602 = vmatpush1.bf16.msra.mxu0 %v11031_v49 }
  0x43   : > { %8610 = vmatpush1.bf16.msra.mxu1 %v11040_v53  ;;  %822 = vmatprep.mubr.f32.mxu0 %v10652_v7 }
  0x44   : > { %917 = vmatprep.mubr.f32.mxu1 %v10652_v7  ;;  %8604 = vmatprep.subr.bf16.mxu0 %v11042_v60 }
  0x45   : > { %7799 = vmatmul.mubr.msk.f32.gmra.mrb[2].mxu0 %vm303_vm0, %v11070_v6  ;;  %8612 = vmatprep.subr.bf16.mxu1 %v11055_v0 }
  0x46   : > { %7804 = vmatmul.mubr.msk.f32.gmra.mrb[2].mxu1 %vm303_vm0, %v11070_v6  ;;  %828 = vmatprep.mubr.f32.mxu0 %v10652_v7 }
  0x47   : > { %923 = vmatprep.mubr.f32.mxu1 %v10652_v7  ;;  %8606 = vmatpush1.bf16.msra.mxu0 %v11080_v15 }
  0x48   : > { %8614 = vmatpush1.bf16.msra.mxu1 %v11084_v19  ;;  %8616 = vmatprep.subr.bf16.mxu0 %v11086_v20 }
  0x49   : > { %7800 = vmatmul.mubr.msk.f32.gmra.mrb[4].mxu0 %vm303_vm0, %v11097_v23  ;;  %8624 = vmatprep.subr.bf16.mxu1 %v11091_v21 }
  0x4a   : > { %7805 = vmatmul.mubr.msk.f32.gmra.mrb[4].mxu1 %vm303_vm0, %v11097_v23  ;;  %834 = vmatprep.mubr.f32.mxu0 %v10652_v7 }
  0x4b   : > { %929 = vmatprep.mubr.f32.mxu1 %v10652_v7 }
  0x4d   : > { %7801 = vmatmul.mubr.msk.f32.gmra.mrb[6].mxu0 %vm303_vm0, %v11110_v24 }
  0x4e   : > { %7806 = vmatmul.mubr.msk.f32.gmra.mrb[6].mxu1 %vm303_vm0, %v11110_v24  ;;  %840 = vmatprep.mubr.f32.mxu0 %v10652_v7 }
  0x4f   : > { %935 = vmatprep.mubr.f32.mxu1 %v10652_v7 }
  0x51   : > { %7802 = vmatmul.mubr.msk.f32.gmra.mrb[8].mxu0 %vm303_vm0, %v11119_v25 }
  0x52   : > { %7807 = vmatmul.mubr.msk.f32.gmra.mrb[8].mxu1 %vm303_vm0, %v11119_v25  ;;  %1064 = vmatprep.mubr.f32.mxu0 %v10652_v7 }
  0x53   : > { %1159 = vmatprep.mubr.f32.mxu1 %v10652_v7 }
  0x55   : > { %7829 = vmatmul.mubr.msk.f32.vlgmr.msra.gmra.mrb[0].mxu0 %vm303_vm0, %v11146_v43 }
  0x56   : > { %7834 = vmatmul.mubr.msk.f32.vlgmr.msra.gmra.mrb[0].mxu1 %vm303_vm0, %v11146_v43  ;;  %8618 = vmatpush1.bf16.msra.mxu0 %v11148_v44 }
  0x57   : > { %8626 = vmatpush1.bf16.msra.mxu1 %v11157_v52  ;;  %1070 = vmatprep.mubr.f32.mxu0 %v10652_v7 }
  0x58   : > { %1165 = vmatprep.mubr.f32.mxu1 %v10652_v7  ;;  %8620 = vmatprep.subr.bf16.mxu0 %v11159_v61 }
  0x59   : > { %7830 = vmatmul.mubr.msk.f32.gmra.mrb[2].mxu0 %vm303_vm0, %v11181_v12  ;;  %8628 = vmatprep.subr.bf16.mxu1 %v11169_v1 }
  0x5a   : > { %7835 = vmatmul.mubr.msk.f32.gmra.mrb[2].mxu1 %vm303_vm0, %v11181_v12  ;;  %1076 = vmatprep.mubr.f32.mxu0 %v10652_v7 }
  0x5b   : > { %1171 = vmatprep.mubr.f32.mxu1 %v10652_v7  ;;  %8622 = vmatpush1.bf16.msra.mxu0 %v11185_v14 }
  0x5c   : > { %8630 = vmatpush1.bf16.msra.mxu1 %v11189_v33  ;;  %8632 = vmatprep.subr.bf16.mxu0 %v10706_v3 }
  0x5d   : > { %7831 = vmatmul.mubr.msk.f32.gmra.mrb[4].mxu0 %vm303_vm0, %v11198_v36  ;;  %8640 = vmatprep.subr.bf16.mxu1 %v10719_v8 }
  0x5e   : > { %7836 = vmatmul.mubr.msk.f32.gmra.mrb[4].mxu1 %vm303_vm0, %v11198_v36  ;;  %1082 = vmatprep.mubr.f32.mxu0 %v10652_v7 }
  0x5f   : > { %1177 = vmatprep.mubr.f32.mxu1 %v10652_v7 }
  0x61   : > { %7832 = vmatmul.mubr.msk.f32.gmra.mrb[6].mxu0 %vm303_vm0, %v11211_v38 }
  0x62   : > { %7837 = vmatmul.mubr.msk.f32.gmra.mrb[6].mxu1 %vm303_vm0, %v11211_v38  ;;  %1088 = vmatprep.mubr.f32.mxu0 %v10652_v7 }
  0x63   : > { %1183 = vmatprep.mubr.f32.mxu1 %v10652_v7 }
  0x65   : > { %7833 = vmatmul.mubr.msk.f32.gmra.mrb[8].mxu0 %vm303_vm0, %v11220_v39 }
  0x66   : > { %7838 = vmatmul.mubr.msk.f32.gmra.mrb[8].mxu1 %vm303_vm0, %v11220_v39  ;;  %1311 = vmatprep.mubr.f32.mxu0 %v10652_v7 }
  0x67   : > { %1406 = vmatprep.mubr.f32.mxu1 %v10652_v7 }
  0x69   : > { %7855 = vmatmul.mubr.msk.f32.vlgmr.msra.gmra.mrb[0].mxu0 %vm303_vm0, %v11229_v40 }
  0x6a   : > { %7860 = vmatmul.mubr.msk.f32.vlgmr.msra.gmra.mrb[0].mxu1 %vm303_vm0, %v11229_v40  ;;  %8634 = vmatpush1.bf16.msra.mxu0 %v10721_v9 }
  0x6b   : > { %8642 = vmatpush1.bf16.msra.mxu1 %v10735_v13  ;;  %1317 = vmatprep.mubr.f32.mxu0 %v10652_v7 }
  0x6c   : > { %1412 = vmatprep.mubr.f32.mxu1 %v10652_v7  ;;  %8636 = vmatprep.subr.bf16.mxu0 %v10748_v17 }
  0x6d   : > { %7856 = vmatmul.mubr.msk.f32.gmra.mrb[2].mxu0 %vm303_vm0, %v11238_v42  ;;  %8644 = vmatprep.subr.bf16.mxu1 %v10750_v18 }
  0x6e   : > { %7861 = vmatmul.mubr.msk.f32.gmra.mrb[2].mxu1 %vm303_vm0, %v11238_v42  ;;  %1323 = vmatprep.mubr.f32.mxu0 %v10652_v7 }
  0x6f   : > { %1418 = vmatprep.mubr.f32.mxu1 %v10652_v7  ;;  %8638 = vmatpush1.bf16.msra.mxu0 %v10763_v22 }
  0x70   : > { %8646 = vmatpush1.bf16.msra.mxu1 %v10776_v26  ;;  %8648 = vmatprep.subr.bf16.mxu0 %v10783_v27 }
  0x71   : > { %7857 = vmatmul.mubr.msk.f32.gmra.mrb[4].mxu0 %vm303_vm0, %v11251_v46  ;;  %8656 = vmatprep.subr.bf16.mxu1 %v10794_v31 }
  0x72   : > { %7862 = vmatmul.mubr.msk.f32.gmra.mrb[4].mxu1 %vm303_vm0, %v11251_v46  ;;  %1329 = vmatprep.mubr.f32.mxu0 %v10652_v7 }
  0x73   : > { %1424 = vmatprep.mubr.f32.mxu1 %v10652_v7 }
  0x75   : > { %7858 = vmatmul.mubr.msk.f32.gmra.mrb[6].mxu0 %vm303_vm0, %v11264_v51 }
  0x76   : > { %7863 = vmatmul.mubr.msk.f32.gmra.mrb[6].mxu1 %vm303_vm0, %v11264_v51  ;;  %1335 = vmatprep.mubr.f32.mxu0 %v10652_v7 }
  0x77   : > { %1430 = vmatprep.mubr.f32.mxu1 %v10652_v7 }
  0x79   : > { %7859 = vmatmul.mubr.msk.f32.gmra.mrb[8].mxu0 %vm303_vm0, %v11273_v62 }
  0x7a   : > { %7864 = vmatmul.mubr.msk.f32.gmra.mrb[8].mxu1 %vm303_vm0, %v11273_v62  ;;  %1521 = vmatprep.mubr.f32.mxu0 %v10652_v7 }
  0x7b   : > { %1616 = vmatprep.mubr.f32.mxu1 %v10652_v7 }
  0x7d   : > { %7865 = vmatmul.mubr.msk.f32.vlgmr.msra.gmra.mrb[10].mxu0 %vm303_vm0, %v11029_v47 }
  0x7e   : > { %7870 = vmatmul.mubr.msk.f32.vlgmr.msra.gmra.mrb[10].mxu1 %vm303_vm0, %v11029_v47  ;;  %8650 = vmatpush1.bf16.msra.mxu0 %v10806_v35 }
  0x7f   : > { %8658 = vmatpush1.bf16.msra.mxu1 %v10813_v37  ;;  %1527 = vmatprep.mubr.f32.mxu0 %v10652_v7 }
  0x80   : > { %1622 = vmatprep.mubr.f32.mxu1 %v10652_v7  ;;  %8652 = vmatprep.subr.bf16.mxu0 %v10825_v41 }
  0x81   : > { %7866 = vmatmul.mubr.msk.f32.gmra.mrb[12].mxu0 %vm303_vm0, %v11070_v6  ;;  %8660 = vmatprep.subr.bf16.mxu1 %v10838_v45 }
  0x82   : > { %7871 = vmatmul.mubr.msk.f32.gmra.mrb[12].mxu1 %vm303_vm0, %v11070_v6  ;;  %1533 = vmatprep.mubr.f32.mxu0 %v10652_v7 }
  0x83   : > { %1628 = vmatprep.mubr.f32.mxu1 %v10652_v7  ;;  %8654 = vmatpush1.bf16.msra.mxu0 %v10857_v50 }
  0x84   : > { %8662 = vmatpush1.bf16.msra.mxu1 %v10870_v54  ;;  %8664 = vmatprep.subr.bf16.mxu0 %v10872_v55 }
  0x85   : > { %7867 = vmatmul.mubr.msk.f32.gmra.mrb[14].mxu0 %vm303_vm0, %v11097_v23  ;;  %8672 = vmatprep.subr.bf16.mxu1 %v10877_v56 }
  0x86   : > { %7872 = vmatmul.mubr.msk.f32.gmra.mrb[14].mxu1 %vm303_vm0, %v11097_v23  ;;  %1539 = vmatprep.mubr.f32.mxu0 %v10652_v7 }
  0x87   : > { %1634 = vmatprep.mubr.f32.mxu1 %v10652_v7 }
  0x89   : > { %7868 = vmatmul.mubr.msk.f32.gmra.mrb[16].mxu0 %vm303_vm0, %v11110_v24 }
  0x8a   : > { %7873 = vmatmul.mubr.msk.f32.gmra.mrb[16].mxu1 %vm303_vm0, %v11110_v24  ;;  %1545 = vmatprep.mubr.f32.mxu0 %v10652_v7 }
  0x8b   : > { %1640 = vmatprep.mubr.f32.mxu1 %v10652_v7 }
  0x8d   : > { %7869 = vmatmul.mubr.msk.f32.gmra.mrb[18].mxu0 %vm303_vm0, %v11119_v25 }
  0x8e   : > { %7874 = vmatmul.mubr.msk.f32.gmra.mrb[18].mxu1 %vm303_vm0, %v11119_v25  ;;  %1711 = vmatprep.mubr.f32.mxu0 %v10652_v7 }
  0x8f   : > { %1806 = vmatprep.mubr.f32.mxu1 %v10652_v7 }
  0x91   : > { %7875 = vmatmul.mubr.msk.f32.vlgmr.msra.gmra.mrb[10].mxu0 %vm303_vm0, %v10804_v34 }
  0x92   : > { %7880 = vmatmul.mubr.msk.f32.vlgmr.msra.gmra.mrb[10].mxu1 %vm303_vm0, %v10804_v34  ;;  %8666 = vmatpush1.bf16.msra.mxu0 %v10932_v4  ;;  %v254_v34 = vld [vmem:[%s15760_s5] sm:$0xff] }
  0x93   : > { %8674 = vmatpush1.bf16.msra.mxu1 %v10941_v10  ;;  %1717 = vmatprep.mubr.f32.mxu0 %v10652_v7 }
  0x94   : > { %1812 = vmatprep.mubr.f32.mxu1 %v10652_v7  ;;  %8668 = vmatprep.subr.bf16.mxu0 %v10943_v11 }
  0x95   : > { %7876 = vmatmul.mubr.msk.f32.gmra.mrb[12].mxu0 %vm303_vm0, %v10850_v48  ;;  %8676 = vmatprep.subr.bf16.mxu1 %v10955_v16 }
  0x96   : > { %7881 = vmatmul.mubr.msk.f32.gmra.mrb[12].mxu1 %vm303_vm0, %v10850_v48  ;;  %1723 = vmatprep.mubr.f32.mxu0 %v10652_v7  ;;  %v10653_v48 = vmov 0  }
  0x97   : > { %1818 = vmatprep.mubr.f32.mxu1 %v10652_v7  ;;  %8670 = vmatpush1.bf16.msra.mxu0 %v10977_v28 }
  0x98   : > { %8678 = vmatpush1.bf16.msra.mxu1 %v10981_v29  ;;  %8680 = vmatprep.subr.bf16.mxu0 %v10983_v30 }
  0x99   : > { %7877 = vmatmul.mubr.msk.f32.gmra.mrb[14].mxu0 %vm303_vm0, %v10883_v57  ;;  %8688 = vmatprep.subr.bf16.mxu1 %v10987_v32 }
  0x9a   : > { %7882 = vmatmul.mubr.msk.f32.gmra.mrb[14].mxu1 %vm303_vm0, %v10883_v57  ;;  %1729 = vmatprep.mubr.f32.mxu0 %v10652_v7  ;;  %v256_v57 = vld [vmem:[%s15760_s5 + $0x10] sm:$0xff] }
  0x9b   : > { %1824 = vmatprep.mubr.f32.mxu1 %v10652_v7  ;;  %10642 = vset.pattern.permute.xlu0 %v10653_v48 }
  0x9c   : > { %2550 = vperm.xlu0 %10642, %v254_v34   ;;  %10643 = vset.pattern.permute.xlu1 %v10653_v48  ;;  %v11471_v34 = vld [vmem:[%s10781_s16 + $0x41] sm:$0xff]  ;;  %v11484_v48 = vld [vmem:[%s10781_s16 + $0x49] sm:$0xff] }
  0x9d   : > { %7878 = vmatmul.mubr.msk.f32.gmra.mrb[16].mxu0 %vm303_vm0, %v10896_v58  ;;  %2560 = vperm.xlu1 %10643, %v256_v57   ;;  %v11493_v57 = vld [vmem:[%s10781_s16 + $0x51] sm:$0xf] }
  0x9e   : > { %7883 = vmatmul.mubr.msk.f32.gmra.mrb[16].mxu1 %vm303_vm0, %v10896_v58  ;;  %1735 = vmatprep.mubr.f32.mxu0 %v10652_v7  ;;  %v255_v58 = vld [vmem:[%s15760_s5 + $0x8] sm:$0xff] }
  0x9f   : > { %1830 = vmatprep.mubr.f32.mxu1 %v10652_v7 }
  0xa0   : > { %2555 = vperm.xlu0 %10642, %v255_v58  }
  0xa1   : > { %7879 = vmatmul.mubr.msk.f32.gmra.mrb[18].mxu0 %vm303_vm0, %v10905_v59 }
  0xa2   : > { %7884 = vmatmul.mubr.msk.f32.gmra.mrb[18].mxu1 %vm303_vm0, %v10905_v59  ;;  %1901 = vmatprep.mubr.f32.mxu0 %v10652_v7  ;;  %v257_v59 = vld [vmem:[%s15760_s5 + $0x18] sm:$0xff] }
  0xa3   : > { %1996 = vmatprep.mubr.f32.mxu1 %v10652_v7  ;;  %2565 = vperm.xlu1 %10643, %v257_v59  }
  0xa4   : > { %2570 = vperm.xlu0 %10642, %v258_v63  }
  0xa5   : > { %7885 = vmatmul.mubr.msk.f32.vlgmr.msra.gmra.mrb[10].mxu0 %vm303_vm0, %v11146_v43 }
  0xa6   : > { %7890 = vmatmul.mubr.msk.f32.vlgmr.msra.gmra.mrb[10].mxu1 %vm303_vm0, %v11146_v43  ;;  %8682 = vmatpush1.bf16.msra.mxu0 %v11031_v49 }
  0xa7   : > { %8690 = vmatpush1.bf16.msra.mxu1 %v11040_v53  ;;  %1907 = vmatprep.mubr.f32.mxu0 %v10652_v7 }
  0xa8   : > { %2002 = vmatprep.mubr.f32.mxu1 %v10652_v7  ;;  %8684 = vmatprep.subr.bf16.mxu0 %v11042_v60 }
  0xa9   : > { %7886 = vmatmul.mubr.msk.f32.gmra.mrb[12].mxu0 %vm303_vm0, %v11181_v12  ;;  %8692 = vmatprep.subr.bf16.mxu1 %v11055_v0 }
  0xaa   : > { %7891 = vmatmul.mubr.msk.f32.gmra.mrb[12].mxu1 %vm303_vm0, %v11181_v12  ;;  %1913 = vmatprep.mubr.f32.mxu0 %v10652_v7 }
  0xab   : > { %2008 = vmatprep.mubr.f32.mxu1 %v10652_v7  ;;  %8686 = vmatpush1.bf16.msra.mxu0 %v11080_v15 }
  0xac   : > { %8694 = vmatpush1.bf16.msra.mxu1 %v11084_v19  ;;  %8696 = vmatprep.subr.bf16.mxu0 %v11086_v20 }
  0xad   : > { %7887 = vmatmul.mubr.msk.f32.gmra.mrb[14].mxu0 %vm303_vm0, %v11198_v36  ;;  %8704 = vmatprep.subr.bf16.mxu1 %v11091_v21 }
  0xae   : > { %7892 = vmatmul.mubr.msk.f32.gmra.mrb[14].mxu1 %vm303_vm0, %v11198_v36  ;;  %1919 = vmatprep.mubr.f32.mxu0 %v10652_v7 }
  0xaf   : > { %2014 = vmatprep.mubr.f32.mxu1 %v10652_v7 }
  0xb1   : > { %7888 = vmatmul.mubr.msk.f32.gmra.mrb[16].mxu0 %vm303_vm0, %v11211_v38 }
  0xb2   : > { %7893 = vmatmul.mubr.msk.f32.gmra.mrb[16].mxu1 %vm303_vm0, %v11211_v38  ;;  %1925 = vmatprep.mubr.f32.mxu0 %v10652_v7 }
  0xb3   : > { %2020 = vmatprep.mubr.f32.mxu1 %v10652_v7 }
  0xb5   : > { %7889 = vmatmul.mubr.msk.f32.gmra.mrb[18].mxu0 %vm303_vm0, %v11220_v39 }
  0xb6   : > { %7894 = vmatmul.mubr.msk.f32.gmra.mrb[18].mxu1 %vm303_vm0, %v11220_v39  ;;  %2111 = vmatprep.mubr.f32.mxu0 %v10652_v7 }
  0xb7   : > { %2206 = vmatprep.mubr.f32.mxu1 %v10652_v7 }
  0xb9   : > { %7895 = vmatmul.mubr.msk.f32.vlgmr.msra.gmra.mrb[10].mxu0 %vm303_vm0, %v11229_v40 }
  0xba   : > { %7900 = vmatmul.mubr.msk.f32.vlgmr.msra.gmra.mrb[10].mxu1 %vm303_vm0, %v11229_v40  ;;  %8698 = vmatpush1.bf16.msra.mxu0 %v11148_v44 }
  0xbb   : > { %8706 = vmatpush1.bf16.msra.mxu1 %v11157_v52  ;;  %2117 = vmatprep.mubr.f32.mxu0 %v10652_v7 }
  0xbc   : > { %2212 = vmatprep.mubr.f32.mxu1 %v10652_v7  ;;  %8700 = vmatprep.subr.bf16.mxu0 %v11159_v61 }
  0xbd   : > { %7896 = vmatmul.mubr.msk.f32.gmra.mrb[12].mxu0 %vm303_vm0, %v11238_v42  ;;  %8708 = vmatprep.subr.bf16.mxu1 %v11169_v1 }
  0xbe   : > { %7901 = vmatmul.mubr.msk.f32.gmra.mrb[12].mxu1 %vm303_vm0, %v11238_v42  ;;  %2123 = vmatprep.mubr.f32.mxu0 %v10652_v7 }
  0xbf   : > { %2218 = vmatprep.mubr.f32.mxu1 %v10652_v7  ;;  %8702 = vmatpush1.bf16.msra.mxu0 %v11185_v14 }
  0xc0   : > { %8710 = vmatpush1.bf16.msra.mxu1 %v11189_v33  ;;  %8712 = vmatprep.subr.bf16.mxu0 %v10706_v3 }
  0xc1   : > { %7897 = vmatmul.mubr.msk.f32.gmra.mrb[14].mxu0 %vm303_vm0, %v11251_v46  ;;  %8720 = vmatprep.subr.bf16.mxu1 %v10719_v8 }
  0xc2   : > { %7902 = vmatmul.mubr.msk.f32.gmra.mrb[14].mxu1 %vm303_vm0, %v11251_v46  ;;  %2129 = vmatprep.mubr.f32.mxu0 %v10652_v7 }
  0xc3   : > { %2224 = vmatprep.mubr.f32.mxu1 %v10652_v7 }
  0xc5   : > { %7898 = vmatmul.mubr.msk.f32.gmra.mrb[16].mxu0 %vm303_vm0, %v11264_v51 }
  0xc6   : > { %7903 = vmatmul.mubr.msk.f32.gmra.mrb[16].mxu1 %vm303_vm0, %v11264_v51  ;;  %2135 = vmatprep.mubr.f32.mxu0 %v10652_v7 }
  0xc7   : > { %2230 = vmatprep.mubr.f32.mxu1 %v10652_v7 }
  0xc9   : > { %7899 = vmatmul.mubr.msk.f32.gmra.mrb[18].mxu0 %vm303_vm0, %v11273_v62 }
  0xca   : > { %7904 = vmatmul.mubr.msk.f32.gmra.mrb[18].mxu1 %vm303_vm0, %v11273_v62  ;;  %2341 = vmatprep.mubr.f32.mxu0 %v10652_v7 }
  0xcb   : > { %2436 = vmatprep.mubr.f32.mxu1 %v10652_v7 }
  0xcd   : > { %7910 = vmatmul.mubr.msk.f32.vlgmr.msra.gmra.mrb[10].mxu0 %vm303_vm0, %v11449_v2 }
  0xce   : > { %7915 = vmatmul.mubr.msk.f32.vlgmr.msra.gmra.mrb[10].mxu1 %vm303_vm0, %v11449_v2  ;;  %8714 = vmatpush1.bf16.msra.mxu0 %v10721_v9 }
  0xcf   : > { %8722 = vmatpush1.bf16.msra.mxu1 %v10735_v13  ;;  %2347 = vmatprep.mubr.f32.mxu0 %v10652_v7 }
  0xd0   : > { %2442 = vmatprep.mubr.f32.mxu1 %v10652_v7  ;;  %8716 = vmatprep.subr.bf16.mxu0 %v10748_v17 }
  0xd1   : > { %7911 = vmatmul.mubr.msk.f32.gmra.mrb[12].mxu0 %vm303_vm0, %v11458_v5  ;;  %8724 = vmatprep.subr.bf16.mxu1 %v10750_v18 }
  0xd2   : > { %7916 = vmatmul.mubr.msk.f32.gmra.mrb[12].mxu1 %vm303_vm0, %v11458_v5  ;;  %2353 = vmatprep.mubr.f32.mxu0 %v10652_v7 }
  0xd3   : > { %2448 = vmatprep.mubr.f32.mxu1 %v10652_v7  ;;  %8718 = vmatpush1.bf16.msra.mxu0 %v10763_v22 }
  0xd4   : > { %8726 = vmatpush1.bf16.msra.mxu1 %v10776_v26  ;;  %8728 = vmatprep.subr.bf16.mxu0 %v10783_v27 }
  0xd5   : > { %7912 = vmatmul.mubr.msk.f32.gmra.mrb[14].mxu0 %vm303_vm0, %v11471_v34  ;;  %8736 = vmatprep.subr.bf16.mxu1 %v10794_v31 }
  0xd6   : > { %7917 = vmatmul.mubr.msk.f32.gmra.mrb[14].mxu1 %vm303_vm0, %v11471_v34  ;;  %2359 = vmatprep.mubr.f32.mxu0 %v10652_v7 }
  0xd7   : > { %2454 = vmatprep.mubr.f32.mxu1 %v10652_v7 }
  0xd9   : > { %7913 = vmatmul.mubr.msk.f32.gmra.mrb[16].mxu0 %vm303_vm0, %v11484_v48 }
  0xda   : > { %7918 = vmatmul.mubr.msk.f32.gmra.mrb[16].mxu1 %vm303_vm0, %v11484_v48  ;;  %2365 = vmatprep.mubr.f32.mxu0 %v10652_v7 }
  0xdb   : > { %2460 = vmatprep.mubr.f32.mxu1 %v10652_v7 }
  0xdd   : > { %7914 = vmatmul.mubr.msk.f32.gmra.mrb[18].mxu0 %vm303_vm0, %v11493_v57 }
  0xde   : > { %7919 = vmatmul.mubr.msk.f32.gmra.mrb[18].mxu1 %vm303_vm0, %v11493_v57  ;;  %2647 = vmatprep.mubr.f32.mxu0 %v10652_v7 }
  0xdf   : > { %2742 = vmatprep.mubr.f32.mxu1 %v10652_v7 }
  0xe1   : > { %7920 = vmatmul.mubr.msk.f32.vlgmr.msra.gmra.mrb[20].mxu0 %vm303_vm0, %v11146_v43 }
  0xe2   : > { %7925 = vmatmul.mubr.msk.f32.vlgmr.msra.gmra.mrb[20].mxu1 %vm303_vm0, %v11146_v43  ;;  %8730 = vmatpush1.bf16.msra.mxu0 %v10806_v35 }
  0xe3   : > { %8738 = vmatpush1.bf16.msra.mxu1 %v10813_v37  ;;  %2653 = vmatprep.mubr.f32.mxu0 %v10652_v7 }
  0xe4   : > { %2748 = vmatprep.mubr.f32.mxu1 %v10652_v7  ;;  %8732 = vmatprep.subr.bf16.mxu0 %v10825_v41 }
  0xe5   : > { %7921 = vmatmul.mubr.msk.f32.gmra.mrb[22].mxu0 %vm303_vm0, %v11181_v12  ;;  %8740 = vmatprep.subr.bf16.mxu1 %v10838_v45 }
  0xe6   : > { %7926 = vmatmul.mubr.msk.f32.gmra.mrb[22].mxu1 %vm303_vm0, %v11181_v12  ;;  %2659 = vmatprep.mubr.f32.mxu0 %v10652_v7 }
  0xe7   : > { %2754 = vmatprep.mubr.f32.mxu1 %v10652_v7  ;;  %8734 = vmatpush1.bf16.msra.mxu0 %v10857_v50 }
  0xe8   : > { %8742 = vmatpush1.bf16.msra.mxu1 %v10870_v54  ;;  %8744 = vmatprep.subr.bf16.mxu0 %v10872_v55 }
  0xe9   : > { %7922 = vmatmul.mubr.msk.f32.gmra.mrb[24].mxu0 %vm303_vm0, %v11198_v36  ;;  %8752 = vmatprep.subr.bf16.mxu1 %v10877_v56 }
  0xea   : > { %7927 = vmatmul.mubr.msk.f32.gmra.mrb[24].mxu1 %vm303_vm0, %v11198_v36  ;;  %2665 = vmatprep.mubr.f32.mxu0 %v10652_v7 }
  0xeb   : > { %2760 = vmatprep.mubr.f32.mxu1 %v10652_v7 }
  0xed   : > { %7923 = vmatmul.mubr.msk.f32.gmra.mrb[26].mxu0 %vm303_vm0, %v11211_v38 }
  0xee   : > { %7928 = vmatmul.mubr.msk.f32.gmra.mrb[26].mxu1 %vm303_vm0, %v11211_v38  ;;  %2671 = vmatprep.mubr.f32.mxu0 %v10652_v7 }
  0xef   : > { %2766 = vmatprep.mubr.f32.mxu1 %v10652_v7 }
  0xf1   : > { %7924 = vmatmul.mubr.msk.f32.gmra.mrb[28].mxu0 %vm303_vm0, %v11220_v39 }
  0xf2   : > { %7929 = vmatmul.mubr.msk.f32.gmra.mrb[28].mxu1 %vm303_vm0, %v11220_v39  ;;  %2837 = vmatprep.mubr.f32.mxu0 %v10652_v7 }
  0xf3   : > { %2932 = vmatprep.mubr.f32.mxu1 %v10652_v7 }
  0xf5   : > { %7930 = vmatmul.mubr.msk.f32.vlgmr.msra.gmra.mrb[20].mxu0 %vm303_vm0, %v11029_v47 }
  0xf6   : > { %7935 = vmatmul.mubr.msk.f32.vlgmr.msra.gmra.mrb[20].mxu1 %vm303_vm0, %v11029_v47  ;;  %8746 = vmatpush1.bf16.msra.mxu0 %v10932_v4 }
  0xf7   : > { %8754 = vmatpush1.bf16.msra.mxu1 %v10941_v10  ;;  %2843 = vmatprep.mubr.f32.mxu0 %v10652_v7 }
  0xf8   : > { %2938 = vmatprep.mubr.f32.mxu1 %v10652_v7  ;;  %8748 = vmatprep.subr.bf16.mxu0 %v10943_v11 }
  0xf9   : > { %7931 = vmatmul.mubr.msk.f32.gmra.mrb[22].mxu0 %vm303_vm0, %v11070_v6  ;;  %8756 = vmatprep.subr.bf16.mxu1 %v10955_v16 }
  0xfa   : > { %7936 = vmatmul.mubr.msk.f32.gmra.mrb[22].mxu1 %vm303_vm0, %v11070_v6  ;;  %2849 = vmatprep.mubr.f32.mxu0 %v10652_v7 }
  0xfb   : > { %2944 = vmatprep.mubr.f32.mxu1 %v10652_v7  ;;  %8750 = vmatpush1.bf16.msra.mxu0 %v10977_v28 }
  0xfc   : > { %8758 = vmatpush1.bf16.msra.mxu1 %v10981_v29  ;;  %8760 = vmatprep.subr.bf16.mxu0 %v10983_v30 }
  0xfd   : > { %7932 = vmatmul.mubr.msk.f32.gmra.mrb[24].mxu0 %vm303_vm0, %v11097_v23  ;;  %8768 = vmatprep.subr.bf16.mxu1 %v10987_v32 }
  0xfe   : > { %7937 = vmatmul.mubr.msk.f32.gmra.mrb[24].mxu1 %vm303_vm0, %v11097_v23  ;;  %2855 = vmatprep.mubr.f32.mxu0 %v10652_v7 }
  0xff   : > { %2950 = vmatprep.mubr.f32.mxu1 %v10652_v7 }
 0x101   : > { %7933 = vmatmul.mubr.msk.f32.gmra.mrb[26].mxu0 %vm303_vm0, %v11110_v24 }
 0x102   : > { %7938 = vmatmul.mubr.msk.f32.gmra.mrb[26].mxu1 %vm303_vm0, %v11110_v24  ;;  %2861 = vmatprep.mubr.f32.mxu0 %v10652_v7 }
 0x103   : > { %2956 = vmatprep.mubr.f32.mxu1 %v10652_v7 }
 0x105   : > { %7934 = vmatmul.mubr.msk.f32.gmra.mrb[28].mxu0 %vm303_vm0, %v11119_v25 }
 0x106   : > { %7939 = vmatmul.mubr.msk.f32.gmra.mrb[28].mxu1 %vm303_vm0, %v11119_v25  ;;  %3027 = vmatprep.mubr.f32.mxu0 %v10652_v7 }
 0x107   : > { %3122 = vmatprep.mubr.f32.mxu1 %v10652_v7 }
 0x109   : > { %7940 = vmatmul.mubr.msk.f32.vlgmr.msra.gmra.mrb[20].mxu0 %vm303_vm0, %v11229_v40 }
 0x10a   : > { %7945 = vmatmul.mubr.msk.f32.vlgmr.msra.gmra.mrb[20].mxu1 %vm303_vm0, %v11229_v40  ;;  %8762 = vmatpush1.bf16.msra.mxu0 %v11031_v49 }
 0x10b   : > { %8770 = vmatpush1.bf16.msra.mxu1 %v11040_v53  ;;  %3033 = vmatprep.mubr.f32.mxu0 %v10652_v7 }
 0x10c   : > { %3128 = vmatprep.mubr.f32.mxu1 %v10652_v7  ;;  %8764 = vmatprep.subr.bf16.mxu0 %v11042_v60 }
 0x10d   : > { %7941 = vmatmul.mubr.msk.f32.gmra.mrb[22].mxu0 %vm303_vm0, %v11238_v42  ;;  %8772 = vmatprep.subr.bf16.mxu1 %v11055_v0 }
 0x10e   : > { %7946 = vmatmul.mubr.msk.f32.gmra.mrb[22].mxu1 %vm303_vm0, %v11238_v42  ;;  %3039 = vmatprep.mubr.f32.mxu0 %v10652_v7 }
 0x10f   : > { %3134 = vmatprep.mubr.f32.mxu1 %v10652_v7  ;;  %8766 = vmatpush1.bf16.msra.mxu0 %v11080_v15 }
 0x110   : > { %8774 = vmatpush1.bf16.msra.mxu1 %v11084_v19  ;;  %8776 = vmatprep.subr.bf16.mxu0 %v11086_v20 }
 0x111   : > { %7942 = vmatmul.mubr.msk.f32.gmra.mrb[24].mxu0 %vm303_vm0, %v11251_v46  ;;  %8784 = vmatprep.subr.bf16.mxu1 %v11091_v21 }
 0x112   : > { %7947 = vmatmul.mubr.msk.f32.gmra.mrb[24].mxu1 %vm303_vm0, %v11251_v46  ;;  %3045 = vmatprep.mubr.f32.mxu0 %v10652_v7 }
 0x113   : > { %3140 = vmatprep.mubr.f32.mxu1 %v10652_v7 }
 0x115   : > { %7943 = vmatmul.mubr.msk.f32.gmra.mrb[26].mxu0 %vm303_vm0, %v11264_v51 }
 0x116   : > { %7948 = vmatmul.mubr.msk.f32.gmra.mrb[26].mxu1 %vm303_vm0, %v11264_v51  ;;  %3051 = vmatprep.mubr.f32.mxu0 %v10652_v7 }
 0x117   : > { %3146 = vmatprep.mubr.f32.mxu1 %v10652_v7 }
 0x119   : > { %7944 = vmatmul.mubr.msk.f32.gmra.mrb[28].mxu0 %vm303_vm0, %v11273_v62 }
 0x11a   : > { %7949 = vmatmul.mubr.msk.f32.gmra.mrb[28].mxu1 %vm303_vm0, %v11273_v62  ;;  %3237 = vmatprep.mubr.f32.mxu0 %v10652_v7 }
 0x11b   : > { %3332 = vmatprep.mubr.f32.mxu1 %v10652_v7 }
 0x11d   : > { %7950 = vmatmul.mubr.msk.f32.vlgmr.msra.gmra.mrb[20].mxu0 %vm303_vm0, %v11449_v2 }
 0x11e   : > { %7955 = vmatmul.mubr.msk.f32.vlgmr.msra.gmra.mrb[20].mxu1 %vm303_vm0, %v11449_v2  ;;  %8778 = vmatpush1.bf16.msra.mxu0 %v11148_v44 }
 0x11f   : > { %8786 = vmatpush1.bf16.msra.mxu1 %v11157_v52  ;;  %3243 = vmatprep.mubr.f32.mxu0 %v10652_v7 }
 0x120   : > { %3338 = vmatprep.mubr.f32.mxu1 %v10652_v7  ;;  %8780 = vmatprep.subr.bf16.mxu0 %v11159_v61 }
 0x121   : > { %7951 = vmatmul.mubr.msk.f32.gmra.mrb[22].mxu0 %vm303_vm0, %v11458_v5  ;;  %8788 = vmatprep.subr.bf16.mxu1 %v11169_v1 }
 0x122   : > { %7956 = vmatmul.mubr.msk.f32.gmra.mrb[22].mxu1 %vm303_vm0, %v11458_v5  ;;  %3249 = vmatprep.mubr.f32.mxu0 %v10652_v7 }
 0x123   : > { %3344 = vmatprep.mubr.f32.mxu1 %v10652_v7  ;;  %8782 = vmatpush1.bf16.msra.mxu0 %v11185_v14 }
 0x124   : > { %8790 = vmatpush1.bf16.msra.mxu1 %v11189_v33  ;;  %8792 = vmatprep.subr.bf16.mxu0 %v10706_v3  ;;  %v11654_v3 = vld [vmem:[%s10781_s16 + $0x61] sm:$0xff] }
 0x125   : > { %7952 = vmatmul.mubr.msk.f32.gmra.mrb[24].mxu0 %vm303_vm0, %v11471_v34  ;;  %8800 = vmatprep.subr.bf16.mxu1 %v10719_v8  ;;  %v11663_v8 = vld [vmem:[%s10781_s16 + $0x69] sm:$0xff] }
 0x126   : > { %7957 = vmatmul.mubr.msk.f32.gmra.mrb[24].mxu1 %vm303_vm0, %v11471_v34  ;;  %3255 = vmatprep.mubr.f32.mxu0 %v10652_v7 }
 0x127   : > { %3350 = vmatprep.mubr.f32.mxu1 %v10652_v7 }
 0x129   : > { %7953 = vmatmul.mubr.msk.f32.gmra.mrb[26].mxu0 %vm303_vm0, %v11484_v48 }
 0x12a   : > { %7958 = vmatmul.mubr.msk.f32.gmra.mrb[26].mxu1 %vm303_vm0, %v11484_v48  ;;  %3261 = vmatprep.mubr.f32.mxu0 %v10652_v7 }
 0x12b   : > { %3356 = vmatprep.mubr.f32.mxu1 %v10652_v7 }
 0x12d   : > { %7954 = vmatmul.mubr.msk.f32.gmra.mrb[28].mxu0 %vm303_vm0, %v11493_v57 }
 0x12e   : > { %7959 = vmatmul.mubr.msk.f32.gmra.mrb[28].mxu1 %vm303_vm0, %v11493_v57  ;;  %3467 = vmatprep.mubr.f32.mxu0 %v10652_v7 }
 0x12f   : > { %3562 = vmatprep.mubr.f32.mxu1 %v10652_v7 }
 0x131   : > { %7965 = vmatmul.mubr.msk.f32.vlgmr.msra.gmra.mrb[20].mxu0 %vm303_vm0, %v11654_v3 }
 0x132   : > { %7970 = vmatmul.mubr.msk.f32.vlgmr.msra.gmra.mrb[20].mxu1 %vm303_vm0, %v11654_v3  ;;  %8794 = vmatpush1.bf16.msra.mxu0 %v10721_v9  ;;  %v11676_v9 = vld [vmem:[%s10781_s16 + $0x71] sm:$0xff] }
 0x133   : > { %8802 = vmatpush1.bf16.msra.mxu1 %v10735_v13  ;;  %3473 = vmatprep.mubr.f32.mxu0 %v10652_v7  ;;  %v11689_v13 = vld [vmem:[%s10781_s16 + $0x79] sm:$0xff] }
 0x134   : > { %3568 = vmatprep.mubr.f32.mxu1 %v10652_v7  ;;  %8796 = vmatprep.subr.bf16.mxu0 %v10748_v17 }
 0x135   : > { %7966 = vmatmul.mubr.msk.f32.gmra.mrb[22].mxu0 %vm303_vm0, %v11663_v8  ;;  %8804 = vmatprep.subr.bf16.mxu1 %v10750_v18 }
 0x136   : > { %7971 = vmatmul.mubr.msk.f32.gmra.mrb[22].mxu1 %vm303_vm0, %v11663_v8  ;;  %3479 = vmatprep.mubr.f32.mxu0 %v10652_v7 }
 0x137   : > { %3574 = vmatprep.mubr.f32.mxu1 %v10652_v7  ;;  %8798 = vmatpush1.bf16.msra.mxu0 %v10763_v22 }
 0x138   : > { %8806 = vmatpush1.bf16.msra.mxu1 %v10776_v26  ;;  %8808 = vmatprep.subr.bf16.mxu0 %v10783_v27  ;;  %v11706_v27 = vld [vmem:[%s10781_s16 + $0x81] sm:$0xf] }
 0x139   : > { %7967 = vmatmul.mubr.msk.f32.gmra.mrb[24].mxu0 %vm303_vm0, %v11676_v9  ;;  %8816 = vmatprep.subr.bf16.mxu1 %v10794_v31 }
 0x13a   : > { %7972 = vmatmul.mubr.msk.f32.gmra.mrb[24].mxu1 %vm303_vm0, %v11676_v9  ;;  %3485 = vmatprep.mubr.f32.mxu0 %v10652_v7 }
 0x13b   : > { %3580 = vmatprep.mubr.f32.mxu1 %v10652_v7 }
 0x13c   : > { %v11692_v17 = vpop.f32.mrb[0].mxu0 }
 0x13d   : > { %v11694_v18 = vpop.f32.mrb[0].mxu1  ;;  %v11696_v22 = vpop.f32.mrb[1].mxu0  ;;  %7968 = vmatmul.mubr.msk.f32.gmra.mrb[26].mxu0 %vm303_vm0, %v11689_v13 }
 0x13e   : > { %v11700_v26 = vpop.f32.mrb[1].mxu1  ;;  %7973 = vmatmul.mubr.msk.f32.gmra.mrb[26].mxu1 %vm303_vm0, %v11689_v13  ;;  %3491 = vmatprep.mubr.f32.mxu0 %v10652_v7 }
 0x13f   : > { %3586 = vmatprep.mubr.f32.mxu1 %v10652_v7 }
 0x140   : > { %v11709_v31 = vpop.f32.mrb[2].mxu0 }
 0x141   : > { %v11711_v47 = vpop.f32.mrb[2].mxu1  ;;  %v11713_v6 = vpop.f32.mrb[3].mxu0  ;;  %7969 = vmatmul.mubr.msk.f32.gmra.mrb[28].mxu0 %vm303_vm0, %v11706_v27 }
 0x142   : > { %v11717_v23 = vpop.f32.mrb[3].mxu1  ;;  %7974 = vmatmul.mubr.msk.f32.gmra.mrb[28].mxu1 %vm303_vm0, %v11706_v27  ;;  %3677 = vmatprep.mubr.f32.mxu0 %v10652_v7 }
 0x143   : > { %3772 = vmatprep.mubr.f32.mxu1 %v10652_v7 }
 0x144   : > { %v11723_v24 = vpop.f32.mrb[4].mxu0 }
 0x145   : > { %v11725_v25 = vpop.f32.mrb[4].mxu1  ;;  %v11727_v58 = vpop.f32.mrb[5].mxu0  ;;  %7975 = vmatmul.mubr.msk.f32.vlgmr.msra.gmra.mrb[30].mxu0 %vm303_vm0, %v11229_v40 }
 0x146   : > { %16080 = vst [vmem:[#allocation2_spill] sm:$0xff] %v11725_v25  ;;  %16081 = vst [vmem:[#allocation3_spill] sm:$0xff] %v11727_v58  ;;  %v11731_v59 = vpop.f32.mrb[5].mxu1  ;;  %7980 = vmatmul.mubr.msk.f32.vlgmr.msra.gmra.mrb[30].mxu1 %vm303_vm0, %v11229_v40  ;;  %8810 = vmatpush1.bf16.msra.mxu0 %v10806_v35 }
 0x147   : > { %8818 = vmatpush1.bf16.msra.mxu1 %v10813_v37  ;;  %3683 = vmatprep.mubr.f32.mxu0 %v10652_v7 }
 0x148   : > { %v11738_v63 = vpop.f32.mrb[6].mxu0  ;;  %3778 = vmatprep.mubr.f32.mxu1 %v10652_v7  ;;  %8812 = vmatprep.subr.bf16.mxu0 %v10825_v41 }
 0x149   : > { %v11742_v58 = vpop.f32.mrb[6].mxu1  ;;  %v11744_v25 = vpop.f32.mrb[7].mxu0  ;;  %7976 = vmatmul.mubr.msk.f32.gmra.mrb[32].mxu0 %vm303_vm0, %v11238_v42  ;;  %8820 = vmatprep.subr.bf16.mxu1 %v10838_v45 }
 0x14a   : > { %v11749_v35 = vpop.f32.mrb[7].mxu1  ;;  %7981 = vmatmul.mubr.msk.f32.gmra.mrb[32].mxu1 %vm303_vm0, %v11238_v42  ;;  %3689 = vmatprep.mubr.f32.mxu0 %v10652_v7  ;;  %v8046_v42 = vld [vmem:[%s15757_s2 + $0x480] sm:$0xff] }
 0x14b   : > { %3784 = vmatprep.mubr.f32.mxu1 %v10652_v7  ;;  %8814 = vmatpush1.bf16.msra.mxu0 %v10857_v50  ;;  %v8015_v50 = vld [vmem:[%s10781_s16 + $0x91] sm:$0xff] }
 0x14c   : > { %v11756_v37 = vpop.f32.mrb[8].mxu0  ;;  %8822 = vmatpush1.bf16.msra.mxu1 %v10870_v54  ;;  %8824 = vmatprep.subr.bf16.mxu0 %v10872_v55  ;;  %v8016_v54 = vld [vmem:[%s10781_s16 + $0x99] sm:$0xff]  ;;  %v8031_v55 = vld [vmem:[%s15757_s2 + $0x408] sm:$0xff] }
 0x14d   : > { %v11760_v41 = vpop.f32.mrb[8].mxu1  ;;  %v11762_v45 = vpop.f32.mrb[9].mxu0  ;;  %7977 = vmatmul.mubr.msk.f32.gmra.mrb[34].mxu0 %vm303_vm0, %v11251_v46  ;;  %8832 = vmatprep.subr.bf16.mxu1 %v10877_v56  ;;  %v8035_v56 = vld [vmem:[%s15757_s2 + $0x428] sm:$0xff] }
 0x14e   : > { %v11767_v40 = vpop.f32.mrb[9].mxu1  ;;  %7982 = vmatmul.mubr.msk.f32.gmra.mrb[34].mxu1 %vm303_vm0, %v11251_v46  ;;  %3695 = vmatprep.mubr.f32.mxu0 %v10652_v7 }
 0x14f   : > { %3790 = vmatprep.mubr.f32.mxu1 %v10652_v7 }
 0x151   : > { %7978 = vmatmul.mubr.msk.f32.gmra.mrb[36].mxu0 %vm303_vm0, %v11264_v51 }
 0x152   : > { %7983 = vmatmul.mubr.msk.f32.gmra.mrb[36].mxu1 %vm303_vm0, %v11264_v51  ;;  %3701 = vmatprep.mubr.f32.mxu0 %v10652_v7  ;;  %v8050_v51 = vld [vmem:[%s15757_s2 + $0x4a0] sm:$0xff] }
 0x153   : > { %3796 = vmatprep.mubr.f32.mxu1 %v10652_v7 }
 0x155   : > { %7979 = vmatmul.mubr.msk.f32.gmra.mrb[38].mxu0 %vm303_vm0, %v11273_v62 }
 0x156   : > { %7984 = vmatmul.mubr.msk.f32.gmra.mrb[38].mxu1 %vm303_vm0, %v11273_v62  ;;  %3867 = vmatprep.mubr.f32.mxu0 %v10652_v7  ;;  %v8048_v62 = vld [vmem:[%s15757_s2 + $0x490] sm:$0xff] }
 0x157   : > { %3962 = vmatprep.mubr.f32.mxu1 %v10652_v7 }
 0x159   : > { %7985 = vmatmul.mubr.msk.f32.vlgmr.msra.gmra.mrb[30].mxu0 %vm303_vm0, %v11146_v43 }
 0x15a   : > { %7990 = vmatmul.mubr.msk.f32.vlgmr.msra.gmra.mrb[30].mxu1 %vm303_vm0, %v11146_v43  ;;  %8826 = vmatpush1.bf16.msra.mxu0 %v10932_v4  ;;  %v8033_v4 = vld [vmem:[%s15757_s2 + $0x418] sm:$0xff]  ;;  %v8038_v43 = vld [vmem:[%s15757_s2 + $0x440] sm:$0xff] }
 0x15b   : > { %8834 = vmatpush1.bf16.msra.mxu1 %v10941_v10  ;;  %3873 = vmatprep.mubr.f32.mxu0 %v10652_v7  ;;  %v11912_v10 = vpack.c.bf16 %v8035_v56, %v8031_v55  ;;  %v8056_v55 = vld [vmem:[%s15757_s2 + $0x4d0] sm:$0xff] }
 0x15c   : > { %3968 = vmatprep.mubr.f32.mxu1 %v10652_v7  ;;  %8828 = vmatprep.subr.bf16.mxu0 %v10943_v11  ;;  %v8037_v11 = vld [vmem:[%s15757_s2 + $0x438] sm:$0xff] }
 0x15d   : > { %7986 = vmatmul.mubr.msk.f32.gmra.mrb[32].mxu0 %vm303_vm0, %v11181_v12  ;;  %8836 = vmatprep.subr.bf16.mxu1 %v10955_v16  ;;  %v8030_v16 = vld [vmem:[%s15757_s2 + $0x400] sm:$0xff] }
 0x15e   : > { %7991 = vmatmul.mubr.msk.f32.gmra.mrb[32].mxu1 %vm303_vm0, %v11181_v12  ;;  %3879 = vmatprep.mubr.f32.mxu0 %v10652_v7  ;;  %v8047_v12 = vld [vmem:[%s15757_s2 + $0x488] sm:$0xff] }
 0x15f   : > { %3974 = vmatprep.mubr.f32.mxu1 %v10652_v7  ;;  %8830 = vmatpush1.bf16.msra.mxu0 %v10977_v28  ;;  %v8034_v28 = vld [vmem:[%s15757_s2 + $0x420] sm:$0xff] }
 0x160   : > { %8838 = vmatpush1.bf16.msra.mxu1 %v10981_v29  ;;  %8840 = vmatprep.subr.bf16.mxu0 %v10983_v30  ;;  %v8017_v29 = vld [vmem:[%s10781_s16 + $0xa1] sm:$0xff]  ;;  %v11924_v30 = vpack.c.bf16 %v8037_v11, %v8033_v4 }
 0x161   : > { %7987 = vmatmul.mubr.msk.f32.gmra.mrb[34].mxu0 %vm303_vm0, %v11198_v36  ;;  %8848 = vmatprep.subr.bf16.mxu1 %v10987_v32  ;;  %v11926_v32 = vpack.c.bf16 %v8034_v28, %v8030_v16  ;;  %v8060_v28 = vld [vmem:[%s15757_s2 + $0x4f0] sm:$0xff] }
 0x162   : > { %7992 = vmatmul.mubr.msk.f32.gmra.mrb[34].mxu1 %vm303_vm0, %v11198_v36  ;;  %3885 = vmatprep.mubr.f32.mxu0 %v10652_v7 }
 0x163   : > { %3980 = vmatprep.mubr.f32.mxu1 %v10652_v7 }
 0x165   : > { %7988 = vmatmul.mubr.msk.f32.gmra.mrb[36].mxu0 %vm303_vm0, %v11211_v38 }
 0x166   : > { %7993 = vmatmul.mubr.msk.f32.gmra.mrb[36].mxu1 %vm303_vm0, %v11211_v38  ;;  %3891 = vmatprep.mubr.f32.mxu0 %v10652_v7  ;;  %v8049_v38 = vld [vmem:[%s15757_s2 + $0x498] sm:$0xff] }
 0x167   : > { %3986 = vmatprep.mubr.f32.mxu1 %v10652_v7 }
 0x169   : > { %7989 = vmatmul.mubr.msk.f32.gmra.mrb[38].mxu0 %vm303_vm0, %v11220_v39 }
 0x16a   : > { %7994 = vmatmul.mubr.msk.f32.gmra.mrb[38].mxu1 %vm303_vm0, %v11220_v39  ;;  %4057 = vmatprep.mubr.f32.mxu0 %v10652_v7  ;;  %v8053_v39 = vld [vmem:[%s15757_s2 + $0x4b8] sm:$0xff] }
 0x16b   : > { %4152 = vmatprep.mubr.f32.mxu1 %v10652_v7 }
 0x16d   : > { %7995 = vmatmul.mubr.msk.f32.vlgmr.msra.gmra.mrb[30].mxu0 %vm303_vm0, %v11449_v2 }
 0x16e   : > { %8000 = vmatmul.mubr.msk.f32.vlgmr.msra.gmra.mrb[30].mxu1 %vm303_vm0, %v11449_v2  ;;  %8842 = vmatpush1.bf16.msra.mxu0 %v11031_v49  ;;  %v8032_v49 = vld [vmem:[%s15757_s2 + $0x410] sm:$0xff] }
 0x16f   : > { %8850 = vmatpush1.bf16.msra.mxu1 %v11040_v53  ;;  %4063 = vmatprep.mubr.f32.mxu0 %v10652_v7  ;;  %v8036_v53 = vld [vmem:[%s15757_s2 + $0x430] sm:$0xff] }
 0x170   : > { %4158 = vmatprep.mubr.f32.mxu1 %v10652_v7  ;;  %8844 = vmatprep.subr.bf16.mxu0 %v11042_v60  ;;  %v8039_v60 = vld [vmem:[%s15757_s2 + $0x448] sm:$0xff]  ;;  %v8052_v2 = vld [vmem:[%s15757_s2 + $0x4b0] sm:$0xff] }
 0x171   : > { %7996 = vmatmul.mubr.msk.f32.gmra.mrb[32].mxu0 %vm303_vm0, %v11458_v5  ;;  %8852 = vmatprep.subr.bf16.mxu1 %v11055_v0  ;;  %v11939_v0 = vpack.c.bf16 %v8036_v53, %v8032_v49 }
 0x172   : > { %8001 = vmatmul.mubr.msk.f32.gmra.mrb[32].mxu1 %vm303_vm0, %v11458_v5  ;;  %4069 = vmatprep.mubr.f32.mxu0 %v10652_v7  ;;  %v8018_v5 = vld [vmem:[%s10781_s16 + $0xa9] sm:$0xff] }
 0x173   : > { %4164 = vmatprep.mubr.f32.mxu1 %v10652_v7  ;;  %8846 = vmatpush1.bf16.msra.mxu0 %v11080_v15  ;;  %v8043_v15 = vld [vmem:[%s15757_s2 + $0x468] sm:$0xff] }
 0x174   : > { %8854 = vmatpush1.bf16.msra.mxu1 %v11084_v19  ;;  %8856 = vmatprep.subr.bf16.mxu0 %v11086_v20  ;;  %v8041_v19 = vld [vmem:[%s15757_s2 + $0x458] sm:$0xff] }
 0x175   : > { %7997 = vmatmul.mubr.msk.f32.gmra.mrb[34].mxu0 %vm303_vm0, %v11471_v34  ;;  %8864 = vmatprep.subr.bf16.mxu1 %v11091_v21  ;;  %v8045_v20 = vld [vmem:[%s15757_s2 + $0x478] sm:$0xff]  ;;  %v11952_v21 = vpack.c.bf16 %v8043_v15, %v8039_v60  ;;  %v8019_v15 = vld [vmem:[%s10781_s16 + $0xb1] sm:$0xf] }
 0x176   : > { %8002 = vmatmul.mubr.msk.f32.gmra.mrb[34].mxu1 %vm303_vm0, %v11471_v34  ;;  %4075 = vmatprep.mubr.f32.mxu0 %v10652_v7  ;;  %v8055_v34 = vld [vmem:[%s15757_s2 + $0x4c8] sm:$0xff] }
 0x177   : > { %4170 = vmatprep.mubr.f32.mxu1 %v10652_v7 }
 0x179   : > { %7998 = vmatmul.mubr.msk.f32.gmra.mrb[36].mxu0 %vm303_vm0, %v11484_v48 }
 0x17a   : > { %8003 = vmatmul.mubr.msk.f32.gmra.mrb[36].mxu1 %vm303_vm0, %v11484_v48  ;;  %4081 = vmatprep.mubr.f32.mxu0 %v10652_v7  ;;  %v8059_v48 = vld [vmem:[%s15757_s2 + $0x4e8] sm:$0xff] }
 0x17b   : > { %4176 = vmatprep.mubr.f32.mxu1 %v10652_v7  ;;  %v12041_v16 = vpack.c.bf16 %v8059_v48, %v8055_v34 }
 0x17d   : > { %7999 = vmatmul.mubr.msk.f32.gmra.mrb[38].mxu0 %vm303_vm0, %v11493_v57 }
 0x17e   : > { %8004 = vmatmul.mubr.msk.f32.gmra.mrb[38].mxu1 %vm303_vm0, %v11493_v57  ;;  %4267 = vmatprep.mubr.f32.mxu0 %v10652_v7  ;;  %v12015_v57 = vpack.c.bf16 %v8053_v39, %v8049_v38 }
 0x17f   : > { %4362 = vmatprep.mubr.f32.mxu1 %v10652_v7 }
 0x181   : > { %8005 = vmatmul.mubr.msk.f32.vlgmr.msra.gmra.mrb[30].mxu0 %vm303_vm0, %v11654_v3 }
 0x182   : > { %8010 = vmatmul.mubr.msk.f32.vlgmr.msra.gmra.mrb[30].mxu1 %vm303_vm0, %v11654_v3  ;;  %8858 = vmatpush1.bf16.msra.mxu0 %v11148_v44  ;;  %v8042_v44 = vld [vmem:[%s15757_s2 + $0x460] sm:$0xff]  ;;  %v8057_v3 = vld [vmem:[%s15757_s2 + $0x4d8] sm:$0xff] }
 0x183   : > { %8866 = vmatpush1.bf16.msra.mxu1 %v11157_v52  ;;  %4273 = vmatprep.mubr.f32.mxu0 %v10652_v7  ;;  %v8040_v52 = vld [vmem:[%s15757_s2 + $0x450] sm:$0xff] }
 0x184   : > { %4368 = vmatprep.mubr.f32.mxu1 %v10652_v7  ;;  %8860 = vmatprep.subr.bf16.mxu0 %v11159_v61  ;;  %v11965_v61 = vpack.c.bf16 %v8045_v20, %v8041_v19  ;;  %v8065_v20 = vld [vmem:[%s15757_s2 + $0x518] sm:$0xff] }
 0x185   : > { %8006 = vmatmul.mubr.msk.f32.gmra.mrb[32].mxu0 %vm303_vm0, %v11663_v8  ;;  %8868 = vmatprep.subr.bf16.mxu1 %v11169_v1  ;;  %v8044_v1 = vld [vmem:[%s15757_s2 + $0x470] sm:$0xff] }
 0x186   : > { %8011 = vmatmul.mubr.msk.f32.gmra.mrb[32].mxu1 %vm303_vm0, %v11663_v8  ;;  %4279 = vmatprep.mubr.f32.mxu0 %v10652_v7  ;;  %v11980_v36 = vpack.c.bf16 %v8044_v1, %v8040_v52  ;;  %v8061_v8 = vld [vmem:[%s15757_s2 + $0x4f8] sm:$0xff]  ;;  %v12074_v1 = vpack.c.bf16 %v8060_v28, %v8056_v55 }
 0x187   : > { %4374 = vmatprep.mubr.f32.mxu1 %v10652_v7  ;;  %8862 = vmatpush1.bf16.msra.mxu0 %v11185_v14  ;;  %v8051_v14 = vld [vmem:[%s15757_s2 + $0x4a8] sm:$0xff]  ;;  %v12057_v19 = vpack.c.bf16 %v8061_v8, %v8057_v3  ;;  %v8073_v8 = vld [vmem:[%s15757_s2 + $0x558] sm:$0xff] }
 0x188   : > { %8870 = vmatpush1.bf16.msra.mxu1 %v11189_v33  ;;  %8872 = vmatprep.subr.bf16.mxu0 %v11912_v10  ;;  %v11978_v33 = vpack.c.bf16 %v8042_v44, %v8038_v43  ;;  %v11993_v46 = vpack.c.bf16 %v8051_v14, %v8047_v12  ;;  %v8069_v43 = vld [vmem:[%s15757_s2 + $0x538] sm:$0xff]  ;;  %16082 = vst [vmem:[#allocation4_spill] sm:$0xff] %v12074_v1  ;;  %v8064_v14 = vld [vmem:[%s15757_s2 + $0x510] sm:$0xff] }
 0x189   : > { %8007 = vmatmul.mubr.msk.f32.gmra.mrb[34].mxu0 %vm303_vm0, %v11676_v9  ;;  %8936 = vmatprep.subr.bf16.mxu1 %v11924_v30 }
 0x18a   : > { %8012 = vmatmul.mubr.msk.f32.gmra.mrb[34].mxu1 %vm303_vm0, %v11676_v9  ;;  %4285 = vmatprep.mubr.f32.mxu0 %v10652_v7 }
 0x18b   : > { %4380 = vmatprep.mubr.f32.mxu1 %v10652_v7 }
 0x18d   : > { %8008 = vmatmul.mubr.msk.f32.gmra.mrb[36].mxu0 %vm303_vm0, %v11689_v13 }
 0x18e   : > { %8013 = vmatmul.mubr.msk.f32.gmra.mrb[36].mxu1 %vm303_vm0, %v11689_v13  ;;  %4291 = vmatprep.mubr.f32.mxu0 %v10652_v7  ;;  %v12025_v13 = vpack.c.bf16 %v8050_v51, %v8046_v42 }
 0x18f   : > { %4386 = vmatprep.mubr.f32.mxu1 %v10652_v7 }
 0x191   : > { %8009 = vmatmul.mubr.msk.f32.gmra.mrb[38].mxu0 %vm303_vm0, %v11706_v27 }
 0x192   : > { %8014 = vmatmul.mubr.msk.f32.gmra.mrb[38].mxu1 %vm303_vm0, %v11706_v27  ;;  %4497 = vmatprep.mubr.f32.mxu0 %v10652_v7  ;;  %v12027_v27 = vpack.c.bf16 %v8052_v2, %v8048_v62  ;;  %v12092_v62 = vpack.c.bf16 %v8069_v43, %v8065_v20  ;;  %v8068_v2 = vld [vmem:[%s15757_s2 + $0x530] sm:$0xff]  ;;  %v16089_v20 = vld [vmem:[#allocation2_spill] sm:$0xff] }
 0x193   : > { %4592 = vmatprep.mubr.f32.mxu1 %v10652_v7  ;;  %v12120_v55 = vpack.c.bf16 %v8068_v2, %v8064_v14  ;;  %v8085_v14 = vld [vmem:[%s15757_s2 + $0x5b8] sm:$0xff] }
 0x194   : > { %16084 = vst [vmem:[#allocation6_spill] sm:$0xff] %v12092_v62 }
 0x195   : > { %8020 = vmatmul.mubr.msk.f32.vlgmr.msra.gmra.mrb[30].mxu0 %vm303_vm0, %v8015_v50  ;;  %16086 = vst [vmem:[#allocation8_spill] sm:$0xff] %v12120_v55 }
 0x196   : > { %8025 = vmatmul.mubr.msk.f32.vlgmr.msra.gmra.mrb[30].mxu1 %vm303_vm0, %v8015_v50  ;;  %4503 = vmatprep.mubr.f32.mxu0 %v10652_v7  ;;  %v8054_v50 = vld [vmem:[%s15757_s2 + $0x4c0] sm:$0xff] }
 0x197   : > { %4598 = vmatprep.mubr.f32.mxu1 %v10652_v7  ;;  %8874 = vmatpush1.bf16.msra.mxu0 %v11926_v32 }
 0x198   : > { %8938 = vmatpush1.bf16.msra.mxu1 %v11939_v0  ;;  %8876 = vmatprep.subr.bf16.mxu0 %v11952_v21 }
 0x199   : > { %8021 = vmatmul.mubr.msk.f32.gmra.mrb[32].mxu0 %vm303_vm0, %v8016_v54  ;;  %8940 = vmatprep.subr.bf16.mxu1 %v11965_v61 }
 0x19a   : > { %8026 = vmatmul.mubr.msk.f32.gmra.mrb[32].mxu1 %vm303_vm0, %v8016_v54  ;;  %4509 = vmatprep.mubr.f32.mxu0 %v10652_v7  ;;  %v8058_v54 = vld [vmem:[%s15757_s2 + $0x4e0] sm:$0xff] }
 0x19b   : > { %4604 = vmatprep.mubr.f32.mxu1 %v10652_v7  ;;  %8878 = vmatpush1.bf16.msra.mxu0 %v11978_v33 }
 0x19c   : > { %8942 = vmatpush1.bf16.msra.mxu1 %v11980_v36  ;;  %8880 = vmatprep.subr.bf16.mxu0 %v11993_v46 }
 0x19d   : > { %8022 = vmatmul.mubr.msk.f32.gmra.mrb[34].mxu0 %vm303_vm0, %v8017_v29  ;;  %8944 = vmatprep.subr.bf16.mxu1 %v12015_v57 }
 0x19e   : > { %8027 = vmatmul.mubr.msk.f32.gmra.mrb[34].mxu1 %vm303_vm0, %v8017_v29  ;;  %4515 = vmatprep.mubr.f32.mxu0 %v10652_v7  ;;  %v8063_v29 = vld [vmem:[%s15757_s2 + $0x508] sm:$0xff] }
 0x19f   : > { %4610 = vmatprep.mubr.f32.mxu1 %v10652_v7  ;;  %8882 = vmatpush1.bf16.msra.mxu0 %v12025_v13 }
 0x1a0   : > { %v2343_v9 = vpop.f32.mrb[10].mxu0  ;;  %8946 = vmatpush1.bf16.msra.mxu1 %v12027_v27  ;;  %8884 = vmatprep.subr.bf16.mxu0 %v12041_v16 }
 0x1a1   : > { %v2487_v56 = vmax.f32 %v11692_v17, %v2343_v9  ;;  %v2438_v4 = vpop.f32.mrb[10].mxu1  ;;  %v2345_v11 = vpop.f32.mrb[11].mxu0  ;;  %8023 = vmatmul.mubr.msk.f32.gmra.mrb[36].mxu0 %vm303_vm0, %v8018_v5  ;;  %v8067_v17 = vld [vmem:[%s15757_s2 + $0x528] sm:$0xff]  ;;  %8948 = vmatprep.subr.bf16.mxu1 %v12057_v19  ;;  %v8077_v9 = vld [vmem:[%s15757_s2 + $0x578] sm:$0xff] }
 0x1a2   : > { %v2489_v49 = vmax.f32 %v11694_v18, %v2438_v4  ;;  %v2488_v53 = vmax.f32 %v11696_v22, %v2345_v11  ;;  %v2440_v60 = vpop.f32.mrb[11].mxu1  ;;  %8028 = vmatmul.mubr.msk.f32.gmra.mrb[36].mxu1 %vm303_vm0, %v8018_v5  ;;  %4521 = vmatprep.mubr.f32.mxu0 %v10652_v7  ;;  %v12068_v22 = vpack.c.bf16 %v8058_v54, %v8054_v50  ;;  %v8071_v5 = vld [vmem:[%s15757_s2 + $0x548] sm:$0xff]  ;;  %v8070_v4 = vld [vmem:[%s15757_s2 + $0x540] sm:$0xff]  ;;  %v8072_v11 = vld [vmem:[%s15757_s2 + $0x550] sm:$0xff] }
 0x1a3   : > { %v2490_v18 = vmax.f32 %v11700_v26, %v2440_v60  ;;  %4616 = vmatprep.mubr.f32.mxu1 %v10652_v7  ;;  %v12076_v12 = vpack.c.bf16 %v8067_v17, %v8063_v29  ;;  %v8062_v26 = vld [vmem:[%s15757_s2 + $0x500] sm:$0xff]  ;;  %v8076_v60 = vld [vmem:[%s15757_s2 + $0x570] sm:$0xff] }
 0x1a4   : > { %v12070_v44 = vmax.f32 %v2487_v56, %v2489_v49  ;;  %v2349_v52 = vpop.f32.mrb[12].mxu0  ;;  %v8066_v7 = vld [vmem:[%s15757_s2 + $0x520] sm:$0xff]  ;;  %8886 = vmatpush1.bf16.msra.mxu0 %v12068_v22  ;;  %8950 = vmatpush1.bf16.msra.mxu1 %v12074_v1 }
 0x1a5   : > { %16083 = vst [vmem:[#allocation5_spill] sm:$0xff] %v12076_v12  ;;  %v12087_v38 = vmax.f32 %v2488_v53, %v2490_v18  ;;  %v2491_v39 = vmax.f32 %v11709_v31, %v2349_v52  ;;  %v2444_v42 = vpop.f32.mrb[12].mxu1  ;;  %v2351_v51 = vpop.f32.mrb[13].mxu0  ;;  %8024 = vmatmul.mubr.msk.f32.gmra.mrb[38].mxu0 %vm303_vm0, %v8019_v15  ;;  %v8075_v31 = vld [vmem:[%s15757_s2 + $0x568] sm:$0xff]  ;;  %v12114_v54 = vpack.c.bf16 %v8066_v7, %v8062_v26  ;;  %v8081_v7 = vld [vmem:[%s15757_s2 + $0x598] sm:$0xff] }
 0x1a6   : > { %v2493_v34 = vmax.f32 %v11711_v47, %v2444_v42  ;;  %v2492_v48 = vmax.f32 %v11713_v6, %v2351_v51  ;;  %v2446_v3 = vpop.f32.mrb[13].mxu1  ;;  %8029 = vmatmul.mubr.msk.f32.gmra.mrb[38].mxu1 %vm303_vm0, %v8019_v15  ;;  %v12122_v56 = vpack.c.bf16 %v8075_v31, %v8071_v5  ;;  %8888 = vmatprep.subr.bf16.mxu0 %v12076_v12  ;;  %v8079_v15 = vld [vmem:[%s15757_s2 + $0x588] sm:$0xff] }
 0x1a7   : > { %v2494_v50 = vmax.f32 %v11717_v23, %v2446_v3  ;;  %16085 = vst [vmem:[#allocation7_spill] sm:$0xff] %v12114_v54  ;;  %v8074_v23 = vld [vmem:[%s15757_s2 + $0x560] sm:$0xff]  ;;  %8952 = vmatprep.subr.bf16.mxu1 %v12092_v62  ;;  %v12138_v53 = vpack.c.bf16 %v8077_v9, %v8073_v8  ;;  %v16090_v18 = vld [vmem:[#allocation3_spill] sm:$0xff]  ;;  %v12164_v5 = vpack.c.bf16 %v8076_v60, %v8072_v11  ;;  %v8093_v60 = vld [vmem:[%s15757_s2 + $0x5f8] sm:$0xff] }
 0x1a8   : > { %v12116_v47 = vmax.f32 %v2491_v39, %v2493_v34  ;;  %v2355_v6 = vpop.f32.mrb[14].mxu0  ;;  %16087 = vst [vmem:[#allocation9_spill] sm:$0xff] %v12122_v56  ;;  %v12158_v42 = vpack.c.bf16 %v8074_v23, %v8070_v4  ;;  %8890 = vmatpush1.bf16.msra.mxu0 %v12114_v54  ;;  %8954 = vmatpush1.bf16.msra.mxu1 %v12120_v55  ;;  %v8078_v34 = vld [vmem:[%s15757_s2 + $0x580] sm:$0xff]  ;;  %v8084_v4 = vld [vmem:[%s15757_s2 + $0x5b0] sm:$0xff]  ;;  %v8087_v23 = vld [vmem:[%s15757_s2 + $0x5c8] sm:$0xff] }
 0x1a9   : > { %v12133_v28 = vmax.f32 %v2492_v48, %v2494_v50  ;;  %v2495_v29 = vmax.f32 %v11723_v24, %v2355_v6  ;;  %v2450_v17 = vpop.f32.mrb[14].mxu1  ;;  %v2357_v49 = vpop.f32.mrb[15].mxu0  ;;  %16088 = vst [vmem:[#allocation10_spill] sm:$0xff] %v12138_v53  ;;  %v8083_v24 = vld [vmem:[%s15757_s2 + $0x5a8] sm:$0xff]  ;;  %16092 = vst [vmem:[#allocation3_spill] sm:$0xff] %v12164_v5  ;;  %v8080_v48 = vld [vmem:[%s15757_s2 + $0x590] sm:$0xff]  ;;  %8892 = vmatprep.subr.bf16.mxu0 %v12122_v56  ;;  %8956 = vmatprep.subr.bf16.mxu1 %v12138_v53 }
 0x1aa   : > { %v2497_v43 = vmax.f32 %v16089_v20, %v2450_v17  ;;  %v2496_v52 = vmax.f32 %v16090_v18, %v2357_v49  ;;  %v2452_v26 = vpop.f32.mrb[15].mxu1  ;;  %16091 = vst [vmem:[#allocation2_spill] sm:$0xff] %v12158_v42  ;;  %v12166_v31 = vpack.c.bf16 %v8083_v24, %v8079_v15  ;;  %v12182_v6 = vpack.c.bf16 %v8085_v14, %v8081_v7  ;;  %v8089_v49 = vld [vmem:[%s15757_s2 + $0x5d8] sm:$0xff]  ;;  %v8086_v18 = vld [vmem:[%s15757_s2 + $0x5c0] sm:$0xff] }
 0x1ab   : > { %v2498_v39 = vmax.f32 %v11731_v59, %v2452_v26  ;;  %v8082_v59 = vld [vmem:[%s15757_s2 + $0x5a0] sm:$0xff] }
 0x1ac   : > { %v12160_v51 = vmax.f32 %v2495_v29, %v2497_v43  ;;  %v2361_v2 = vpop.f32.mrb[16].mxu0  ;;  %16093 = vst [vmem:[#allocation11_spill] sm:$0xff] %v12166_v31  ;;  %16094 = vst [vmem:[#allocation12_spill] sm:$0xff] %v12182_v6  ;;  %v12202_v24 = vpack.c.bf16 %v8082_v59, %v8078_v34  ;;  %8894 = vmatpush1.bf16.msra.mxu0 %v12158_v42  ;;  %8958 = vmatpush1.bf16.msra.mxu1 %v12164_v5  ;;  %v8092_v34 = vld [vmem:[%s15757_s2 + $0x5f0] sm:$0xff] }
 0x1ad   : > { %v12177_v3 = vmax.f32 %v2496_v52, %v2498_v39  ;;  %v2499_v8 = vmax.f32 %v11738_v63, %v2361_v2  ;;  %v2456_v9 = vpop.f32.mrb[16].mxu1  ;;  %v2363_v50 = vpop.f32.mrb[17].mxu0  ;;  %v8091_v63 = vld [vmem:[%s15757_s2 + $0x5e8] sm:$0xff]  ;;  %8896 = vmatprep.subr.bf16.mxu0 %v12166_v31  ;;  %8960 = vmatprep.subr.bf16.mxu1 %v12182_v6  ;;  %v12223_v39 = vpack.c.bf16 %v8093_v60, %v8089_v49  ;;  %v8088_v2 = vld [vmem:[%s15757_s2 + $0x5d0] sm:$0xff] }
 0x1ae   : > { %v2501_v11 = vmax.f32 %v11742_v58, %v2456_v9  ;;  %v2500_v29 = vmax.f32 %v11744_v25, %v2363_v50  ;;  %v2458_v17 = vpop.f32.mrb[17].mxu1  ;;  %16095 = vst [vmem:[#allocation13_spill] sm:$0xff] %v12202_v24  ;;  %v12208_v25 = vpack.c.bf16 %v8084_v4, %v8080_v48  ;;  %v12210_v58 = vpack.c.bf16 %v8091_v63, %v8087_v23  ;;  %v8099_v9 = vld [vmem:[%s15757_s2 + $0x628] sm:$0xff]  ;;  %v8097_v50 = vld [vmem:[%s15757_s2 + $0x618] sm:$0xff]  ;;  %v8096_v60 = vld [vmem:[%s15757_s2 + $0x610] sm:$0xff] }
 0x1af   : > { %v2502_v15 = vmax.f32 %v11749_v35, %v2458_v17  ;;  %v8090_v35 = vld [vmem:[%s15757_s2 + $0x5e0] sm:$0xff]  ;;  %16098 = vst [vmem:[#allocation16_spill] sm:$0xff] %v12223_v39  ;;  %v8101_v4 = vld [vmem:[%s15757_s2 + $0x638] sm:$0xff] }
 0x1b0   : > { %v12204_v20 = vmax.f32 %v2499_v8, %v2501_v11  ;;  %v2367_v43 = vpop.f32.mrb[18].mxu0  ;;  %16096 = vst [vmem:[#allocation14_spill] sm:$0xff] %v12208_v25  ;;  %16097 = vst [vmem:[#allocation15_spill] sm:$0xff] %v12210_v58  ;;  %8898 = vmatpush1.bf16.msra.mxu0 %v12202_v24  ;;  %8962 = vmatpush1.bf16.msra.mxu1 %v12208_v25  ;;  %v8094_v11 = vld [vmem:[%s15757_s2 + $0x600] sm:$0xff]  ;;  %v12266_v49 = vpack.c.bf16 %v8101_v4, %v8097_v50  ;;  %v8115_v50 = vld [vmem:[%s15757_s2 + $0x6a8] sm:$0xff] }
 0x1b1   : > { %v12218_v52 = vmax.f32 %v2500_v29, %v2502_v15  ;;  %v2503_v26 = vmax.f32 %v11756_v37, %v2367_v43  ;;  %v2462_v7 = vpop.f32.mrb[18].mxu1  ;;  %v2369_v14 = vpop.f32.mrb[19].mxu0  ;;  %v8095_v37 = vld [vmem:[%s15757_s2 + $0x608] sm:$0xff]  ;;  %v8098_v29 = vld [vmem:[%s15757_s2 + $0x620] sm:$0xff]  ;;  %8900 = vmatprep.subr.bf16.mxu0 %v12210_v58  ;;  %8964 = vmatprep.subr.bf16.mxu1 %v12223_v39  ;;  %v8100_v15 = vld [vmem:[%s15757_s2 + $0x630] sm:$0xff] }
 0x1b2   : > { %v2505_v59 = vmax.f32 %v11760_v41, %v2462_v7  ;;  %v2504_v48 = vmax.f32 %v11762_v45, %v2369_v14  ;;  %v2464_v8 = vpop.f32.mrb[19].mxu1  ;;  %v12250_v41 = vpack.c.bf16 %v8090_v35, %v8086_v18  ;;  %v12252_v45 = vpack.c.bf16 %v8092_v34, %v8088_v2  ;;  %16102 = vst [vmem:[#allocation20_spill] sm:$0xff] %v12266_v49  ;;  %v8103_v43 = vld [vmem:[%s15757_s2 + $0x648] sm:$0xff]  ;;  %v8105_v35 = vld [vmem:[%s15757_s2 + $0x658] sm:$0xff]  ;;  %v8102_v2 = vld [vmem:[%s15757_s2 + $0x640] sm:$0xff] }
 0x1b3   : > { %v2506_v23 = vmax.f32 %v11767_v40, %v2464_v8  ;;  %v12264_v40 = vpack.c.bf16 %v8099_v9, %v8095_v37  ;;  %v8107_v18 = vld [vmem:[%s15757_s2 + $0x668] sm:$0xff]  ;;  %v12288_v7 = vpack.c.bf16 %v8098_v29, %v8094_v11  ;;  %v12290_v14 = vpack.c.bf16 %v8100_v15, %v8096_v60  ;;  %v8106_v34 = vld [vmem:[%s15757_s2 + $0x660] sm:$0xff]  ;;  %v8108_v8 = vld [vmem:[%s15757_s2 + $0x670] sm:$0xff] }
 0x1b4   : > { %v12246_v63 = vmax.f32 %v2503_v26, %v2505_v59  ;;  %16099 = vst [vmem:[#allocation17_spill] sm:$0xff] %v12250_v41  ;;  %16100 = vst [vmem:[#allocation18_spill] sm:$0xff] %v12252_v45  ;;  %v8109_v26 = vld [vmem:[%s15757_s2 + $0x678] sm:$0xff]  ;;  %8902 = vmatpush1.bf16.msra.mxu0 %v12250_v41  ;;  %8966 = vmatpush1.bf16.msra.mxu1 %v12252_v45  ;;  %v12300_v37 = vpack.c.bf16 %v8107_v18, %v8103_v43  ;;  %v8111_v9 = vld [vmem:[%s15757_s2 + $0x688] sm:$0xff] }
 0x1b5   : > { %v12260_v17 = vmax.f32 %v2504_v48, %v2506_v23  ;;  %16101 = vst [vmem:[#allocation19_spill] sm:$0xff] %v12264_v40  ;;  %16103 = vst [vmem:[#allocation21_spill] sm:$0xff] %v12288_v7  ;;  %8904 = vmatprep.subr.bf16.mxu0 %v12264_v40  ;;  %8968 = vmatprep.subr.bf16.mxu1 %v12266_v49  ;;  %v12302_v59 = vpack.c.bf16 %v8109_v26, %v8105_v35  ;;  %v8104_v48 = vld [vmem:[%s15757_s2 + $0x650] sm:$0xff]  ;;  %v8113_v4 = vld [vmem:[%s15757_s2 + $0x698] sm:$0xff]  ;;  %v2518_v49 = vlaneseq }
 0x1b6   : > { %16104 = vst [vmem:[#allocation22_spill] sm:$0xff] %v12290_v14  ;;  %16105 = vst [vmem:[#allocation23_spill] sm:$0xff] %v12300_v37  ;;  %v8117_v23 = vld [vmem:[%s15757_s2 + $0x6b8] sm:$0xff]  ;;  %v12324_v11 = vpack.c.bf16 %v8106_v34, %v8102_v2  ;;  %v12326_v29 = vpack.c.bf16 %v8108_v8, %v8104_v48  ;;  %v8110_v60 = vld [vmem:[%s15757_s2 + $0x680] sm:$0xff]  ;;  %v12336_v43 = vpack.c.bf16 %v8115_v50, %v8111_v9 }
 0x1b7   : > { %16106 = vst [vmem:[#allocation24_spill] sm:$0xff] %v12302_v59  ;;  %v8114_v15 = vld [vmem:[%s15757_s2 + $0x6a0] sm:$0xff]  ;;  %v12338_v18 = vpack.c.bf16 %v8117_v23, %v8113_v4  ;;  %v8112_v35 = vld [vmem:[%s15757_s2 + $0x690] sm:$0xff]  ;;  %v8119_v2 = vld [vmem:[%s15757_s2 + $0x6c8] sm:$0xff]  ;;  %v12578_v40 = vshrl.u32 %v2518_v49, 7 }
 0x1b8   : > { %8906 = vmatpush1.bf16.msra.mxu0 %v12288_v7  ;;  %8970 = vmatpush1.bf16.msra.mxu1 %v12290_v14  ;;  %16107 = vst [vmem:[#allocation25_spill] sm:$0xff] %v12324_v11  ;;  %16108 = vst [vmem:[#allocation26_spill] sm:$0xff] %v12326_v29  ;;  %v8116_v26 = vld [vmem:[%s15757_s2 + $0x6b0] sm:$0xff]  ;;  %v8123_v34 = vld [vmem:[%s15757_s2 + $0x6e8] sm:$0xff]  ;;  %v12360_v9 = vpack.c.bf16 %v8114_v15, %v8110_v60 }
 0x1b9   : > { %8908 = vmatprep.subr.bf16.mxu0 %v12300_v37  ;;  %8972 = vmatprep.subr.bf16.mxu1 %v12302_v59  ;;  %16109 = vst [vmem:[#allocation27_spill] sm:$0xff] %v12336_v43  ;;  %16110 = vst [vmem:[#allocation28_spill] sm:$0xff] %v12338_v18  ;;  %v8121_v48 = vld [vmem:[%s15757_s2 + $0x6d8] sm:$0xff]  ;;  %v12362_v50 = vpack.c.bf16 %v8116_v26, %v8112_v35  ;;  %v8118_v4 = vld [vmem:[%s15757_s2 + $0x6c0] sm:$0xff]  ;;  %v12372_v59 = vpack.c.bf16 %v8123_v34, %v8119_v2  ;;  %v15814_v45 = vsub.s32 0, %v12578_v40 }
 0x1ba   : > { %v8125_v8 = vld [vmem:[%s15757_s2 + $0x6f8] sm:$0xff]  ;;  %16111 = vst [vmem:[#allocation29_spill] sm:$0xff] %v12360_v9  ;;  %v8122_v23 = vld [vmem:[%s15757_s2 + $0x6e0] sm:$0xff]  ;;  %v8120_v60 = vld [vmem:[%s15757_s2 + $0x6d0] sm:$0xff]  ;;  %v15813_v58 = vsub.s32 1, %v12578_v40 }
 0x1bb   : > { %16112 = vst [vmem:[#allocation30_spill] sm:$0xff] %v12362_v50  ;;  %16113 = vst [vmem:[#allocation31_spill] sm:$0xff] %v12372_v59  ;;  %v8124_v15 = vld [vmem:[%s15757_s2 + $0x6f0] sm:$0xff]  ;;  %v8127_v35 = vld [vmem:[%s15757_s2 + $0x708] sm:$0xff] }
 0x1bc   : > { %8910 = vmatpush1.bf16.msra.mxu0 %v12324_v11  ;;  %8974 = vmatpush1.bf16.msra.mxu1 %v12326_v29  ;;  %v12374_v11 = vpack.c.bf16 %v8125_v8, %v8121_v48  ;;  %v8131_v26 = vld [vmem:[%s15757_s2 + $0x728] sm:$0xff]  ;;  %v8129_v2 = vld [vmem:[%s15757_s2 + $0x718] sm:$0xff]  ;;  %v12396_v48 = vpack.c.bf16 %v8122_v23, %v8118_v4  ;;  %v12398_v8 = vpack.c.bf16 %v8124_v15, %v8120_v60  ;;  %v8128_v4 = vld [vmem:[%s15757_s2 + $0x710] sm:$0xff] }
 0x1bd   : > { %8912 = vmatprep.subr.bf16.mxu0 %v12336_v43  ;;  %8976 = vmatprep.subr.bf16.mxu1 %v12338_v18  ;;  %v8133_v34 = vld [vmem:[%s15757_s2 + $0x738] sm:$0xff]  ;;  %v8126_v18 = vld [vmem:[%s15757_s2 + $0x700] sm:$0xff]  ;;  %v12405_v43 = vpack.c.bf16 %v8131_v26, %v8127_v35  ;;  %v8132_v23 = vld [vmem:[%s15757_s2 + $0x730] sm:$0xff]  ;;  %16135 = vst [vmem:[#allocation53_spill] sm:$0xff] %v12578_v40 }
 0x1be   : > { %16114 = vst [vmem:[#allocation32_spill] sm:$0xff] %v12374_v11  ;;  %16115 = vst [vmem:[#allocation33_spill] sm:$0xff] %v12396_v48  ;;  %v12407_v29 = vpack.c.bf16 %v8133_v34, %v8129_v2  ;;  %v12422_v15 = vpack.c.bf16 %v8132_v23, %v8128_v4  ;;  %v8135_v35 = vld [vmem:[%s15757_s2 + $0x748] sm:$0xff]  ;;  %v8141_v2 = vld [vmem:[%s15757_s2 + $0x778] sm:$0xff] }
 0x1bf   : > { %16116 = vst [vmem:[#allocation34_spill] sm:$0xff] %v12398_v8  ;;  %16117 = vst [vmem:[#allocation35_spill] sm:$0xff] %v12405_v43  ;;  %v8139_v26 = vld [vmem:[%s15757_s2 + $0x768] sm:$0xff]  ;;  %v8134_v34 = vld [vmem:[%s15757_s2 + $0x740] sm:$0xff] }
 0x1c0   : > { %8914 = vmatpush1.bf16.msra.mxu0 %v12360_v9  ;;  %8978 = vmatpush1.bf16.msra.mxu1 %v12362_v50  ;;  %16118 = vst [vmem:[#allocation36_spill] sm:$0xff] %v12407_v29  ;;  %v8130_v50 = vld [vmem:[%s15757_s2 + $0x720] sm:$0xff]  ;;  %16120 = vst [vmem:[#allocation38_spill] sm:$0xff] %v12422_v15 }
 0x1c1   : > { %8916 = vmatprep.subr.bf16.mxu0 %v12372_v59  ;;  %8980 = vmatprep.subr.bf16.mxu1 %v12374_v11  ;;  %v12420_v60 = vpack.c.bf16 %v8130_v50, %v8126_v18  ;;  %v8137_v18 = vld [vmem:[%s15757_s2 + $0x758] sm:$0xff]  ;;  %v12437_v50 = vpack.c.bf16 %v8139_v26, %v8135_v35  ;;  %v8138_v4 = vld [vmem:[%s15757_s2 + $0x760] sm:$0xff]  ;;  %v8136_v35 = vld [vmem:[%s15757_s2 + $0x750] sm:$0xff] }
 0x1c2   : > { %v12448_v23 = vpack.c.bf16 %v8141_v2, %v8137_v18  ;;  %v8140_v26 = vld [vmem:[%s15757_s2 + $0x770] sm:$0xff]  ;;  %v8143_v18 = vld [vmem:[%s15757_s2 + $0x788] sm:$0xff]  ;;  %v252_v39 = vld [vmem:[%s15758_s3] sm:$0x3] }
 0x1c3   : > { %16119 = vst [vmem:[#allocation37_spill] sm:$0xff] %v12420_v60  ;;  %16121 = vst [vmem:[#allocation39_spill] sm:$0xff] %v12437_v50  ;;  %v8147_v2 = vld [vmem:[%s15757_s2 + $0x7a8] sm:$0xff]  ;;  %v12587_v49 = vrot.slane %v252_v39, %v15814_v45  ;;  %v12591_v54 = vrot.slane %v252_v39, %v15813_v58 }
 0x1c4   : > { %8918 = vmatpush1.bf16.msra.mxu0 %v12396_v48  ;;  %8982 = vmatpush1.bf16.msra.mxu1 %v12398_v8  ;;  %16122 = vst [vmem:[#allocation40_spill] sm:$0xff] %v12448_v23 }
 0x1c5   : > { %8920 = vmatprep.subr.bf16.mxu0 %v12405_v43  ;;  %8984 = vmatprep.subr.bf16.mxu1 %v12407_v29 }
 0x1c8   : > { %8922 = vmatpush1.bf16.msra.mxu0 %v12420_v60  ;;  %8986 = vmatpush1.bf16.msra.mxu1 %v12422_v15  ;;  %v12450_v15 = vpack.c.bf16 %v8138_v4, %v8134_v34  ;;  %v12459_v60 = vpack.c.bf16 %v8140_v26, %v8136_v35  ;;  %v8145_v34 = vld [vmem:[%s15757_s2 + $0x798] sm:$0xff]  ;;  %v12473_v4 = vpack.c.bf16 %v8147_v2, %v8143_v18  ;;  %v8142_v26 = vld [vmem:[%s15757_s2 + $0x780] sm:$0xff]  ;;  %v8144_v18 = vld [vmem:[%s15757_s2 + $0x790] sm:$0xff] }
 0x1c9   : > { %8924 = vmatprep.subr.bf16.mxu0 %v12437_v50  ;;  %8988 = vmatprep.subr.bf16.mxu1 %v12448_v23  ;;  %v8149_v35 = vld [vmem:[%s15757_s2 + $0x7b8] sm:$0xff]  ;;  %v8148_v2 = vld [vmem:[%s15757_s2 + $0x7b0] sm:$0xff] }
 0x1ca   : > { %16123 = vst [vmem:[#allocation41_spill] sm:$0xff] %v12450_v15  ;;  %16124 = vst [vmem:[#allocation42_spill] sm:$0xff] %v12459_v60  ;;  %v12484_v23 = vpack.c.bf16 %v8149_v35, %v8145_v34  ;;  %v8155_v34 = vld [vmem:[%s15757_s2 + $0x7e8] sm:$0xff]  ;;  %v8153_v35 = vld [vmem:[%s15757_s2 + $0x7d8] sm:$0xff] }
 0x1cb   : > { %16125 = vst [vmem:[#allocation43_spill] sm:$0xff] %v12473_v4 }
 0x1cc   : > { %8926 = vmatpush1.bf16.msra.mxu0 %v12450_v15  ;;  %8990 = vmatpush1.bf16.msra.mxu1 %v12459_v60  ;;  %v8146_v15 = vld [vmem:[%s15757_s2 + $0x7a0] sm:$0xff]  ;;  %16126 = vst [vmem:[#allocation44_spill] sm:$0xff] %v12484_v23  ;;  %v12495_v60 = vpack.c.bf16 %v8148_v2, %v8144_v18  ;;  %v8157_v18 = vld [vmem:[%s15757_s2 + $0x7f8] sm:$0xff] }
 0x1cd   : > { %v12486_v50 = vpack.c.bf16 %v8146_v15, %v8142_v26  ;;  %8928 = vmatprep.subr.bf16.mxu0 %v12473_v4  ;;  %8992 = vmatprep.subr.bf16.mxu1 %v12484_v23  ;;  %v8151_v15 = vld [vmem:[%s15757_s2 + $0x7c8] sm:$0xff]  ;;  %v8150_v2 = vld [vmem:[%s15757_s2 + $0x7c0] sm:$0xff]  ;;  %v12520_v23 = vpack.c.bf16 %v8157_v18, %v8153_v35  ;;  %v4706_v18 = vld [vmem:[%s15757_s2 + $0x18] sm:$0xff] }
 0x1ce   : > { %16128 = vst [vmem:[#allocation46_spill] sm:$0xff] %v12495_v60  ;;  %v12509_v26 = vpack.c.bf16 %v8155_v34, %v8151_v15  ;;  %v8152_v15 = vld [vmem:[%s15757_s2 + $0x7d0] sm:$0xff]  ;;  %v4708_v35 = vld [vmem:[%s15757_s2 + $0x28] sm:$0xff] }
 0x1cf   : > { %16127 = vst [vmem:[#allocation45_spill] sm:$0xff] %v12486_v50  ;;  %16130 = vst [vmem:[#allocation48_spill] sm:$0xff] %v12520_v23  ;;  %v8156_v34 = vld [vmem:[%s15757_s2 + $0x7f0] sm:$0xff] }
 0x1d0   : > { %8930 = vmatpush1.bf16.msra.mxu0 %v12486_v50  ;;  %8994 = vmatpush1.bf16.msra.mxu1 %v12495_v60  ;;  %16129 = vst [vmem:[#allocation47_spill] sm:$0xff] %v12509_v26  ;;  %v8154_v50 = vld [vmem:[%s15757_s2 + $0x7e0] sm:$0xff]  ;;  %v12531_v60 = vpack.c.bf16 %v8156_v34, %v8152_v15  ;;  %v4710_v15 = vld [vmem:[%s15757_s2 + $0x38] sm:$0xff] }
 0x1d1   : > { %v12522_v4 = vpack.c.bf16 %v8154_v50, %v8150_v2  ;;  %8932 = vmatprep.subr.bf16.mxu0 %v12509_v26  ;;  %8996 = vmatprep.subr.bf16.mxu1 %v12520_v23  ;;  %v4704_v50 = vld [vmem:[%s15757_s2 + $0x8] sm:$0xff]  ;;  %v12550_v34 = vpack.c.bf16 %v4710_v15, %v4706_v18 }
 0x1d2   : > { %16132 = vst [vmem:[#allocation50_spill] sm:$0xff] %v12531_v60  ;;  %v12545_v2 = vpack.c.bf16 %v4708_v35, %v4704_v50 }
 0x1d3   : > { %16131 = vst [vmem:[#allocation49_spill] sm:$0xff] %v12522_v4  ;;  %16134 = vst [vmem:[#allocation52_spill] sm:$0xff] %v12550_v34 }
 0x1d4   : > { %8934 = vmatpush1.bf16.msra.mxu0 %v12522_v4  ;;  %8998 = vmatpush1.bf16.msra.mxu1 %v12531_v60  ;;  %16133 = vst [vmem:[#allocation51_spill] sm:$0xff] %v12545_v2 }
 0x1d5   : > { %9000 = vmatprep.subr.bf16.mxu0 %v12545_v2  ;;  %9064 = vmatprep.subr.bf16.mxu1 %v12550_v34 }
 0x204   : > { %v3469_v4 = vpop.f32.mrb[20].mxu0 }
 0x205   : > { %v3564_v23 = vpop.f32.mrb[20].mxu1  ;;  %v3471_v26 = vpop.f32.mrb[21].mxu0 }
 0x206   : > { %v3566_v29 = vpop.f32.mrb[21].mxu1 }
 0x208   : > { %v3475_v43 = vpop.f32.mrb[22].mxu0 }
 0x209   : > { %v3570_v8 = vpop.f32.mrb[22].mxu1  ;;  %v3477_v48 = vpop.f32.mrb[23].mxu0 }
 0x20a   : > { %v3572_v60 = vpop.f32.mrb[23].mxu1 }
 0x20c   : > { %v12554_v50 = vpop.f32.mrb[24].mxu0 }
 0x20d   : > { %v12556_v35 = vpop.f32.mrb[24].mxu1  ;;  %v12558_v11 = vpop.f32.mrb[25].mxu0 }
 0x20e   : > { %v12560_v18 = vpop.f32.mrb[25].mxu1 }
 0x210   : > { %v12562_v15 = vpop.f32.mrb[26].mxu0 }
 0x211   : > { %v12564_v2 = vpop.f32.mrb[26].mxu1  ;;  %v12566_v34 = vpop.f32.mrb[27].mxu0 }
 0x212   : > { %v12568_v59 = vpop.f32.mrb[27].mxu1 }
 0x214   : > { %v12570_v9 = vpop.f32.mrb[28].mxu0 }
 0x215   : > { %v12572_v37 = vpop.f32.mrb[28].mxu1  ;;  %v12574_v14 = vpop.f32.mrb[29].mxu0 }
 0x216   : > { %v12576_v7 = vpop.f32.mrb[29].mxu1 }
 0x268   : > { %v4499_v41 = vpop.f32.mrb[30].mxu0 }
 0x269   : > { %v4643_v25 = vmax.f32 %v3469_v4, %v4499_v41  ;;  %v4594_v24 = vpop.f32.mrb[30].mxu1  ;;  %v4501_v6 = vpop.f32.mrb[31].mxu0 }
 0x26a   : > { %v4645_v31 = vmax.f32 %v3564_v23, %v4594_v24  ;;  %v4644_v5 = vmax.f32 %v3471_v26, %v4501_v6  ;;  %v4596_v42 = vpop.f32.mrb[31].mxu1 }
 0x26b   : > { %v4646_v53 = vmax.f32 %v3566_v29, %v4596_v42  ;;  %v4703_v42 = vld [vmem:[%s15757_s2] sm:$0xff] }
 0x26c   : > { %v4663_v56 = vmax.f32 %v4643_v25, %v4645_v31  ;;  %v4505_v55 = vpop.f32.mrb[32].mxu0  ;;  %v4707_v31 = vld [vmem:[%s15757_s2 + $0x20] sm:$0xff] }
 0x26d   : > { %v4664_v62 = vmax.f32 %v4644_v5, %v4646_v53  ;;  %v4647_v12 = vmax.f32 %v3475_v43, %v4505_v55  ;;  %v4600_v1 = vpop.f32.mrb[32].mxu1  ;;  %v4507_v41 = vpop.f32.mrb[33].mxu0  ;;  %v4705_v55 = vld [vmem:[%s15757_s2 + $0x10] sm:$0xff]  ;;  %v4712_v43 = vld [vmem:[%s15757_s2 + $0x48] sm:$0xff] }
 0x26e   : > { %v4673_v4 = vadd.f32 %v4663_v56, %v12587_v49  ;;  %v4649_v24 = vmax.f32 %v3570_v8, %v4600_v1  ;;  %v4648_v6 = vmax.f32 %v3477_v48, %v4507_v41  ;;  %v4602_v23 = vpop.f32.mrb[33].mxu1  ;;  %v4709_v1 = vld [vmem:[%s15757_s2 + $0x30] sm:$0xff]  ;;  %v12607_v56 = vpop.permute.xlu0 %2550 }
 0x26f   : > { %v4674_v25 = vadd.f32 %v4664_v62, %v12591_v54  ;;  %v4650_v39 = vmax.f32 %v3572_v60, %v4602_v23  ;;  %v4716_v62 = vld [vmem:[%s15757_s2 + $0x68] sm:$0xff]  ;;  %v12616_v23 = vpack.c.bf16 %v4707_v31, %v4703_v42  ;;  %v4711_v42 = vld [vmem:[%s15757_s2 + $0x40] sm:$0xff] }
 0x270   : > { %v4683_v53 = vmax.f32 %v4673_v4, 0.0  ;;  %v4665_v5 = vmax.f32 %v4647_v12, %v4649_v24  ;;  %v4511_v29 = vpop.f32.mrb[34].mxu0  ;;  %v4714_v12 = vld [vmem:[%s15757_s2 + $0x58] sm:$0xff]  ;;  %v4715_v31 = vld [vmem:[%s15757_s2 + $0x60] sm:$0xff] }
 0x271   : > { %v4684_v48 = vmax.f32 %v4674_v25, 0.0  ;;  %v4666_v8 = vmax.f32 %v4648_v6, %v4650_v39  ;;  %v4651_v60 = vmax.f32 %v12554_v50, %v4511_v29  ;;  %v4606_v26 = vpop.f32.mrb[34].mxu1  ;;  %v4513_v41 = vpop.f32.mrb[35].mxu0  ;;  %v4718_v4 = vld [vmem:[%s15757_s2 + $0x78] sm:$0xff]  ;;  %v12627_v50 = vpack.c.bf16 %v4709_v1, %v4705_v55  ;;  %v4717_v55 = vld [vmem:[%s15757_s2 + $0x70] sm:$0xff] }
 0x272   : > { %v4675_v24 = vadd.f32 %v4665_v5, %v12587_v49  ;;  %v4653_v58 = vmax.f32 %v12556_v35, %v4606_v26  ;;  %v4652_v6 = vmax.f32 %v12558_v11, %v4513_v41  ;;  %v4608_v25 = vpop.f32.mrb[35].mxu1  ;;  %v12640_v29 = vpack.c.bf16 %v4716_v62, %v4712_v43  ;;  %v4713_v11 = vld [vmem:[%s15757_s2 + $0x50] sm:$0xff] }
 0x273   : > { %v12636_v39 = vmul.f32 %v4684_v48, %v12607_v56  ;;  %v4676_v5 = vadd.f32 %v4666_v8, %v12591_v54  ;;  %v4654_v35 = vmax.f32 %v12560_v18, %v4608_v25  ;;  %v12649_v1 = vmul.f32 %v4683_v53, %v12607_v56  ;;  %v4720_v53 = vld [vmem:[%s15757_s2 + $0x88] sm:$0xff] }
 0x274   : > { %16136 = vst [vmem:[#allocation54_spill] sm:$0xff] %v12640_v29  ;;  %v4685_v26 = vmax.f32 %v4675_v24, 0.0  ;;  %v4667_v48 = vmax.f32 %v4651_v60, %v4653_v58  ;;  %v4517_v41 = vpop.f32.mrb[36].mxu0  ;;  %v12651_v45 = vpack.c.bf16 %v4718_v4, %v4714_v12  ;;  %v12656_v40 = vpack.c.bf16 %v4715_v31, %v4711_v42  ;;  %v4724_v58 = vld [vmem:[%s15757_s2 + $0xa8] sm:$0xff]  ;;  %v12664_v60 = vpop.permute.xlu0 %2555 }
 0x275   : > { %v4686_v8 = vmax.f32 %v4676_v5, 0.0  ;;  %v4668_v18 = vmax.f32 %v4652_v6, %v4654_v35  ;;  %v4655_v43 = vmax.f32 %v12562_v15, %v4517_v41  ;;  %v4612_v62 = vpop.f32.mrb[36].mxu1  ;;  %5024 = vmatprep.mubr.f32.mxu0 %v12636_v39  ;;  %5119 = vmatprep.mubr.f32.mxu1 %v12636_v39  ;;  %v4519_v25 = vpop.f32.mrb[37].mxu0  ;;  %v12670_v6 = vpack.c.bf16 %v4717_v55, %v4713_v11  ;;  %v4719_v41 = vld [vmem:[%s15757_s2 + $0x80] sm:$0xff] }
 0x276   : > { %16137 = vst [vmem:[#allocation55_spill] sm:$0xff] %v12651_v45  ;;  %16138 = vst [vmem:[#allocation56_spill] sm:$0xff] %v12656_v40  ;;  %v4677_v15 = vadd.f32 %v4667_v48, %v12587_v49  ;;  %v4657_v12 = vmax.f32 %v12564_v2, %v4612_v62  ;;  %v4656_v4 = vmax.f32 %v12566_v34, %v4519_v25  ;;  %v4614_v24 = vpop.f32.mrb[37].mxu1  ;;  %5025 = vmatmul.mubr.f32.vlgmr.msra.gmra.mrb[40].mxu0 %v12649_v1  ;;  %v4722_v2 = vld [vmem:[%s15757_s2 + $0x98] sm:$0xff]  ;;  %v12685_v35 = vpop.permute.xlu1 %2560 }
 0x277   : > { %16139 = vst [vmem:[#allocation57_spill] sm:$0xff] %v12670_v6  ;;  %v12673_v42 = vmul.f32 %v4686_v8, %v12664_v60  ;;  %v4678_v31 = vadd.f32 %v4668_v18, %v12591_v54  ;;  %v4658_v5 = vmax.f32 %v12568_v59, %v4614_v24  ;;  %5120 = vmatmul.mubr.f32.vlgmr.msra.gmra.mrb[40].mxu1 %v12649_v1  ;;  %v4726_v34 = vld [vmem:[%s15757_s2 + $0xb8] sm:$0xff]  ;;  %v4723_v8 = vld [vmem:[%s15757_s2 + $0xa0] sm:$0xff] }
 0x278   : > { %9002 = vmatpush1.bf16.msra.mxu0 %v12616_v23  ;;  %v12688_v11 = vmul.f32 %v4685_v26, %v12664_v60  ;;  %v4669_v55 = vmax.f32 %v4655_v43, %v4657_v12  ;;  %9066 = vmatpush1.bf16.msra.mxu1 %v12627_v50  ;;  %v4523_v59 = vpop.f32.mrb[38].mxu0  ;;  %v12692_v48 = vpack.c.bf16 %v4724_v58, %v4720_v53  ;;  %v4687_v18 = vmax.f32 %v4677_v15, 0.0  ;;  %v4721_v58 = vld [vmem:[%s15757_s2 + $0x90] sm:$0xff] }
 0x279   : > { %16140 = vst [vmem:[#allocation58_spill] sm:$0xff] %v12673_v42  ;;  %9004 = vmatprep.subr.bf16.mxu0 %v12640_v29  ;;  %v4688_v62 = vmax.f32 %v4678_v31, 0.0  ;;  %v4670_v26 = vmax.f32 %v4656_v4, %v4658_v5  ;;  %v4659_v43 = vmax.f32 %v12570_v9, %v4523_v59  ;;  %v4618_v25 = vpop.f32.mrb[38].mxu1  ;;  %5030 = vmatprep.mubr.f32.mxu0 %v12673_v42  ;;  %v4525_v53 = vpop.f32.mrb[39].mxu0  ;;  %v4725_v12 = vld [vmem:[%s15757_s2 + $0xb0] sm:$0xff]  ;;  %v4728_v5 = vld [vmem:[%s15757_s2 + $0xc8] sm:$0xff] }
 0x27a   : > { %16141 = vst [vmem:[#allocation59_spill] sm:$0xff] %v12688_v11  ;;  %16142 = vst [vmem:[#allocation60_spill] sm:$0xff] %v12692_v48  ;;  %5125 = vmatprep.mubr.f32.mxu1 %v12673_v42  ;;  %v4679_v15 = vadd.f32 %v4669_v55, %v12587_v49  ;;  %v4661_v4 = vmax.f32 %v12572_v37, %v4618_v25  ;;  %9068 = vmatprep.subr.bf16.mxu1 %v12651_v45  ;;  %v4620_v24 = vpop.f32.mrb[39].mxu1  ;;  %v4730_v37 = vld [vmem:[%s15757_s2 + $0xd8] sm:$0xff] }
 0x27b   : > { %v4660_v9 = vmax.f32 %v12574_v14, %v4525_v53  ;;  %v12713_v31 = vpack.c.bf16 %v4726_v34, %v4722_v2  ;;  %v12719_v59 = vmul.f32 %v4688_v62, %v12685_v35  ;;  %v4680_v29 = vadd.f32 %v4670_v26, %v12591_v54  ;;  %5031 = vmatmul.mubr.f32.gmra.mrb[42].mxu0 %v12688_v11  ;;  %v4732_v14 = vld [vmem:[%s15757_s2 + $0xe8] sm:$0xff]  ;;  %v4734_v2 = vld [vmem:[%s15757_s2 + $0xf8] sm:$0xff]  ;;  %v4727_v26 = vld [vmem:[%s15757_s2 + $0xc0] sm:$0xff] }
 0x27c   : > { %v4662_v55 = vmax.f32 %v12576_v7, %v4620_v24  ;;  %5126 = vmatmul.mubr.f32.gmra.mrb[42].mxu1 %v12688_v11  ;;  %v4671_v34 = vmax.f32 %v4659_v43, %v4661_v4  ;;  %9006 = vmatpush1.bf16.msra.mxu0 %v12656_v40  ;;  %v12736_v7 = vpack.c.bf16 %v4723_v8, %v4719_v41  ;;  %v4689_v53 = vmax.f32 %v4679_v15, 0.0  ;;  %v4731_v41 = vld [vmem:[%s15757_s2 + $0xe0] sm:$0xff]  ;;  %v4729_v8 = vld [vmem:[%s15757_s2 + $0xd0] sm:$0xff]  ;;  %v12757_v43 = vpop.permute.xlu1 %2565  ;;  %v4736_v15 = vld [vmem:[%s15757_s2 + $0x108] sm:$0xff] }
 0x27d   : > { %16143 = vst [vmem:[#allocation61_spill] sm:$0xff] %v12713_v31  ;;  %16144 = vst [vmem:[#allocation62_spill] sm:$0xff] %v12719_v59  ;;  %9070 = vmatpush1.bf16.msra.mxu1 %v12670_v6  ;;  %v12738_v62 = vpack.c.bf16 %v4725_v12, %v4721_v58  ;;  %v12744_v25 = vmul.f32 %v4687_v18, %v12685_v35  ;;  %v4690_v24 = vmax.f32 %v4680_v29, 0.0  ;;  %5036 = vmatprep.mubr.f32.mxu0 %v12719_v59  ;;  %v4733_v18 = vld [vmem:[%s15757_s2 + $0xf0] sm:$0xff] }
 0x27e   : > { %16145 = vst [vmem:[#allocation63_spill] sm:$0xff] %v12736_v7  ;;  %v4672_v45 = vmax.f32 %v4660_v9, %v4662_v55  ;;  %5131 = vmatprep.mubr.f32.mxu1 %v12719_v59  ;;  %v4681_v29 = vadd.f32 %v4671_v34, %v12587_v49  ;;  %9008 = vmatprep.subr.bf16.mxu0 %v12692_v48  ;;  %v4758_v48 = vld [vmem:[%s15757_s2 + $0x1b8] sm:$0xff] }
 0x27f   : > { %16146 = vst [vmem:[#allocation64_spill] sm:$0xff] %v12738_v62  ;;  %16147 = vst [vmem:[#allocation65_spill] sm:$0xff] %v12744_v25  ;;  %9072 = vmatprep.subr.bf16.mxu1 %v12713_v31  ;;  %v12762_v58 = vpack.c.bf16 %v4732_v14, %v4728_v5  ;;  %v12764_v12 = vpack.c.bf16 %v4734_v2, %v4730_v37  ;;  %v2529_v4 = vadd.f32 %v12591_v54, %v12087_v38  ;;  %v4740_v5 = vld [vmem:[%s15757_s2 + $0x128] sm:$0xff]  ;;  %v4738_v14 = vld [vmem:[%s15757_s2 + $0x118] sm:$0xff] }
 0x280   : > { %v12772_v9 = vmul.f32 %v4690_v24, %v12757_v43  ;;  %v4682_v55 = vadd.f32 %v4672_v45, %v12591_v54  ;;  %5037 = vmatmul.mubr.f32.gmra.mrb[44].mxu0 %v12744_v25  ;;  %5132 = vmatmul.mubr.f32.gmra.mrb[44].mxu1 %v12744_v25  ;;  %v4742_v38 = vld [vmem:[%s15757_s2 + $0x138] sm:$0xff]  ;;  %v12788_v45 = vpack.c.bf16 %v4731_v41, %v4727_v26  ;;  %v4735_v2 = vld [vmem:[%s15757_s2 + $0x100] sm:$0xff]  ;;  %v4691_v24 = vmax.f32 %v4681_v29, 0.0  ;;  %v4737_v41 = vld [vmem:[%s15757_s2 + $0x110] sm:$0xff] }
 0x281   : > { %16148 = vst [vmem:[#allocation66_spill] sm:$0xff] %v12762_v58  ;;  %16149 = vst [vmem:[#allocation67_spill] sm:$0xff] %v12764_v12  ;;  %9010 = vmatpush1.bf16.msra.mxu0 %v12736_v7  ;;  %9074 = vmatpush1.bf16.msra.mxu1 %v12738_v62  ;;  %v12790_v37 = vpack.c.bf16 %v4733_v18, %v4729_v8  ;;  %v12796_v34 = vmul.f32 %v4689_v53, %v12757_v43  ;;  %v4739_v26 = vld [vmem:[%s15757_s2 + $0x120] sm:$0xff]  ;;  %v4741_v8 = vld [vmem:[%s15757_s2 + $0x130] sm:$0xff]  ;;  %v12809_v53 = vpop.permute.xlu0 %2570  ;;  %v2539_v62 = vmax.f32 %v2529_v4, 0.0 }
 0x282   : > { %16150 = vst [vmem:[#allocation68_spill] sm:$0xff] %v12772_v9  ;;  %16151 = vst [vmem:[#allocation69_spill] sm:$0xff] %v12788_v45  ;;  %v4692_v31 = vmax.f32 %v4682_v55, 0.0  ;;  %5042 = vmatprep.mubr.f32.mxu0 %v12772_v9  ;;  %5137 = vmatprep.mubr.f32.mxu1 %v12772_v9  ;;  %v12813_v18 = vpack.c.bf16 %v4740_v5, %v4736_v15  ;;  %v12815_v29 = vpack.c.bf16 %v4742_v38, %v4738_v14  ;;  %v4744_v55 = vld [vmem:[%s15757_s2 + $0x148] sm:$0xff]  ;;  %v4746_v15 = vld [vmem:[%s15757_s2 + $0x158] sm:$0xff] }
 0x283   : > { %16152 = vst [vmem:[#allocation70_spill] sm:$0xff] %v12790_v37  ;;  %9012 = vmatprep.subr.bf16.mxu0 %v12762_v58  ;;  %9076 = vmatprep.subr.bf16.mxu1 %v12764_v12  ;;  %v4748_v12 = vld [vmem:[%s15757_s2 + $0x168] sm:$0xff]  ;;  %v4750_v5 = vld [vmem:[%s15757_s2 + $0x178] sm:$0xff]  ;;  %v12838_v4 = vpack.c.bf16 %v4741_v8, %v4737_v41  ;;  %v4743_v14 = vld [vmem:[%s15757_s2 + $0x140] sm:$0xff]  ;;  %v12847_v58 = vmul.f32 %v4691_v24, %v12809_v53 }
 0x284   : > { %16153 = vst [vmem:[#allocation71_spill] sm:$0xff] %v12813_v18  ;;  %16154 = vst [vmem:[#allocation72_spill] sm:$0xff] %v12815_v29  ;;  %v12821_v7 = vmul.f32 %v4692_v31, %v12809_v53  ;;  %5043 = vmatmul.mubr.f32.gmra.mrb[46].mxu0 %v12796_v34  ;;  %5138 = vmatmul.mubr.f32.gmra.mrb[46].mxu1 %v12796_v34  ;;  %v12836_v31 = vpack.c.bf16 %v4739_v26, %v4735_v2  ;;  %v4747_v38 = vld [vmem:[%s15757_s2 + $0x160] sm:$0xff]  ;;  %v4745_v2 = vld [vmem:[%s15757_s2 + $0x150] sm:$0xff] }
 0x285   : > { %9014 = vmatpush1.bf16.msra.mxu0 %v12788_v45  ;;  %9078 = vmatpush1.bf16.msra.mxu1 %v12790_v37  ;;  %16156 = vst [vmem:[#allocation74_spill] sm:$0xff] %v12838_v4  ;;  %v4749_v26 = vld [vmem:[%s15757_s2 + $0x170] sm:$0xff]  ;;  %v4752_v41 = vld [vmem:[%s15757_s2 + $0x188] sm:$0xff]  ;;  %v12862_v24 = vpack.c.bf16 %v4748_v12, %v4744_v55  ;;  %v12864_v8 = vpack.c.bf16 %v4750_v5, %v4746_v15  ;;  %v4754_v45 = vld [vmem:[%s15757_s2 + $0x198] sm:$0xff] }
 0x286   : > { %16155 = vst [vmem:[#allocation73_spill] sm:$0xff] %v12836_v31  ;;  %5048 = vmatprep.mubr.f32.mxu0 %v12821_v7  ;;  %5143 = vmatprep.mubr.f32.mxu1 %v12821_v7  ;;  %v4756_v37 = vld [vmem:[%s15757_s2 + $0x1a8] sm:$0xff]  ;;  %v12882_v12 = vpack.c.bf16 %v4747_v38, %v4743_v14  ;;  %v12884_v55 = vpack.c.bf16 %v4749_v26, %v4745_v2  ;;  %v4751_v15 = vld [vmem:[%s15757_s2 + $0x180] sm:$0xff]  ;;  %v4753_v14 = vld [vmem:[%s15757_s2 + $0x190] sm:$0xff] }
 0x287   : > { %9016 = vmatprep.subr.bf16.mxu0 %v12813_v18  ;;  %9080 = vmatprep.subr.bf16.mxu1 %v12815_v29  ;;  %16157 = vst [vmem:[#allocation75_spill] sm:$0xff] %v12862_v24  ;;  %16158 = vst [vmem:[#allocation76_spill] sm:$0xff] %v12864_v8  ;;  %v12876_v18 = vmul.f32 %v12607_v56, %v2539_v62  ;;  %v4755_v62 = vld [vmem:[%s15757_s2 + $0x1a0] sm:$0xff]  ;;  %v12894_v5 = vpack.c.bf16 %v4756_v37, %v4752_v41  ;;  %v4757_v38 = vld [vmem:[%s15757_s2 + $0x1b0] sm:$0xff] }
 0x288   : > { %5049 = vmatmul.mubr.f32.gmra.mrb[48].mxu0 %v12847_v58  ;;  %5144 = vmatmul.mubr.f32.gmra.mrb[48].mxu1 %v12847_v58  ;;  %16159 = vst [vmem:[#allocation77_spill] sm:$0xff] %v12882_v12  ;;  %16160 = vst [vmem:[#allocation78_spill] sm:$0xff] %v12884_v55  ;;  %v4760_v2 = vld [vmem:[%s15757_s2 + $0x1c8] sm:$0xff]  ;;  %v4766_v37 = vld [vmem:[%s15757_s2 + $0x1f8] sm:$0xff]  ;;  %v12920_v26 = vpack.c.bf16 %v4755_v62, %v4751_v15  ;;  %v12922_v41 = vpack.c.bf16 %v4757_v38, %v4753_v14 }
 0x289   : > { %9018 = vmatpush1.bf16.msra.mxu0 %v12836_v31  ;;  %9082 = vmatpush1.bf16.msra.mxu1 %v12838_v4  ;;  %16161 = vst [vmem:[#allocation79_spill] sm:$0xff] %v12894_v5  ;;  %v12896_v31 = vpack.c.bf16 %v4758_v48, %v4754_v45  ;;  %v4764_v48 = vld [vmem:[%s15757_s2 + $0x1e8] sm:$0xff]  ;;  %v4762_v45 = vld [vmem:[%s15757_s2 + $0x1d8] sm:$0xff]  ;;  %v4761_v15 = vld [vmem:[%s15757_s2 + $0x1d0] sm:$0xff] }
 0x28a   : > { %5214 = vmatprep.mubr.f32.mxu0 %v12876_v18  ;;  %5309 = vmatprep.mubr.f32.mxu1 %v12876_v18  ;;  %16163 = vst [vmem:[#allocation81_spill] sm:$0xff] %v12920_v26  ;;  %16164 = vst [vmem:[#allocation82_spill] sm:$0xff] %v12922_v41  ;;  %v12932_v4 = vpack.c.bf16 %v4764_v48, %v4760_v2  ;;  %v4765_v62 = vld [vmem:[%s15757_s2 + $0x1f0] sm:$0xff]  ;;  %v4768_v14 = vld [vmem:[%s15757_s2 + $0x208] sm:$0xff] }
 0x28b   : > { %16162 = vst [vmem:[#allocation80_spill] sm:$0xff] %v12896_v31  ;;  %9020 = vmatprep.subr.bf16.mxu0 %v12862_v24  ;;  %9084 = vmatprep.subr.bf16.mxu1 %v12864_v8  ;;  %v4759_v8 = vld [vmem:[%s15757_s2 + $0x1c0] sm:$0xff]  ;;  %v4772_v38 = vld [vmem:[%s15757_s2 + $0x228] sm:$0xff]  ;;  %v4770_v2 = vld [vmem:[%s15757_s2 + $0x218] sm:$0xff] }
 0x28c   : > { %v4763_v24 = vld [vmem:[%s15757_s2 + $0x1e0] sm:$0xff]  ;;  %16165 = vst [vmem:[#allocation83_spill] sm:$0xff] %v12932_v4  ;;  %v4774_v48 = vld [vmem:[%s15757_s2 + $0x238] sm:$0xff] }
 0x28d   : > { %9022 = vmatpush1.bf16.msra.mxu0 %v12882_v12  ;;  %9086 = vmatpush1.bf16.msra.mxu1 %v12884_v55  ;;  %v12934_v12 = vpack.c.bf16 %v4766_v37, %v4762_v45  ;;  %v12956_v45 = vpack.c.bf16 %v4763_v24, %v4759_v8  ;;  %v12958_v37 = vpack.c.bf16 %v4765_v62, %v4761_v15  ;;  %v4769_v24 = vld [vmem:[%s15757_s2 + $0x210] sm:$0xff]  ;;  %v4776_v15 = vld [vmem:[%s15757_s2 + $0x248] sm:$0xff] }
 0x28e   : > { %9024 = vmatprep.subr.bf16.mxu0 %v12894_v5  ;;  %9088 = vmatprep.subr.bf16.mxu1 %v12896_v31  ;;  %v4767_v31 = vld [vmem:[%s15757_s2 + $0x200] sm:$0xff]  ;;  %v12968_v55 = vpack.c.bf16 %v4772_v38, %v4768_v14  ;;  %v4773_v8 = vld [vmem:[%s15757_s2 + $0x230] sm:$0xff]  ;;  %v4780_v62 = vld [vmem:[%s15757_s2 + $0x268] sm:$0xff] }
 0x28f   : > { %16166 = vst [vmem:[#allocation84_spill] sm:$0xff] %v12934_v12  ;;  %16167 = vst [vmem:[#allocation85_spill] sm:$0xff] %v12956_v45  ;;  %v4771_v5 = vld [vmem:[%s15757_s2 + $0x220] sm:$0xff]  ;;  %v4778_v14 = vld [vmem:[%s15757_s2 + $0x258] sm:$0xff] }
 0x290   : > { %16168 = vst [vmem:[#allocation86_spill] sm:$0xff] %v12958_v37  ;;  %16169 = vst [vmem:[#allocation87_spill] sm:$0xff] %v12968_v55  ;;  %v4782_v38 = vld [vmem:[%s15757_s2 + $0x278] sm:$0xff] }
 0x291   : > { %9026 = vmatpush1.bf16.msra.mxu0 %v12920_v26  ;;  %9090 = vmatpush1.bf16.msra.mxu1 %v12922_v41  ;;  %v12970_v26 = vpack.c.bf16 %v4774_v48, %v4770_v2  ;;  %v12992_v2 = vpack.c.bf16 %v4771_v5, %v4767_v31  ;;  %v12994_v48 = vpack.c.bf16 %v4773_v8, %v4769_v24  ;;  %v4777_v31 = vld [vmem:[%s15757_s2 + $0x250] sm:$0xff]  ;;  %v4784_v24 = vld [vmem:[%s15757_s2 + $0x288] sm:$0xff] }
 0x292   : > { %9028 = vmatprep.subr.bf16.mxu0 %v12932_v4  ;;  %9092 = vmatprep.subr.bf16.mxu1 %v12934_v12  ;;  %v4775_v12 = vld [vmem:[%s15757_s2 + $0x240] sm:$0xff]  ;;  %v13004_v41 = vpack.c.bf16 %v4780_v62, %v4776_v15  ;;  %v4781_v5 = vld [vmem:[%s15757_s2 + $0x270] sm:$0xff]  ;;  %v4788_v8 = vld [vmem:[%s15757_s2 + $0x2a8] sm:$0xff] }
 0x293   : > { %16170 = vst [vmem:[#allocation88_spill] sm:$0xff] %v12970_v26  ;;  %16171 = vst [vmem:[#allocation89_spill] sm:$0xff] %v12992_v2  ;;  %v4779_v4 = vld [vmem:[%s15757_s2 + $0x260] sm:$0xff]  ;;  %v4786_v15 = vld [vmem:[%s15757_s2 + $0x298] sm:$0xff] }
 0x294   : > { %16172 = vst [vmem:[#allocation90_spill] sm:$0xff] %v12994_v48  ;;  %16173 = vst [vmem:[#allocation91_spill] sm:$0xff] %v13004_v41  ;;  %v4790_v62 = vld [vmem:[%s15757_s2 + $0x2b8] sm:$0xff] }
 0x295   : > { %9030 = vmatpush1.bf16.msra.mxu0 %v12956_v45  ;;  %9094 = vmatpush1.bf16.msra.mxu1 %v12958_v37  ;;  %v13006_v45 = vpack.c.bf16 %v4782_v38, %v4778_v14  ;;  %v13028_v14 = vpack.c.bf16 %v4779_v4, %v4775_v12  ;;  %v13030_v38 = vpack.c.bf16 %v4781_v5, %v4777_v31  ;;  %v4785_v4 = vld [vmem:[%s15757_s2 + $0x290] sm:$0xff]  ;;  %v4792_v31 = vld [vmem:[%s15757_s2 + $0x2c8] sm:$0xff] }
 0x296   : > { %9032 = vmatprep.subr.bf16.mxu0 %v12968_v55  ;;  %9096 = vmatprep.subr.bf16.mxu1 %v12970_v26  ;;  %v4783_v26 = vld [vmem:[%s15757_s2 + $0x280] sm:$0xff]  ;;  %v13040_v37 = vpack.c.bf16 %v4788_v8, %v4784_v24  ;;  %v4789_v12 = vld [vmem:[%s15757_s2 + $0x2b0] sm:$0xff]  ;;  %v4796_v5 = vld [vmem:[%s15757_s2 + $0x2e8] sm:$0xff] }
 0x297   : > { %16174 = vst [vmem:[#allocation92_spill] sm:$0xff] %v13006_v45  ;;  %16175 = vst [vmem:[#allocation93_spill] sm:$0xff] %v13028_v14  ;;  %v4787_v55 = vld [vmem:[%s15757_s2 + $0x2a0] sm:$0xff]  ;;  %v4794_v24 = vld [vmem:[%s15757_s2 + $0x2d8] sm:$0xff] }
 0x298   : > { %16176 = vst [vmem:[#allocation94_spill] sm:$0xff] %v13030_v38  ;;  %16177 = vst [vmem:[#allocation95_spill] sm:$0xff] %v13040_v37  ;;  %v4798_v8 = vld [vmem:[%s15757_s2 + $0x2f8] sm:$0xff] }
 0x299   : > { %9034 = vmatpush1.bf16.msra.mxu0 %v12992_v2  ;;  %9098 = vmatpush1.bf16.msra.mxu1 %v12994_v48  ;;  %v13042_v2 = vpack.c.bf16 %v4790_v62, %v4786_v15  ;;  %v13064_v15 = vpack.c.bf16 %v4787_v55, %v4783_v26  ;;  %v13066_v62 = vpack.c.bf16 %v4789_v12, %v4785_v4  ;;  %v4793_v55 = vld [vmem:[%s15757_s2 + $0x2d0] sm:$0xff]  ;;  %v4800_v4 = vld [vmem:[%s15757_s2 + $0x308] sm:$0xff] }
 0x29a   : > { %9036 = vmatprep.subr.bf16.mxu0 %v13004_v41  ;;  %9100 = vmatprep.subr.bf16.mxu1 %v13006_v45  ;;  %v4791_v45 = vld [vmem:[%s15757_s2 + $0x2c0] sm:$0xff]  ;;  %v13076_v48 = vpack.c.bf16 %v4796_v5, %v4792_v31  ;;  %v4797_v26 = vld [vmem:[%s15757_s2 + $0x2f0] sm:$0xff]  ;;  %v4804_v12 = vld [vmem:[%s15757_s2 + $0x328] sm:$0xff] }
 0x29b   : > { %16178 = vst [vmem:[#allocation96_spill] sm:$0xff] %v13042_v2  ;;  %16179 = vst [vmem:[#allocation97_spill] sm:$0xff] %v13064_v15  ;;  %v4795_v41 = vld [vmem:[%s15757_s2 + $0x2e0] sm:$0xff]  ;;  %v4802_v31 = vld [vmem:[%s15757_s2 + $0x318] sm:$0xff] }
 0x29c   : > { %16180 = vst [vmem:[#allocation98_spill] sm:$0xff] %v13066_v62  ;;  %16181 = vst [vmem:[#allocation99_spill] sm:$0xff] %v13076_v48  ;;  %v4806_v5 = vld [vmem:[%s15757_s2 + $0x338] sm:$0xff] }
 0x29d   : > { %9038 = vmatpush1.bf16.msra.mxu0 %v13028_v14  ;;  %9102 = vmatpush1.bf16.msra.mxu1 %v13030_v38  ;;  %v13078_v14 = vpack.c.bf16 %v4798_v8, %v4794_v24  ;;  %v13100_v24 = vpack.c.bf16 %v4795_v41, %v4791_v45  ;;  %v13102_v8 = vpack.c.bf16 %v4797_v26, %v4793_v55  ;;  %v4801_v41 = vld [vmem:[%s15757_s2 + $0x310] sm:$0xff]  ;;  %v4808_v55 = vld [vmem:[%s15757_s2 + $0x348] sm:$0xff] }
 0x29e   : > { %9040 = vmatprep.subr.bf16.mxu0 %v13040_v37  ;;  %9104 = vmatprep.subr.bf16.mxu1 %v13042_v2  ;;  %v4799_v2 = vld [vmem:[%s15757_s2 + $0x300] sm:$0xff]  ;;  %v13112_v38 = vpack.c.bf16 %v4804_v12, %v4800_v4  ;;  %v4805_v45 = vld [vmem:[%s15757_s2 + $0x330] sm:$0xff]  ;;  %v4812_v26 = vld [vmem:[%s15757_s2 + $0x368] sm:$0xff] }
 0x29f   : > { %16182 = vst [vmem:[#allocation100_spill] sm:$0xff] %v13078_v14  ;;  %16183 = vst [vmem:[#allocation101_spill] sm:$0xff] %v13100_v24  ;;  %v4803_v37 = vld [vmem:[%s15757_s2 + $0x320] sm:$0xff]  ;;  %v4810_v4 = vld [vmem:[%s15757_s2 + $0x358] sm:$0xff] }
 0x2a0   : > { %16184 = vst [vmem:[#allocation102_spill] sm:$0xff] %v13102_v8  ;;  %16185 = vst [vmem:[#allocation103_spill] sm:$0xff] %v13112_v38  ;;  %v4814_v12 = vld [vmem:[%s15757_s2 + $0x378] sm:$0xff] }
 0x2a1   : > { %9042 = vmatpush1.bf16.msra.mxu0 %v13064_v15  ;;  %9106 = vmatpush1.bf16.msra.mxu1 %v13066_v62  ;;  %v13114_v15 = vpack.c.bf16 %v4806_v5, %v4802_v31  ;;  %v13136_v31 = vpack.c.bf16 %v4803_v37, %v4799_v2  ;;  %v13138_v5 = vpack.c.bf16 %v4805_v45, %v4801_v41  ;;  %v4809_v37 = vld [vmem:[%s15757_s2 + $0x350] sm:$0xff]  ;;  %v4816_v41 = vld [vmem:[%s15757_s2 + $0x388] sm:$0xff] }
 0x2a2   : > { %9044 = vmatprep.subr.bf16.mxu0 %v13076_v48  ;;  %9108 = vmatprep.subr.bf16.mxu1 %v13078_v14  ;;  %v4807_v14 = vld [vmem:[%s15757_s2 + $0x340] sm:$0xff]  ;;  %v13148_v62 = vpack.c.bf16 %v4812_v26, %v4808_v55  ;;  %v4813_v2 = vld [vmem:[%s15757_s2 + $0x370] sm:$0xff]  ;;  %v4820_v45 = vld [vmem:[%s15757_s2 + $0x3a8] sm:$0xff] }
 0x2a3   : > { %16186 = vst [vmem:[#allocation104_spill] sm:$0xff] %v13114_v15  ;;  %16187 = vst [vmem:[#allocation105_spill] sm:$0xff] %v13136_v31  ;;  %v4811_v48 = vld [vmem:[%s15757_s2 + $0x360] sm:$0xff]  ;;  %v4818_v55 = vld [vmem:[%s15757_s2 + $0x398] sm:$0xff] }
 0x2a4   : > { %16188 = vst [vmem:[#allocation106_spill] sm:$0xff] %v13138_v5  ;;  %16189 = vst [vmem:[#allocation107_spill] sm:$0xff] %v13148_v62  ;;  %v4822_v26 = vld [vmem:[%s15757_s2 + $0x3b8] sm:$0xff] }
 0x2a5   : > { %9046 = vmatpush1.bf16.msra.mxu0 %v13100_v24  ;;  %9110 = vmatpush1.bf16.msra.mxu1 %v13102_v8  ;;  %v13150_v24 = vpack.c.bf16 %v4814_v12, %v4810_v4  ;;  %v13172_v4 = vpack.c.bf16 %v4811_v48, %v4807_v14  ;;  %v13174_v12 = vpack.c.bf16 %v4813_v2, %v4809_v37  ;;  %v4817_v48 = vld [vmem:[%s15757_s2 + $0x390] sm:$0xff]  ;;  %v4824_v37 = vld [vmem:[%s15757_s2 + $0x3c8] sm:$0xff] }
 0x2a6   : > { %9048 = vmatprep.subr.bf16.mxu0 %v13112_v38  ;;  %9112 = vmatprep.subr.bf16.mxu1 %v13114_v15  ;;  %v4815_v15 = vld [vmem:[%s15757_s2 + $0x380] sm:$0xff]  ;;  %v13184_v8 = vpack.c.bf16 %v4820_v45, %v4816_v41  ;;  %v4821_v14 = vld [vmem:[%s15757_s2 + $0x3b0] sm:$0xff]  ;;  %v4828_v2 = vld [vmem:[%s15757_s2 + $0x3e8] sm:$0xff] }
 0x2a7   : > { %16190 = vst [vmem:[#allocation108_spill] sm:$0xff] %v13150_v24  ;;  %16191 = vst [vmem:[#allocation109_spill] sm:$0xff] %v13172_v4  ;;  %v4819_v38 = vld [vmem:[%s15757_s2 + $0x3a0] sm:$0xff]  ;;  %v4826_v41 = vld [vmem:[%s15757_s2 + $0x3d8] sm:$0xff] }
 0x2a8   : > { %16192 = vst [vmem:[#allocation110_spill] sm:$0xff] %v13174_v12  ;;  %16193 = vst [vmem:[#allocation111_spill] sm:$0xff] %v13184_v8  ;;  %v4830_v45 = vld [vmem:[%s15757_s2 + $0x3f8] sm:$0xff] }
 0x2a9   : > { %9050 = vmatpush1.bf16.msra.mxu0 %v13136_v31  ;;  %9114 = vmatpush1.bf16.msra.mxu1 %v13138_v5  ;;  %v13186_v31 = vpack.c.bf16 %v4822_v26, %v4818_v55  ;;  %v13208_v55 = vpack.c.bf16 %v4819_v38, %v4815_v15  ;;  %v13210_v26 = vpack.c.bf16 %v4821_v14, %v4817_v48  ;;  %v4825_v15 = vld [vmem:[%s15757_s2 + $0x3d0] sm:$0xff] }
 0x2aa   : > { %9052 = vmatprep.subr.bf16.mxu0 %v13148_v62  ;;  %9116 = vmatprep.subr.bf16.mxu1 %v13150_v24  ;;  %v4823_v24 = vld [vmem:[%s15757_s2 + $0x3c0] sm:$0xff]  ;;  %v2528_v5 = vadd.f32 %v12587_v49, %v12070_v44  ;;  %v13224_v38 = vpack.c.bf16 %v4830_v45, %v4826_v41  ;;  %v4829_v48 = vld [vmem:[%s15757_s2 + $0x3f0] sm:$0xff]  ;;  %v8159_v44 = vld [vmem:[%s15757_s2 + $0x808] sm:$0xff]  ;;  %v2531_v14 = vadd.f32 %v12591_v54, %v12133_v28 }
 0x2ab   : > { %16194 = vst [vmem:[#allocation112_spill] sm:$0xff] %v13186_v31  ;;  %16195 = vst [vmem:[#allocation113_spill] sm:$0xff] %v13208_v55  ;;  %v4827_v62 = vld [vmem:[%s15757_s2 + $0x3e0] sm:$0xff]  ;;  %v8165_v41 = vld [vmem:[%s15757_s2 + $0x838] sm:$0xff]  ;;  %v2530_v45 = vadd.f32 %v12587_v49, %v12116_v47 }
 0x2ac   : > { %16196 = vst [vmem:[#allocation114_spill] sm:$0xff] %v13210_v26  ;;  %16198 = vst [vmem:[#allocation116_spill] sm:$0xff] %v13224_v38  ;;  %v13250_v28 = vpack.c.bf16 %v4827_v62, %v4823_v24  ;;  %v8158_v47 = vld [vmem:[%s15757_s2 + $0x800] sm:$0xff]  ;;  %v2541_v24 = vmax.f32 %v2531_v14, 0.0  ;;  %v8173_v14 = vld [vmem:[%s15757_s2 + $0x878] sm:$0xff] }
 0x2ad   : > { %9054 = vmatpush1.bf16.msra.mxu0 %v13172_v4  ;;  %9118 = vmatpush1.bf16.msra.mxu1 %v13174_v12  ;;  %v13222_v12 = vpack.c.bf16 %v4828_v2, %v4824_v37  ;;  %v8163_v37 = vld [vmem:[%s15757_s2 + $0x828] sm:$0xff]  ;;  %v8161_v2 = vld [vmem:[%s15757_s2 + $0x818] sm:$0xff]  ;;  %v2533_v4 = vadd.f32 %v12591_v54, %v12177_v3  ;;  %v8162_v62 = vld [vmem:[%s15757_s2 + $0x820] sm:$0xff] }
 0x2ae   : > { %9056 = vmatprep.subr.bf16.mxu0 %v13184_v8  ;;  %9120 = vmatprep.subr.bf16.mxu1 %v13186_v31  ;;  %16199 = vst [vmem:[#allocation117_spill] sm:$0xff] %v13250_v28  ;;  %v13252_v31 = vpack.c.bf16 %v4829_v48, %v4825_v15  ;;  %v2538_v8 = vmax.f32 %v2528_v5, 0.0  ;;  %v13258_v29 = vpack.c.bf16 %v8163_v37, %v8159_v44  ;;  %v8160_v3 = vld [vmem:[%s15757_s2 + $0x810] sm:$0xff]  ;;  %v8167_v15 = vld [vmem:[%s15757_s2 + $0x848] sm:$0xff]  ;;  %v8169_v44 = vld [vmem:[%s15757_s2 + $0x858] sm:$0xff]  ;;  %v2540_v37 = vmax.f32 %v2530_v45, 0.0 }
 0x2af   : > { %16197 = vst [vmem:[#allocation115_spill] sm:$0xff] %v13222_v12  ;;  %v13260_v6 = vpack.c.bf16 %v8165_v41, %v8161_v2  ;;  %v8164_v5 = vld [vmem:[%s15757_s2 + $0x830] sm:$0xff]  ;;  %v8171_v48 = vld [vmem:[%s15757_s2 + $0x868] sm:$0xff]  ;;  %v2532_v2 = vadd.f32 %v12587_v49, %v12160_v51  ;;  %v8166_v51 = vld [vmem:[%s15757_s2 + $0x840] sm:$0xff] }
 0x2b0   : > { %16200 = vst [vmem:[#allocation118_spill] sm:$0xff] %v13252_v31  ;;  %16201 = vst [vmem:[#allocation119_spill] sm:$0xff] %v13258_v29  ;;  %v13291_v41 = vmul.f32 %v12607_v56, %v2538_v8  ;;  %v8170_v45 = vld [vmem:[%s15757_s2 + $0x860] sm:$0xff]  ;;  %v13306_v56 = vmul.f32 %v12664_v60, %v2541_v24  ;;  %v2535_v8 = vadd.f32 %v12591_v54, %v12218_v52  ;;  %v8175_v24 = vld [vmem:[%s15757_s2 + $0x888] sm:$0xff] }
 0x2b1   : > { %9058 = vmatpush1.bf16.msra.mxu0 %v13208_v55  ;;  %9122 = vmatpush1.bf16.msra.mxu1 %v13210_v26  ;;  %16202 = vst [vmem:[#allocation120_spill] sm:$0xff] %v13260_v6  ;;  %v13297_v26 = vpack.c.bf16 %v8164_v5, %v8160_v3  ;;  %v8172_v3 = vld [vmem:[%s15757_s2 + $0x870] sm:$0xff]  ;;  %v8179_v52 = vld [vmem:[%s15757_s2 + $0x8a8] sm:$0xff]  ;;  %v8177_v5 = vld [vmem:[%s15757_s2 + $0x898] sm:$0xff] }
 0x2b2   : > { %9060 = vmatprep.subr.bf16.mxu0 %v13222_v12  ;;  %9124 = vmatprep.subr.bf16.mxu1 %v13224_v38  ;;  %v2543_v38 = vmax.f32 %v2533_v4, 0.0  ;;  %v13295_v12 = vpack.c.bf16 %v8162_v62, %v8158_v47  ;;  %v13310_v4 = vpack.c.bf16 %v8171_v48, %v8167_v15  ;;  %v13312_v47 = vpack.c.bf16 %v8173_v14, %v8169_v44  ;;  %v8168_v62 = vld [vmem:[%s15757_s2 + $0x850] sm:$0xff]  ;;  %v8181_v15 = vld [vmem:[%s15757_s2 + $0x8b8] sm:$0xff] }
 0x2b3   : > { %16204 = vst [vmem:[#allocation122_spill] sm:$0xff] %v13297_v26  ;;  %v2542_v48 = vmax.f32 %v2532_v2, 0.0  ;;  %v13335_v44 = vmul.f32 %v12664_v60, %v2540_v37  ;;  %v2534_v14 = vadd.f32 %v12587_v49, %v12204_v20  ;;  %v13348_v2 = vpack.c.bf16 %v8172_v3, %v8168_v62  ;;  %v8174_v60 = vld [vmem:[%s15757_s2 + $0x880] sm:$0xff]  ;;  %v8176_v62 = vld [vmem:[%s15757_s2 + $0x890] sm:$0xff] }
 0x2b4   : > { %16203 = vst [vmem:[#allocation121_spill] sm:$0xff] %v13295_v12  ;;  %16205 = vst [vmem:[#allocation123_spill] sm:$0xff] %v13310_v4  ;;  %v8178_v20 = vld [vmem:[%s15757_s2 + $0x8a0] sm:$0xff]  ;;  %v2545_v37 = vmax.f32 %v2535_v8, 0.0  ;;  %v8180_v3 = vld [vmem:[%s15757_s2 + $0x8b0] sm:$0xff] }
 0x2b5   : > { %9062 = vmatpush1.bf16.msra.mxu0 %v13250_v28  ;;  %9126 = vmatpush1.bf16.msra.mxu1 %v13252_v31  ;;  %16206 = vst [vmem:[#allocation124_spill] sm:$0xff] %v13312_v47  ;;  %16208 = vst [vmem:[#allocation126_spill] sm:$0xff] %v13348_v2  ;;  %v8185_v8 = vld [vmem:[%s15757_s2 + $0x8d8] sm:$0xff]  ;;  %v8314_v28 = vld [vmem:[%s15757_s2 + $0xce0] sm:$0xff] }
 0x2b6   : > { %9128 = vmatprep.subr.bf16.mxu0 %v13258_v29  ;;  %9192 = vmatprep.subr.bf16.mxu1 %v13260_v6  ;;  %v13342_v6 = vmul.f32 %v12685_v35, %v2543_v38  ;;  %v13346_v29 = vpack.c.bf16 %v8170_v45, %v8166_v51  ;;  %v2537_v38 = vadd.f32 %v12591_v54, %v12260_v17  ;;  %v8183_v54 = vld [vmem:[%s15757_s2 + $0x8c8] sm:$0xff] }
 0x2b7   : > { %v13360_v51 = vpack.c.bf16 %v8179_v52, %v8175_v24  ;;  %v13362_v45 = vpack.c.bf16 %v8181_v15, %v8177_v5  ;;  %v8187_v17 = vld [vmem:[%s15757_s2 + $0x8e8] sm:$0xff]  ;;  %v8189_v24 = vld [vmem:[%s15757_s2 + $0x8f8] sm:$0xff]  ;;  %v13385_v52 = vmul.f32 %v12685_v35, %v2542_v48  ;;  %v2544_v5 = vmax.f32 %v2534_v14, 0.0  ;;  %v8182_v35 = vld [vmem:[%s15757_s2 + $0x8c0] sm:$0xff] }
 0x2b8   : > { %5215 = vmatmul.mubr.f32.vlgmr.msra.gmra.mrb[40].mxu0 %v13291_v41  ;;  %5310 = vmatmul.mubr.f32.vlgmr.msra.gmra.mrb[40].mxu1 %v13291_v41  ;;  %16207 = vst [vmem:[#allocation125_spill] sm:$0xff] %v13346_v29  ;;  %v2536_v15 = vadd.f32 %v12587_v49, %v12246_v63  ;;  %v8186_v48 = vld [vmem:[%s15757_s2 + $0x8e0] sm:$0xff]  ;;  %v2547_v14 = vmax.f32 %v2537_v38, 0.0  ;;  %v13408_v63 = vpack.c.bf16 %v8187_v17, %v8183_v54  ;;  %v8195_v38 = vld [vmem:[%s15757_s2 + $0x928] sm:$0xff] }
 0x2b9   : > { %5220 = vmatprep.mubr.f32.mxu0 %v13306_v56  ;;  %5315 = vmatprep.mubr.f32.mxu1 %v13306_v56  ;;  %16209 = vst [vmem:[#allocation127_spill] sm:$0xff] %v13360_v51  ;;  %16210 = vst [vmem:[#allocation128_spill] sm:$0xff] %v13362_v45  ;;  %v13410_v49 = vpack.c.bf16 %v8189_v24, %v8185_v8  ;;  %v13435_v17 = vmul.f32 %v12757_v43, %v2544_v5 }
 0x2ba   : > { %9130 = vmatpush1.bf16.msra.mxu0 %v13295_v12  ;;  %9194 = vmatpush1.bf16.msra.mxu1 %v13297_v26  ;;  %v13404_v26 = vmul.f32 %v12757_v43, %v2545_v37  ;;  %16213 = vst [vmem:[#allocation131_spill] sm:$0xff] %v13408_v63  ;;  %v8191_v37 = vld [vmem:[%s15757_s2 + $0x908] sm:$0xff]  ;;  %v2546_v54 = vmax.f32 %v2536_v15, 0.0  ;;  %v13439_v8 = vpack.c.bf16 %v8186_v48, %v8182_v35  ;;  %v8192_v35 = vld [vmem:[%s15757_s2 + $0x910] sm:$0xff]  ;;  %v8306_v12 = vld [vmem:[%s15757_s2 + $0xca0] sm:$0xff] }
 0x2bb   : > { %9132 = vmatprep.subr.bf16.mxu0 %v13310_v4  ;;  %9196 = vmatprep.subr.bf16.mxu1 %v13312_v47  ;;  %v13393_v47 = vpack.c.bf16 %v8178_v20, %v8174_v60  ;;  %v13395_v4 = vpack.c.bf16 %v8180_v3, %v8176_v62  ;;  %16214 = vst [vmem:[#allocation132_spill] sm:$0xff] %v13410_v49  ;;  %v8184_v60 = vld [vmem:[%s15757_s2 + $0x8d0] sm:$0xff]  ;;  %v8193_v62 = vld [vmem:[%s15757_s2 + $0x918] sm:$0xff] }
 0x2bc   : > { %5221 = vmatmul.mubr.f32.gmra.mrb[42].mxu0 %v13335_v44  ;;  %5316 = vmatmul.mubr.f32.gmra.mrb[42].mxu1 %v13335_v44  ;;  %v8188_v20 = vld [vmem:[%s15757_s2 + $0x8f0] sm:$0xff]  ;;  %v8197_v3 = vld [vmem:[%s15757_s2 + $0x938] sm:$0xff]  ;;  %16215 = vst [vmem:[#allocation133_spill] sm:$0xff] %v13439_v8  ;;  %v13450_v15 = vmul.f32 %v12809_v53, %v2547_v14  ;;  %v13454_v43 = vpack.c.bf16 %v8195_v38, %v8191_v37  ;;  %v8199_v14 = vld [vmem:[%s15757_s2 + $0x948] sm:$0xff] }
 0x2bd   : > { %5226 = vmatprep.mubr.f32.mxu0 %v13342_v6  ;;  %5321 = vmatprep.mubr.f32.mxu1 %v13342_v6  ;;  %16211 = vst [vmem:[#allocation129_spill] sm:$0xff] %v13393_v47  ;;  %16212 = vst [vmem:[#allocation130_spill] sm:$0xff] %v13395_v4  ;;  %v13441_v24 = vpack.c.bf16 %v8188_v20, %v8184_v60  ;;  %v13456_v5 = vpack.c.bf16 %v8197_v3, %v8193_v62  ;;  %v8196_v48 = vld [vmem:[%s15757_s2 + $0x930] sm:$0xff]  ;;  %v8203_v20 = vld [vmem:[%s15757_s2 + $0x968] sm:$0xff]  ;;  %v5483_v60 = vrot.slane %v12876_v18, 1 }
 0x2be   : > { %9134 = vmatpush1.bf16.msra.mxu0 %v13346_v29  ;;  %9198 = vmatpush1.bf16.msra.mxu1 %v13348_v2  ;;  %16217 = vst [vmem:[#allocation135_spill] sm:$0xff] %v13454_v43  ;;  %v8201_v37 = vld [vmem:[%s15757_s2 + $0x958] sm:$0xff]  ;;  %v13482_v62 = vmul.f32 %v12809_v53, %v2546_v54  ;;  %v13499_v53 = vpack.c.bf16 %v8203_v20, %v8199_v14  ;;  %v8204_v54 = vld [vmem:[%s15757_s2 + $0x970] sm:$0xff]  ;;  %v8211_v20 = vld [vmem:[%s15757_s2 + $0x9a8] sm:$0xff] }
 0x2bf   : > { %9136 = vmatprep.subr.bf16.mxu0 %v13360_v51  ;;  %9200 = vmatprep.subr.bf16.mxu1 %v13362_v45  ;;  %16216 = vst [vmem:[#allocation134_spill] sm:$0xff] %v13441_v24  ;;  %v8190_v45 = vld [vmem:[%s15757_s2 + $0x900] sm:$0xff]  ;;  %16218 = vst [vmem:[#allocation136_spill] sm:$0xff] %v13456_v5  ;;  %v8205_v38 = vld [vmem:[%s15757_s2 + $0x978] sm:$0xff] }
 0x2c0   : > { %5227 = vmatmul.mubr.f32.gmra.mrb[44].mxu0 %v13385_v52  ;;  %5322 = vmatmul.mubr.f32.gmra.mrb[44].mxu1 %v13385_v52  ;;  %v8194_v51 = vld [vmem:[%s15757_s2 + $0x920] sm:$0xff]  ;;  %16221 = vst [vmem:[#allocation139_spill] sm:$0xff] %v13499_v53  ;;  %v14042_v55 = vrot.slane %v13482_v62, 1 }
 0x2c1   : > { %5232 = vmatprep.mubr.f32.mxu0 %v13404_v26  ;;  %5327 = vmatprep.mubr.f32.mxu1 %v13404_v26  ;;  %v13486_v3 = vpack.c.bf16 %v8194_v51, %v8190_v45  ;;  %v13501_v51 = vpack.c.bf16 %v8205_v38, %v8201_v37  ;;  %v8200_v45 = vld [vmem:[%s15757_s2 + $0x950] sm:$0xff]  ;;  %v8209_v37 = vld [vmem:[%s15757_s2 + $0x998] sm:$0xff]  ;;  %v8302_v29 = vld [vmem:[%s15757_s2 + $0xc80] sm:$0xff] }
 0x2c2   : > { %9138 = vmatpush1.bf16.msra.mxu0 %v13393_v47  ;;  %9202 = vmatpush1.bf16.msra.mxu1 %v13395_v4  ;;  %v8202_v4 = vld [vmem:[%s15757_s2 + $0x960] sm:$0xff]  ;;  %v8213_v38 = vld [vmem:[%s15757_s2 + $0x9b8] sm:$0xff]  ;;  %v5486_v47 = vrot.slane %v13385_v52, 1 }
 0x2c3   : > { %9140 = vmatprep.subr.bf16.mxu0 %v13408_v63  ;;  %9204 = vmatprep.subr.bf16.mxu1 %v13410_v49  ;;  %16219 = vst [vmem:[#allocation137_spill] sm:$0xff] %v13486_v3  ;;  %v13489_v49 = vpack.c.bf16 %v8196_v48, %v8192_v35  ;;  %v8198_v63 = vld [vmem:[%s15757_s2 + $0x940] sm:$0xff]  ;;  %16222 = vst [vmem:[#allocation140_spill] sm:$0xff] %v13501_v51  ;;  %v8207_v35 = vld [vmem:[%s15757_s2 + $0x988] sm:$0xff]  ;;  %v16223_v48 = vrot.slane %v13306_v56, 1 }
 0x2c4   : > { %5233 = vmatmul.mubr.f32.gmra.mrb[46].mxu0 %v13435_v17  ;;  %5328 = vmatmul.mubr.f32.gmra.mrb[46].mxu1 %v13435_v17 }
 0x2c5   : > { %5238 = vmatprep.mubr.f32.mxu0 %v13450_v15  ;;  %5333 = vmatprep.mubr.f32.mxu1 %v13450_v15  ;;  %16220 = vst [vmem:[#allocation138_spill] sm:$0xff] %v13489_v49  ;;  %v13517_v14 = vsel %vm5479_vm1, %v5483_v60, %v16223_v48  ;;  %v13532_v60 = vpack.c.bf16 %v8202_v4, %v8198_v63  ;;  %v8208_v4 = vld [vmem:[%s15757_s2 + $0x990] sm:$0xff] }
 0x2c6   : > { %9142 = vmatpush1.bf16.msra.mxu0 %v13439_v8  ;;  %9206 = vmatpush1.bf16.msra.mxu1 %v13441_v24  ;;  %v13534_v48 = vpack.c.bf16 %v8204_v54, %v8200_v45  ;;  %v13544_v24 = vpack.c.bf16 %v8211_v20, %v8207_v35  ;;  %v8212_v63 = vld [vmem:[%s15757_s2 + $0x9b0] sm:$0xff]  ;;  %v8215_v45 = vld [vmem:[%s15757_s2 + $0x9c8] sm:$0xff]  ;;  %v8217_v35 = vld [vmem:[%s15757_s2 + $0x9d8] sm:$0xff] }
 0x2c7   : > { %9144 = vmatprep.subr.bf16.mxu0 %v13454_v43  ;;  %9208 = vmatprep.subr.bf16.mxu1 %v13456_v5  ;;  %16224 = vst [vmem:[#allocation141_spill] sm:$0xff] %v13532_v60  ;;  %v8206_v5 = vld [vmem:[%s15757_s2 + $0x980] sm:$0xff]  ;;  %v8219_v54 = vld [vmem:[%s15757_s2 + $0x9e8] sm:$0xff]  ;;  %v8221_v20 = vld [vmem:[%s15757_s2 + $0x9f8] sm:$0xff] }
 0x2c8   : > { %5239 = vmatmul.mubr.f32.gmra.mrb[48].mxu0 %v13482_v62  ;;  %5334 = vmatmul.mubr.f32.gmra.mrb[48].mxu1 %v13482_v62  ;;  %16225 = vst [vmem:[#allocation142_spill] sm:$0xff] %v13534_v48  ;;  %v8210_v43 = vld [vmem:[%s15757_s2 + $0x9a0] sm:$0xff]  ;;  %16226 = vst [vmem:[#allocation143_spill] sm:$0xff] %v13544_v24 }
 0x2c9   : > { %5572 = vmatprep.mubr.f32.mxu0 %v13517_v14  ;;  %5667 = vmatprep.mubr.f32.mxu1 %v13517_v14  ;;  %v8294_v8 = vld [vmem:[%s15757_s2 + $0xc40] sm:$0xff] }
 0x2ca   : > { %9146 = vmatpush1.bf16.msra.mxu0 %v13486_v3  ;;  %9210 = vmatpush1.bf16.msra.mxu1 %v13489_v49  ;;  %v13546_v3 = vpack.c.bf16 %v8213_v38, %v8209_v37  ;;  %v13568_v37 = vpack.c.bf16 %v8210_v43, %v8206_v5  ;;  %v13570_v38 = vpack.c.bf16 %v8212_v63, %v8208_v4  ;;  %v8216_v43 = vld [vmem:[%s15757_s2 + $0x9d0] sm:$0xff]  ;;  %v8223_v4 = vld [vmem:[%s15757_s2 + $0xa08] sm:$0xff] }
 0x2cb   : > { %9148 = vmatprep.subr.bf16.mxu0 %v13499_v53  ;;  %9212 = vmatprep.subr.bf16.mxu1 %v13501_v51  ;;  %v8214_v51 = vld [vmem:[%s15757_s2 + $0x9c0] sm:$0xff]  ;;  %v13580_v49 = vpack.c.bf16 %v8219_v54, %v8215_v45  ;;  %v8220_v5 = vld [vmem:[%s15757_s2 + $0x9f0] sm:$0xff]  ;;  %v8227_v63 = vld [vmem:[%s15757_s2 + $0xa28] sm:$0xff] }
 0x2cc   : > { %16227 = vst [vmem:[#allocation144_spill] sm:$0xff] %v13546_v3  ;;  %16228 = vst [vmem:[#allocation145_spill] sm:$0xff] %v13568_v37  ;;  %v8218_v53 = vld [vmem:[%s15757_s2 + $0x9e0] sm:$0xff]  ;;  %v8225_v45 = vld [vmem:[%s15757_s2 + $0xa18] sm:$0xff] }
 0x2cd   : > { %16229 = vst [vmem:[#allocation146_spill] sm:$0xff] %v13570_v38  ;;  %16230 = vst [vmem:[#allocation147_spill] sm:$0xff] %v13580_v49  ;;  %v8229_v54 = vld [vmem:[%s15757_s2 + $0xa38] sm:$0xff] }
 0x2ce   : > { %9150 = vmatpush1.bf16.msra.mxu0 %v13532_v60  ;;  %9214 = vmatpush1.bf16.msra.mxu1 %v13534_v48  ;;  %v13582_v60 = vpack.c.bf16 %v8221_v20, %v8217_v35  ;;  %v13604_v35 = vpack.c.bf16 %v8218_v53, %v8214_v51  ;;  %v13606_v20 = vpack.c.bf16 %v8220_v5, %v8216_v43  ;;  %v8224_v53 = vld [vmem:[%s15757_s2 + $0xa10] sm:$0xff]  ;;  %v8231_v43 = vld [vmem:[%s15757_s2 + $0xa48] sm:$0xff] }
 0x2cf   : > { %9152 = vmatprep.subr.bf16.mxu0 %v13544_v24  ;;  %9216 = vmatprep.subr.bf16.mxu1 %v13546_v3  ;;  %v8222_v3 = vld [vmem:[%s15757_s2 + $0xa00] sm:$0xff]  ;;  %v13616_v48 = vpack.c.bf16 %v8227_v63, %v8223_v4  ;;  %v8228_v51 = vld [vmem:[%s15757_s2 + $0xa30] sm:$0xff]  ;;  %v8235_v5 = vld [vmem:[%s15757_s2 + $0xa68] sm:$0xff] }
 0x2d0   : > { %16231 = vst [vmem:[#allocation148_spill] sm:$0xff] %v13582_v60  ;;  %16232 = vst [vmem:[#allocation149_spill] sm:$0xff] %v13604_v35  ;;  %v8226_v24 = vld [vmem:[%s15757_s2 + $0xa20] sm:$0xff]  ;;  %v8233_v4 = vld [vmem:[%s15757_s2 + $0xa58] sm:$0xff] }
 0x2d1   : > { %16233 = vst [vmem:[#allocation150_spill] sm:$0xff] %v13606_v20  ;;  %16234 = vst [vmem:[#allocation151_spill] sm:$0xff] %v13616_v48  ;;  %v8237_v63 = vld [vmem:[%s15757_s2 + $0xa78] sm:$0xff] }
 0x2d2   : > { %9154 = vmatpush1.bf16.msra.mxu0 %v13568_v37  ;;  %9218 = vmatpush1.bf16.msra.mxu1 %v13570_v38  ;;  %v13618_v37 = vpack.c.bf16 %v8229_v54, %v8225_v45  ;;  %v13640_v45 = vpack.c.bf16 %v8226_v24, %v8222_v3  ;;  %v13642_v54 = vpack.c.bf16 %v8228_v51, %v8224_v53  ;;  %v8232_v24 = vld [vmem:[%s15757_s2 + $0xa50] sm:$0xff]  ;;  %v8239_v53 = vld [vmem:[%s15757_s2 + $0xa88] sm:$0xff] }
 0x2d3   : > { %9156 = vmatprep.subr.bf16.mxu0 %v13580_v49  ;;  %9220 = vmatprep.subr.bf16.mxu1 %v13582_v60  ;;  %v8230_v60 = vld [vmem:[%s15757_s2 + $0xa40] sm:$0xff]  ;;  %v13652_v38 = vpack.c.bf16 %v8235_v5, %v8231_v43  ;;  %v8236_v3 = vld [vmem:[%s15757_s2 + $0xa70] sm:$0xff]  ;;  %v8243_v51 = vld [vmem:[%s15757_s2 + $0xaa8] sm:$0xff] }
 0x2d4   : > { %16235 = vst [vmem:[#allocation152_spill] sm:$0xff] %v13618_v37  ;;  %16236 = vst [vmem:[#allocation153_spill] sm:$0xff] %v13640_v45  ;;  %v8234_v49 = vld [vmem:[%s15757_s2 + $0xa60] sm:$0xff]  ;;  %v8241_v43 = vld [vmem:[%s15757_s2 + $0xa98] sm:$0xff] }
 0x2d5   : > { %16237 = vst [vmem:[#allocation154_spill] sm:$0xff] %v13642_v54  ;;  %16238 = vst [vmem:[#allocation155_spill] sm:$0xff] %v13652_v38  ;;  %v8245_v5 = vld [vmem:[%s15757_s2 + $0xab8] sm:$0xff] }
 0x2d6   : > { %9158 = vmatpush1.bf16.msra.mxu0 %v13604_v35  ;;  %9222 = vmatpush1.bf16.msra.mxu1 %v13606_v20  ;;  %v13654_v35 = vpack.c.bf16 %v8237_v63, %v8233_v4  ;;  %v13676_v4 = vpack.c.bf16 %v8234_v49, %v8230_v60  ;;  %v13678_v63 = vpack.c.bf16 %v8236_v3, %v8232_v24  ;;  %v8240_v49 = vld [vmem:[%s15757_s2 + $0xa90] sm:$0xff]  ;;  %v8247_v24 = vld [vmem:[%s15757_s2 + $0xac8] sm:$0xff] }
 0x2d7   : > { %9160 = vmatprep.subr.bf16.mxu0 %v13616_v48  ;;  %9224 = vmatprep.subr.bf16.mxu1 %v13618_v37  ;;  %v8238_v37 = vld [vmem:[%s15757_s2 + $0xa80] sm:$0xff]  ;;  %v13688_v20 = vpack.c.bf16 %v8243_v51, %v8239_v53  ;;  %v8244_v60 = vld [vmem:[%s15757_s2 + $0xab0] sm:$0xff]  ;;  %v8251_v3 = vld [vmem:[%s15757_s2 + $0xae8] sm:$0xff] }
 0x2d8   : > { %16239 = vst [vmem:[#allocation156_spill] sm:$0xff] %v13654_v35  ;;  %16240 = vst [vmem:[#allocation157_spill] sm:$0xff] %v13676_v4  ;;  %v8242_v48 = vld [vmem:[%s15757_s2 + $0xaa0] sm:$0xff]  ;;  %v8249_v53 = vld [vmem:[%s15757_s2 + $0xad8] sm:$0xff] }
 0x2d9   : > { %16241 = vst [vmem:[#allocation158_spill] sm:$0xff] %v13678_v63  ;;  %16242 = vst [vmem:[#allocation159_spill] sm:$0xff] %v13688_v20  ;;  %v8253_v51 = vld [vmem:[%s15757_s2 + $0xaf8] sm:$0xff] }
 0x2da   : > { %9162 = vmatpush1.bf16.msra.mxu0 %v13640_v45  ;;  %9226 = vmatpush1.bf16.msra.mxu1 %v13642_v54  ;;  %v13690_v45 = vpack.c.bf16 %v8245_v5, %v8241_v43  ;;  %v13712_v43 = vpack.c.bf16 %v8242_v48, %v8238_v37  ;;  %v13714_v5 = vpack.c.bf16 %v8244_v60, %v8240_v49  ;;  %v8248_v48 = vld [vmem:[%s15757_s2 + $0xad0] sm:$0xff]  ;;  %v8255_v49 = vld [vmem:[%s15757_s2 + $0xb08] sm:$0xff] }
 0x2db   : > { %9164 = vmatprep.subr.bf16.mxu0 %v13652_v38  ;;  %9228 = vmatprep.subr.bf16.mxu1 %v13654_v35  ;;  %v8246_v35 = vld [vmem:[%s15757_s2 + $0xac0] sm:$0xff]  ;;  %v13724_v54 = vpack.c.bf16 %v8251_v3, %v8247_v24  ;;  %v8252_v37 = vld [vmem:[%s15757_s2 + $0xaf0] sm:$0xff]  ;;  %v8259_v60 = vld [vmem:[%s15757_s2 + $0xb28] sm:$0xff] }
 0x2dc   : > { %16243 = vst [vmem:[#allocation160_spill] sm:$0xff] %v13690_v45  ;;  %16244 = vst [vmem:[#allocation161_spill] sm:$0xff] %v13712_v43  ;;  %v8250_v38 = vld [vmem:[%s15757_s2 + $0xae0] sm:$0xff]  ;;  %v8257_v24 = vld [vmem:[%s15757_s2 + $0xb18] sm:$0xff] }
 0x2dd   : > { %16245 = vst [vmem:[#allocation162_spill] sm:$0xff] %v13714_v5  ;;  %16246 = vst [vmem:[#allocation163_spill] sm:$0xff] %v13724_v54  ;;  %v8261_v3 = vld [vmem:[%s15757_s2 + $0xb38] sm:$0xff] }
 0x2de   : > { %9166 = vmatpush1.bf16.msra.mxu0 %v13676_v4  ;;  %9230 = vmatpush1.bf16.msra.mxu1 %v13678_v63  ;;  %v13726_v4 = vpack.c.bf16 %v8253_v51, %v8249_v53  ;;  %v13748_v53 = vpack.c.bf16 %v8250_v38, %v8246_v35  ;;  %v13750_v51 = vpack.c.bf16 %v8252_v37, %v8248_v48  ;;  %v8256_v38 = vld [vmem:[%s15757_s2 + $0xb10] sm:$0xff]  ;;  %v8263_v48 = vld [vmem:[%s15757_s2 + $0xb48] sm:$0xff] }
 0x2df   : > { %9168 = vmatprep.subr.bf16.mxu0 %v13688_v20  ;;  %9232 = vmatprep.subr.bf16.mxu1 %v13690_v45  ;;  %v8254_v45 = vld [vmem:[%s15757_s2 + $0xb00] sm:$0xff]  ;;  %v13760_v63 = vpack.c.bf16 %v8259_v60, %v8255_v49  ;;  %v8260_v35 = vld [vmem:[%s15757_s2 + $0xb30] sm:$0xff]  ;;  %v8267_v37 = vld [vmem:[%s15757_s2 + $0xb68] sm:$0xff] }
 0x2e0   : > { %16247 = vst [vmem:[#allocation164_spill] sm:$0xff] %v13726_v4  ;;  %16248 = vst [vmem:[#allocation165_spill] sm:$0xff] %v13748_v53  ;;  %v8258_v20 = vld [vmem:[%s15757_s2 + $0xb20] sm:$0xff]  ;;  %v8265_v49 = vld [vmem:[%s15757_s2 + $0xb58] sm:$0xff] }
 0x2e1   : > { %16249 = vst [vmem:[#allocation166_spill] sm:$0xff] %v13750_v51  ;;  %16250 = vst [vmem:[#allocation167_spill] sm:$0xff] %v13760_v63  ;;  %v8269_v60 = vld [vmem:[%s15757_s2 + $0xb78] sm:$0xff] }
 0x2e2   : > { %9170 = vmatpush1.bf16.msra.mxu0 %v13712_v43  ;;  %9234 = vmatpush1.bf16.msra.mxu1 %v13714_v5  ;;  %v13762_v43 = vpack.c.bf16 %v8261_v3, %v8257_v24  ;;  %v13784_v24 = vpack.c.bf16 %v8258_v20, %v8254_v45  ;;  %v13786_v3 = vpack.c.bf16 %v8260_v35, %v8256_v38  ;;  %v8264_v20 = vld [vmem:[%s15757_s2 + $0xb50] sm:$0xff]  ;;  %v8271_v38 = vld [vmem:[%s15757_s2 + $0xb88] sm:$0xff] }
 0x2e3   : > { %9172 = vmatprep.subr.bf16.mxu0 %v13724_v54  ;;  %9236 = vmatprep.subr.bf16.mxu1 %v13726_v4  ;;  %v8262_v4 = vld [vmem:[%s15757_s2 + $0xb40] sm:$0xff]  ;;  %v13796_v5 = vpack.c.bf16 %v8267_v37, %v8263_v48  ;;  %v8268_v45 = vld [vmem:[%s15757_s2 + $0xb70] sm:$0xff]  ;;  %v8275_v35 = vld [vmem:[%s15757_s2 + $0xba8] sm:$0xff] }
 0x2e4   : > { %16251 = vst [vmem:[#allocation168_spill] sm:$0xff] %v13762_v43  ;;  %16252 = vst [vmem:[#allocation169_spill] sm:$0xff] %v13784_v24  ;;  %v8266_v54 = vld [vmem:[%s15757_s2 + $0xb60] sm:$0xff]  ;;  %v8273_v48 = vld [vmem:[%s15757_s2 + $0xb98] sm:$0xff] }
 0x2e5   : > { %16253 = vst [vmem:[#allocation170_spill] sm:$0xff] %v13786_v3  ;;  %16254 = vst [vmem:[#allocation171_spill] sm:$0xff] %v13796_v5  ;;  %v8277_v37 = vld [vmem:[%s15757_s2 + $0xbb8] sm:$0xff] }
 0x2e6   : > { %9174 = vmatpush1.bf16.msra.mxu0 %v13748_v53  ;;  %9238 = vmatpush1.bf16.msra.mxu1 %v13750_v51  ;;  %v13798_v53 = vpack.c.bf16 %v8269_v60, %v8265_v49  ;;  %v13820_v49 = vpack.c.bf16 %v8266_v54, %v8262_v4  ;;  %v13822_v60 = vpack.c.bf16 %v8268_v45, %v8264_v20  ;;  %v8272_v54 = vld [vmem:[%s15757_s2 + $0xb90] sm:$0xff]  ;;  %v8279_v20 = vld [vmem:[%s15757_s2 + $0xbc8] sm:$0xff] }
 0x2e7   : > { %9176 = vmatprep.subr.bf16.mxu0 %v13760_v63  ;;  %9240 = vmatprep.subr.bf16.mxu1 %v13762_v43  ;;  %v8270_v43 = vld [vmem:[%s15757_s2 + $0xb80] sm:$0xff]  ;;  %v13832_v51 = vpack.c.bf16 %v8275_v35, %v8271_v38  ;;  %v8276_v4 = vld [vmem:[%s15757_s2 + $0xbb0] sm:$0xff]  ;;  %v8283_v45 = vld [vmem:[%s15757_s2 + $0xbe8] sm:$0xff] }
 0x2e8   : > { %16255 = vst [vmem:[#allocation172_spill] sm:$0xff] %v13798_v53  ;;  %16256 = vst [vmem:[#allocation173_spill] sm:$0xff] %v13820_v49  ;;  %v8274_v63 = vld [vmem:[%s15757_s2 + $0xba0] sm:$0xff]  ;;  %v8281_v38 = vld [vmem:[%s15757_s2 + $0xbd8] sm:$0xff] }
 0x2e9   : > { %16257 = vst [vmem:[#allocation174_spill] sm:$0xff] %v13822_v60  ;;  %16258 = vst [vmem:[#allocation175_spill] sm:$0xff] %v13832_v51  ;;  %v8285_v35 = vld [vmem:[%s15757_s2 + $0xbf8] sm:$0xff] }
 0x2ea   : > { %9178 = vmatpush1.bf16.msra.mxu0 %v13784_v24  ;;  %9242 = vmatpush1.bf16.msra.mxu1 %v13786_v3  ;;  %v13834_v24 = vpack.c.bf16 %v8277_v37, %v8273_v48  ;;  %v13856_v48 = vpack.c.bf16 %v8274_v63, %v8270_v43  ;;  %v13858_v37 = vpack.c.bf16 %v8276_v4, %v8272_v54  ;;  %v8280_v63 = vld [vmem:[%s15757_s2 + $0xbd0] sm:$0xff]  ;;  %v8287_v54 = vld [vmem:[%s15757_s2 + $0xc08] sm:$0xff] }
 0x2eb   : > { %9180 = vmatprep.subr.bf16.mxu0 %v13796_v5  ;;  %9244 = vmatprep.subr.bf16.mxu1 %v13798_v53  ;;  %v8278_v53 = vld [vmem:[%s15757_s2 + $0xbc0] sm:$0xff]  ;;  %v13868_v3 = vpack.c.bf16 %v8283_v45, %v8279_v20  ;;  %v8284_v43 = vld [vmem:[%s15757_s2 + $0xbf0] sm:$0xff]  ;;  %v8291_v4 = vld [vmem:[%s15757_s2 + $0xc28] sm:$0xff] }
 0x2ec   : > { %16259 = vst [vmem:[#allocation176_spill] sm:$0xff] %v13834_v24  ;;  %16260 = vst [vmem:[#allocation177_spill] sm:$0xff] %v13856_v48  ;;  %v8282_v5 = vld [vmem:[%s15757_s2 + $0xbe0] sm:$0xff]  ;;  %v8289_v20 = vld [vmem:[%s15757_s2 + $0xc18] sm:$0xff] }
 0x2ed   : > { %16261 = vst [vmem:[#allocation178_spill] sm:$0xff] %v13858_v37  ;;  %16262 = vst [vmem:[#allocation179_spill] sm:$0xff] %v13868_v3  ;;  %v8293_v45 = vld [vmem:[%s15757_s2 + $0xc38] sm:$0xff] }
 0x2ee   : > { %9182 = vmatpush1.bf16.msra.mxu0 %v13820_v49  ;;  %9246 = vmatpush1.bf16.msra.mxu1 %v13822_v60  ;;  %v13870_v49 = vpack.c.bf16 %v8285_v35, %v8281_v38  ;;  %v13892_v38 = vpack.c.bf16 %v8282_v5, %v8278_v53  ;;  %v13894_v35 = vpack.c.bf16 %v8284_v43, %v8280_v63  ;;  %v8286_v60 = vld [vmem:[%s15757_s2 + $0xc00] sm:$0xff]  ;;  %v5481_v5 = vrot.slane %v13335_v44, 1  ;;  %v8288_v53 = vld [vmem:[%s15757_s2 + $0xc10] sm:$0xff]  ;;  %v8295_v43 = vld [vmem:[%s15757_s2 + $0xc48] sm:$0xff] }
 0x2ef   : > { %9184 = vmatprep.subr.bf16.mxu0 %v13832_v51  ;;  %9248 = vmatprep.subr.bf16.mxu1 %v13834_v24  ;;  %v13898_v24 = vpack.c.bf16 %v8291_v4, %v8287_v54  ;;  %v13900_v51 = vpack.c.bf16 %v8293_v45, %v8289_v20  ;;  %v8292_v63 = vld [vmem:[%s15757_s2 + $0xc30] sm:$0xff]  ;;  %v5488_v54 = vrot.slane %v13342_v6, 1  ;;  %v8299_v4 = vld [vmem:[%s15757_s2 + $0xc68] sm:$0xff]  ;;  %v8297_v20 = vld [vmem:[%s15757_s2 + $0xc58] sm:$0xff] }
 0x2f0   : > { %16263 = vst [vmem:[#allocation180_spill] sm:$0xff] %v13870_v49  ;;  %16264 = vst [vmem:[#allocation181_spill] sm:$0xff] %v13892_v38  ;;  %v8301_v45 = vld [vmem:[%s15757_s2 + $0xc78] sm:$0xff]  ;;  %v13992_v31 = vsel %vm5479_vm1, %v5481_v5, %v5486_v47 }
 0x2f1   : > { %16265 = vst [vmem:[#allocation182_spill] sm:$0xff] %v13894_v35  ;;  %16266 = vst [vmem:[#allocation183_spill] sm:$0xff] %v13898_v24 }
 0x2f2   : > { %9186 = vmatpush1.bf16.msra.mxu0 %v13856_v48  ;;  %9250 = vmatpush1.bf16.msra.mxu1 %v13858_v37  ;;  %16267 = vst [vmem:[#allocation184_spill] sm:$0xff] %v13900_v51  ;;  %v8290_v37 = vld [vmem:[%s15757_s2 + $0xc20] sm:$0xff]  ;;  %v13935_v48 = vpack.c.bf16 %v8292_v63, %v8288_v53  ;;  %v8303_v53 = vld [vmem:[%s15757_s2 + $0xc88] sm:$0xff] }
 0x2f3   : > { %9188 = vmatprep.subr.bf16.mxu0 %v13868_v3  ;;  %9252 = vmatprep.subr.bf16.mxu1 %v13870_v49  ;;  %v5480_v49 = vrot.slane %v13291_v41, 1  ;;  %v13933_v3 = vpack.c.bf16 %v8290_v37, %v8286_v60  ;;  %v8296_v60 = vld [vmem:[%s15757_s2 + $0xc50] sm:$0xff] }
 0x2f4   : > { %16269 = vst [vmem:[#allocation186_spill] sm:$0xff] %v13935_v48  ;;  %v8300_v37 = vld [vmem:[%s15757_s2 + $0xc70] sm:$0xff] }
 0x2f5   : > { %16268 = vst [vmem:[#allocation185_spill] sm:$0xff] %v13933_v3  ;;  %v13983_v2 = vpack.c.bf16 %v8300_v37, %v8296_v60  ;;  %v8304_v37 = vld [vmem:[%s15757_s2 + $0xc90] sm:$0xff] }
 0x2f6   : > { %9190 = vmatpush1.bf16.msra.mxu0 %v13892_v38  ;;  %9254 = vmatpush1.bf16.msra.mxu1 %v13894_v35  ;;  %v8298_v38 = vld [vmem:[%s15757_s2 + $0xc60] sm:$0xff]  ;;  %v13944_v35 = vsel %vm5479_vm1, %v5480_v49, %v5481_v5  ;;  %v16272_v49 = vrot.slane %v13306_v56, 1  ;;  %v8311_v5 = vld [vmem:[%s15757_s2 + $0xcc8] sm:$0xff] }
 0x2f7   : > { %9256 = vmatprep.subr.bf16.mxu0 %v13898_v24  ;;  %9320 = vmatprep.subr.bf16.mxu1 %v13900_v51  ;;  %v13947_v24 = vpack.c.bf16 %v8299_v4, %v8295_v43  ;;  %v13949_v51 = vpack.c.bf16 %v8301_v45, %v8297_v20  ;;  %v5492_v43 = vrot.slane %v13404_v26, 1  ;;  %v8307_v4 = vld [vmem:[%s15757_s2 + $0xca8] sm:$0xff]  ;;  %v8305_v20 = vld [vmem:[%s15757_s2 + $0xc98] sm:$0xff]  ;;  %16274 = vst [vmem:[#allocation190_spill] sm:$0xff] %v13983_v2 }
 0x2f8   : > { %v13965_v63 = vsel %vm5479_vm1, %v16272_v49, %v5488_v54  ;;  %v8309_v45 = vld [vmem:[%s15757_s2 + $0xcb8] sm:$0xff]  ;;  %v13981_v49 = vpack.c.bf16 %v8298_v38, %v8294_v8  ;;  %v5490_v8 = vrot.slane %v13435_v17, 1  ;;  %v13997_v38 = vpack.c.bf16 %v8307_v4, %v8303_v53  ;;  %v8315_v4 = vld [vmem:[%s15757_s2 + $0xce8] sm:$0xff] }
 0x2f9   : > { %16270 = vst [vmem:[#allocation187_spill] sm:$0xff] %v13947_v24  ;;  %16271 = vst [vmem:[#allocation188_spill] sm:$0xff] %v13949_v51  ;;  %5573 = vmatmul.mubr.f32.vlgmr.msra.gmra.mrb[40].mxu0 %v13944_v35  ;;  %5668 = vmatmul.mubr.f32.vlgmr.msra.gmra.mrb[40].mxu1 %v13944_v35  ;;  %v13999_v60 = vpack.c.bf16 %v8309_v45, %v8305_v20  ;;  %v14016_v53 = vsel %vm5479_vm1, %v5488_v54, %v5492_v43  ;;  %v8313_v20 = vld [vmem:[%s15757_s2 + $0xcd8] sm:$0xff] }
 0x2fa   : > { %5578 = vmatprep.mubr.f32.mxu0 %v13965_v63  ;;  %5673 = vmatprep.mubr.f32.mxu1 %v13965_v63  ;;  %16273 = vst [vmem:[#allocation189_spill] sm:$0xff] %v13981_v49  ;;  %16275 = vst [vmem:[#allocation191_spill] sm:$0xff] %v13997_v38  ;;  %v8317_v45 = vld [vmem:[%s15757_s2 + $0xcf8] sm:$0xff]  ;;  %v14031_v54 = vpack.c.bf16 %v8306_v12, %v8302_v29  ;;  %v14045_v40 = vsel %vm5479_vm1, %v5486_v47, %v5490_v8  ;;  %v8319_v47 = vld [vmem:[%s15757_s2 + $0xd08] sm:$0xff] }
 0x2fb   : > { %9258 = vmatpush1.bf16.msra.mxu0 %v13933_v3  ;;  %9322 = vmatpush1.bf16.msra.mxu1 %v13935_v48  ;;  %16276 = vst [vmem:[#allocation192_spill] sm:$0xff] %v13999_v60  ;;  %v8308_v48 = vld [vmem:[%s15757_s2 + $0xcb0] sm:$0xff]  ;;  %v8310_v3 = vld [vmem:[%s15757_s2 + $0xcc0] sm:$0xff]  ;;  %v14049_v29 = vpack.c.bf16 %v8315_v4, %v8311_v5  ;;  %v14051_v12 = vpack.c.bf16 %v8317_v45, %v8313_v20  ;;  %v8323_v4 = vld [vmem:[%s15757_s2 + $0xd28] sm:$0xff] }
 0x2fc   : > { %9260 = vmatprep.subr.bf16.mxu0 %v13947_v24  ;;  %9324 = vmatprep.subr.bf16.mxu1 %v13949_v51  ;;  %v14011_v51 = vrot.slane %v13450_v15, 1  ;;  %16277 = vst [vmem:[#allocation193_spill] sm:$0xff] %v14031_v54  ;;  %v14033_v24 = vpack.c.bf16 %v8308_v48, %v8304_v37  ;;  %v8312_v48 = vld [vmem:[%s15757_s2 + $0xcd0] sm:$0xff]  ;;  %v8321_v20 = vld [vmem:[%s15757_s2 + $0xd18] sm:$0xff] }
 0x2fd   : > { %5579 = vmatmul.mubr.f32.gmra.mrb[42].mxu0 %v13992_v31  ;;  %5674 = vmatmul.mubr.f32.gmra.mrb[42].mxu1 %v13992_v31  ;;  %16279 = vst [vmem:[#allocation195_spill] sm:$0xff] %v14049_v29  ;;  %16280 = vst [vmem:[#allocation196_spill] sm:$0xff] %v14051_v12  ;;  %v8316_v37 = vld [vmem:[%s15757_s2 + $0xcf0] sm:$0xff]  ;;  %v8325_v45 = vld [vmem:[%s15757_s2 + $0xd38] sm:$0xff] }
 0x2fe   : > { %5584 = vmatprep.mubr.f32.mxu0 %v14016_v53  ;;  %5679 = vmatprep.mubr.f32.mxu1 %v14016_v53  ;;  %16278 = vst [vmem:[#allocation194_spill] sm:$0xff] %v14033_v24  ;;  %v14066_v5 = vsel %vm5479_vm1, %v5492_v43, %v14011_v51  ;;  %v14081_v43 = vpack.c.bf16 %v8314_v28, %v8310_v3 }
 0x2ff   : > { %9262 = vmatpush1.bf16.msra.mxu0 %v13981_v49  ;;  %9326 = vmatpush1.bf16.msra.mxu1 %v13983_v2  ;;  %v8322_v2 = vld [vmem:[%s15757_s2 + $0xd20] sm:$0xff]  ;;  %v14093_v49 = vsel %vm5479_vm1, %v5490_v8, %v14042_v55  ;;  %v14097_v28 = vpack.c.bf16 %v8323_v4, %v8319_v47  ;;  %v14099_v3 = vpack.c.bf16 %v8325_v45, %v8321_v20  ;;  %v8327_v8 = vld [vmem:[%s15757_s2 + $0xd48] sm:$0xff]  ;;  %v8329_v20 = vld [vmem:[%s15757_s2 + $0xd58] sm:$0xff] }
 0x300   : > { %9264 = vmatprep.subr.bf16.mxu0 %v13997_v38  ;;  %9328 = vmatprep.subr.bf16.mxu1 %v13999_v60  ;;  %16281 = vst [vmem:[#allocation197_spill] sm:$0xff] %v14081_v43  ;;  %v14083_v60 = vpack.c.bf16 %v8316_v37, %v8312_v48  ;;  %v8318_v38 = vld [vmem:[%s15757_s2 + $0xd00] sm:$0xff]  ;;  %v8320_v48 = vld [vmem:[%s15757_s2 + $0xd10] sm:$0xff]  ;;  %v8331_v4 = vld [vmem:[%s15757_s2 + $0xd68] sm:$0xff] }
 0x301   : > { %5585 = vmatmul.mubr.f32.gmra.mrb[44].mxu0 %v14045_v40  ;;  %5680 = vmatmul.mubr.f32.gmra.mrb[44].mxu1 %v14045_v40  ;;  %16283 = vst [vmem:[#allocation199_spill] sm:$0xff] %v14097_v28  ;;  %16284 = vst [vmem:[#allocation200_spill] sm:$0xff] %v14099_v3  ;;  %v8324_v37 = vld [vmem:[%s15757_s2 + $0xd30] sm:$0xff]  ;;  %v8333_v45 = vld [vmem:[%s15757_s2 + $0xd78] sm:$0xff]  ;;  %v14126_v47 = vpack.c.bf16 %v8322_v2, %v8318_v38 }
 0x302   : > { %5590 = vmatprep.mubr.f32.mxu0 %v14066_v5  ;;  %5685 = vmatprep.mubr.f32.mxu1 %v14066_v5  ;;  %16282 = vst [vmem:[#allocation198_spill] sm:$0xff] %v14083_v60  ;;  %v14141_v2 = vpack.c.bf16 %v8333_v45, %v8329_v20  ;;  %v8328_v38 = vld [vmem:[%s15757_s2 + $0xd50] sm:$0xff]  ;;  %v8339_v20 = vld [vmem:[%s15757_s2 + $0xda8] sm:$0xff]  ;;  %v8337_v45 = vld [vmem:[%s15757_s2 + $0xd98] sm:$0xff] }
 0x303   : > { %9266 = vmatpush1.bf16.msra.mxu0 %v14031_v54  ;;  %9330 = vmatpush1.bf16.msra.mxu1 %v14033_v24  ;;  %16285 = vst [vmem:[#allocation201_spill] sm:$0xff] %v14126_v47  ;;  %v8326_v24 = vld [vmem:[%s15757_s2 + $0xd40] sm:$0xff] }
 0x304   : > { %9268 = vmatprep.subr.bf16.mxu0 %v14049_v29  ;;  %9332 = vmatprep.subr.bf16.mxu1 %v14051_v12  ;;  %v5860_v12 = vrot.slane %v12636_v39, 1  ;;  %v14129_v29 = vpack.c.bf16 %v8324_v37, %v8320_v48  ;;  %v8330_v54 = vld [vmem:[%s15757_s2 + $0xd60] sm:$0xff]  ;;  %16288 = vst [vmem:[#allocation204_spill] sm:$0xff] %v14141_v2  ;;  %v8332_v48 = vld [vmem:[%s15757_s2 + $0xd70] sm:$0xff]  ;;  %v8335_v37 = vld [vmem:[%s15757_s2 + $0xd88] sm:$0xff] }
 0x305   : > { %5591 = vmatmul.mubr.f32.gmra.mrb[46].mxu0 %v14093_v49  ;;  %5686 = vmatmul.mubr.f32.gmra.mrb[46].mxu1 %v14093_v49 }
 0x306   : > { %5596 = vmatprep.mubr.f32.mxu0 %v14011_v51  ;;  %5691 = vmatprep.mubr.f32.mxu1 %v14011_v51  ;;  %16286 = vst [vmem:[#allocation202_spill] sm:$0xff] %v14129_v29 }
 0x307   : > { %9270 = vmatpush1.bf16.msra.mxu0 %v14081_v43  ;;  %9334 = vmatpush1.bf16.msra.mxu1 %v14083_v60  ;;  %v14139_v43 = vpack.c.bf16 %v8331_v4, %v8327_v8  ;;  %v16289_v8 = vrot.slane %v12673_v42, 1  ;;  %v8338_v60 = vld [vmem:[%s15757_s2 + $0xda0] sm:$0xff] }
 0x308   : > { %9272 = vmatprep.subr.bf16.mxu0 %v14097_v28  ;;  %9336 = vmatprep.subr.bf16.mxu1 %v14099_v3  ;;  %v8341_v3 = vld [vmem:[%s15757_s2 + $0xdb8] sm:$0xff]  ;;  %v8334_v28 = vld [vmem:[%s15757_s2 + $0xd80] sm:$0xff] }
 0x309   : > { %16287 = vst [vmem:[#allocation203_spill] sm:$0xff] %v14139_v43  ;;  %5597 = vmatmul.mubr.f32.gmra.mrb[48].mxu0 %v14042_v55  ;;  %5692 = vmatmul.mubr.f32.gmra.mrb[48].mxu1 %v14042_v55  ;;  %v14157_v4 = vsel %vm5479_vm1, %v5860_v12, %v16289_v8  ;;  %v14172_v12 = vpack.c.bf16 %v8330_v54, %v8326_v24  ;;  %v8336_v24 = vld [vmem:[%s15757_s2 + $0xd90] sm:$0xff] }
 0x30a   : > { %16290 = vst [vmem:[#allocation205_spill] sm:$0xff] %v14157_v4  ;;  %5949 = vmatprep.mubr.f32.mxu0 %v14157_v4  ;;  %6044 = vmatprep.mubr.f32.mxu1 %v14157_v4  ;;  %v14174_v8 = vpack.c.bf16 %v8332_v48, %v8328_v38  ;;  %v14184_v4 = vpack.c.bf16 %v8339_v20, %v8335_v37  ;;  %v8340_v54 = vld [vmem:[%s15757_s2 + $0xdb0] sm:$0xff]  ;;  %v8343_v38 = vld [vmem:[%s15757_s2 + $0xdc8] sm:$0xff]  ;;  %v8349_v37 = vld [vmem:[%s15757_s2 + $0xdf8] sm:$0xff] }
 0x30b   : > { %9274 = vmatpush1.bf16.msra.mxu0 %v14126_v47  ;;  %9338 = vmatpush1.bf16.msra.mxu1 %v14129_v29  ;;  %16291 = vst [vmem:[#allocation206_spill] sm:$0xff] %v14172_v12  ;;  %v14186_v47 = vpack.c.bf16 %v8341_v3, %v8337_v45  ;;  %v8347_v48 = vld [vmem:[%s15757_s2 + $0xde8] sm:$0xff]  ;;  %v8345_v3 = vld [vmem:[%s15757_s2 + $0xdd8] sm:$0xff]  ;;  %v14208_v20 = vpack.c.bf16 %v8338_v60, %v8334_v28  ;;  %v8344_v60 = vld [vmem:[%s15757_s2 + $0xdd0] sm:$0xff] }
 0x30c   : > { %16292 = vst [vmem:[#allocation207_spill] sm:$0xff] %v14174_v8  ;;  %9276 = vmatprep.subr.bf16.mxu0 %v14139_v43  ;;  %9340 = vmatprep.subr.bf16.mxu1 %v14141_v2  ;;  %16293 = vst [vmem:[#allocation208_spill] sm:$0xff] %v14184_v4  ;;  %v14210_v45 = vpack.c.bf16 %v8340_v54, %v8336_v24  ;;  %v8342_v2 = vld [vmem:[%s15757_s2 + $0xdc0] sm:$0xff]  ;;  %v14220_v29 = vpack.c.bf16 %v8347_v48, %v8343_v38  ;;  %v8348_v28 = vld [vmem:[%s15757_s2 + $0xdf0] sm:$0xff] }
 0x30d   : > { %16294 = vst [vmem:[#allocation209_spill] sm:$0xff] %v14186_v47  ;;  %16295 = vst [vmem:[#allocation210_spill] sm:$0xff] %v14208_v20  ;;  %v8346_v43 = vld [vmem:[%s15757_s2 + $0xde0] sm:$0xff]  ;;  %v8351_v24 = vld [vmem:[%s15757_s2 + $0xe08] sm:$0xff] }
 0x30e   : > { %16296 = vst [vmem:[#allocation211_spill] sm:$0xff] %v14210_v45  ;;  %16297 = vst [vmem:[#allocation212_spill] sm:$0xff] %v14220_v29  ;;  %v8355_v54 = vld [vmem:[%s15757_s2 + $0xe28] sm:$0xff]  ;;  %v8353_v38 = vld [vmem:[%s15757_s2 + $0xe18] sm:$0xff] }
 0x30f   : > { %9278 = vmatpush1.bf16.msra.mxu0 %v14172_v12  ;;  %9342 = vmatpush1.bf16.msra.mxu1 %v14174_v8  ;;  %v14222_v12 = vpack.c.bf16 %v8349_v37, %v8345_v3  ;;  %v8357_v48 = vld [vmem:[%s15757_s2 + $0xe38] sm:$0xff]  ;;  %v14244_v3 = vpack.c.bf16 %v8346_v43, %v8342_v2  ;;  %v14246_v37 = vpack.c.bf16 %v8348_v28, %v8344_v60  ;;  %v8352_v43 = vld [vmem:[%s15757_s2 + $0xe10] sm:$0xff]  ;;  %v8359_v60 = vld [vmem:[%s15757_s2 + $0xe48] sm:$0xff] }
 0x310   : > { %9280 = vmatprep.subr.bf16.mxu0 %v14184_v4  ;;  %9344 = vmatprep.subr.bf16.mxu1 %v14186_v47  ;;  %v8350_v47 = vld [vmem:[%s15757_s2 + $0xe00] sm:$0xff]  ;;  %v14256_v8 = vpack.c.bf16 %v8355_v54, %v8351_v24  ;;  %v8356_v2 = vld [vmem:[%s15757_s2 + $0xe30] sm:$0xff]  ;;  %v8363_v28 = vld [vmem:[%s15757_s2 + $0xe68] sm:$0xff] }
 0x311   : > { %16298 = vst [vmem:[#allocation213_spill] sm:$0xff] %v14222_v12  ;;  %16299 = vst [vmem:[#allocation214_spill] sm:$0xff] %v14244_v3  ;;  %v8354_v4 = vld [vmem:[%s15757_s2 + $0xe20] sm:$0xff]  ;;  %v8361_v24 = vld [vmem:[%s15757_s2 + $0xe58] sm:$0xff] }
 0x312   : > { %16300 = vst [vmem:[#allocation215_spill] sm:$0xff] %v14246_v37  ;;  %16301 = vst [vmem:[#allocation216_spill] sm:$0xff] %v14256_v8  ;;  %v8365_v54 = vld [vmem:[%s15757_s2 + $0xe78] sm:$0xff] }
 0x313   : > { %9282 = vmatpush1.bf16.msra.mxu0 %v14208_v20  ;;  %9346 = vmatpush1.bf16.msra.mxu1 %v14210_v45  ;;  %v14258_v20 = vpack.c.bf16 %v8357_v48, %v8353_v38  ;;  %v14280_v38 = vpack.c.bf16 %v8354_v4, %v8350_v47  ;;  %v14282_v48 = vpack.c.bf16 %v8356_v2, %v8352_v43  ;;  %v8360_v47 = vld [vmem:[%s15757_s2 + $0xe50] sm:$0xff]  ;;  %v8367_v43 = vld [vmem:[%s15757_s2 + $0xe88] sm:$0xff] }
 0x314   : > { %9284 = vmatprep.subr.bf16.mxu0 %v14220_v29  ;;  %9348 = vmatprep.subr.bf16.mxu1 %v14222_v12  ;;  %v8358_v12 = vld [vmem:[%s15757_s2 + $0xe40] sm:$0xff]  ;;  %v14292_v45 = vpack.c.bf16 %v8363_v28, %v8359_v60  ;;  %v8364_v4 = vld [vmem:[%s15757_s2 + $0xe70] sm:$0xff]  ;;  %v8371_v2 = vld [vmem:[%s15757_s2 + $0xea8] sm:$0xff] }
 0x315   : > { %16302 = vst [vmem:[#allocation217_spill] sm:$0xff] %v14258_v20  ;;  %16303 = vst [vmem:[#allocation218_spill] sm:$0xff] %v14280_v38  ;;  %v8362_v29 = vld [vmem:[%s15757_s2 + $0xe60] sm:$0xff]  ;;  %v8369_v60 = vld [vmem:[%s15757_s2 + $0xe98] sm:$0xff] }
 0x316   : > { %16304 = vst [vmem:[#allocation219_spill] sm:$0xff] %v14282_v48  ;;  %16305 = vst [vmem:[#allocation220_spill] sm:$0xff] %v14292_v45  ;;  %v8373_v28 = vld [vmem:[%s15757_s2 + $0xeb8] sm:$0xff] }
 0x317   : > { %9286 = vmatpush1.bf16.msra.mxu0 %v14244_v3  ;;  %9350 = vmatpush1.bf16.msra.mxu1 %v14246_v37  ;;  %v14294_v3 = vpack.c.bf16 %v8365_v54, %v8361_v24  ;;  %v14316_v24 = vpack.c.bf16 %v8362_v29, %v8358_v12  ;;  %v14318_v54 = vpack.c.bf16 %v8364_v4, %v8360_v47  ;;  %v8368_v29 = vld [vmem:[%s15757_s2 + $0xe90] sm:$0xff]  ;;  %v8375_v47 = vld [vmem:[%s15757_s2 + $0xec8] sm:$0xff] }
 0x318   : > { %9288 = vmatprep.subr.bf16.mxu0 %v14256_v8  ;;  %9352 = vmatprep.subr.bf16.mxu1 %v14258_v20  ;;  %v8366_v20 = vld [vmem:[%s15757_s2 + $0xe80] sm:$0xff]  ;;  %v14328_v37 = vpack.c.bf16 %v8371_v2, %v8367_v43  ;;  %v8372_v12 = vld [vmem:[%s15757_s2 + $0xeb0] sm:$0xff]  ;;  %v8379_v4 = vld [vmem:[%s15757_s2 + $0xee8] sm:$0xff] }
 0x319   : > { %16306 = vst [vmem:[#allocation221_spill] sm:$0xff] %v14294_v3  ;;  %16307 = vst [vmem:[#allocation222_spill] sm:$0xff] %v14316_v24  ;;  %v8370_v8 = vld [vmem:[%s15757_s2 + $0xea0] sm:$0xff]  ;;  %v8377_v43 = vld [vmem:[%s15757_s2 + $0xed8] sm:$0xff] }
 0x31a   : > { %16308 = vst [vmem:[#allocation223_spill] sm:$0xff] %v14318_v54  ;;  %16309 = vst [vmem:[#allocation224_spill] sm:$0xff] %v14328_v37  ;;  %v8381_v2 = vld [vmem:[%s15757_s2 + $0xef8] sm:$0xff] }
 0x31b   : > { %9290 = vmatpush1.bf16.msra.mxu0 %v14280_v38  ;;  %9354 = vmatpush1.bf16.msra.mxu1 %v14282_v48  ;;  %v14330_v38 = vpack.c.bf16 %v8373_v28, %v8369_v60  ;;  %v14352_v60 = vpack.c.bf16 %v8370_v8, %v8366_v20  ;;  %v14354_v28 = vpack.c.bf16 %v8372_v12, %v8368_v29  ;;  %v8376_v8 = vld [vmem:[%s15757_s2 + $0xed0] sm:$0xff]  ;;  %v8383_v29 = vld [vmem:[%s15757_s2 + $0xf08] sm:$0xff] }
 0x31c   : > { %9292 = vmatprep.subr.bf16.mxu0 %v14292_v45  ;;  %9356 = vmatprep.subr.bf16.mxu1 %v14294_v3  ;;  %v8374_v3 = vld [vmem:[%s15757_s2 + $0xec0] sm:$0xff]  ;;  %v14364_v48 = vpack.c.bf16 %v8379_v4, %v8375_v47  ;;  %v8380_v20 = vld [vmem:[%s15757_s2 + $0xef0] sm:$0xff]  ;;  %v8387_v12 = vld [vmem:[%s15757_s2 + $0xf28] sm:$0xff] }
 0x31d   : > { %16310 = vst [vmem:[#allocation225_spill] sm:$0xff] %v14330_v38  ;;  %16311 = vst [vmem:[#allocation226_spill] sm:$0xff] %v14352_v60  ;;  %v8378_v45 = vld [vmem:[%s15757_s2 + $0xee0] sm:$0xff]  ;;  %v8385_v47 = vld [vmem:[%s15757_s2 + $0xf18] sm:$0xff] }
 0x31e   : > { %16312 = vst [vmem:[#allocation227_spill] sm:$0xff] %v14354_v28  ;;  %16313 = vst [vmem:[#allocation228_spill] sm:$0xff] %v14364_v48  ;;  %v8389_v4 = vld [vmem:[%s15757_s2 + $0xf38] sm:$0xff] }
 0x31f   : > { %9294 = vmatpush1.bf16.msra.mxu0 %v14316_v24  ;;  %9358 = vmatpush1.bf16.msra.mxu1 %v14318_v54  ;;  %v14366_v24 = vpack.c.bf16 %v8381_v2, %v8377_v43  ;;  %v14388_v43 = vpack.c.bf16 %v8378_v45, %v8374_v3  ;;  %v14390_v2 = vpack.c.bf16 %v8380_v20, %v8376_v8  ;;  %v8384_v45 = vld [vmem:[%s15757_s2 + $0xf10] sm:$0xff]  ;;  %v8391_v8 = vld [vmem:[%s15757_s2 + $0xf48] sm:$0xff] }
 0x320   : > { %9296 = vmatprep.subr.bf16.mxu0 %v14328_v37  ;;  %9360 = vmatprep.subr.bf16.mxu1 %v14330_v38  ;;  %v8382_v38 = vld [vmem:[%s15757_s2 + $0xf00] sm:$0xff]  ;;  %v14400_v54 = vpack.c.bf16 %v8387_v12, %v8383_v29  ;;  %v8388_v3 = vld [vmem:[%s15757_s2 + $0xf30] sm:$0xff]  ;;  %v8395_v20 = vld [vmem:[%s15757_s2 + $0xf68] sm:$0xff] }
 0x321   : > { %16314 = vst [vmem:[#allocation229_spill] sm:$0xff] %v14366_v24  ;;  %16315 = vst [vmem:[#allocation230_spill] sm:$0xff] %v14388_v43  ;;  %v8386_v37 = vld [vmem:[%s15757_s2 + $0xf20] sm:$0xff]  ;;  %v8393_v29 = vld [vmem:[%s15757_s2 + $0xf58] sm:$0xff] }
 0x322   : > { %16316 = vst [vmem:[#allocation231_spill] sm:$0xff] %v14390_v2  ;;  %16317 = vst [vmem:[#allocation232_spill] sm:$0xff] %v14400_v54  ;;  %v8397_v12 = vld [vmem:[%s15757_s2 + $0xf78] sm:$0xff] }
 0x323   : > { %9298 = vmatpush1.bf16.msra.mxu0 %v14352_v60  ;;  %9362 = vmatpush1.bf16.msra.mxu1 %v14354_v28  ;;  %v14402_v60 = vpack.c.bf16 %v8389_v4, %v8385_v47  ;;  %v14424_v47 = vpack.c.bf16 %v8386_v37, %v8382_v38  ;;  %v14426_v4 = vpack.c.bf16 %v8388_v3, %v8384_v45  ;;  %v8392_v37 = vld [vmem:[%s15757_s2 + $0xf50] sm:$0xff]  ;;  %v8399_v45 = vld [vmem:[%s15757_s2 + $0xf88] sm:$0xff] }
 0x324   : > { %9300 = vmatprep.subr.bf16.mxu0 %v14364_v48  ;;  %9364 = vmatprep.subr.bf16.mxu1 %v14366_v24  ;;  %v8390_v24 = vld [vmem:[%s15757_s2 + $0xf40] sm:$0xff]  ;;  %v14436_v28 = vpack.c.bf16 %v8395_v20, %v8391_v8  ;;  %v8396_v38 = vld [vmem:[%s15757_s2 + $0xf70] sm:$0xff]  ;;  %v8403_v3 = vld [vmem:[%s15757_s2 + $0xfa8] sm:$0xff] }
 0x325   : > { %16318 = vst [vmem:[#allocation233_spill] sm:$0xff] %v14402_v60  ;;  %16319 = vst [vmem:[#allocation234_spill] sm:$0xff] %v14424_v47  ;;  %v8394_v48 = vld [vmem:[%s15757_s2 + $0xf60] sm:$0xff]  ;;  %v8401_v8 = vld [vmem:[%s15757_s2 + $0xf98] sm:$0xff] }
 0x326   : > { %16320 = vst [vmem:[#allocation235_spill] sm:$0xff] %v14426_v4  ;;  %16321 = vst [vmem:[#allocation236_spill] sm:$0xff] %v14436_v28  ;;  %v8405_v20 = vld [vmem:[%s15757_s2 + $0xfb8] sm:$0xff] }
 0x327   : > { %9302 = vmatpush1.bf16.msra.mxu0 %v14388_v43  ;;  %9366 = vmatpush1.bf16.msra.mxu1 %v14390_v2  ;;  %v14438_v43 = vpack.c.bf16 %v8397_v12, %v8393_v29  ;;  %v14460_v29 = vpack.c.bf16 %v8394_v48, %v8390_v24  ;;  %v14462_v12 = vpack.c.bf16 %v8396_v38, %v8392_v37  ;;  %v8400_v48 = vld [vmem:[%s15757_s2 + $0xf90] sm:$0xff]  ;;  %v8407_v37 = vld [vmem:[%s15757_s2 + $0xfc8] sm:$0xff] }
 0x328   : > { %9304 = vmatprep.subr.bf16.mxu0 %v14400_v54  ;;  %9368 = vmatprep.subr.bf16.mxu1 %v14402_v60  ;;  %v8398_v60 = vld [vmem:[%s15757_s2 + $0xf80] sm:$0xff]  ;;  %v14472_v2 = vpack.c.bf16 %v8403_v3, %v8399_v45  ;;  %v8404_v24 = vld [vmem:[%s15757_s2 + $0xfb0] sm:$0xff]  ;;  %v8411_v38 = vld [vmem:[%s15757_s2 + $0xfe8] sm:$0xff] }
 0x329   : > { %16322 = vst [vmem:[#allocation237_spill] sm:$0xff] %v14438_v43  ;;  %16323 = vst [vmem:[#allocation238_spill] sm:$0xff] %v14460_v29  ;;  %v8402_v54 = vld [vmem:[%s15757_s2 + $0xfa0] sm:$0xff]  ;;  %v8409_v45 = vld [vmem:[%s15757_s2 + $0xfd8] sm:$0xff] }
 0x32a   : > { %16324 = vst [vmem:[#allocation239_spill] sm:$0xff] %v14462_v12  ;;  %16325 = vst [vmem:[#allocation240_spill] sm:$0xff] %v14472_v2  ;;  %v8413_v3 = vld [vmem:[%s15757_s2 + $0xff8] sm:$0xff] }
 0x32b   : > { %9306 = vmatpush1.bf16.msra.mxu0 %v14424_v47  ;;  %9370 = vmatpush1.bf16.msra.mxu1 %v14426_v4  ;;  %v14474_v47 = vpack.c.bf16 %v8405_v20, %v8401_v8  ;;  %v14496_v8 = vpack.c.bf16 %v8402_v54, %v8398_v60  ;;  %v14498_v20 = vpack.c.bf16 %v8404_v24, %v8400_v48  ;;  %v8408_v54 = vld [vmem:[%s15757_s2 + $0xfd0] sm:$0xff]  ;;  %v8415_v48 = vld [vmem:[%s15757_s2 + $0x1008] sm:$0xff] }
 0x32c   : > { %9308 = vmatprep.subr.bf16.mxu0 %v14436_v28  ;;  %9372 = vmatprep.subr.bf16.mxu1 %v14438_v43  ;;  %v8406_v43 = vld [vmem:[%s15757_s2 + $0xfc0] sm:$0xff]  ;;  %v14508_v4 = vpack.c.bf16 %v8411_v38, %v8407_v37  ;;  %v8412_v60 = vld [vmem:[%s15757_s2 + $0xff0] sm:$0xff]  ;;  %v8419_v24 = vld [vmem:[%s15757_s2 + $0x1028] sm:$0xff] }
 0x32d   : > { %16326 = vst [vmem:[#allocation241_spill] sm:$0xff] %v14474_v47  ;;  %16327 = vst [vmem:[#allocation242_spill] sm:$0xff] %v14496_v8  ;;  %v8410_v28 = vld [vmem:[%s15757_s2 + $0xfe0] sm:$0xff]  ;;  %v8417_v37 = vld [vmem:[%s15757_s2 + $0x1018] sm:$0xff] }
 0x32e   : > { %16328 = vst [vmem:[#allocation243_spill] sm:$0xff] %v14498_v20  ;;  %16329 = vst [vmem:[#allocation244_spill] sm:$0xff] %v14508_v4  ;;  %v8421_v38 = vld [vmem:[%s15757_s2 + $0x1038] sm:$0xff] }
 0x32f   : > { %9310 = vmatpush1.bf16.msra.mxu0 %v14460_v29  ;;  %9374 = vmatpush1.bf16.msra.mxu1 %v14462_v12  ;;  %v14510_v29 = vpack.c.bf16 %v8413_v3, %v8409_v45  ;;  %v14532_v45 = vpack.c.bf16 %v8410_v28, %v8406_v43  ;;  %v14534_v3 = vpack.c.bf16 %v8412_v60, %v8408_v54  ;;  %v8414_v12 = vld [vmem:[%s15757_s2 + $0x1000] sm:$0xff]  ;;  %v5858_v28 = vrot.slane %v12688_v11, 1  ;;  %v8416_v43 = vld [vmem:[%s15757_s2 + $0x1010] sm:$0xff]  ;;  %v8423_v60 = vld [vmem:[%s15757_s2 + $0x1048] sm:$0xff] }
 0x330   : > { %9312 = vmatprep.subr.bf16.mxu0 %v14472_v2  ;;  %9376 = vmatprep.subr.bf16.mxu1 %v14474_v47  ;;  %v14538_v47 = vpack.c.bf16 %v8419_v24, %v8415_v48  ;;  %v14540_v2 = vpack.c.bf16 %v8421_v38, %v8417_v37  ;;  %v8420_v54 = vld [vmem:[%s15757_s2 + $0x1030] sm:$0xff]  ;;  %v5865_v48 = vrot.slane %v12719_v59, 1  ;;  %v8427_v24 = vld [vmem:[%s15757_s2 + $0x1068] sm:$0xff]  ;;  %v8425_v37 = vld [vmem:[%s15757_s2 + $0x1058] sm:$0xff]  ;;  %v5863_v11 = vrot.slane %v12744_v25, 1 }
 0x331   : > { %16330 = vst [vmem:[#allocation245_spill] sm:$0xff] %v14510_v29  ;;  %16331 = vst [vmem:[#allocation246_spill] sm:$0xff] %v14532_v45  ;;  %v8429_v38 = vld [vmem:[%s15757_s2 + $0x1078] sm:$0xff]  ;;  %v8422_v59 = vld [vmem:[%s15757_s2 + $0x1040] sm:$0xff] }
 0x332   : > { %16332 = vst [vmem:[#allocation247_spill] sm:$0xff] %v14534_v3  ;;  %16333 = vst [vmem:[#allocation248_spill] sm:$0xff] %v14538_v47  ;;  %v8434_v25 = vld [vmem:[%s15757_s2 + $0x10a0] sm:$0xff] }
 0x333   : > { %9314 = vmatpush1.bf16.msra.mxu0 %v14496_v8  ;;  %9378 = vmatpush1.bf16.msra.mxu1 %v14498_v20  ;;  %16334 = vst [vmem:[#allocation249_spill] sm:$0xff] %v14540_v2  ;;  %v8418_v20 = vld [vmem:[%s15757_s2 + $0x1020] sm:$0xff]  ;;  %v14575_v8 = vpack.c.bf16 %v8420_v54, %v8416_v43  ;;  %v8431_v43 = vld [vmem:[%s15757_s2 + $0x1088] sm:$0xff] }
 0x334   : > { %9316 = vmatprep.subr.bf16.mxu0 %v14508_v4  ;;  %9380 = vmatprep.subr.bf16.mxu1 %v14510_v29  ;;  %v5857_v29 = vrot.slane %v12649_v1, 1  ;;  %v14573_v4 = vpack.c.bf16 %v8418_v20, %v8414_v12  ;;  %v8424_v12 = vld [vmem:[%s15757_s2 + $0x1050] sm:$0xff] }
 0x335   : > { %16336 = vst [vmem:[#allocation251_spill] sm:$0xff] %v14575_v8  ;;  %v8428_v20 = vld [vmem:[%s15757_s2 + $0x1070] sm:$0xff] }
 0x336   : > { %16335 = vst [vmem:[#allocation250_spill] sm:$0xff] %v14573_v4 }
 0x337   : > { %9318 = vmatpush1.bf16.msra.mxu0 %v14532_v45  ;;  %9382 = vmatpush1.bf16.msra.mxu1 %v14534_v3  ;;  %v8426_v45 = vld [vmem:[%s15757_s2 + $0x1060] sm:$0xff]  ;;  %v14584_v3 = vsel %vm5479_vm1, %v5857_v29, %v5858_v28  ;;  %v16340_v29 = vrot.slane %v12673_v42, 1  ;;  %v14632_v42 = vsel %vm5479_vm1, %v5858_v28, %v5863_v11  ;;  %v8439_v28 = vld [vmem:[%s15757_s2 + $0x10c8] sm:$0xff] }
 0x338   : > { %9384 = vmatprep.subr.bf16.mxu0 %v14538_v47  ;;  %9448 = vmatprep.subr.bf16.mxu1 %v14540_v2  ;;  %16337 = vst [vmem:[#allocation252_spill] sm:$0xff] %v14584_v3  ;;  %v14587_v47 = vpack.c.bf16 %v8427_v24, %v8423_v60  ;;  %v14589_v2 = vpack.c.bf16 %v8429_v38, %v8425_v37  ;;  %v5869_v60 = vrot.slane %v12772_v9, 1  ;;  %v8435_v24 = vld [vmem:[%s15757_s2 + $0x10a8] sm:$0xff]  ;;  %v8433_v37 = vld [vmem:[%s15757_s2 + $0x1098] sm:$0xff]  ;;  %v8430_v9 = vld [vmem:[%s15757_s2 + $0x1080] sm:$0xff] }
 0x339   : > { %v14605_v54 = vsel %vm5479_vm1, %v16340_v29, %v5865_v48  ;;  %v8437_v38 = vld [vmem:[%s15757_s2 + $0x10b8] sm:$0xff]  ;;  %v14621_v29 = vpack.c.bf16 %v8426_v45, %v8422_v59  ;;  %16344 = vst [vmem:[#allocation258_spill] sm:$0xff] %v14632_v42  ;;  %v5867_v59 = vrot.slane %v12796_v34, 1  ;;  %v14637_v45 = vpack.c.bf16 %v8435_v24, %v8431_v43 }
 0x33a   : > { %16338 = vst [vmem:[#allocation253_spill] sm:$0xff] %v14587_v47  ;;  %16339 = vst [vmem:[#allocation254_spill] sm:$0xff] %v14589_v2  ;;  %5950 = vmatmul.mubr.f32.vlgmr.msra.gmra.mrb[40].mxu0 %v14584_v3  ;;  %6045 = vmatmul.mubr.f32.vlgmr.msra.gmra.mrb[40].mxu1 %v14584_v3  ;;  %v14623_v3 = vpack.c.bf16 %v8428_v20, %v8424_v12  ;;  %v14639_v12 = vpack.c.bf16 %v8437_v38, %v8433_v37  ;;  %v8432_v20 = vld [vmem:[%s15757_s2 + $0x1090] sm:$0xff]  ;;  %v14656_v24 = vrot.slane %v12821_v7, 1  ;;  %v8443_v37 = vld [vmem:[%s15757_s2 + $0x10e8] sm:$0xff] }
 0x33b   : > { %16341 = vst [vmem:[#allocation255_spill] sm:$0xff] %v14605_v54  ;;  %5955 = vmatprep.mubr.f32.mxu0 %v14605_v54  ;;  %6050 = vmatprep.mubr.f32.mxu1 %v14605_v54  ;;  %16342 = vst [vmem:[#allocation256_spill] sm:$0xff] %v14621_v29  ;;  %v14653_v43 = vsel %vm5479_vm1, %v5865_v48, %v5869_v60  ;;  %v8441_v38 = vld [vmem:[%s15757_s2 + $0x10d8] sm:$0xff]  ;;  %v14671_v48 = vpack.c.bf16 %v8434_v25, %v8430_v9  ;;  %v14687_v25 = vrot.slane %v12847_v58, 1 }
 0x33c   : > { %9386 = vmatpush1.bf16.msra.mxu0 %v14573_v4  ;;  %9450 = vmatpush1.bf16.msra.mxu1 %v14575_v8  ;;  %16343 = vst [vmem:[#allocation257_spill] sm:$0xff] %v14623_v3  ;;  %16345 = vst [vmem:[#allocation259_spill] sm:$0xff] %v14637_v45  ;;  %v8436_v8 = vld [vmem:[%s15757_s2 + $0x10b0] sm:$0xff]  ;;  %v8438_v4 = vld [vmem:[%s15757_s2 + $0x10c0] sm:$0xff]  ;;  %v14682_v54 = vsel %vm5479_vm1, %v5863_v11, %v5867_v59  ;;  %v14689_v9 = vpack.c.bf16 %v8443_v37, %v8439_v28 }
 0x33d   : > { %9388 = vmatprep.subr.bf16.mxu0 %v14587_v47  ;;  %9452 = vmatprep.subr.bf16.mxu1 %v14589_v2  ;;  %16346 = vst [vmem:[#allocation260_spill] sm:$0xff] %v14639_v12  ;;  %v8445_v2 = vld [vmem:[%s15757_s2 + $0x10f8] sm:$0xff]  ;;  %16347 = vst [vmem:[#allocation261_spill] sm:$0xff] %v14671_v48  ;;  %v14673_v47 = vpack.c.bf16 %v8436_v8, %v8432_v20  ;;  %v8440_v20 = vld [vmem:[%s15757_s2 + $0x10d0] sm:$0xff] }
 0x33e   : > { %5956 = vmatmul.mubr.f32.gmra.mrb[42].mxu0 %v14632_v42  ;;  %6051 = vmatmul.mubr.f32.gmra.mrb[42].mxu1 %v14632_v42  ;;  %v8442_v42 = vld [vmem:[%s15757_s2 + $0x10e0] sm:$0xff]  ;;  %16349 = vst [vmem:[#allocation263_spill] sm:$0xff] %v14682_v54  ;;  %16350 = vst [vmem:[#allocation264_spill] sm:$0xff] %v14689_v9  ;;  %v14691_v8 = vpack.c.bf16 %v8445_v2, %v8441_v38  ;;  %v8444_v11 = vld [vmem:[%s15757_s2 + $0x10f0] sm:$0xff]  ;;  %v14706_v2 = vsel %vm5479_vm1, %v5869_v60, %v14656_v24 }
 0x33f   : > { %5961 = vmatprep.mubr.f32.mxu0 %v14653_v43  ;;  %6056 = vmatprep.mubr.f32.mxu1 %v14653_v43  ;;  %16348 = vst [vmem:[#allocation262_spill] sm:$0xff] %v14673_v47  ;;  %v8451_v28 = vld [vmem:[%s15757_s2 + $0x1128] sm:$0xff]  ;;  %v8449_v37 = vld [vmem:[%s15757_s2 + $0x1118] sm:$0xff]  ;;  %v14721_v60 = vpack.c.bf16 %v8442_v42, %v8438_v4 }
 0x340   : > { %9390 = vmatpush1.bf16.msra.mxu0 %v14621_v29  ;;  %9454 = vmatpush1.bf16.msra.mxu1 %v14623_v3  ;;  %16351 = vst [vmem:[#allocation265_spill] sm:$0xff] %v14691_v8  ;;  %v8453_v38 = vld [vmem:[%s15757_s2 + $0x1138] sm:$0xff]  ;;  %v8446_v3 = vld [vmem:[%s15757_s2 + $0x1100] sm:$0xff] }
 0x341   : > { %9392 = vmatprep.subr.bf16.mxu0 %v14637_v45  ;;  %9456 = vmatprep.subr.bf16.mxu1 %v14639_v12  ;;  %v8447_v45 = vld [vmem:[%s15757_s2 + $0x1108] sm:$0xff]  ;;  %16352 = vst [vmem:[#allocation266_spill] sm:$0xff] %v14721_v60  ;;  %v14723_v12 = vpack.c.bf16 %v8444_v11, %v8440_v20  ;;  %v8450_v29 = vld [vmem:[%s15757_s2 + $0x1120] sm:$0xff]  ;;  %v14739_v4 = vpack.c.bf16 %v8453_v38, %v8449_v37  ;;  %v8448_v20 = vld [vmem:[%s15757_s2 + $0x1110] sm:$0xff] }
 0x342   : > { %5962 = vmatmul.mubr.f32.gmra.mrb[44].mxu0 %v14682_v54  ;;  %6057 = vmatmul.mubr.f32.gmra.mrb[44].mxu1 %v14682_v54  ;;  %v14733_v54 = vsel %vm5479_vm1, %v5867_v59, %v14687_v25  ;;  %v14737_v42 = vpack.c.bf16 %v8451_v28, %v8447_v45  ;;  %v8452_v11 = vld [vmem:[%s15757_s2 + $0x1130] sm:$0xff]  ;;  %v8455_v59 = vld [vmem:[%s15757_s2 + $0x1148] sm:$0xff]  ;;  %v8457_v37 = vld [vmem:[%s15757_s2 + $0x1158] sm:$0xff]  ;;  %v14766_v45 = vpack.c.bf16 %v8450_v29, %v8446_v3 }
 0x343   : > { %5967 = vmatprep.mubr.f32.mxu0 %v14706_v2  ;;  %6062 = vmatprep.mubr.f32.mxu1 %v14706_v2  ;;  %16353 = vst [vmem:[#allocation267_spill] sm:$0xff] %v14723_v12  ;;  %16355 = vst [vmem:[#allocation269_spill] sm:$0xff] %v14739_v4  ;;  %v8459_v28 = vld [vmem:[%s15757_s2 + $0x1168] sm:$0xff]  ;;  %v8461_v38 = vld [vmem:[%s15757_s2 + $0x1178] sm:$0xff] }
 0x344   : > { %9394 = vmatpush1.bf16.msra.mxu0 %v14671_v48  ;;  %9458 = vmatpush1.bf16.msra.mxu1 %v14673_v47  ;;  %16354 = vst [vmem:[#allocation268_spill] sm:$0xff] %v14737_v42  ;;  %16356 = vst [vmem:[#allocation270_spill] sm:$0xff] %v14766_v45  ;;  %v8454_v47 = vld [vmem:[%s15757_s2 + $0x1140] sm:$0xff]  ;;  %v14781_v3 = vpack.c.bf16 %v8461_v38, %v8457_v37  ;;  %v8460_v29 = vld [vmem:[%s15757_s2 + $0x1170] sm:$0xff] }
 0x345   : > { %9396 = vmatprep.subr.bf16.mxu0 %v14689_v9  ;;  %9460 = vmatprep.subr.bf16.mxu1 %v14691_v8  ;;  %v6228_v8 = vrot.slane %v12876_v18, 2  ;;  %v14769_v9 = vpack.c.bf16 %v8452_v11, %v8448_v20  ;;  %v8458_v48 = vld [vmem:[%s15757_s2 + $0x1160] sm:$0xff]  ;;  %v8456_v18 = vld [vmem:[%s15757_s2 + $0x1150] sm:$0xff]  ;;  %v8463_v20 = vld [vmem:[%s15757_s2 + $0x1188] sm:$0xff]  ;;  %v16360_v11 = vrot.slane %v13306_v56, 2 }
 0x346   : > { %5968 = vmatmul.mubr.f32.gmra.mrb[46].mxu0 %v14733_v54  ;;  %6063 = vmatmul.mubr.f32.gmra.mrb[46].mxu1 %v14733_v54  ;;  %16359 = vst [vmem:[#allocation273_spill] sm:$0xff] %v14781_v3  ;;  %v8465_v37 = vld [vmem:[%s15757_s2 + $0x1198] sm:$0xff] }
 0x347   : > { %5973 = vmatprep.mubr.f32.mxu0 %v14656_v24  ;;  %6068 = vmatprep.mubr.f32.mxu1 %v14656_v24  ;;  %16357 = vst [vmem:[#allocation271_spill] sm:$0xff] %v14769_v9  ;;  %v8469_v38 = vld [vmem:[%s15757_s2 + $0x11b8] sm:$0xff] }
 0x348   : > { %9398 = vmatpush1.bf16.msra.mxu0 %v14721_v60  ;;  %9462 = vmatpush1.bf16.msra.mxu1 %v14723_v12  ;;  %v14779_v60 = vpack.c.bf16 %v8459_v28, %v8455_v59  ;;  %v14797_v59 = vsel %vm6224_vm2, %v6228_v8, %v16360_v11  ;;  %v8467_v28 = vld [vmem:[%s15757_s2 + $0x11a8] sm:$0xff]  ;;  %v14812_v8 = vpack.c.bf16 %v8458_v48, %v8454_v47  ;;  %v8464_v47 = vld [vmem:[%s15757_s2 + $0x1190] sm:$0xff] }
 0x349   : > { %9400 = vmatprep.subr.bf16.mxu0 %v14737_v42  ;;  %9464 = vmatprep.subr.bf16.mxu1 %v14739_v4  ;;  %v14814_v11 = vpack.c.bf16 %v8460_v29, %v8456_v18  ;;  %v8462_v4 = vld [vmem:[%s15757_s2 + $0x1180] sm:$0xff]  ;;  %v14824_v12 = vpack.c.bf16 %v8467_v28, %v8463_v20  ;;  %v8468_v48 = vld [vmem:[%s15757_s2 + $0x11b0] sm:$0xff]  ;;  %v8471_v18 = vld [vmem:[%s15757_s2 + $0x11c8] sm:$0xff] }
 0x34a   : > { %16358 = vst [vmem:[#allocation272_spill] sm:$0xff] %v14779_v60  ;;  %5974 = vmatmul.mubr.f32.gmra.mrb[48].mxu0 %v14687_v25  ;;  %6069 = vmatmul.mubr.f32.gmra.mrb[48].mxu1 %v14687_v25  ;;  %16361 = vst [vmem:[#allocation274_spill] sm:$0xff] %v14812_v8  ;;  %v8466_v42 = vld [vmem:[%s15757_s2 + $0x11a0] sm:$0xff]  ;;  %v8475_v29 = vld [vmem:[%s15757_s2 + $0x11e8] sm:$0xff] }
 0x34b   : > { %6317 = vmatprep.mubr.f32.mxu0 %v14797_v59  ;;  %6412 = vmatprep.mubr.f32.mxu1 %v14797_v59  ;;  %16362 = vst [vmem:[#allocation275_spill] sm:$0xff] %v14814_v11  ;;  %16363 = vst [vmem:[#allocation276_spill] sm:$0xff] %v14824_v12  ;;  %v8473_v20 = vld [vmem:[%s15757_s2 + $0x11d8] sm:$0xff] }
 0x34c   : > { %9402 = vmatpush1.bf16.msra.mxu0 %v14766_v45  ;;  %9466 = vmatpush1.bf16.msra.mxu1 %v14769_v9  ;;  %v14826_v45 = vpack.c.bf16 %v8469_v38, %v8465_v37  ;;  %v8477_v28 = vld [vmem:[%s15757_s2 + $0x11f8] sm:$0xff]  ;;  %v14848_v37 = vpack.c.bf16 %v8466_v42, %v8462_v4  ;;  %v14850_v38 = vpack.c.bf16 %v8468_v48, %v8464_v47  ;;  %v8472_v42 = vld [vmem:[%s15757_s2 + $0x11d0] sm:$0xff]  ;;  %v8479_v47 = vld [vmem:[%s15757_s2 + $0x1208] sm:$0xff] }
 0x34d   : > { %9404 = vmatprep.subr.bf16.mxu0 %v14779_v60  ;;  %9468 = vmatprep.subr.bf16.mxu1 %v14781_v3  ;;  %v8470_v3 = vld [vmem:[%s15757_s2 + $0x11c0] sm:$0xff]  ;;  %v14860_v9 = vpack.c.bf16 %v8475_v29, %v8471_v18  ;;  %v8476_v4 = vld [vmem:[%s15757_s2 + $0x11f0] sm:$0xff]  ;;  %v8483_v48 = vld [vmem:[%s15757_s2 + $0x1228] sm:$0xff] }
 0x34e   : > { %16364 = vst [vmem:[#allocation277_spill] sm:$0xff] %v14826_v45  ;;  %16365 = vst [vmem:[#allocation278_spill] sm:$0xff] %v14848_v37  ;;  %v8474_v60 = vld [vmem:[%s15757_s2 + $0x11e0] sm:$0xff]  ;;  %v8481_v18 = vld [vmem:[%s15757_s2 + $0x1218] sm:$0xff] }
 0x34f   : > { %16366 = vst [vmem:[#allocation279_spill] sm:$0xff] %v14850_v38  ;;  %16367 = vst [vmem:[#allocation280_spill] sm:$0xff] %v14860_v9  ;;  %v8485_v29 = vld [vmem:[%s15757_s2 + $0x1238] sm:$0xff] }
 0x350   : > { %9406 = vmatpush1.bf16.msra.mxu0 %v14812_v8  ;;  %9470 = vmatpush1.bf16.msra.mxu1 %v14814_v11  ;;  %v14862_v8 = vpack.c.bf16 %v8477_v28, %v8473_v20  ;;  %v14884_v20 = vpack.c.bf16 %v8474_v60, %v8470_v3  ;;  %v14886_v28 = vpack.c.bf16 %v8476_v4, %v8472_v42  ;;  %v8480_v60 = vld [vmem:[%s15757_s2 + $0x1210] sm:$0xff]  ;;  %v8487_v42 = vld [vmem:[%s15757_s2 + $0x1248] sm:$0xff] }
 0x351   : > { %9408 = vmatprep.subr.bf16.mxu0 %v14824_v12  ;;  %9472 = vmatprep.subr.bf16.mxu1 %v14826_v45  ;;  %v8478_v45 = vld [vmem:[%s15757_s2 + $0x1200] sm:$0xff]  ;;  %v14896_v11 = vpack.c.bf16 %v8483_v48, %v8479_v47  ;;  %v8484_v3 = vld [vmem:[%s15757_s2 + $0x1230] sm:$0xff]  ;;  %v8491_v4 = vld [vmem:[%s15757_s2 + $0x1268] sm:$0xff] }
 0x352   : > { %16368 = vst [vmem:[#allocation281_spill] sm:$0xff] %v14862_v8  ;;  %16369 = vst [vmem:[#allocation282_spill] sm:$0xff] %v14884_v20  ;;  %v8482_v12 = vld [vmem:[%s15757_s2 + $0x1220] sm:$0xff]  ;;  %v8489_v47 = vld [vmem:[%s15757_s2 + $0x1258] sm:$0xff] }
 0x353   : > { %16370 = vst [vmem:[#allocation283_spill] sm:$0xff] %v14886_v28  ;;  %16371 = vst [vmem:[#allocation284_spill] sm:$0xff] %v14896_v11  ;;  %v8493_v48 = vld [vmem:[%s15757_s2 + $0x1278] sm:$0xff] }
 0x354   : > { %9410 = vmatpush1.bf16.msra.mxu0 %v14848_v37  ;;  %9474 = vmatpush1.bf16.msra.mxu1 %v14850_v38  ;;  %v14898_v37 = vpack.c.bf16 %v8485_v29, %v8481_v18  ;;  %v14920_v18 = vpack.c.bf16 %v8482_v12, %v8478_v45  ;;  %v14922_v29 = vpack.c.bf16 %v8484_v3, %v8480_v60  ;;  %v8488_v12 = vld [vmem:[%s15757_s2 + $0x1250] sm:$0xff]  ;;  %v8495_v60 = vld [vmem:[%s15757_s2 + $0x1288] sm:$0xff] }
 0x355   : > { %9412 = vmatprep.subr.bf16.mxu0 %v14860_v9  ;;  %9476 = vmatprep.subr.bf16.mxu1 %v14862_v8  ;;  %v8486_v8 = vld [vmem:[%s15757_s2 + $0x1240] sm:$0xff]  ;;  %v14932_v38 = vpack.c.bf16 %v8491_v4, %v8487_v42  ;;  %v8492_v45 = vld [vmem:[%s15757_s2 + $0x1270] sm:$0xff]  ;;  %v8499_v3 = vld [vmem:[%s15757_s2 + $0x12a8] sm:$0xff] }
 0x356   : > { %16372 = vst [vmem:[#allocation285_spill] sm:$0xff] %v14898_v37  ;;  %16373 = vst [vmem:[#allocation286_spill] sm:$0xff] %v14920_v18  ;;  %v8490_v9 = vld [vmem:[%s15757_s2 + $0x1260] sm:$0xff]  ;;  %v8497_v42 = vld [vmem:[%s15757_s2 + $0x1298] sm:$0xff] }
 0x357   : > { %16374 = vst [vmem:[#allocation287_spill] sm:$0xff] %v14922_v29  ;;  %16375 = vst [vmem:[#allocation288_spill] sm:$0xff] %v14932_v38  ;;  %v8501_v4 = vld [vmem:[%s15757_s2 + $0x12b8] sm:$0xff] }
 0x358   : > { %9414 = vmatpush1.bf16.msra.mxu0 %v14884_v20  ;;  %9478 = vmatpush1.bf16.msra.mxu1 %v14886_v28  ;;  %v14934_v20 = vpack.c.bf16 %v8493_v48, %v8489_v47  ;;  %v14956_v47 = vpack.c.bf16 %v8490_v9, %v8486_v8  ;;  %v14958_v48 = vpack.c.bf16 %v8492_v45, %v8488_v12  ;;  %v8496_v9 = vld [vmem:[%s15757_s2 + $0x1290] sm:$0xff]  ;;  %v8503_v12 = vld [vmem:[%s15757_s2 + $0x12c8] sm:$0xff] }
 0x359   : > { %9416 = vmatprep.subr.bf16.mxu0 %v14896_v11  ;;  %9480 = vmatprep.subr.bf16.mxu1 %v14898_v37  ;;  %v8494_v37 = vld [vmem:[%s15757_s2 + $0x1280] sm:$0xff]  ;;  %v14968_v28 = vpack.c.bf16 %v8499_v3, %v8495_v60  ;;  %v8500_v8 = vld [vmem:[%s15757_s2 + $0x12b0] sm:$0xff]  ;;  %v8507_v45 = vld [vmem:[%s15757_s2 + $0x12e8] sm:$0xff] }
 0x35a   : > { %16376 = vst [vmem:[#allocation289_spill] sm:$0xff] %v14934_v20  ;;  %16377 = vst [vmem:[#allocation290_spill] sm:$0xff] %v14956_v47  ;;  %v8498_v11 = vld [vmem:[%s15757_s2 + $0x12a0] sm:$0xff]  ;;  %v8505_v60 = vld [vmem:[%s15757_s2 + $0x12d8] sm:$0xff] }
 0x35b   : > { %16378 = vst [vmem:[#allocation291_spill] sm:$0xff] %v14958_v48  ;;  %16379 = vst [vmem:[#allocation292_spill] sm:$0xff] %v14968_v28  ;;  %v8509_v3 = vld [vmem:[%s15757_s2 + $0x12f8] sm:$0xff] }
 0x35c   : > { %9418 = vmatpush1.bf16.msra.mxu0 %v14920_v18  ;;  %9482 = vmatpush1.bf16.msra.mxu1 %v14922_v29  ;;  %v14970_v18 = vpack.c.bf16 %v8501_v4, %v8497_v42  ;;  %v14992_v42 = vpack.c.bf16 %v8498_v11, %v8494_v37  ;;  %v14994_v4 = vpack.c.bf16 %v8500_v8, %v8496_v9  ;;  %v8504_v11 = vld [vmem:[%s15757_s2 + $0x12d0] sm:$0xff]  ;;  %v8511_v9 = vld [vmem:[%s15757_s2 + $0x1308] sm:$0xff] }
 0x35d   : > { %9420 = vmatprep.subr.bf16.mxu0 %v14932_v38  ;;  %9484 = vmatprep.subr.bf16.mxu1 %v14934_v20  ;;  %v8502_v20 = vld [vmem:[%s15757_s2 + $0x12c0] sm:$0xff]  ;;  %v15004_v29 = vpack.c.bf16 %v8507_v45, %v8503_v12  ;;  %v8508_v37 = vld [vmem:[%s15757_s2 + $0x12f0] sm:$0xff]  ;;  %v8515_v8 = vld [vmem:[%s15757_s2 + $0x1328] sm:$0xff] }
 0x35e   : > { %16380 = vst [vmem:[#allocation293_spill] sm:$0xff] %v14970_v18  ;;  %16381 = vst [vmem:[#allocation294_spill] sm:$0xff] %v14992_v42  ;;  %v8506_v38 = vld [vmem:[%s15757_s2 + $0x12e0] sm:$0xff]  ;;  %v8513_v12 = vld [vmem:[%s15757_s2 + $0x1318] sm:$0xff] }
 0x35f   : > { %16382 = vst [vmem:[#allocation295_spill] sm:$0xff] %v14994_v4  ;;  %16383 = vst [vmem:[#allocation296_spill] sm:$0xff] %v15004_v29  ;;  %v8517_v45 = vld [vmem:[%s15757_s2 + $0x1338] sm:$0xff] }
 0x360   : > { %9422 = vmatpush1.bf16.msra.mxu0 %v14956_v47  ;;  %9486 = vmatpush1.bf16.msra.mxu1 %v14958_v48  ;;  %v15006_v47 = vpack.c.bf16 %v8509_v3, %v8505_v60  ;;  %v15028_v60 = vpack.c.bf16 %v8506_v38, %v8502_v20  ;;  %v15030_v3 = vpack.c.bf16 %v8508_v37, %v8504_v11  ;;  %v8512_v38 = vld [vmem:[%s15757_s2 + $0x1310] sm:$0xff]  ;;  %v8519_v11 = vld [vmem:[%s15757_s2 + $0x1348] sm:$0xff] }
 0x361   : > { %9424 = vmatprep.subr.bf16.mxu0 %v14968_v28  ;;  %9488 = vmatprep.subr.bf16.mxu1 %v14970_v18  ;;  %v8510_v18 = vld [vmem:[%s15757_s2 + $0x1300] sm:$0xff]  ;;  %v15040_v48 = vpack.c.bf16 %v8515_v8, %v8511_v9  ;;  %v8516_v20 = vld [vmem:[%s15757_s2 + $0x1330] sm:$0xff]  ;;  %v8523_v37 = vld [vmem:[%s15757_s2 + $0x1368] sm:$0xff] }
 0x362   : > { %16384 = vst [vmem:[#allocation297_spill] sm:$0xff] %v15006_v47  ;;  %16385 = vst [vmem:[#allocation298_spill] sm:$0xff] %v15028_v60  ;;  %v8514_v28 = vld [vmem:[%s15757_s2 + $0x1320] sm:$0xff]  ;;  %v8521_v9 = vld [vmem:[%s15757_s2 + $0x1358] sm:$0xff] }
 0x363   : > { %16386 = vst [vmem:[#allocation299_spill] sm:$0xff] %v15030_v3  ;;  %16387 = vst [vmem:[#allocation300_spill] sm:$0xff] %v15040_v48  ;;  %v8525_v8 = vld [vmem:[%s15757_s2 + $0x1378] sm:$0xff] }
 0x364   : > { %9426 = vmatpush1.bf16.msra.mxu0 %v14992_v42  ;;  %9490 = vmatpush1.bf16.msra.mxu1 %v14994_v4  ;;  %v15042_v42 = vpack.c.bf16 %v8517_v45, %v8513_v12  ;;  %v15064_v12 = vpack.c.bf16 %v8514_v28, %v8510_v18  ;;  %v15066_v45 = vpack.c.bf16 %v8516_v20, %v8512_v38  ;;  %v8520_v28 = vld [vmem:[%s15757_s2 + $0x1350] sm:$0xff]  ;;  %v8527_v38 = vld [vmem:[%s15757_s2 + $0x1388] sm:$0xff] }
 0x365   : > { %9428 = vmatprep.subr.bf16.mxu0 %v15004_v29  ;;  %9492 = vmatprep.subr.bf16.mxu1 %v15006_v47  ;;  %v8518_v47 = vld [vmem:[%s15757_s2 + $0x1340] sm:$0xff]  ;;  %v15076_v4 = vpack.c.bf16 %v8523_v37, %v8519_v11  ;;  %v8524_v18 = vld [vmem:[%s15757_s2 + $0x1370] sm:$0xff]  ;;  %v8531_v20 = vld [vmem:[%s15757_s2 + $0x13a8] sm:$0xff] }
 0x366   : > { %16388 = vst [vmem:[#allocation301_spill] sm:$0xff] %v15042_v42  ;;  %16389 = vst [vmem:[#allocation302_spill] sm:$0xff] %v15064_v12  ;;  %v8522_v29 = vld [vmem:[%s15757_s2 + $0x1360] sm:$0xff]  ;;  %v8529_v11 = vld [vmem:[%s15757_s2 + $0x1398] sm:$0xff] }
 0x367   : > { %16390 = vst [vmem:[#allocation303_spill] sm:$0xff] %v15066_v45  ;;  %16391 = vst [vmem:[#allocation304_spill] sm:$0xff] %v15076_v4  ;;  %v8533_v37 = vld [vmem:[%s15757_s2 + $0x13b8] sm:$0xff] }
 0x368   : > { %9430 = vmatpush1.bf16.msra.mxu0 %v15028_v60  ;;  %9494 = vmatpush1.bf16.msra.mxu1 %v15030_v3  ;;  %v15078_v60 = vpack.c.bf16 %v8525_v8, %v8521_v9  ;;  %v15100_v9 = vpack.c.bf16 %v8522_v29, %v8518_v47  ;;  %v15102_v8 = vpack.c.bf16 %v8524_v18, %v8520_v28  ;;  %v8528_v29 = vld [vmem:[%s15757_s2 + $0x1390] sm:$0xff]  ;;  %v8535_v28 = vld [vmem:[%s15757_s2 + $0x13c8] sm:$0xff] }
 0x369   : > { %9432 = vmatprep.subr.bf16.mxu0 %v15040_v48  ;;  %9496 = vmatprep.subr.bf16.mxu1 %v15042_v42  ;;  %v8526_v42 = vld [vmem:[%s15757_s2 + $0x1380] sm:$0xff]  ;;  %v15112_v3 = vpack.c.bf16 %v8531_v20, %v8527_v38  ;;  %v8532_v47 = vld [vmem:[%s15757_s2 + $0x13b0] sm:$0xff]  ;;  %v8539_v18 = vld [vmem:[%s15757_s2 + $0x13e8] sm:$0xff] }
 0x36a   : > { %16392 = vst [vmem:[#allocation305_spill] sm:$0xff] %v15078_v60  ;;  %16393 = vst [vmem:[#allocation306_spill] sm:$0xff] %v15102_v8  ;;  %v8530_v48 = vld [vmem:[%s15757_s2 + $0x13a0] sm:$0xff]  ;;  %v8537_v38 = vld [vmem:[%s15757_s2 + $0x13d8] sm:$0xff] }
 0x36b   : > { %v8541_v20 = vld [vmem:[%s15757_s2 + $0x13f8] sm:$0xff] }
 0x36c   : > { %9434 = vmatpush1.bf16.msra.mxu0 %v15064_v12  ;;  %9498 = vmatpush1.bf16.msra.mxu1 %v15066_v45  ;;  %v15114_v12 = vpack.c.bf16 %v8533_v37, %v8529_v11  ;;  %v15136_v11 = vpack.c.bf16 %v8530_v48, %v8526_v42  ;;  %v15138_v37 = vpack.c.bf16 %v8532_v47, %v8528_v29  ;;  %v8536_v48 = vld [vmem:[%s15757_s2 + $0x13d0] sm:$0xff] }
 0x36d   : > { %9436 = vmatprep.subr.bf16.mxu0 %v15076_v4  ;;  %9500 = vmatprep.subr.bf16.mxu1 %v15078_v60  ;;  %v8534_v60 = vld [vmem:[%s15757_s2 + $0x13c0] sm:$0xff]  ;;  %v15145_v4 = vpack.c.bf16 %v8539_v18, %v8535_v28  ;;  %v15147_v45 = vpack.c.bf16 %v8541_v20, %v8537_v38  ;;  %v8540_v42 = vld [vmem:[%s15757_s2 + $0x13f0] sm:$0xff]  ;;  %v6226_v28 = vrot.slane %v13335_v44, 2  ;;  %v6233_v18 = vrot.slane %v13342_v6, 2 }
 0x36e   : > { %v15162_v47 = vpack.c.bf16 %v8540_v42, %v8536_v48  ;;  %v6225_v38 = vrot.slane %v13291_v41, 2  ;;  %v16394_v6 = vrot.slane %v13306_v56, 2  ;;  %v6237_v41 = vrot.slane %v13404_v26, 2  ;;  %v16403_v26 = vld [vmem:[#allocation3_spill] sm:$0xff]  ;;  %v16409_v20 = vld [vmem:[#allocation16_spill] sm:$0xff]  ;;  %v16410_v48 = vld [vmem:[#allocation17_spill] sm:$0xff] }
 0x36f   : > { %v15196_v56 = vrot.slane %v13450_v15, 2  ;;  %v16406_v15 = vld [vmem:[#allocation13_spill] sm:$0xff]  ;;  %v16411_v42 = vld [vmem:[#allocation18_spill] sm:$0xff] }
 0x370   : > { %9438 = vmatpush1.bf16.msra.mxu0 %v15100_v9  ;;  %9502 = vmatpush1.bf16.msra.mxu1 %v15102_v8  ;;  %v8538_v8 = vld [vmem:[%s15757_s2 + $0x13e0] sm:$0xff]  ;;  %v15182_v44 = vsel %vm6224_vm2, %v16394_v6, %v6233_v18  ;;  %v16416_v6 = vld [vmem:[#allocation23_spill] sm:$0xff] }
 0x371   : > { %9440 = vmatprep.subr.bf16.mxu0 %v15112_v3  ;;  %9504 = vmatprep.subr.bf16.mxu1 %v15114_v12  ;;  %v15160_v29 = vpack.c.bf16 %v8538_v8, %v8534_v60  ;;  %v15174_v60 = vsel %vm6224_vm2, %v6225_v38, %v6226_v28  ;;  %v6231_v8 = vrot.slane %v13385_v52, 2  ;;  %v16404_v52 = vld [vmem:[#allocation11_spill] sm:$0xff]  ;;  %v16414_v38 = vld [vmem:[#allocation21_spill] sm:$0xff] }
 0x374   : > { %9442 = vmatpush1.bf16.msra.mxu0 %v15136_v11  ;;  %9506 = vmatpush1.bf16.msra.mxu1 %v15138_v37 }
 0x375   : > { %9444 = vmatprep.subr.bf16.mxu0 %v15145_v4  ;;  %9508 = vmatprep.subr.bf16.mxu1 %v15147_v45 }
 0x378   : > { %9446 = vmatpush1.bf16.msra.mxu0 %v15160_v29  ;;  %9510 = vmatpush1.bf16.msra.mxu1 %v15162_v47 }
 0x379   : > { %9512 = vmatprep.subr.bf16.mxu0 %v11912_v10  ;;  %9576 = vmatprep.subr.bf16.mxu1 %v11924_v30  ;;  %v15190_v10 = vsel %vm6224_vm2, %v6226_v28, %v6231_v8  ;;  %v6235_v30 = vrot.slane %v13435_v17, 2  ;;  %v16405_v17 = vld [vmem:[#allocation12_spill] sm:$0xff]  ;;  %v16412_v28 = vld [vmem:[#allocation19_spill] sm:$0xff] }
 0x37b   : > { %6318 = vmatmul.mubr.f32.vlgmr.msra.gmra.mrb[40].mxu0 %v15174_v60  ;;  %6413 = vmatmul.mubr.f32.vlgmr.msra.gmra.mrb[40].mxu1 %v15174_v60 }
 0x37c   : > { %6323 = vmatprep.mubr.f32.mxu0 %v15182_v44  ;;  %6418 = vmatprep.mubr.f32.mxu1 %v15182_v44 }
 0x37d   : > { %9514 = vmatpush1.bf16.msra.mxu0 %v11926_v32  ;;  %9578 = vmatpush1.bf16.msra.mxu1 %v11939_v0  ;;  %v15201_v32 = vsel %vm6224_vm2, %v6233_v18, %v6237_v41  ;;  %v15208_v0 = vrot.slane %v13482_v62, 2  ;;  %v16407_v62 = vld [vmem:[#allocation14_spill] sm:$0xff]  ;;  %v16413_v18 = vld [vmem:[#allocation20_spill] sm:$0xff] }
 0x37e   : > { %9516 = vmatprep.subr.bf16.mxu0 %v11952_v21  ;;  %9580 = vmatprep.subr.bf16.mxu1 %v11965_v61  ;;  %v15211_v21 = vsel %vm6224_vm2, %v6231_v8, %v6235_v30  ;;  %v15219_v61 = vsel %vm6224_vm2, %v6237_v41, %v15196_v56  ;;  %v16415_v8 = vld [vmem:[#allocation22_spill] sm:$0xff]  ;;  %v16417_v41 = vld [vmem:[#allocation24_spill] sm:$0xff] }
 0x37f   : > { %6324 = vmatmul.mubr.f32.gmra.mrb[42].mxu0 %v15190_v10  ;;  %6419 = vmatmul.mubr.f32.gmra.mrb[42].mxu1 %v15190_v10 }
 0x380   : > { %6329 = vmatprep.mubr.f32.mxu0 %v15201_v32  ;;  %6424 = vmatprep.mubr.f32.mxu1 %v15201_v32 }
 0x381   : > { %9518 = vmatpush1.bf16.msra.mxu0 %v11978_v33  ;;  %9582 = vmatpush1.bf16.msra.mxu1 %v11980_v36  ;;  %v15227_v33 = vsel %vm6224_vm2, %v6235_v30, %v15208_v0  ;;  %v16395_v36 = vld [vmem:[#allocation4_spill] sm:$0xff]  ;;  %v16418_v30 = vld [vmem:[#allocation25_spill] sm:$0xff] }
 0x382   : > { %9520 = vmatprep.subr.bf16.mxu0 %v11993_v46  ;;  %9584 = vmatprep.subr.bf16.mxu1 %v12015_v57  ;;  %v16396_v46 = vld [vmem:[#allocation5_spill] sm:$0xff]  ;;  %v16397_v57 = vld [vmem:[#allocation6_spill] sm:$0xff] }
 0x383   : > { %6330 = vmatmul.mubr.f32.gmra.mrb[44].mxu0 %v15211_v21  ;;  %6425 = vmatmul.mubr.f32.gmra.mrb[44].mxu1 %v15211_v21 }
 0x384   : > { %6335 = vmatprep.mubr.f32.mxu0 %v15219_v61  ;;  %6430 = vmatprep.mubr.f32.mxu1 %v15219_v61 }
 0x385   : > { %9522 = vmatpush1.bf16.msra.mxu0 %v12025_v13  ;;  %9586 = vmatpush1.bf16.msra.mxu1 %v12027_v27  ;;  %v16398_v13 = vld [vmem:[#allocation7_spill] sm:$0xff]  ;;  %v16399_v27 = vld [vmem:[#allocation8_spill] sm:$0xff] }
 0x386   : > { %9524 = vmatprep.subr.bf16.mxu0 %v12041_v16  ;;  %9588 = vmatprep.subr.bf16.mxu1 %v12057_v19  ;;  %v16400_v16 = vld [vmem:[#allocation9_spill] sm:$0xff]  ;;  %v16401_v19 = vld [vmem:[#allocation10_spill] sm:$0xff] }
 0x387   : > { %6336 = vmatmul.mubr.f32.gmra.mrb[46].mxu0 %v15227_v33  ;;  %6431 = vmatmul.mubr.f32.gmra.mrb[46].mxu1 %v15227_v33 }
 0x388   : > { %6341 = vmatprep.mubr.f32.mxu0 %v15196_v56  ;;  %6436 = vmatprep.mubr.f32.mxu1 %v15196_v56 }
 0x389   : > { %9526 = vmatpush1.bf16.msra.mxu0 %v12068_v22  ;;  %9590 = vmatpush1.bf16.msra.mxu1 %v16395_v36  ;;  %v16402_v22 = vld [vmem:[#allocation2_spill] sm:$0xff] }
 0x38a   : > { %9528 = vmatprep.subr.bf16.mxu0 %v16396_v46  ;;  %9592 = vmatprep.subr.bf16.mxu1 %v16397_v57  ;;  %v16419_v36 = vld [vmem:[#allocation26_spill] sm:$0xff]  ;;  %v16420_v46 = vld [vmem:[#allocation27_spill] sm:$0xff]  ;;  %v16421_v57 = vld [vmem:[#allocation28_spill] sm:$0xff] }
 0x38b   : > { %6342 = vmatmul.mubr.f32.gmra.mrb[48].mxu0 %v15208_v0  ;;  %6437 = vmatmul.mubr.f32.gmra.mrb[48].mxu1 %v15208_v0 }
 0x38c   : > { %6598 = vmatprep.mubr.f32.mxu0 %v13517_v14  ;;  %6693 = vmatprep.mubr.f32.mxu1 %v13517_v14  ;;  %v16408_v14 = vld [vmem:[#allocation15_spill] sm:$0xff] }
 0x38d   : > { %9530 = vmatpush1.bf16.msra.mxu0 %v16398_v13  ;;  %9594 = vmatpush1.bf16.msra.mxu1 %v16399_v27  ;;  %v16422_v13 = vld [vmem:[#allocation29_spill] sm:$0xff]  ;;  %v16423_v27 = vld [vmem:[#allocation30_spill] sm:$0xff] }
 0x38e   : > { %9532 = vmatprep.subr.bf16.mxu0 %v16400_v16  ;;  %9596 = vmatprep.subr.bf16.mxu1 %v16401_v19  ;;  %v16424_v16 = vld [vmem:[#allocation31_spill] sm:$0xff]  ;;  %v16425_v19 = vld [vmem:[#allocation32_spill] sm:$0xff] }
 0x391   : > { %9534 = vmatpush1.bf16.msra.mxu0 %v16402_v22  ;;  %9598 = vmatpush1.bf16.msra.mxu1 %v16403_v26  ;;  %v16426_v22 = vld [vmem:[#allocation33_spill] sm:$0xff]  ;;  %v16427_v26 = vld [vmem:[#allocation34_spill] sm:$0xff] }
 0x392   : > { %9536 = vmatprep.subr.bf16.mxu0 %v16404_v52  ;;  %9600 = vmatprep.subr.bf16.mxu1 %v16405_v17  ;;  %v16428_v52 = vld [vmem:[#allocation35_spill] sm:$0xff]  ;;  %v16429_v17 = vld [vmem:[#allocation36_spill] sm:$0xff] }
 0x395   : > { %9538 = vmatpush1.bf16.msra.mxu0 %v16406_v15  ;;  %9602 = vmatpush1.bf16.msra.mxu1 %v16407_v62  ;;  %v16430_v15 = vld [vmem:[#allocation37_spill] sm:$0xff]  ;;  %v16431_v62 = vld [vmem:[#allocation38_spill] sm:$0xff] }
 0x396   : > { %9540 = vmatprep.subr.bf16.mxu0 %v16408_v14  ;;  %9604 = vmatprep.subr.bf16.mxu1 %v16409_v20  ;;  %v16432_v14 = vld [vmem:[#allocation39_spill] sm:$0xff]  ;;  %v16433_v20 = vld [vmem:[#allocation40_spill] sm:$0xff] }
 0x399   : > { %9542 = vmatpush1.bf16.msra.mxu0 %v16410_v48  ;;  %9606 = vmatpush1.bf16.msra.mxu1 %v16411_v42  ;;  %v16434_v48 = vld [vmem:[#allocation41_spill] sm:$0xff]  ;;  %v16435_v42 = vld [vmem:[#allocation42_spill] sm:$0xff] }
 0x39a   : > { %9544 = vmatprep.subr.bf16.mxu0 %v16412_v28  ;;  %9608 = vmatprep.subr.bf16.mxu1 %v16413_v18  ;;  %v16436_v28 = vld [vmem:[#allocation43_spill] sm:$0xff]  ;;  %v16437_v18 = vld [vmem:[#allocation44_spill] sm:$0xff] }
 0x39d   : > { %9546 = vmatpush1.bf16.msra.mxu0 %v16414_v38  ;;  %9610 = vmatpush1.bf16.msra.mxu1 %v16415_v8  ;;  %v16438_v38 = vld [vmem:[#allocation45_spill] sm:$0xff]  ;;  %v16439_v8 = vld [vmem:[#allocation46_spill] sm:$0xff] }
 0x39e   : > { %9548 = vmatprep.subr.bf16.mxu0 %v16416_v6  ;;  %9612 = vmatprep.subr.bf16.mxu1 %v16417_v41  ;;  %v16440_v6 = vld [vmem:[#allocation47_spill] sm:$0xff]  ;;  %v16441_v41 = vld [vmem:[#allocation48_spill] sm:$0xff] }
 0x3a1   : > { %9550 = vmatpush1.bf16.msra.mxu0 %v16418_v30  ;;  %9614 = vmatpush1.bf16.msra.mxu1 %v16419_v36  ;;  %v16442_v30 = vld [vmem:[#allocation49_spill] sm:$0xff]  ;;  %v16443_v36 = vld [vmem:[#allocation50_spill] sm:$0xff] }
 0x3a2   : > { %9552 = vmatprep.subr.bf16.mxu0 %v16420_v46  ;;  %9616 = vmatprep.subr.bf16.mxu1 %v16421_v57  ;;  %v16444_v46 = vld [vmem:[#allocation51_spill] sm:$0xff]  ;;  %v16445_v57 = vld [vmem:[#allocation52_spill] sm:$0xff] }
 0x3a5   : > { %9554 = vmatpush1.bf16.msra.mxu0 %v16422_v13  ;;  %9618 = vmatpush1.bf16.msra.mxu1 %v16423_v27  ;;  %v16446_v13 = vld [vmem:[#allocation54_spill] sm:$0xff]  ;;  %v16447_v27 = vld [vmem:[#allocation55_spill] sm:$0xff] }
 0x3a6   : > { %9556 = vmatprep.subr.bf16.mxu0 %v16424_v16  ;;  %9620 = vmatprep.subr.bf16.mxu1 %v16425_v19  ;;  %v16449_v16 = vld [vmem:[#allocation57_spill] sm:$0xff]  ;;  %v16455_v19 = vld [vmem:[#allocation67_spill] sm:$0xff] }
 0x3a9   : > { %9558 = vmatpush1.bf16.msra.mxu0 %v16426_v22  ;;  %9622 = vmatpush1.bf16.msra.mxu1 %v16427_v26  ;;  %v16457_v22 = vld [vmem:[#allocation70_spill] sm:$0xff]  ;;  %v16459_v26 = vld [vmem:[#allocation72_spill] sm:$0xff] }
 0x3aa   : > { %9560 = vmatprep.subr.bf16.mxu0 %v16428_v52  ;;  %9624 = vmatprep.subr.bf16.mxu1 %v16429_v17  ;;  %v16461_v52 = vld [vmem:[#allocation74_spill] sm:$0xff]  ;;  %v16463_v17 = vld [vmem:[#allocation76_spill] sm:$0xff] }
 0x3ad   : > { %9562 = vmatpush1.bf16.msra.mxu0 %v16430_v15  ;;  %9626 = vmatpush1.bf16.msra.mxu1 %v16431_v62  ;;  %v16464_v15 = vld [vmem:[#allocation77_spill] sm:$0xff]  ;;  %v16465_v62 = vld [vmem:[#allocation78_spill] sm:$0xff] }
 0x3ae   : > { %9564 = vmatprep.subr.bf16.mxu0 %v16432_v14  ;;  %9628 = vmatprep.subr.bf16.mxu1 %v16433_v20  ;;  %v16466_v14 = vld [vmem:[#allocation79_spill] sm:$0xff]  ;;  %v16467_v20 = vld [vmem:[#allocation80_spill] sm:$0xff] }
 0x3b1   : > { %9566 = vmatpush1.bf16.msra.mxu0 %v16434_v48  ;;  %9630 = vmatpush1.bf16.msra.mxu1 %v16435_v42  ;;  %v16469_v48 = vld [vmem:[#allocation82_spill] sm:$0xff]  ;;  %v16470_v42 = vld [vmem:[#allocation83_spill] sm:$0xff] }
 0x3b2   : > { %9568 = vmatprep.subr.bf16.mxu0 %v16436_v28  ;;  %9632 = vmatprep.subr.bf16.mxu1 %v16437_v18  ;;  %v16471_v28 = vld [vmem:[#allocation84_spill] sm:$0xff]  ;;  %v16472_v18 = vld [vmem:[#allocation85_spill] sm:$0xff] }
 0x3b5   : > { %9570 = vmatpush1.bf16.msra.mxu0 %v16438_v38  ;;  %9634 = vmatpush1.bf16.msra.mxu1 %v16439_v8  ;;  %v16473_v38 = vld [vmem:[#allocation86_spill] sm:$0xff]  ;;  %v16474_v8 = vld [vmem:[#allocation87_spill] sm:$0xff] }
 0x3b6   : > { %9572 = vmatprep.subr.bf16.mxu0 %v16440_v6  ;;  %9636 = vmatprep.subr.bf16.mxu1 %v16441_v41  ;;  %v16475_v6 = vld [vmem:[#allocation88_spill] sm:$0xff]  ;;  %v16476_v41 = vld [vmem:[#allocation89_spill] sm:$0xff] }
 0x3b9   : > { %9574 = vmatpush1.bf16.msra.mxu0 %v16442_v30  ;;  %9638 = vmatpush1.bf16.msra.mxu1 %v16443_v36  ;;  %v16477_v30 = vld [vmem:[#allocation90_spill] sm:$0xff]  ;;  %v16478_v36 = vld [vmem:[#allocation91_spill] sm:$0xff] }
 0x3ba   : > { %9640 = vmatprep.subr.bf16.mxu0 %v16444_v46  ;;  %9704 = vmatprep.subr.bf16.mxu1 %v16445_v57  ;;  %v16479_v46 = vld [vmem:[#allocation92_spill] sm:$0xff]  ;;  %v16480_v57 = vld [vmem:[#allocation93_spill] sm:$0xff] }
 0x3bc   : > { %6599 = vmatmul.mubr.f32.vlgmr.msra.gmra.mrb[50].mxu0 %v13944_v35  ;;  %6694 = vmatmul.mubr.f32.vlgmr.msra.gmra.mrb[50].mxu1 %v13944_v35  ;;  %v16448_v35 = vld [vmem:[#allocation56_spill] sm:$0xff] }
 0x3bd   : > { %6604 = vmatprep.mubr.f32.mxu0 %v13965_v63  ;;  %6699 = vmatprep.mubr.f32.mxu1 %v13965_v63  ;;  %v16450_v63 = vld [vmem:[#allocation60_spill] sm:$0xff] }
 0x3be   : > { %9642 = vmatpush1.bf16.msra.mxu0 %v12616_v23  ;;  %9706 = vmatpush1.bf16.msra.mxu1 %v12627_v50  ;;  %v16451_v23 = vld [vmem:[#allocation61_spill] sm:$0xff]  ;;  %v16452_v50 = vld [vmem:[#allocation63_spill] sm:$0xff] }
 0x3bf   : > { %9644 = vmatprep.subr.bf16.mxu0 %v16446_v13  ;;  %9708 = vmatprep.subr.bf16.mxu1 %v16447_v27  ;;  %v16481_v13 = vld [vmem:[#allocation94_spill] sm:$0xff]  ;;  %v16482_v27 = vld [vmem:[#allocation95_spill] sm:$0xff] }
 0x3c0   : > { %6605 = vmatmul.mubr.f32.gmra.mrb[52].mxu0 %v13992_v31  ;;  %6700 = vmatmul.mubr.f32.gmra.mrb[52].mxu1 %v13992_v31  ;;  %v16453_v31 = vld [vmem:[#allocation64_spill] sm:$0xff] }
 0x3c1   : > { %6610 = vmatprep.mubr.f32.mxu0 %v14016_v53  ;;  %6705 = vmatprep.mubr.f32.mxu1 %v14016_v53  ;;  %v16454_v53 = vld [vmem:[#allocation66_spill] sm:$0xff] }
 0x3c2   : > { %9646 = vmatpush1.bf16.msra.mxu0 %v16448_v35  ;;  %9710 = vmatpush1.bf16.msra.mxu1 %v16449_v16  ;;  %v16483_v35 = vld [vmem:[#allocation96_spill] sm:$0xff]  ;;  %v16484_v16 = vld [vmem:[#allocation97_spill] sm:$0xff] }
 0x3c3   : > { %9648 = vmatprep.subr.bf16.mxu0 %v16450_v63  ;;  %9712 = vmatprep.subr.bf16.mxu1 %v16451_v23  ;;  %v16485_v63 = vld [vmem:[#allocation98_spill] sm:$0xff]  ;;  %v16486_v23 = vld [vmem:[#allocation99_spill] sm:$0xff] }
 0x3c4   : > { %6611 = vmatmul.mubr.f32.gmra.mrb[54].mxu0 %v14045_v40  ;;  %6706 = vmatmul.mubr.f32.gmra.mrb[54].mxu1 %v14045_v40  ;;  %v16456_v40 = vld [vmem:[#allocation69_spill] sm:$0xff] }
 0x3c5   : > { %6616 = vmatprep.mubr.f32.mxu0 %v14066_v5  ;;  %6711 = vmatprep.mubr.f32.mxu1 %v14066_v5  ;;  %v16458_v5 = vld [vmem:[#allocation71_spill] sm:$0xff] }
 0x3c6   : > { %9650 = vmatpush1.bf16.msra.mxu0 %v16452_v50  ;;  %9714 = vmatpush1.bf16.msra.mxu1 %v16453_v31  ;;  %v16487_v50 = vld [vmem:[#allocation100_spill] sm:$0xff]  ;;  %v16488_v31 = vld [vmem:[#allocation101_spill] sm:$0xff] }
 0x3c7   : > { %9652 = vmatprep.subr.bf16.mxu0 %v16454_v53  ;;  %9716 = vmatprep.subr.bf16.mxu1 %v16455_v19  ;;  %v16489_v53 = vld [vmem:[#allocation102_spill] sm:$0xff]  ;;  %v16490_v19 = vld [vmem:[#allocation103_spill] sm:$0xff] }
 0x3c8   : > { %6617 = vmatmul.mubr.f32.gmra.mrb[56].mxu0 %v14093_v49  ;;  %6712 = vmatmul.mubr.f32.gmra.mrb[56].mxu1 %v14093_v49  ;;  %v16460_v49 = vld [vmem:[#allocation73_spill] sm:$0xff] }
 0x3c9   : > { %6622 = vmatprep.mubr.f32.mxu0 %v14011_v51  ;;  %6717 = vmatprep.mubr.f32.mxu1 %v14011_v51  ;;  %v16462_v51 = vld [vmem:[#allocation75_spill] sm:$0xff] }
 0x3ca   : > { %9654 = vmatpush1.bf16.msra.mxu0 %v16456_v40  ;;  %9718 = vmatpush1.bf16.msra.mxu1 %v16457_v22  ;;  %v16491_v40 = vld [vmem:[#allocation104_spill] sm:$0xff]  ;;  %v16492_v22 = vld [vmem:[#allocation105_spill] sm:$0xff] }
 0x3cb   : > { %9656 = vmatprep.subr.bf16.mxu0 %v16458_v5  ;;  %9720 = vmatprep.subr.bf16.mxu1 %v16459_v26  ;;  %v16493_v5 = vld [vmem:[#allocation106_spill] sm:$0xff]  ;;  %v16494_v26 = vld [vmem:[#allocation107_spill] sm:$0xff] }
 0x3cc   : > { %6623 = vmatmul.mubr.f32.gmra.mrb[58].mxu0 %v14042_v55  ;;  %6718 = vmatmul.mubr.f32.gmra.mrb[58].mxu1 %v14042_v55  ;;  %v16468_v55 = vld [vmem:[#allocation81_spill] sm:$0xff] }
 0x3cd   : > { %6788 = vmatprep.mubr.f32.mxu0 %v12636_v39  ;;  %6883 = vmatprep.mubr.f32.mxu1 %v12636_v39 }
 0x3ce   : > { %9658 = vmatpush1.bf16.msra.mxu0 %v16460_v49  ;;  %9722 = vmatpush1.bf16.msra.mxu1 %v16461_v52  ;;  %v16495_v49 = vld [vmem:[#allocation108_spill] sm:$0xff]  ;;  %v16496_v52 = vld [vmem:[#allocation109_spill] sm:$0xff] }
 0x3cf   : > { %9660 = vmatprep.subr.bf16.mxu0 %v16462_v51  ;;  %9724 = vmatprep.subr.bf16.mxu1 %v16463_v17  ;;  %v16497_v51 = vld [vmem:[#allocation110_spill] sm:$0xff]  ;;  %v16498_v17 = vld [vmem:[#allocation111_spill] sm:$0xff] }
 0x3d2   : > { %9662 = vmatpush1.bf16.msra.mxu0 %v16464_v15  ;;  %9726 = vmatpush1.bf16.msra.mxu1 %v16465_v62  ;;  %v16499_v15 = vld [vmem:[#allocation112_spill] sm:$0xff]  ;;  %v16500_v62 = vld [vmem:[#allocation113_spill] sm:$0xff] }
 0x3d3   : > { %9664 = vmatprep.subr.bf16.mxu0 %v16466_v14  ;;  %9728 = vmatprep.subr.bf16.mxu1 %v16467_v20  ;;  %v16501_v14 = vld [vmem:[#allocation114_spill] sm:$0xff]  ;;  %v16502_v20 = vld [vmem:[#allocation115_spill] sm:$0xff] }
 0x3d6   : > { %9666 = vmatpush1.bf16.msra.mxu0 %v16468_v55  ;;  %9730 = vmatpush1.bf16.msra.mxu1 %v16469_v48  ;;  %v16503_v55 = vld [vmem:[#allocation116_spill] sm:$0xff]  ;;  %v16504_v48 = vld [vmem:[#allocation117_spill] sm:$0xff] }
 0x3d7   : > { %9668 = vmatprep.subr.bf16.mxu0 %v16470_v42  ;;  %9732 = vmatprep.subr.bf16.mxu1 %v16471_v28  ;;  %v16505_v42 = vld [vmem:[#allocation118_spill] sm:$0xff]  ;;  %v16506_v28 = vld [vmem:[#allocation119_spill] sm:$0xff] }
 0x3da   : > { %9670 = vmatpush1.bf16.msra.mxu0 %v16472_v18  ;;  %9734 = vmatpush1.bf16.msra.mxu1 %v16473_v38  ;;  %v16507_v18 = vld [vmem:[#allocation120_spill] sm:$0xff]  ;;  %v16508_v38 = vld [vmem:[#allocation58_spill] sm:$0xff] }
 0x3db   : > { %9672 = vmatprep.subr.bf16.mxu0 %v16474_v8  ;;  %9736 = vmatprep.subr.bf16.mxu1 %v16475_v6  ;;  %v16509_v8 = vld [vmem:[#allocation121_spill] sm:$0xff]  ;;  %v16510_v6 = vld [vmem:[#allocation122_spill] sm:$0xff] }
 0x3de   : > { %9674 = vmatpush1.bf16.msra.mxu0 %v16476_v41  ;;  %9738 = vmatpush1.bf16.msra.mxu1 %v16477_v30  ;;  %v16511_v41 = vld [vmem:[#allocation123_spill] sm:$0xff]  ;;  %v16512_v30 = vld [vmem:[#allocation124_spill] sm:$0xff] }
 0x3df   : > { %9676 = vmatprep.subr.bf16.mxu0 %v16478_v36  ;;  %9740 = vmatprep.subr.bf16.mxu1 %v16479_v46  ;;  %v16513_v36 = vld [vmem:[#allocation59_spill] sm:$0xff]  ;;  %v16514_v46 = vld [vmem:[#allocation62_spill] sm:$0xff] }
 0x3e2   : > { %9678 = vmatpush1.bf16.msra.mxu0 %v16480_v57  ;;  %9742 = vmatpush1.bf16.msra.mxu1 %v16481_v13  ;;  %v16515_v57 = vld [vmem:[#allocation125_spill] sm:$0xff]  ;;  %v16516_v13 = vld [vmem:[#allocation126_spill] sm:$0xff] }
 0x3e3   : > { %9680 = vmatprep.subr.bf16.mxu0 %v16482_v27  ;;  %9744 = vmatprep.subr.bf16.mxu1 %v16483_v35  ;;  %v16517_v27 = vld [vmem:[#allocation127_spill] sm:$0xff]  ;;  %v16518_v35 = vld [vmem:[#allocation128_spill] sm:$0xff] }
 0x3e6   : > { %9682 = vmatpush1.bf16.msra.mxu0 %v16484_v16  ;;  %9746 = vmatpush1.bf16.msra.mxu1 %v16485_v63  ;;  %v16519_v16 = vld [vmem:[#allocation65_spill] sm:$0xff]  ;;  %v16520_v63 = vld [vmem:[#allocation68_spill] sm:$0xff] }
 0x3e7   : > { %9684 = vmatprep.subr.bf16.mxu0 %v16486_v23  ;;  %9748 = vmatprep.subr.bf16.mxu1 %v16487_v50  ;;  %v16521_v23 = vld [vmem:[#allocation129_spill] sm:$0xff]  ;;  %v16522_v50 = vld [vmem:[#allocation130_spill] sm:$0xff] }
 0x3ea   : > { %9686 = vmatpush1.bf16.msra.mxu0 %v16488_v31  ;;  %9750 = vmatpush1.bf16.msra.mxu1 %v16489_v53  ;;  %v16523_v31 = vld [vmem:[#allocation131_spill] sm:$0xff]  ;;  %v16524_v53 = vld [vmem:[#allocation132_spill] sm:$0xff] }
 0x3eb   : > { %9688 = vmatprep.subr.bf16.mxu0 %v16490_v19  ;;  %9752 = vmatprep.subr.bf16.mxu1 %v16491_v40  ;;  %v16525_v19 = vld [vmem:[#allocation133_spill] sm:$0xff]  ;;  %v16526_v40 = vld [vmem:[#allocation134_spill] sm:$0xff] }
 0x3ee   : > { %9690 = vmatpush1.bf16.msra.mxu0 %v16492_v22  ;;  %9754 = vmatpush1.bf16.msra.mxu1 %v16493_v5  ;;  %v16527_v22 = vld [vmem:[#allocation135_spill] sm:$0xff]  ;;  %v16528_v5 = vld [vmem:[#allocation136_spill] sm:$0xff] }
 0x3ef   : > { %9692 = vmatprep.subr.bf16.mxu0 %v16494_v26  ;;  %9756 = vmatprep.subr.bf16.mxu1 %v16495_v49  ;;  %v16529_v26 = vld [vmem:[#allocation205_spill] sm:$0xff] }
 0x3f0   : > { %v16530_v49 = vld [vmem:[#allocation137_spill] sm:$0xff] }
 0x3f2   : > { %9694 = vmatpush1.bf16.msra.mxu0 %v16496_v52  ;;  %9758 = vmatpush1.bf16.msra.mxu1 %v16497_v51  ;;  %v16531_v52 = vld [vmem:[#allocation138_spill] sm:$0xff]  ;;  %v16532_v51 = vld [vmem:[#allocation139_spill] sm:$0xff] }
 0x3f3   : > { %9696 = vmatprep.subr.bf16.mxu0 %v16498_v17  ;;  %9760 = vmatprep.subr.bf16.mxu1 %v16499_v15  ;;  %v16533_v17 = vld [vmem:[#allocation140_spill] sm:$0xff]  ;;  %v16534_v15 = vld [vmem:[#allocation141_spill] sm:$0xff] }
 0x3f6   : > { %9698 = vmatpush1.bf16.msra.mxu0 %v16500_v62  ;;  %9762 = vmatpush1.bf16.msra.mxu1 %v16501_v14  ;;  %v16535_v62 = vld [vmem:[#allocation142_spill] sm:$0xff]  ;;  %v16536_v14 = vld [vmem:[#allocation143_spill] sm:$0xff] }
 0x3f7   : > { %9700 = vmatprep.subr.bf16.mxu0 %v16502_v20  ;;  %9764 = vmatprep.subr.bf16.mxu1 %v16503_v55  ;;  %v16537_v20 = vld [vmem:[#allocation144_spill] sm:$0xff]  ;;  %v16538_v55 = vld [vmem:[#allocation145_spill] sm:$0xff] }
 0x3fa   : > { %9702 = vmatpush1.bf16.msra.mxu0 %v16504_v48  ;;  %9766 = vmatpush1.bf16.msra.mxu1 %v16505_v42  ;;  %v16539_v48 = vld [vmem:[#allocation146_spill] sm:$0xff]  ;;  %v16540_v42 = vld [vmem:[#allocation147_spill] sm:$0xff] }
 0x3fb   : > { %9768 = vmatprep.subr.bf16.mxu0 %v16506_v28  ;;  %9832 = vmatprep.subr.bf16.mxu1 %v16507_v18  ;;  %v16541_v28 = vld [vmem:[#allocation148_spill] sm:$0xff]  ;;  %v16542_v18 = vld [vmem:[#allocation149_spill] sm:$0xff] }
 0x3fd   : > { %6789 = vmatmul.mubr.f32.vlgmr.msra.gmra.mrb[50].mxu0 %v12649_v1  ;;  %6884 = vmatmul.mubr.f32.vlgmr.msra.gmra.mrb[50].mxu1 %v12649_v1 }
 0x3fe   : > { %6794 = vmatprep.mubr.f32.mxu0 %v16508_v38  ;;  %6889 = vmatprep.mubr.f32.mxu1 %v16508_v38 }
 0x3ff   : > { %9770 = vmatpush1.bf16.msra.mxu0 %v16509_v8  ;;  %9834 = vmatpush1.bf16.msra.mxu1 %v16510_v6  ;;  %v16543_v8 = vld [vmem:[#allocation150_spill] sm:$0xff]  ;;  %v16544_v6 = vld [vmem:[#allocation151_spill] sm:$0xff] }
 0x400   : > { %9772 = vmatprep.subr.bf16.mxu0 %v16511_v41  ;;  %9836 = vmatprep.subr.bf16.mxu1 %v16512_v30  ;;  %v16545_v41 = vld [vmem:[#allocation152_spill] sm:$0xff]  ;;  %v16546_v30 = vld [vmem:[#allocation153_spill] sm:$0xff] }
 0x401   : > { %6795 = vmatmul.mubr.f32.gmra.mrb[52].mxu0 %v16513_v36  ;;  %6890 = vmatmul.mubr.f32.gmra.mrb[52].mxu1 %v16513_v36 }
 0x402   : > { %6800 = vmatprep.mubr.f32.mxu0 %v16514_v46  ;;  %6895 = vmatprep.mubr.f32.mxu1 %v16514_v46 }
 0x403   : > { %9774 = vmatpush1.bf16.msra.mxu0 %v16515_v57  ;;  %9838 = vmatpush1.bf16.msra.mxu1 %v16516_v13  ;;  %v16547_v57 = vld [vmem:[#allocation154_spill] sm:$0xff]  ;;  %v16548_v13 = vld [vmem:[#allocation155_spill] sm:$0xff] }
 0x404   : > { %9776 = vmatprep.subr.bf16.mxu0 %v16517_v27  ;;  %9840 = vmatprep.subr.bf16.mxu1 %v16518_v35  ;;  %v16549_v27 = vld [vmem:[#allocation156_spill] sm:$0xff]  ;;  %v16550_v35 = vld [vmem:[#allocation157_spill] sm:$0xff] }
 0x405   : > { %6801 = vmatmul.mubr.f32.gmra.mrb[54].mxu0 %v16519_v16  ;;  %6896 = vmatmul.mubr.f32.gmra.mrb[54].mxu1 %v16519_v16 }
 0x406   : > { %6806 = vmatprep.mubr.f32.mxu0 %v16520_v63  ;;  %6901 = vmatprep.mubr.f32.mxu1 %v16520_v63 }
 0x407   : > { %9778 = vmatpush1.bf16.msra.mxu0 %v16521_v23  ;;  %9842 = vmatpush1.bf16.msra.mxu1 %v16522_v50  ;;  %v16551_v23 = vld [vmem:[#allocation158_spill] sm:$0xff]  ;;  %v16552_v50 = vld [vmem:[#allocation159_spill] sm:$0xff] }
 0x408   : > { %9780 = vmatprep.subr.bf16.mxu0 %v16523_v31  ;;  %9844 = vmatprep.subr.bf16.mxu1 %v16524_v53  ;;  %v16553_v31 = vld [vmem:[#allocation160_spill] sm:$0xff]  ;;  %v16554_v53 = vld [vmem:[#allocation161_spill] sm:$0xff] }
 0x409   : > { %6807 = vmatmul.mubr.f32.gmra.mrb[56].mxu0 %v12796_v34  ;;  %6902 = vmatmul.mubr.f32.gmra.mrb[56].mxu1 %v12796_v34 }
 0x40a   : > { %6812 = vmatprep.mubr.f32.mxu0 %v12821_v7  ;;  %6907 = vmatprep.mubr.f32.mxu1 %v12821_v7 }
 0x40b   : > { %9782 = vmatpush1.bf16.msra.mxu0 %v16525_v19  ;;  %9846 = vmatpush1.bf16.msra.mxu1 %v16526_v40  ;;  %v16555_v19 = vld [vmem:[#allocation162_spill] sm:$0xff]  ;;  %v16556_v40 = vld [vmem:[#allocation163_spill] sm:$0xff] }
 0x40c   : > { %9784 = vmatprep.subr.bf16.mxu0 %v16527_v22  ;;  %9848 = vmatprep.subr.bf16.mxu1 %v16528_v5  ;;  %v16557_v22 = vld [vmem:[#allocation164_spill] sm:$0xff]  ;;  %v16558_v5 = vld [vmem:[#allocation165_spill] sm:$0xff] }
 0x40d   : > { %6813 = vmatmul.mubr.f32.gmra.mrb[58].mxu0 %v12847_v58  ;;  %6908 = vmatmul.mubr.f32.gmra.mrb[58].mxu1 %v12847_v58 }
 0x40e   : > { %6978 = vmatprep.mubr.f32.mxu0 %v16529_v26  ;;  %7073 = vmatprep.mubr.f32.mxu1 %v16529_v26  ;;  %v16559_v26 = vld [vmem:[#allocation166_spill] sm:$0xff] }
 0x40f   : > { %9786 = vmatpush1.bf16.msra.mxu0 %v16530_v49  ;;  %9850 = vmatpush1.bf16.msra.mxu1 %v16531_v52  ;;  %v16560_v49 = vld [vmem:[#allocation167_spill] sm:$0xff]  ;;  %v16561_v52 = vld [vmem:[#allocation168_spill] sm:$0xff] }
 0x410   : > { %9788 = vmatprep.subr.bf16.mxu0 %v16532_v51  ;;  %9852 = vmatprep.subr.bf16.mxu1 %v16533_v17  ;;  %v16562_v51 = vld [vmem:[#allocation169_spill] sm:$0xff]  ;;  %v16563_v17 = vld [vmem:[#allocation170_spill] sm:$0xff] }
 0x413   : > { %9790 = vmatpush1.bf16.msra.mxu0 %v16534_v15  ;;  %9854 = vmatpush1.bf16.msra.mxu1 %v16535_v62  ;;  %v16564_v15 = vld [vmem:[#allocation171_spill] sm:$0xff]  ;;  %v16565_v62 = vld [vmem:[#allocation172_spill] sm:$0xff] }
 0x414   : > { %9792 = vmatprep.subr.bf16.mxu0 %v16536_v14  ;;  %9856 = vmatprep.subr.bf16.mxu1 %v16537_v20  ;;  %v16566_v14 = vld [vmem:[#allocation173_spill] sm:$0xff]  ;;  %v16567_v20 = vld [vmem:[#allocation174_spill] sm:$0xff] }
 0x417   : > { %9794 = vmatpush1.bf16.msra.mxu0 %v16538_v55  ;;  %9858 = vmatpush1.bf16.msra.mxu1 %v16539_v48  ;;  %v16568_v55 = vld [vmem:[#allocation175_spill] sm:$0xff]  ;;  %v16569_v48 = vld [vmem:[#allocation176_spill] sm:$0xff] }
 0x418   : > { %9796 = vmatprep.subr.bf16.mxu0 %v16540_v42  ;;  %9860 = vmatprep.subr.bf16.mxu1 %v16541_v28  ;;  %v16570_v42 = vld [vmem:[#allocation177_spill] sm:$0xff]  ;;  %v16571_v28 = vld [vmem:[#allocation178_spill] sm:$0xff] }
 0x41b   : > { %9798 = vmatpush1.bf16.msra.mxu0 %v16542_v18  ;;  %9862 = vmatpush1.bf16.msra.mxu1 %v16543_v8  ;;  %v16572_v18 = vld [vmem:[#allocation179_spill] sm:$0xff]  ;;  %v16573_v8 = vld [vmem:[#allocation180_spill] sm:$0xff] }
 0x41c   : > { %9800 = vmatprep.subr.bf16.mxu0 %v16544_v6  ;;  %9864 = vmatprep.subr.bf16.mxu1 %v16545_v41  ;;  %v16574_v6 = vld [vmem:[#allocation181_spill] sm:$0xff]  ;;  %v16575_v41 = vld [vmem:[#allocation182_spill] sm:$0xff] }
 0x41f   : > { %9802 = vmatpush1.bf16.msra.mxu0 %v16546_v30  ;;  %9866 = vmatpush1.bf16.msra.mxu1 %v16547_v57  ;;  %v16576_v30 = vld [vmem:[#allocation183_spill] sm:$0xff]  ;;  %v16577_v57 = vld [vmem:[#allocation184_spill] sm:$0xff] }
 0x420   : > { %9804 = vmatprep.subr.bf16.mxu0 %v16548_v13  ;;  %9868 = vmatprep.subr.bf16.mxu1 %v16549_v27  ;;  %v16578_v13 = vld [vmem:[#allocation252_spill] sm:$0xff]  ;;  %v16579_v27 = vld [vmem:[#allocation255_spill] sm:$0xff] }
 0x423   : > { %9806 = vmatpush1.bf16.msra.mxu0 %v16550_v35  ;;  %9870 = vmatpush1.bf16.msra.mxu1 %v16551_v23  ;;  %v16580_v35 = vld [vmem:[#allocation185_spill] sm:$0xff]  ;;  %v16581_v23 = vld [vmem:[#allocation186_spill] sm:$0xff] }
 0x424   : > { %9808 = vmatprep.subr.bf16.mxu0 %v16552_v50  ;;  %9872 = vmatprep.subr.bf16.mxu1 %v16553_v31  ;;  %v16582_v50 = vld [vmem:[#allocation187_spill] sm:$0xff]  ;;  %v16583_v31 = vld [vmem:[#allocation188_spill] sm:$0xff] }
 0x427   : > { %9810 = vmatpush1.bf16.msra.mxu0 %v16554_v53  ;;  %9874 = vmatpush1.bf16.msra.mxu1 %v16555_v19  ;;  %v16584_v53 = vld [vmem:[#allocation258_spill] sm:$0xff]  ;;  %v16585_v19 = vld [vmem:[#allocation189_spill] sm:$0xff] }
 0x428   : > { %9812 = vmatprep.subr.bf16.mxu0 %v16556_v40  ;;  %9876 = vmatprep.subr.bf16.mxu1 %v16557_v22  ;;  %v16586_v40 = vld [vmem:[#allocation190_spill] sm:$0xff]  ;;  %v16587_v22 = vld [vmem:[#allocation191_spill] sm:$0xff] }
 0x42b   : > { %9814 = vmatpush1.bf16.msra.mxu0 %v16558_v5  ;;  %9878 = vmatpush1.bf16.msra.mxu1 %v16559_v26  ;;  %v16588_v5 = vld [vmem:[#allocation192_spill] sm:$0xff]  ;;  %v16589_v26 = vld [vmem:[#allocation263_spill] sm:$0xff] }
 0x42c   : > { %9816 = vmatprep.subr.bf16.mxu0 %v16560_v49  ;;  %9880 = vmatprep.subr.bf16.mxu1 %v16561_v52  ;;  %v16590_v49 = vld [vmem:[#allocation53_spill] sm:$0xff] }
 0x42d   : > { %v6474_v52 = vsub.s32 2, %v16590_v49 }
 0x42f   : > { %9818 = vmatpush1.bf16.msra.mxu0 %v16562_v51  ;;  %9882 = vmatpush1.bf16.msra.mxu1 %v16563_v17  ;;  %v16591_v51 = vld [vmem:[#allocation193_spill] sm:$0xff]  ;;  %v253_v17 = vld [vmem:[%s15759_s4] sm:$0xf] }
 0x430   : > { %9820 = vmatprep.subr.bf16.mxu0 %v16564_v15  ;;  %9884 = vmatprep.subr.bf16.mxu1 %v16565_v62  ;;  %v6478_v15 = vsub.s32 3, %v16590_v49  ;;  %v16593_v62 = vld [vmem:[#allocation195_spill] sm:$0xff] }
 0x433   : > { %9822 = vmatpush1.bf16.msra.mxu0 %v16566_v14  ;;  %9886 = vmatpush1.bf16.msra.mxu1 %v16567_v20  ;;  %v16594_v14 = vld [vmem:[#allocation196_spill] sm:$0xff] }
 0x434   : > { %9824 = vmatprep.subr.bf16.mxu0 %v16568_v55  ;;  %9888 = vmatprep.subr.bf16.mxu1 %v16569_v48  ;;  %v15496_v55 = vrot.slane %v253_v17, %v6474_v52  ;;  %v16596_v48 = vld [vmem:[#allocation197_spill] sm:$0xff] }
 0x437   : > { %9826 = vmatpush1.bf16.msra.mxu0 %v16570_v42  ;;  %9890 = vmatpush1.bf16.msra.mxu1 %v16571_v28  ;;  %v16597_v42 = vld [vmem:[#allocation198_spill] sm:$0xff]  ;;  %v16598_v28 = vsub.s32 1, %v16590_v49 }
 0x438   : > { %9828 = vmatprep.subr.bf16.mxu0 %v16572_v18  ;;  %9892 = vmatprep.subr.bf16.mxu1 %v16573_v8  ;;  %v15504_v8 = vrot.slane %v253_v17, %v6478_v15 }
 0x439   : > { %v15502_v18 = vrot.slane %v253_v17, %v16598_v28 }
 0x43b   : > { %9830 = vmatpush1.bf16.msra.mxu0 %v16574_v6  ;;  %9894 = vmatpush1.bf16.msra.mxu1 %v16575_v41  ;;  %v16600_v6 = vld [vmem:[#allocation200_spill] sm:$0xff] }
 0x43c   : > { %9896 = vmatprep.subr.bf16.mxu0 %v16576_v30  ;;  %9960 = vmatprep.subr.bf16.mxu1 %v16577_v57 }
 0x43e   : > { %6979 = vmatmul.mubr.f32.vlgmr.msra.gmra.mrb[50].mxu0 %v16578_v13  ;;  %7074 = vmatmul.mubr.f32.vlgmr.msra.gmra.mrb[50].mxu1 %v16578_v13 }
 0x43f   : > { %6984 = vmatprep.mubr.f32.mxu0 %v16579_v27  ;;  %7079 = vmatprep.mubr.f32.mxu1 %v16579_v27 }
 0x440   : > { %9898 = vmatpush1.bf16.msra.mxu0 %v16580_v35  ;;  %9962 = vmatpush1.bf16.msra.mxu1 %v16581_v23  ;;  %v16601_v35 = vld [vmem:[#allocation201_spill] sm:$0xff]  ;;  %v16602_v23 = vld [vmem:[#allocation202_spill] sm:$0xff] }
 0x441   : > { %9900 = vmatprep.subr.bf16.mxu0 %v16582_v50  ;;  %9964 = vmatprep.subr.bf16.mxu1 %v16583_v31 }
 0x442   : > { %6985 = vmatmul.mubr.f32.gmra.mrb[52].mxu0 %v16584_v53  ;;  %7080 = vmatmul.mubr.f32.gmra.mrb[52].mxu1 %v16584_v53 }
 0x443   : > { %6990 = vmatprep.mubr.f32.mxu0 %v14653_v43  ;;  %7085 = vmatprep.mubr.f32.mxu1 %v14653_v43  ;;  %v16592_v43 = vld [vmem:[#allocation194_spill] sm:$0xff] }
 0x444   : > { %9902 = vmatpush1.bf16.msra.mxu0 %v16585_v19  ;;  %9966 = vmatpush1.bf16.msra.mxu1 %v16586_v40  ;;  %v16603_v19 = vld [vmem:[#allocation203_spill] sm:$0xff]  ;;  %v16604_v40 = vld [vmem:[#allocation204_spill] sm:$0xff] }
 0x445   : > { %9904 = vmatprep.subr.bf16.mxu0 %v16587_v22  ;;  %9968 = vmatprep.subr.bf16.mxu1 %v16588_v5 }
 0x446   : > { %6991 = vmatmul.mubr.f32.gmra.mrb[54].mxu0 %v16589_v26  ;;  %7086 = vmatmul.mubr.f32.gmra.mrb[54].mxu1 %v16589_v26 }
 0x447   : > { %6996 = vmatprep.mubr.f32.mxu0 %v14706_v2  ;;  %7091 = vmatprep.mubr.f32.mxu1 %v14706_v2  ;;  %v16595_v2 = vsub.s32 0, %v16590_v49 }
 0x448   : > { %9906 = vmatpush1.bf16.msra.mxu0 %v16591_v51  ;;  %9970 = vmatpush1.bf16.msra.mxu1 %v16592_v43 }
 0x449   : > { %9908 = vmatprep.subr.bf16.mxu0 %v16593_v62  ;;  %9972 = vmatprep.subr.bf16.mxu1 %v16594_v14  ;;  %v15494_v20 = vrot.slane %v253_v17, %v16595_v2  ;;  %v16605_v62 = vld [vmem:[#allocation206_spill] sm:$0xff]  ;;  %v16606_v14 = vld [vmem:[#allocation207_spill] sm:$0xff] }
 0x44a   : > { %6997 = vmatmul.mubr.f32.gmra.mrb[56].mxu0 %v14733_v54  ;;  %7092 = vmatmul.mubr.f32.gmra.mrb[56].mxu1 %v14733_v54  ;;  %v16599_v54 = vld [vmem:[#allocation199_spill] sm:$0xff] }
 0x44b   : > { %7002 = vmatprep.mubr.f32.mxu0 %v14656_v24  ;;  %7097 = vmatprep.mubr.f32.mxu1 %v14656_v24 }
 0x44c   : > { %9910 = vmatpush1.bf16.msra.mxu0 %v16596_v48  ;;  %9974 = vmatpush1.bf16.msra.mxu1 %v16597_v42 }
 0x44d   : > { %9912 = vmatprep.subr.bf16.mxu0 %v16599_v54  ;;  %9976 = vmatprep.subr.bf16.mxu1 %v16600_v6  ;;  %v16607_v54 = vld [vmem:[#allocation208_spill] sm:$0xff]  ;;  %v16608_v6 = vld [vmem:[#allocation209_spill] sm:$0xff] }
 0x44e   : > { %7003 = vmatmul.mubr.f32.gmra.mrb[58].mxu0 %v14687_v25  ;;  %7098 = vmatmul.mubr.f32.gmra.mrb[58].mxu1 %v14687_v25  ;;  %v6319_v24 = vpop.f32.mrb[40].mxu0  ;;  %v6414_v41 = vpop.f32.mrb[40].mxu1 }
 0x44f   : > { %7188 = vmatprep.mubr.f32.mxu0 %v14797_v59  ;;  %7283 = vmatprep.mubr.f32.mxu1 %v14797_v59  ;;  %v6484_v30 = vadd.f32 %v15494_v20, %v6319_v24  ;;  %v6486_v57 = vadd.f32 %v15496_v55, %v6414_v41  ;;  %v6321_v13 = vpop.f32.mrb[41].mxu0  ;;  %v6416_v27 = vpop.f32.mrb[41].mxu1 }
 0x450   : > { %9914 = vmatpush1.bf16.msra.mxu0 %v16601_v35  ;;  %9978 = vmatpush1.bf16.msra.mxu1 %v16602_v23  ;;  %v6485_v50 = vadd.f32 %v15502_v18, %v6321_v13  ;;  %v6487_v25 = vadd.f32 %v15504_v8, %v6416_v27 }
 0x451   : > { %v6504_v31 = vmax.f32 %v6484_v30, 0.0  ;;  %v6506_v53 = vmax.f32 %v6486_v57, 0.0  ;;  %9916 = vmatprep.subr.bf16.mxu0 %v16603_v19  ;;  %9980 = vmatprep.subr.bf16.mxu1 %v16604_v40 }
 0x452   : > { %v6505_v59 = vmax.f32 %v6485_v50, 0.0  ;;  %v6507_v22 = vmax.f32 %v6487_v25, 0.0  ;;  %v6325_v5 = vpop.f32.mrb[42].mxu0  ;;  %v6420_v26 = vpop.f32.mrb[42].mxu1 }
 0x453   : > { %v15520_v49 = vmax.f32 %v6504_v31, %v6506_v53  ;;  %v6488_v52 = vadd.f32 %v15494_v20, %v6325_v5  ;;  %v6490_v51 = vadd.f32 %v15496_v55, %v6420_v26  ;;  %v6327_v43 = vpop.f32.mrb[43].mxu0  ;;  %v6422_v17 = vpop.f32.mrb[43].mxu1  ;;  %v16609_v31 = vld [vmem:[#allocation210_spill] sm:$0xff]  ;;  %v16610_v53 = vld [vmem:[#allocation211_spill] sm:$0xff]  ;;  %v16611_v5 = vld [vmem:[#allocation212_spill] sm:$0xff] }
 0x454   : > { %v15524_v15 = vmax.f32 %v6505_v59, %v6507_v22  ;;  %9918 = vmatpush1.bf16.msra.mxu0 %v16605_v62  ;;  %9982 = vmatpush1.bf16.msra.mxu1 %v16606_v14  ;;  %v6489_v2 = vadd.f32 %v15502_v18, %v6327_v43  ;;  %v6491_v48 = vadd.f32 %v15504_v8, %v6422_v17  ;;  %v16612_v26 = vld [vmem:[#allocation213_spill] sm:$0xff] }
 0x455   : > { %v6508_v42 = vmax.f32 %v6488_v52, 0.0  ;;  %v6510_v28 = vmax.f32 %v6490_v51, 0.0  ;;  %9920 = vmatprep.subr.bf16.mxu0 %v16607_v54  ;;  %9984 = vmatprep.subr.bf16.mxu1 %v16608_v6  ;;  %v16613_v54 = vld [vmem:[#allocation214_spill] sm:$0xff]  ;;  %v16614_v6 = vld [vmem:[#allocation215_spill] sm:$0xff] }
 0x456   : > { %v6509_v24 = vmax.f32 %v6489_v2, 0.0  ;;  %v6511_v41 = vmax.f32 %v6491_v48, 0.0  ;;  %v6331_v30 = vpop.f32.mrb[44].mxu0  ;;  %v6426_v57 = vpop.f32.mrb[44].mxu1 }
 0x457   : > { %v15532_v13 = vmax.f32 %v6508_v42, %v6510_v28  ;;  %v6492_v27 = vadd.f32 %v15494_v20, %v6331_v30  ;;  %v6494_v35 = vadd.f32 %v15496_v55, %v6426_v57  ;;  %v6333_v23 = vpop.f32.mrb[45].mxu0  ;;  %v6428_v50 = vpop.f32.mrb[45].mxu1 }
 0x458   : > { %v15536_v25 = vmax.f32 %v6509_v24, %v6511_v41  ;;  %9922 = vmatpush1.bf16.msra.mxu0 %v16609_v31  ;;  %9986 = vmatpush1.bf16.msra.mxu1 %v16610_v53  ;;  %v6493_v19 = vadd.f32 %v15502_v18, %v6333_v23  ;;  %v6495_v40 = vadd.f32 %v15504_v8, %v6428_v50 }
 0x459   : > { %v6512_v59 = vmax.f32 %v6492_v27, 0.0  ;;  %v6514_v22 = vmax.f32 %v6494_v35, 0.0  ;;  %9924 = vmatprep.subr.bf16.mxu0 %v16611_v5  ;;  %9988 = vmatprep.subr.bf16.mxu1 %v16612_v26  ;;  %v16615_v27 = vld [vmem:[#allocation216_spill] sm:$0xff]  ;;  %v16616_v35 = vld [vmem:[#allocation217_spill] sm:$0xff] }
 0x45a   : > { %v6513_v52 = vmax.f32 %v6493_v19, 0.0  ;;  %v6515_v51 = vmax.f32 %v6495_v40, 0.0  ;;  %v6337_v43 = vpop.f32.mrb[46].mxu0  ;;  %v6432_v17 = vpop.f32.mrb[46].mxu1 }
 0x45b   : > { %v15544_v62 = vmax.f32 %v6512_v59, %v6514_v22  ;;  %v6496_v14 = vadd.f32 %v15494_v20, %v6337_v43  ;;  %v6498_v2 = vadd.f32 %v15496_v55, %v6432_v17  ;;  %v6339_v48 = vpop.f32.mrb[47].mxu0  ;;  %v6434_v42 = vpop.f32.mrb[47].mxu1 }
 0x45c   : > { %v15548_v28 = vmax.f32 %v6513_v52, %v6515_v51  ;;  %9926 = vmatpush1.bf16.msra.mxu0 %v16613_v54  ;;  %9990 = vmatpush1.bf16.msra.mxu1 %v16614_v6  ;;  %v6497_v24 = vadd.f32 %v15502_v18, %v6339_v48  ;;  %v6499_v41 = vadd.f32 %v15504_v8, %v6434_v42  ;;  %v16617_v52 = vld [vmem:[#allocation218_spill] sm:$0xff]  ;;  %v16618_v51 = vld [vmem:[#allocation219_spill] sm:$0xff]  ;;  %v16619_v48 = vld [vmem:[#allocation220_spill] sm:$0xff] }
 0x45d   : > { %v6516_v30 = vmax.f32 %v6496_v14, 0.0  ;;  %v6518_v57 = vmax.f32 %v6498_v2, 0.0  ;;  %9928 = vmatprep.subr.bf16.mxu0 %v16615_v27  ;;  %9992 = vmatprep.subr.bf16.mxu1 %v16616_v35  ;;  %v16620_v42 = vld [vmem:[#allocation221_spill] sm:$0xff]  ;;  %v16623_v27 = vld [vmem:[#allocation224_spill] sm:$0xff] }
 0x45e   : > { %v6517_v23 = vmax.f32 %v6497_v24, 0.0  ;;  %v6519_v50 = vmax.f32 %v6499_v41, 0.0  ;;  %v6343_v31 = vpop.f32.mrb[48].mxu0  ;;  %v6438_v53 = vpop.f32.mrb[48].mxu1  ;;  %v16624_v35 = vld [vmem:[#allocation225_spill] sm:$0xff] }
 0x45f   : > { %v15556_v19 = vmax.f32 %v6516_v30, %v6518_v57  ;;  %v6500_v40 = vadd.f32 %v15494_v20, %v6343_v31  ;;  %v6502_v59 = vadd.f32 %v15496_v55, %v6438_v53  ;;  %v6345_v22 = vpop.f32.mrb[49].mxu0  ;;  %v6440_v5 = vpop.f32.mrb[49].mxu1  ;;  %v16621_v30 = vld [vmem:[#allocation222_spill] sm:$0xff]  ;;  %v16622_v57 = vld [vmem:[#allocation223_spill] sm:$0xff]  ;;  %v16627_v31 = vld [vmem:[#allocation228_spill] sm:$0xff] }
 0x460   : > { %v15560_v26 = vmax.f32 %v6517_v23, %v6519_v50  ;;  %9930 = vmatpush1.bf16.msra.mxu0 %v16617_v52  ;;  %9994 = vmatpush1.bf16.msra.mxu1 %v16618_v51  ;;  %v6501_v43 = vadd.f32 %v15502_v18, %v6345_v22  ;;  %v6503_v17 = vadd.f32 %v15504_v8, %v6440_v5  ;;  %v16625_v23 = vld [vmem:[#allocation226_spill] sm:$0xff]  ;;  %v16626_v50 = vld [vmem:[#allocation227_spill] sm:$0xff]  ;;  %v16628_v53 = vld [vmem:[#allocation229_spill] sm:$0xff] }
 0x461   : > { %v6520_v14 = vmax.f32 %v6500_v40, 0.0  ;;  %v6522_v2 = vmax.f32 %v6502_v59, 0.0  ;;  %9932 = vmatprep.subr.bf16.mxu0 %v16619_v48  ;;  %9996 = vmatprep.subr.bf16.mxu1 %v16620_v42  ;;  %v16629_v40 = vld [vmem:[#allocation230_spill] sm:$0xff]  ;;  %v16630_v59 = vld [vmem:[#allocation231_spill] sm:$0xff]  ;;  %v16631_v22 = vld [vmem:[#allocation232_spill] sm:$0xff] }
 0x462   : > { %v6521_v54 = vmax.f32 %v6501_v43, 0.0  ;;  %v6523_v6 = vmax.f32 %v6503_v17, 0.0  ;;  %v16632_v5 = vld [vmem:[#allocation233_spill] sm:$0xff]  ;;  %v16633_v52 = vld [vmem:[#allocation234_spill] sm:$0xff]  ;;  %v16634_v51 = vld [vmem:[#allocation235_spill] sm:$0xff] }
 0x463   : > { %v15568_v24 = vmax.f32 %v6520_v14, %v6522_v2  ;;  %v16635_v43 = vld [vmem:[#allocation236_spill] sm:$0xff]  ;;  %v16636_v17 = vld [vmem:[#allocation237_spill] sm:$0xff]  ;;  %v16637_v14 = vld [vmem:[#allocation238_spill] sm:$0xff] }
 0x464   : > { %v15570_v41 = vmax.f32 %v6521_v54, %v6523_v6  ;;  %9934 = vmatpush1.bf16.msra.mxu0 %v16621_v30  ;;  %9998 = vmatpush1.bf16.msra.mxu1 %v16622_v57  ;;  %v16638_v2 = vld [vmem:[#allocation239_spill] sm:$0xff]  ;;  %v16639_v48 = vld [vmem:[#allocation240_spill] sm:$0xff]  ;;  %v16640_v42 = vld [vmem:[#allocation241_spill] sm:$0xff] }
 0x465   : > { %9936 = vmatprep.subr.bf16.mxu0 %v16623_v27  ;;  %10000 = vmatprep.subr.bf16.mxu1 %v16624_v35  ;;  %v16641_v54 = vld [vmem:[#allocation242_spill] sm:$0xff]  ;;  %v16642_v6 = vld [vmem:[#allocation243_spill] sm:$0xff]  ;;  %v16643_v30 = vld [vmem:[#allocation244_spill] sm:$0xff] }
 0x466   : > { %v16644_v57 = vld [vmem:[#allocation245_spill] sm:$0xff]  ;;  %v16645_v27 = vld [vmem:[#allocation246_spill] sm:$0xff]  ;;  %v16646_v35 = vld [vmem:[#allocation247_spill] sm:$0xff] }
 0x468   : > { %9938 = vmatpush1.bf16.msra.mxu0 %v16625_v23  ;;  %10002 = vmatpush1.bf16.msra.mxu1 %v16626_v50  ;;  %v16647_v23 = vld [vmem:[#allocation248_spill] sm:$0xff]  ;;  %v16648_v50 = vld [vmem:[#allocation249_spill] sm:$0xff] }
 0x469   : > { %9940 = vmatprep.subr.bf16.mxu0 %v16627_v31  ;;  %10004 = vmatprep.subr.bf16.mxu1 %v16628_v53  ;;  %v16649_v31 = vld [vmem:[#allocation250_spill] sm:$0xff]  ;;  %v16650_v53 = vld [vmem:[#allocation251_spill] sm:$0xff] }
 0x46c   : > { %9942 = vmatpush1.bf16.msra.mxu0 %v16629_v40  ;;  %10006 = vmatpush1.bf16.msra.mxu1 %v16630_v59  ;;  %v16651_v40 = vld [vmem:[#allocation253_spill] sm:$0xff]  ;;  %v16652_v59 = vld [vmem:[#allocation254_spill] sm:$0xff] }
 0x46d   : > { %9944 = vmatprep.subr.bf16.mxu0 %v16631_v22  ;;  %10008 = vmatprep.subr.bf16.mxu1 %v16632_v5  ;;  %v16654_v22 = vld [vmem:[#allocation257_spill] sm:$0xff]  ;;  %v16656_v5 = vld [vmem:[#allocation260_spill] sm:$0xff] }
 0x470   : > { %9946 = vmatpush1.bf16.msra.mxu0 %v16633_v52  ;;  %10010 = vmatpush1.bf16.msra.mxu1 %v16634_v51  ;;  %v16658_v52 = vld [vmem:[#allocation262_spill] sm:$0xff]  ;;  %v16660_v51 = vld [vmem:[#allocation265_spill] sm:$0xff] }
 0x471   : > { %9948 = vmatprep.subr.bf16.mxu0 %v16635_v43  ;;  %10012 = vmatprep.subr.bf16.mxu1 %v16636_v17  ;;  %v7338_v43 = vrot.slane %v16508_v38, 2  ;;  %v7337_v17 = vrot.slane %v12636_v39, 2  ;;  %v16668_v39 = vld [vmem:[#allocation273_spill] sm:$0xff]  ;;  %v7348_v38 = vrot.slane %v12847_v58, 2 }
 0x474   : > { %9950 = vmatpush1.bf16.msra.mxu0 %v16637_v14  ;;  %10014 = vmatpush1.bf16.msra.mxu1 %v16638_v2  ;;  %v16663_v14 = vld [vmem:[#allocation268_spill] sm:$0xff]  ;;  %v16664_v2 = vld [vmem:[#allocation269_spill] sm:$0xff] }
 0x475   : > { %9952 = vmatprep.subr.bf16.mxu0 %v16639_v48  ;;  %10016 = vmatprep.subr.bf16.mxu1 %v16640_v42  ;;  %v16666_v48 = vld [vmem:[#allocation271_spill] sm:$0xff]  ;;  %v16667_v42 = vld [vmem:[#allocation272_spill] sm:$0xff] }
 0x478   : > { %9954 = vmatpush1.bf16.msra.mxu0 %v16641_v54  ;;  %10018 = vmatpush1.bf16.msra.mxu1 %v16642_v6  ;;  %v16669_v54 = vld [vmem:[#allocation274_spill] sm:$0xff]  ;;  %v16670_v6 = vld [vmem:[#allocation275_spill] sm:$0xff] }
 0x479   : > { %9956 = vmatprep.subr.bf16.mxu0 %v16643_v30  ;;  %10020 = vmatprep.subr.bf16.mxu1 %v16644_v57  ;;  %v16671_v30 = vld [vmem:[#allocation276_spill] sm:$0xff]  ;;  %v16673_v57 = vld [vmem:[#allocation278_spill] sm:$0xff] }
 0x47c   : > { %9958 = vmatpush1.bf16.msra.mxu0 %v16645_v27  ;;  %10022 = vmatpush1.bf16.msra.mxu1 %v16646_v35  ;;  %v16674_v27 = vld [vmem:[#allocation279_spill] sm:$0xff]  ;;  %v16675_v35 = vld [vmem:[#allocation280_spill] sm:$0xff] }
 0x47d   : > { %10024 = vmatprep.subr.bf16.mxu0 %v16647_v23  ;;  %10088 = vmatprep.subr.bf16.mxu1 %v16648_v50  ;;  %v16676_v23 = vld [vmem:[#allocation281_spill] sm:$0xff]  ;;  %v16677_v50 = vld [vmem:[#allocation282_spill] sm:$0xff] }
 0x47f   : > { %7189 = vmatmul.mubr.f32.vlgmr.msra.gmra.mrb[50].mxu0 %v15174_v60  ;;  %7284 = vmatmul.mubr.f32.vlgmr.msra.gmra.mrb[50].mxu1 %v15174_v60  ;;  %v16653_v60 = vld [vmem:[#allocation256_spill] sm:$0xff] }
 0x480   : > { %7194 = vmatprep.mubr.f32.mxu0 %v15182_v44  ;;  %7289 = vmatprep.mubr.f32.mxu1 %v15182_v44  ;;  %v16655_v44 = vld [vmem:[#allocation259_spill] sm:$0xff] }
 0x481   : > { %10026 = vmatpush1.bf16.msra.mxu0 %v16649_v31  ;;  %10090 = vmatpush1.bf16.msra.mxu1 %v16650_v53  ;;  %v16678_v31 = vld [vmem:[#allocation283_spill] sm:$0xff]  ;;  %v16679_v53 = vld [vmem:[#allocation284_spill] sm:$0xff] }
 0x482   : > { %10028 = vmatprep.subr.bf16.mxu0 %v16651_v40  ;;  %10092 = vmatprep.subr.bf16.mxu1 %v16652_v59  ;;  %v16680_v40 = vld [vmem:[#allocation285_spill] sm:$0xff]  ;;  %v16681_v59 = vld [vmem:[#allocation286_spill] sm:$0xff] }
 0x483   : > { %7195 = vmatmul.mubr.f32.gmra.mrb[52].mxu0 %v15190_v10  ;;  %7290 = vmatmul.mubr.f32.gmra.mrb[52].mxu1 %v15190_v10  ;;  %v16657_v10 = vld [vmem:[#allocation261_spill] sm:$0xff] }
 0x484   : > { %7200 = vmatprep.mubr.f32.mxu0 %v15201_v32  ;;  %7295 = vmatprep.mubr.f32.mxu1 %v15201_v32  ;;  %v16659_v32 = vld [vmem:[#allocation264_spill] sm:$0xff] }
 0x485   : > { %10030 = vmatpush1.bf16.msra.mxu0 %v16653_v60  ;;  %10094 = vmatpush1.bf16.msra.mxu1 %v16654_v22  ;;  %v16682_v60 = vld [vmem:[#allocation287_spill] sm:$0xff]  ;;  %v16683_v22 = vld [vmem:[#allocation288_spill] sm:$0xff] }
 0x486   : > { %10032 = vmatprep.subr.bf16.mxu0 %v16655_v44  ;;  %10096 = vmatprep.subr.bf16.mxu1 %v16656_v5  ;;  %v16684_v44 = vld [vmem:[#allocation289_spill] sm:$0xff]  ;;  %v16685_v5 = vld [vmem:[#allocation290_spill] sm:$0xff] }
 0x487   : > { %7201 = vmatmul.mubr.f32.gmra.mrb[54].mxu0 %v15211_v21  ;;  %7296 = vmatmul.mubr.f32.gmra.mrb[54].mxu1 %v15211_v21  ;;  %v16661_v21 = vld [vmem:[#allocation266_spill] sm:$0xff] }
 0x488   : > { %7206 = vmatprep.mubr.f32.mxu0 %v15219_v61  ;;  %7301 = vmatprep.mubr.f32.mxu1 %v15219_v61  ;;  %v16662_v61 = vld [vmem:[#allocation267_spill] sm:$0xff] }
 0x489   : > { %10034 = vmatpush1.bf16.msra.mxu0 %v16657_v10  ;;  %10098 = vmatpush1.bf16.msra.mxu1 %v16658_v52  ;;  %v16686_v10 = vld [vmem:[#allocation291_spill] sm:$0xff]  ;;  %v16687_v52 = vld [vmem:[#allocation292_spill] sm:$0xff] }
 0x48a   : > { %10036 = vmatprep.subr.bf16.mxu0 %v16659_v32  ;;  %10100 = vmatprep.subr.bf16.mxu1 %v16660_v51  ;;  %v16688_v32 = vld [vmem:[#allocation293_spill] sm:$0xff]  ;;  %v16689_v51 = vld [vmem:[#allocation294_spill] sm:$0xff] }
 0x48b   : > { %7207 = vmatmul.mubr.f32.gmra.mrb[56].mxu0 %v15227_v33  ;;  %7302 = vmatmul.mubr.f32.gmra.mrb[56].mxu1 %v15227_v33  ;;  %v7339_v33 = vsel %vm6224_vm2, %v7337_v17, %v7338_v43  ;;  %v16692_v17 = vld [vmem:[#allocation297_spill] sm:$0xff] }
 0x48c   : > { %7212 = vmatprep.mubr.f32.mxu0 %v15196_v56  ;;  %7307 = vmatprep.mubr.f32.mxu1 %v15196_v56  ;;  %v16665_v56 = vld [vmem:[#allocation270_spill] sm:$0xff] }
 0x48d   : > { %10038 = vmatpush1.bf16.msra.mxu0 %v16661_v21  ;;  %10102 = vmatpush1.bf16.msra.mxu1 %v16662_v61  ;;  %v16690_v21 = vld [vmem:[#allocation295_spill] sm:$0xff]  ;;  %v16691_v61 = vld [vmem:[#allocation296_spill] sm:$0xff] }
 0x48e   : > { %10040 = vmatprep.subr.bf16.mxu0 %v16663_v14  ;;  %10104 = vmatprep.subr.bf16.mxu1 %v16664_v2  ;;  %v16693_v14 = vld [vmem:[#allocation298_spill] sm:$0xff]  ;;  %v16694_v2 = vld [vmem:[#allocation299_spill] sm:$0xff] }
 0x48f   : > { %7213 = vmatmul.mubr.f32.gmra.mrb[58].mxu0 %v15208_v0  ;;  %7308 = vmatmul.mubr.f32.gmra.mrb[58].mxu1 %v15208_v0  ;;  %v16672_v0 = vld [vmem:[#allocation277_spill] sm:$0xff] }
 0x490   : > { %7426 = vmatprep.mubr.f32.mxu0 %v7339_v33  ;;  %7521 = vmatprep.mubr.f32.mxu1 %v7339_v33  ;;  %v16695_v33 = vld [vmem:[#allocation300_spill] sm:$0xff] }
 0x491   : > { %10042 = vmatpush1.bf16.msra.mxu0 %v16665_v56  ;;  %10106 = vmatpush1.bf16.msra.mxu1 %v16666_v48  ;;  %v16696_v56 = vld [vmem:[#allocation301_spill] sm:$0xff]  ;;  %v16697_v48 = vld [vmem:[#allocation302_spill] sm:$0xff] }
 0x492   : > { %10044 = vmatprep.subr.bf16.mxu0 %v16667_v42  ;;  %10108 = vmatprep.subr.bf16.mxu1 %v16668_v39  ;;  %v16698_v42 = vld [vmem:[#allocation303_spill] sm:$0xff]  ;;  %v16699_v39 = vld [vmem:[#allocation304_spill] sm:$0xff] }
 0x495   : > { %10046 = vmatpush1.bf16.msra.mxu0 %v16669_v54  ;;  %10110 = vmatpush1.bf16.msra.mxu1 %v16670_v6  ;;  %v16700_v54 = vld [vmem:[#allocation305_spill] sm:$0xff]  ;;  %v16701_v6 = vld [vmem:[#allocation306_spill] sm:$0xff] }
 0x496   : > { %10048 = vmatprep.subr.bf16.mxu0 %v16671_v30  ;;  %10112 = vmatprep.subr.bf16.mxu1 %v16672_v0  ;;  %v7335_v30 = vrot.slane %v16513_v36, 2  ;;  %v7342_v0 = vrot.slane %v16514_v46, 2 }
 0x499   : > { %10050 = vmatpush1.bf16.msra.mxu0 %v16673_v57  ;;  %10114 = vmatpush1.bf16.msra.mxu1 %v16674_v27 }
 0x49a   : > { %10052 = vmatprep.subr.bf16.mxu0 %v16675_v35  ;;  %10116 = vmatprep.subr.bf16.mxu1 %v16676_v23 }
 0x49d   : > { %10054 = vmatpush1.bf16.msra.mxu0 %v16677_v50  ;;  %10118 = vmatpush1.bf16.msra.mxu1 %v16678_v31 }
 0x49e   : > { %10056 = vmatprep.subr.bf16.mxu0 %v16679_v53  ;;  %10120 = vmatprep.subr.bf16.mxu1 %v16680_v40 }
 0x4a1   : > { %10058 = vmatpush1.bf16.msra.mxu0 %v16681_v59  ;;  %10122 = vmatpush1.bf16.msra.mxu1 %v16682_v60 }
 0x4a2   : > { %10060 = vmatprep.subr.bf16.mxu0 %v16683_v22  ;;  %10124 = vmatprep.subr.bf16.mxu1 %v16684_v44 }
 0x4a5   : > { %10062 = vmatpush1.bf16.msra.mxu0 %v16685_v5  ;;  %10126 = vmatpush1.bf16.msra.mxu1 %v16686_v10 }
 0x4a6   : > { %10064 = vmatprep.subr.bf16.mxu0 %v16687_v52  ;;  %10128 = vmatprep.subr.bf16.mxu1 %v16688_v32 }
 0x4a9   : > { %10066 = vmatpush1.bf16.msra.mxu0 %v16689_v51  ;;  %10130 = vmatpush1.bf16.msra.mxu1 %v16690_v21 }
 0x4aa   : > { %10068 = vmatprep.subr.bf16.mxu0 %v16691_v61  ;;  %10132 = vmatprep.subr.bf16.mxu1 %v16692_v17 }
 0x4ad   : > { %10070 = vmatpush1.bf16.msra.mxu0 %v16693_v14  ;;  %10134 = vmatpush1.bf16.msra.mxu1 %v16694_v2 }
 0x4ae   : > { %10072 = vmatprep.subr.bf16.mxu0 %v16695_v33  ;;  %10136 = vmatprep.subr.bf16.mxu1 %v16696_v56 }
 0x4b1   : > { %10074 = vmatpush1.bf16.msra.mxu0 %v16697_v48  ;;  %10138 = vmatpush1.bf16.msra.mxu1 %v16698_v42 }
 0x4b2   : > { %10076 = vmatprep.subr.bf16.mxu0 %v16699_v39  ;;  %10140 = vmatprep.subr.bf16.mxu1 %v16700_v54 }
 0x4b5   : > { %10078 = vmatpush1.bf16.msra.mxu0 %v15100_v9  ;;  %10142 = vmatpush1.bf16.msra.mxu1 %v16701_v6  ;;  %v7340_v9 = vrot.slane %v16519_v16, 2 }
 0x4b6   : > { %10080 = vmatprep.subr.bf16.mxu0 %v15112_v3  ;;  %10144 = vmatprep.subr.bf16.mxu1 %v15114_v12  ;;  %v7334_v3 = vrot.slane %v12649_v1, 2 }
 0x4b8   : > { %v7336_v12 = vsel %vm6224_vm2, %v7334_v3, %v7335_v30 }
 0x4b9   : > { %10082 = vmatpush1.bf16.msra.mxu0 %v15136_v11  ;;  %10146 = vmatpush1.bf16.msra.mxu1 %v15138_v37  ;;  %v7341_v11 = vsel %vm6224_vm2, %v7335_v30, %v7340_v9  ;;  %v7344_v37 = vrot.slane %v12796_v34, 2 }
 0x4ba   : > { %10084 = vmatprep.subr.bf16.mxu0 %v15145_v4  ;;  %10148 = vmatprep.subr.bf16.mxu1 %v15147_v45  ;;  %v7343_v4 = vsel %vm6224_vm2, %v7338_v43, %v7342_v0  ;;  %v7346_v45 = vrot.slane %v16520_v63, 2 }
 0x4bb   : > { %v7349_v34 = vsel %vm6224_vm2, %v7344_v37, %v7348_v38 }
 0x4bc   : > { %v7347_v1 = vsel %vm6224_vm2, %v7342_v0, %v7346_v45 }
 0x4bd   : > { %10086 = vmatpush1.bf16.msra.mxu0 %v15160_v29  ;;  %10150 = vmatpush1.bf16.msra.mxu1 %v15162_v47  ;;  %v7350_v29 = vrot.slane %v12821_v7, 2  ;;  %v7345_v47 = vsel %vm6224_vm2, %v7340_v9, %v7344_v37 }
 0x4bf   : > { %v7351_v36 = vsel %vm6224_vm2, %v7346_v45, %v7350_v29 }
 0x4c0   : > { %7427 = vmatmul.mubr.f32.vlgmr.msra.gmra.mrb[50].mxu0 %v7336_v12  ;;  %7522 = vmatmul.mubr.f32.vlgmr.msra.gmra.mrb[50].mxu1 %v7336_v12 }
 0x4c1   : > { %7432 = vmatprep.mubr.f32.mxu0 %v7343_v4  ;;  %7527 = vmatprep.mubr.f32.mxu1 %v7343_v4 }
 0x4c4   : > { %7433 = vmatmul.mubr.f32.gmra.mrb[52].mxu0 %v7341_v11  ;;  %7528 = vmatmul.mubr.f32.gmra.mrb[52].mxu1 %v7341_v11 }
 0x4c5   : > { %7438 = vmatprep.mubr.f32.mxu0 %v7347_v1  ;;  %7533 = vmatprep.mubr.f32.mxu1 %v7347_v1 }
 0x4c8   : > { %7439 = vmatmul.mubr.f32.gmra.mrb[54].mxu0 %v7345_v47  ;;  %7534 = vmatmul.mubr.f32.gmra.mrb[54].mxu1 %v7345_v47 }
 0x4c9   : > { %7444 = vmatprep.mubr.f32.mxu0 %v7351_v36  ;;  %7539 = vmatprep.mubr.f32.mxu1 %v7351_v36 }
 0x4cc   : > { %7445 = vmatmul.mubr.f32.gmra.mrb[56].mxu0 %v7349_v34  ;;  %7540 = vmatmul.mubr.f32.gmra.mrb[56].mxu1 %v7349_v34 }
 0x4cd   : > { %7450 = vmatprep.mubr.f32.mxu0 %v7350_v29  ;;  %7545 = vmatprep.mubr.f32.mxu1 %v7350_v29 }
 0x4d0   : > { %7451 = vmatmul.mubr.f32.gmra.mrb[58].mxu0 %v7348_v38  ;;  %7546 = vmatmul.mubr.f32.gmra.mrb[58].mxu1 %v7348_v38 }
 0x593   : > { %v7428_v7 = vpop.f32.mrb[50].mxu0  ;;  %v7523_v46 = vpop.f32.mrb[50].mxu1 }
 0x594   : > { %v7572_v16 = vadd.f32 %v7428_v7, %v15494_v20  ;;  %v7574_v58 = vadd.f32 %v7523_v46, %v15496_v55  ;;  %v7430_v63 = vpop.f32.mrb[51].mxu0  ;;  %v7525_v43 = vpop.f32.mrb[51].mxu1 }
 0x595   : > { %v7573_v57 = vadd.f32 %v7430_v63, %v15502_v18  ;;  %v7575_v27 = vadd.f32 %v7525_v43, %v15504_v8 }
 0x596   : > { %v7592_v35 = vmax.f32 %v7572_v16, 0.0  ;;  %v7594_v23 = vmax.f32 %v7574_v58, 0.0 }
 0x597   : > { %v7593_v50 = vmax.f32 %v7573_v57, 0.0  ;;  %v7595_v31 = vmax.f32 %v7575_v27, 0.0  ;;  %v7434_v53 = vpop.f32.mrb[52].mxu0  ;;  %v7529_v40 = vpop.f32.mrb[52].mxu1 }
 0x598   : > { %v7612_v59 = vmax.f32 %v7592_v35, %v7594_v23  ;;  %v7576_v60 = vadd.f32 %v7434_v53, %v15494_v20  ;;  %v7578_v22 = vadd.f32 %v7529_v40, %v15496_v55  ;;  %v7436_v44 = vpop.f32.mrb[53].mxu0  ;;  %v7531_v5 = vpop.f32.mrb[53].mxu1 }
 0x599   : > { %v7613_v10 = vmax.f32 %v7593_v50, %v7595_v31  ;;  %v7577_v52 = vadd.f32 %v7436_v44, %v15502_v18  ;;  %v7579_v32 = vadd.f32 %v7531_v5, %v15504_v8 }
 0x59a   : > { %v7622_v51 = vmax.f32 %v15520_v49, %v7612_v59  ;;  %v7596_v21 = vmax.f32 %v7576_v60, 0.0  ;;  %v7598_v61 = vmax.f32 %v7578_v22, 0.0 }
 0x59b   : > { %v7623_v17 = vmax.f32 %v15524_v15, %v7613_v10  ;;  %v7597_v14 = vmax.f32 %v7577_v52, 0.0  ;;  %v7599_v2 = vmax.f32 %v7579_v32, 0.0  ;;  %v7440_v33 = vpop.f32.mrb[54].mxu0  ;;  %v7535_v56 = vpop.f32.mrb[54].mxu1 }
 0x59c   : > { %7632 = vst [vmem:[%s15712_s17] sm:$0x7f] %v7622_v51  ;;  %v7614_v48 = vmax.f32 %v7596_v21, %v7598_v61  ;;  %v7580_v42 = vadd.f32 %v7440_v33, %v15494_v20  ;;  %v7582_v39 = vadd.f32 %v7535_v56, %v15496_v55  ;;  %v7442_v54 = vpop.f32.mrb[55].mxu0  ;;  %v7537_v6 = vpop.f32.mrb[55].mxu1 }
 0x59d   : > { %7634 = vst.msk [vmem:[%s15712_s17 + $0x8] sm:$0x7f] %vm7633_vm3, %v7623_v17  ;;  %v7615_v49 = vmax.f32 %v7597_v14, %v7599_v2  ;;  %v7581_v30 = vadd.f32 %v7442_v54, %v15502_v18  ;;  %v7583_v0 = vadd.f32 %v7537_v6, %v15504_v8 }
 0x59e   : > { %v7624_v15 = vmax.f32 %v15532_v13, %v7614_v48  ;;  %v7600_v3 = vmax.f32 %v7580_v42, 0.0  ;;  %v7602_v12 = vmax.f32 %v7582_v39, 0.0 }
 0x59f   : > { %v7625_v9 = vmax.f32 %v15536_v25, %v7615_v49  ;;  %v7601_v4 = vmax.f32 %v7581_v30, 0.0  ;;  %v7603_v45 = vmax.f32 %v7583_v0, 0.0  ;;  %v7446_v11 = vpop.f32.mrb[56].mxu0  ;;  %v7541_v37 = vpop.f32.mrb[56].mxu1 }
 0x5a0   : > { %v7637_v1 = vrot.slane %v7624_v15, 1  ;;  %v7616_v29 = vmax.f32 %v7600_v3, %v7602_v12  ;;  %v7584_v47 = vadd.f32 %v7446_v11, %v15494_v20  ;;  %v7586_v38 = vadd.f32 %v7541_v37, %v15496_v55  ;;  %v7448_v36 = vpop.f32.mrb[57].mxu0  ;;  %v7543_v34 = vpop.f32.mrb[57].mxu1 }
 0x5a1   : > { %v7638_v7 = vrot.slane %v7625_v9, 1  ;;  %v7617_v13 = vmax.f32 %v7601_v4, %v7603_v45  ;;  %v7585_v46 = vadd.f32 %v7448_v36, %v15502_v18  ;;  %v7587_v16 = vadd.f32 %v7543_v34, %v15504_v8 }
 0x5a2   : > { %8542 = vst [vmem:[%s15712_s17 + $0x10] sm:$0x7f] %v7637_v1  ;;  %v7626_v25 = vmax.f32 %v15544_v62, %v7616_v29  ;;  %v7604_v58 = vmax.f32 %v7584_v47, 0.0  ;;  %v7606_v63 = vmax.f32 %v7586_v38, 0.0 }
 0x5a3   : > { %8543 = vst.msk [vmem:[%s15712_s17 + $0x18] sm:$0x7f] %vm7633_vm3, %v7638_v7  ;;  %v7627_v43 = vmax.f32 %v15548_v28, %v7617_v13  ;;  %v7605_v57 = vmax.f32 %v7585_v46, 0.0  ;;  %v7607_v27 = vmax.f32 %v7587_v16, 0.0  ;;  %v7452_v35 = vpop.f32.mrb[58].mxu0  ;;  %v7547_v23 = vpop.f32.mrb[58].mxu1 }
 0x5a4   : > { %v7618_v50 = vmax.f32 %v7604_v58, %v7606_v63  ;;  %v7588_v31 = vadd.f32 %v7452_v35, %v15494_v20  ;;  %v7590_v53 = vadd.f32 %v7547_v23, %v15496_v55  ;;  %v7454_v40 = vpop.f32.mrb[59].mxu0  ;;  %v7549_v59 = vpop.f32.mrb[59].mxu1  ;;  %v7648_v20 = vrot.slane %v7626_v25, 2 }
 0x5a5   : > { %v7619_v60 = vmax.f32 %v7605_v57, %v7607_v27  ;;  %v7589_v62 = vadd.f32 %v7454_v40, %v15502_v18  ;;  %v7591_v22 = vadd.f32 %v7549_v59, %v15504_v8  ;;  %v7651_v21 = vrot.slane %v7627_v43, 2 }
 0x5a6   : > { %v7628_v44 = vmax.f32 %v15556_v19, %v7618_v50  ;;  %v7608_v28 = vmax.f32 %v7588_v31, 0.0  ;;  %v7610_v5 = vmax.f32 %v7590_v53, 0.0 }
 0x5a7   : > { %v7629_v10 = vmax.f32 %v15560_v26, %v7619_v60  ;;  %v7609_v52 = vmax.f32 %v7589_v62, 0.0  ;;  %v7611_v32 = vmax.f32 %v7591_v22, 0.0 }
 0x5a8   : > { %v7649_v51 = vrot.slane %v7628_v44, 2  ;;  %v7620_v55 = vmax.f32 %v7608_v28, %v7610_v5  ;;  %v7662_v14 = vrot.slane %v7628_v44, 3 }
 0x5a9   : > { %v7652_v61 = vrot.slane %v7629_v10, 2  ;;  %v7621_v18 = vmax.f32 %v7609_v52, %v7611_v32  ;;  %v7665_v33 = vrot.slane %v7629_v10, 3 }
 0x5aa   : > { %v7650_v17 = vsel %vm6224_vm2, %v7648_v20, %v7649_v51  ;;  %v7630_v8 = vmax.f32 %v15568_v24, %v7620_v55 }
 0x5ab   : > { %8544 = vst [vmem:[%s15712_s17 + $0x20] sm:$0x7f] %v7650_v17  ;;  %v7653_v19 = vsel %vm6224_vm2, %v7651_v21, %v7652_v61  ;;  %v7631_v26 = vmax.f32 %v15570_v41, %v7621_v18 }
 0x5ac   : > { %8545 = vst.msk [vmem:[%s15712_s17 + $0x28] sm:$0x7f] %vm7633_vm3, %v7653_v19  ;;  %v7663_v2 = vrot.slane %v7630_v8, 3 }
 0x5ad   : > { %v7666_v56 = vrot.slane %v7631_v26, 3 }
 0x5ae   : > { %v7664_v48 = vsel %vm7661_vm4, %v7662_v14, %v7663_v2 }
 0x5af   : > { %8546 = vst [vmem:[%s15712_s17 + $0x30] sm:$0x7f] %v7664_v48  ;;  %v7667_v42 = vsel %vm7661_vm4, %v7665_v33, %v7666_v56 }
 0x5b0   : > { %8547 = vst.msk [vmem:[%s15712_s17 + $0x38] sm:$0x7f] %vm7633_vm3, %v7667_v42 }
 0x5b1 PF: > { %s16_s21 = sadd.s32 1, %s10650_s21  }
 0x5b2   : > { %p13_p4 = scmp.ge.s32.totalorder %s16_s21, 4  }
 0x5b4   :  { %15 = sbr.rel (!%p13_p4) target bundleno = 1 (0x1), region = 88 }

</bundles_post_ra>
